<compile_context>
chip_gen: v6e
topology: v6e:2x2x1
jax: 0.10.0
libtpu: 0.0.40
codegen_flags: <defaults>
</compile_context>

<pallas_src>
import functools

import jax
import jax.numpy as jnp
from jax.experimental import pallas as pl
from jax.experimental.pallas import tpu as pltpu

EPS = 1e-5
KSIZE = 4
LANE = 128
MAX_TILE_ROWS = 1024                     # upper bound; per-layer tile minimizes padding


def _round_up(x, m):
    return (x + m - 1) // m * m


def _cdiv(a, b):
    return (a + b - 1) // b


def _vmem_limit_bytes():
    """Scoped-VMEM request derived from reported capacity (v5e/v6e: 128 MiB,
    v7x: 64 MiB) instead of a hard-coded constant; keep headroom for
    double-buffering."""
    try:
        cap = int(pltpu.get_tpu_info().vmem_capacity_bytes)
    except Exception:
        cap = 64 * 1024 * 1024
    return int(max(32 * 1024 * 1024, min(cap // 2, 96 * 1024 * 1024)))


# ----------------------------------------------------------------------------
# Kernels
# ----------------------------------------------------------------------------
def fused_conv_bn_relu_kernel(inv_count, groups, p_ref, w_ref, g_ref, b_ref, o_ref):
    """Single-call path (small layers): per-parity conv matmuls (bf16 in, f32
    acc) + GLOBAL BatchNorm statistics + BN folded into one per-channel FMA +
    ReLU, everything resident in VMEM.  Zero-padded rows contribute exact
    zeros to the statistics; `inv_count` = 1 / (true output-position count)."""
    cp = o_ref.shape[-1]
    csum = jnp.zeros((1, cp), jnp.float32)
    csq = jnp.zeros((1, cp), jnp.float32)
    ys = []
    for g in range(groups):                                  # static unroll
        y = jnp.dot(p_ref[g], w_ref[g], preferred_element_type=jnp.float32)
        csum = csum + jnp.sum(y, axis=0, keepdims=True)
        csq = csq + jnp.sum(y * y, axis=0, keepdims=True)
        ys.append(y)
    mean = csum * inv_count
    var = csq * inv_count - mean * mean                      # single-pass variance (f32)
    scale = g_ref[...] * jax.lax.rsqrt(var + EPS)            # rsqrt -> EUP slot
    shift = b_ref[...] - mean * scale
    for g in range(groups):
        o_ref[g] = jnp.maximum(ys[g] * scale + shift, 0.0).astype(o_ref.dtype)


def conv_stats_kernel(p_ref, w_ref, y_ref, sum_ref, sq_ref):
    """Pass A (two-pass path): one row tile of one parity group -> bf16 conv
    output plus f32 per-tile PARTIAL sum / sum-of-squares.  Fully "parallel"
    grid (no accumulator), so v7x can shard tiles across both TensorCores."""
    y = jnp.dot(p_ref[...], w_ref[...], preferred_element_type=jnp.float32)
    y_ref[...] = y.astype(y_ref.dtype)
    sum_ref[...] = jnp.sum(y, axis=0, keepdims=True).reshape(sum_ref.shape)
    sq_ref[...] = jnp.sum(y * y, axis=0, keepdims=True).reshape(sq_ref.shape)


def bn_relu_kernel(inv_count, y_ref, sum_ref, sq_ref, g_ref, b_ref, o_ref):
    """Pass B: reduce the tiny per-tile partial statistics, fold BatchNorm
    (training-mode batch stats, biased variance) into one per-channel FMA,
    then ReLU."""
    csum = jnp.sum(sum_ref[...], axis=0)                     # (1, cp)
    csq = jnp.sum(sq_ref[...], axis=0)
    mean = csum * inv_count
    var = csq * inv_count - mean * mean
    scale = g_ref[...] * jax.lax.rsqrt(var + EPS)
    shift = b_ref[...] - mean * scale
    y = y_ref[...].astype(jnp.float32)
    o_ref[...] = jnp.maximum(y * scale + shift, 0.0).astype(o_ref.dtype)


def conv_tanh_kernel(p_ref, w_ref, o_ref):
    """Final layer (no norm / relu): conv matmul + tanh in one pass."""
    y = jnp.dot(p_ref[...], w_ref[...], preferred_element_type=jnp.float32)
    o_ref[...] = jnp.tanh(y).astype(o_ref.dtype)


# ----------------------------------------------------------------------------
# Layout glue (plain JAX)
# ----------------------------------------------------------------------------
def _dilate_and_pad(x_nhwc, stride, ksize, pad, out_pad):
    """Generic path (used for stride=1): zero-dilate + zero-pad so a stride-1
    valid conv with the flipped kernel reproduces PyTorch ConvTranspose2d."""
    n, h, w, c = x_nhwc.shape
    if stride > 1:
        hd, wd = (h - 1) * stride + 1, (w - 1) * stride + 1
        xd = jnp.zeros((n, hd, wd, c), x_nhwc.dtype)
        xd = xd.at[:, ::stride, ::stride, :].set(x_nhwc)
    else:
        xd = x_nhwc
    lo = ksize - 1 - pad
    hi = ksize - 1 - pad + out_pad
    return jnp.pad(xd, ((0, 0), (lo, hi), (lo, hi), (0, 0)))


def _im2col(xp, ksize, ho, wo):
    n, _, _, c = xp.shape
    taps = [xp[:, ky:ky + ho, kx:kx + wo, :]
            for ky in range(ksize) for kx in range(ksize)]
    return jnp.stack(taps, axis=3).reshape(n * ho * wo, ksize * ksize * c)


def _conv_weight_matrix(wt, ksize):
    """ConvTranspose2d weight (Cin, Cout, k, k) -> im2col matmul weight
    (k*k*Cin, Cout) of the equivalent stride-1 conv with the flipped kernel."""
    wc = jnp.flip(wt, axis=(2, 3)).transpose(1, 0, 2, 3)      # (Cout, Cin, k, k)
    cin, cout = wt.shape[0], wt.shape[1]
    return wc.transpose(2, 3, 1, 0).reshape(ksize * ksize * cin, cout)


def _parity_patches_and_weights(x_nhwc, wt):
    """Sub-pixel (2x2 parity) decomposition of ConvTranspose2d(k=4, s=2, p=1,
    output_padding=1): output position (2*oy+py, 2*ox+px) depends only on a
    2x2 window of the once-padded input and a 2x2 sub-kernel
    w[ci, co, 3-py-2*dy, 3-px-2*dx].  All four parity grids are padded to the
    same (H+1, W+1) size; the extra odd-parity row/col reads only zero padding
    so it contributes exact zeros (cropped away after interleaving)."""
    n, h, w, cin = x_nhwc.shape
    cout = wt.shape[1]
    hp, wp = h + 1, w + 1
    xp1 = jnp.pad(x_nhwc, ((0, 0), (1, 2), (1, 2), (0, 0)))
    patches, weights = [], []
    for py in range(2):
        for px in range(2):
            taps = [xp1[:, py + dy: py + dy + hp, px + dx: px + dx + wp, :]
                    for dy in range(2) for dx in range(2)]
            patches.append(jnp.stack(taps, axis=3).reshape(n * hp * wp, 4 * cin))
            wtaps = [wt[:, :, 3 - py - 2 * dy, 3 - px - 2 * dx]
                     for dy in range(2) for dx in range(2)]
            weights.append(jnp.stack(wtaps, axis=0).reshape(4 * cin, cout))
    return jnp.stack(patches, axis=0), jnp.stack(weights, axis=0), hp, wp


def _interleave_parities(y4, n, hp, wp, ho, wo):
    """(4, n*hp*wp, C) parity results (order (py,px)=(0,0),(0,1),(1,0),(1,1))
    -> (n, ho, wo, C) by interleaving and cropping."""
    cout = y4.shape[-1]
    y = y4.reshape(2, 2, n, hp, wp, cout)
    y = jnp.transpose(y, (2, 3, 0, 4, 1, 5)).reshape(n, 2 * hp, 2 * wp, cout)
    return y[:, :ho, :wo, :]


# ----------------------------------------------------------------------------
# One DECBR2d layer (convT [+ BN + ReLU] or convT + tanh)
# ----------------------------------------------------------------------------
def _decbr_layer(x_nhwc, wt, gamma, beta, *, stride, pad, out_pad, fuse, vmem_limit):
    x_nhwc = x_nhwc.astype(jnp.bfloat16)          # bf16 activation path everywhere
    n, h, w, cin = x_nhwc.shape
    cout = wt.shape[1]
    k = KSIZE
    ho = (h - 1) * stride - 2 * pad + k + out_pad
    wo = (w - 1) * stride - 2 * pad + k + out_pad

    use_parity = (stride == 2 and pad == 1 and out_pad == 1 and k == 4)
    if use_parity:
        patches, wmat, hp, wp = _parity_patches_and_weights(x_nhwc, wt)
        groups, mg = 4, n * hp * wp
    else:
        xp = _dilate_and_pad(x_nhwc, stride, k, pad, out_pad)
        patches = _im2col(xp, k, ho, wo)[None]                 # (1, M, k*k*Cin)
        wmat = _conv_weight_matrix(wt, k)[None]                # (1, k*k*Cin, Cout)
        groups, mg = 1, n * ho * wo
        hp, wp = ho, wo

    kdim = patches.shape[-1]
    kp = _round_up(kdim, LANE)
    cp = _round_up(cout, LANE)

    # Per-layer tile size minimizing row padding (instead of a fixed tile).
    n_tiles = max(1, _cdiv(mg, MAX_TILE_ROWS))
    tile_m = _round_up(_cdiv(mg, n_tiles), 16)
    mp = _round_up(mg, tile_m)
    n_tiles = mp // tile_m

    patches = jnp.pad(patches, ((0, 0), (0, mp - mg), (0, kp - kdim))).astype(jnp.bfloat16)
    wmat = jnp.pad(wmat, ((0, 0), (0, kp - kdim), (0, cp - cout))).astype(jnp.bfloat16)

    count = n * ho * wo                                        # true output positions
    grid = (groups, n_tiles)
    p_spec = pl.BlockSpec((None, tile_m, kp), lambda g, i: (g, i, 0))
    w_spec = pl.BlockSpec((None, kp, cp), lambda g, i: (g, 0, 0))
    y_spec = pl.BlockSpec((None, tile_m, cp), lambda g, i: (g, i, 0))
    vec_spec = pl.BlockSpec((1, cp), lambda g, i: (0, 0))
    mm_flops = 2 * groups * mp * kp * cp

    if fuse == "tanh":
        out = pl.pallas_call(
            conv_tanh_kernel,
            out_shape=jax.ShapeDtypeStruct((groups, mp, cp), jnp.float32),
            grid=grid,
            in_specs=[p_spec, w_spec],
            out_specs=y_spec,
            compiler_params=pltpu.CompilerParams(
                dimension_semantics=("parallel", "parallel"),
                vmem_limit_bytes=vmem_limit),
            cost_estimate=pl.CostEstimate(
                flops=mm_flops,
                transcendentals=groups * mp * cp,
                bytes_accessed=patches.size * 2 + wmat.size * 2 + groups * mp * cp * 4),
        )(patches, wmat)
    else:
        gvec = jnp.pad(gamma.astype(jnp.float32), (0, cp - cout),
                       constant_values=1.0).reshape(1, cp)
        bvec = jnp.pad(beta.astype(jnp.float32), (0, cp - cout)).reshape(1, cp)
        fused_bytes = patches.size * 2 + wmat.size * 2 + groups * mp * cp * 6

        if groups * mp <= MAX_TILE_ROWS and fused_bytes <= vmem_limit // 2:
            # Fused single-call path: conv + global stats + BN + ReLU.
            def fspec(shape):
                return pl.BlockSpec(shape, lambda i: (0,) * len(shape))
            out = pl.pallas_call(
                functools.partial(fused_conv_bn_relu_kernel, 1.0 / float(count), groups),
                out_shape=jax.ShapeDtypeStruct((groups, mp, cp), jnp.bfloat16),
                grid=(1,),
                in_specs=[fspec((groups, mp, kp)), fspec((groups, kp, cp)),
                          fspec((1, cp)), fspec((1, cp))],
                out_specs=fspec((groups, mp, cp)),
                compiler_params=pltpu.CompilerParams(
                    dimension_semantics=("arbitrary",),
                    vmem_limit_bytes=vmem_limit),
                cost_estimate=pl.CostEstimate(
                    flops=mm_flops + 6 * groups * mp * cp,
                    transcendentals=cp,
                    bytes_accessed=fused_bytes),
            )(patches, wmat, gvec, bvec)
        else:
            # Two-pass path: A) conv + per-tile partial stats (parallel grid),
            # B) reduce partials + BN folded into one per-channel FMA + ReLU.
            n_parts = groups * n_tiles
            part_spec = pl.BlockSpec((1, 1, cp),
                                     lambda g, i: (g * n_tiles + i, 0, 0))
            y, csum, csq = pl.pallas_call(
                conv_stats_kernel,
                out_shape=(jax.ShapeDtypeStruct((groups, mp, cp), jnp.bfloat16),
                           jax.ShapeDtypeStruct((n_parts, 1, cp), jnp.float32),
                           jax.ShapeDtypeStruct((n_parts, 1, cp), jnp.float32)),
                grid=grid,
                in_specs=[p_spec, w_spec],
                out_specs=(y_spec, part_spec, part_spec),
                compiler_params=pltpu.CompilerParams(
                    dimension_semantics=("parallel", "parallel"),
                    vmem_limit_bytes=vmem_limit),
                cost_estimate=pl.CostEstimate(
                    flops=mm_flops + 4 * groups * mp * cp,
                    transcendentals=0,
                    bytes_accessed=patches.size * 2 + wmat.size * 2 + groups * mp * cp * 2),
            )(patches, wmat)

            parts_full = pl.BlockSpec((n_parts, 1, cp), lambda g, i: (0, 0, 0))
            out = pl.pallas_call(
                functools.partial(bn_relu_kernel, 1.0 / float(count)),
                out_shape=jax.ShapeDtypeStruct((groups, mp, cp), jnp.bfloat16),
                grid=grid,
                in_specs=[y_spec, parts_full, parts_full, vec_spec, vec_spec],
                out_specs=y_spec,
                compiler_params=pltpu.CompilerParams(
                    dimension_semantics=("parallel", "parallel"),
                    vmem_limit_bytes=vmem_limit),
                cost_estimate=pl.CostEstimate(
                    flops=6 * groups * mp * cp,
                    transcendentals=cp,
                    bytes_accessed=2 * groups * mp * cp * 2),
            )(y, csum, csq, gvec, bvec)

    out = out[:, :mg, :cout]                                   # strip padding
    if use_parity:
        return _interleave_parities(out, n, hp, wp, ho, wo)
    return out[0].reshape(n, ho, wo, cout)


# ----------------------------------------------------------------------------
# Full Generator forward (NCHW in, NCHW out)
# ----------------------------------------------------------------------------
@jax.jit
def generator_forward(x_nchw, p):
    vmem_limit = _vmem_limit_bytes()
    x = jnp.transpose(x_nchw, (0, 2, 3, 1))
    x = _decbr_layer(x, p["w1"], p["g1"], p["b1"], stride=1, pad=0, out_pad=1,
                     fuse="bn_relu", vmem_limit=vmem_limit)          # dec1
    x = _decbr_layer(x, p["w2"], p["g2"], p["b2"], stride=2, pad=1, out_pad=1,
                     fuse="bn_relu", vmem_limit=vmem_limit)          # dec2
    x = _decbr_layer(x, p["w3"], p["g3"], p["b3"], stride=2, pad=1, out_pad=1,
                     fuse="bn_relu", vmem_limit=vmem_limit)          # dec3
    x = _decbr_layer(x, p["w4"], None, None, stride=2, pad=1, out_pad=1,
                     fuse="tanh", vmem_limit=vmem_limit)             # dec4 + tanh
    return jnp.transpose(x, (0, 3, 1, 2)).astype(jnp.float32)


# ----------------------------------------------------------------------------
# Deterministic parameter init (shapes from Generator.__init__, bias=False)
# ----------------------------------------------------------------------------
def init_params(key, in_channels, out_channels, nker):
    keys = jax.random.split(key, 4)

    def conv_t_w(k, cin, cout):
        fan_in = cin * KSIZE * KSIZE
        return (jax.random.normal(k, (cin, cout, KSIZE, KSIZE), jnp.float32)
                / jnp.sqrt(float(fan_in)))

    return {
        "w1": conv_t_w(keys[0], in_channels, 4 * nker),
        "g1": jnp.ones((4 * nker,), jnp.float32),
        "b1": jnp.zeros((4 * nker,), jnp.float32),
        "w2": conv_t_w(keys[1], 4 * nker, 2 * nker),
        "g2": jnp.ones((2 * nker,), jnp.float32),
        "b2": jnp.zeros((2 * nker,), jnp.float32),
        "w3": conv_t_w(keys[2], 2 * nker, 1 * nker),
        "g3": jnp.ones((1 * nker,), jnp.float32),
        "b3": jnp.zeros((1 * nker,), jnp.float32),
        "w4": conv_t_w(keys[3], 1 * nker, out_channels),
    }


# ----------------------------------------------------------------------------
# Pure-JAX reference (mirrors the PyTorch forward) for a sanity check
# ----------------------------------------------------------------------------
def _ref_conv_transpose(x_nchw, wt, stride, pad, out_pad):
    wc = jnp.flip(wt, axis=(2, 3)).transpose(1, 0, 2, 3)       # (Cout, Cin, k, k)
    lo = KSIZE - 1 - pad
    hi = KSIZE - 1 - pad + out_pad
    return jax.lax.conv_general_dilated(
        x_nchw, wc, window_strides=(1, 1),
        padding=[(lo, hi), (lo, hi)],
        lhs_dilation=(stride, stride),
        dimension_numbers=("NCHW", "OIHW", "NCHW"),
        precision=jax.lax.Precision.HIGHEST)


def reference_forward(x, p):
    def bn(y):  # training-mode batch stats, biased var, gamma=1, beta=0
        mean = y.mean(axis=(0, 2, 3), keepdims=True)
        var = ((y - mean) ** 2).mean(axis=(0, 2, 3), keepdims=True)
        return (y - mean) * jax.lax.rsqrt(var + EPS)

    h = jnp.maximum(bn(_ref_conv_transpose(x, p["w1"], 1, 0, 1)), 0.0)
    h = jnp.maximum(bn(_ref_conv_transpose(h, p["w2"], 2, 1, 1)), 0.0)
    h = jnp.maximum(bn(_ref_conv_transpose(h, p["w3"], 2, 1, 1)), 0.0)
    h = _ref_conv_transpose(h, p["w4"], 2, 1, 1)
    return jnp.tanh(h)


# ----------------------------------------------------------------------------
if __name__ == "__main__":
    N, IN_CH, OUT_CH, NKER = 2, 16, 3, 64
    H = W = 1                                  # latent "image", as the forward implies

    key = jax.random.PRNGKey(0)
    kx, kparam = jax.random.split(key)
    x = jax.random.normal(kx, (N, IN_CH, H, W), jnp.float32)
    params = init_params(kparam, IN_CH, OUT_CH, NKER)

    out = jax.block_until_ready(generator_forward(x, params))

    # Spatial chain with output_padding=1 everywhere: 1 -> 5 -> 11 -> 23 -> 47
    assert out.shape == (N, OUT_CH, 47, 47), out.shape

    ref = reference_forward(x, params)
    max_err = float(jnp.max(jnp.abs(out - ref)))
    assert max_err < 5e-2, f"mismatch vs reference: {max_err}"

    print("KERNEL_OK")
</pallas_src>

<mosaic_0001>
module attributes {stable_mosaic.version = 11 : i64} {
  func.func @fused_conv_bn_relu_kernel(%arg0: i32, %arg1: memref<1x64x256xbf16, #tpu.memory_space<vmem>>, %arg2: memref<1x256x256xbf16, #tpu.memory_space<vmem>>, %arg3: memref<1x256xf32, #tpu.memory_space<vmem>>, %arg4: memref<1x256xf32, #tpu.memory_space<vmem>>, %arg5: memref<1x64x256xbf16, #tpu.memory_space<vmem>>) attributes {dimension_semantics = [#tpu.dimension_semantics<arbitrary>], iteration_bounds = array<i64: 1>, scalar_prefetch = 0 : i64, scratch_operands = 0 : i64, tpu.core_type = #tpu.core_type<tc>, window_params = [{pipeline_mode = #tpu.pipeline_mode<synchronous>, transform_indices = @transform_0, window_bounds = array<i64: 1, 64, 256>}, {pipeline_mode = #tpu.pipeline_mode<synchronous>, transform_indices = @transform_1, window_bounds = array<i64: 1, 256, 256>}, {pipeline_mode = #tpu.pipeline_mode<synchronous>, transform_indices = @transform_2, window_bounds = array<i64: 1, 256>}, {pipeline_mode = #tpu.pipeline_mode<synchronous>, transform_indices = @transform_3, window_bounds = array<i64: 1, 256>}, {pipeline_mode = #tpu.pipeline_mode<synchronous>, transform_indices = @transform_4, window_bounds = array<i64: 1, 64, 256>}]} {
    %cst = arith.constant 0.000000e+00 : f32
    %0 = vector.broadcast %cst : f32 to vector<1x256xf32>
    %cst_0 = arith.constant 0.000000e+00 : f32
    %1 = vector.broadcast %cst_0 : f32 to vector<1x256xf32>
    %c0 = arith.constant 0 : index
    %c0_1 = arith.constant 0 : index
    %c0_2 = arith.constant 0 : index
    %2 = vector.load %arg1[%c0, %c0_1, %c0_2] : memref<1x64x256xbf16, #tpu.memory_space<vmem>>, vector<1x64x256xbf16>
    %3 = vector.shape_cast %2 : vector<1x64x256xbf16> to vector<64x256xbf16>
    %c0_3 = arith.constant 0 : index
    %c0_4 = arith.constant 0 : index
    %c0_5 = arith.constant 0 : index
    %4 = vector.load %arg2[%c0_3, %c0_4, %c0_5] : memref<1x256x256xbf16, #tpu.memory_space<vmem>>, vector<1x256x256xbf16>
    %5 = vector.shape_cast %4 : vector<1x256x256xbf16> to vector<256x256xbf16>
    %cst_6 = arith.constant dense<0.000000e+00> : vector<64x256xf32>
    %6 = tpu.matmul %3, %5, %cst_6 {dimension_numbers = #tpu.dot_dimension_numbers<[1], [0], [0], [1], [0, 0, 1, 1], [], []>} : vector<64x256xbf16>, vector<256x256xbf16>, vector<64x256xf32> -> vector<64x256xf32>
    %cst_7 = arith.constant dense<0.000000e+00> : vector<256xf32>
    %7 = vector.multi_reduction <add>, %6, %cst_7 [0] : vector<64x256xf32> to vector<256xf32>
    %8 = vector.shape_cast %7 : vector<256xf32> to vector<1x256xf32>
    %9 = arith.addf %0, %8 : vector<1x256xf32>
    %10 = arith.mulf %6, %6 : vector<64x256xf32>
    %cst_8 = arith.constant dense<0.000000e+00> : vector<256xf32>
    %11 = vector.multi_reduction <add>, %10, %cst_8 [0] : vector<64x256xf32> to vector<256xf32>
    %12 = vector.shape_cast %11 : vector<256xf32> to vector<1x256xf32>
    %13 = arith.addf %1, %12 : vector<1x256xf32>
    %cst_9 = arith.constant 2.000000e-02 : f32
    %14 = vector.broadcast %cst_9 : f32 to vector<1x256xf32>
    %15 = arith.mulf %9, %14 : vector<1x256xf32>
    %cst_10 = arith.constant 2.000000e-02 : f32
    %16 = vector.broadcast %cst_10 : f32 to vector<1x256xf32>
    %17 = arith.mulf %13, %16 : vector<1x256xf32>
    %18 = arith.mulf %15, %15 : vector<1x256xf32>
    %19 = arith.subf %17, %18 : vector<1x256xf32>
    %c0_11 = arith.constant 0 : index
    %c0_12 = arith.constant 0 : index
    %20 = vector.load %arg3[%c0_11, %c0_12] : memref<1x256xf32, #tpu.memory_space<vmem>>, vector<1x256xf32>
    %cst_13 = arith.constant 9.99999974E-6 : f32
    %21 = vector.broadcast %cst_13 : f32 to vector<1x256xf32>
    %22 = arith.addf %19, %21 : vector<1x256xf32>
    %23 = math.rsqrt %22 : vector<1x256xf32>
    %24 = arith.mulf %20, %23 : vector<1x256xf32>
    %c0_14 = arith.constant 0 : index
    %c0_15 = arith.constant 0 : index
    %25 = vector.load %arg4[%c0_14, %c0_15] : memref<1x256xf32, #tpu.memory_space<vmem>>, vector<1x256xf32>
    %26 = arith.mulf %15, %24 : vector<1x256xf32>
    %27 = arith.subf %25, %26 : vector<1x256xf32>
    %28 = vector.broadcast %24 : vector<1x256xf32> to vector<64x256xf32>
    %29 = arith.mulf %6, %28 : vector<64x256xf32>
    %30 = vector.broadcast %27 : vector<1x256xf32> to vector<64x256xf32>
    %31 = arith.addf %29, %30 : vector<64x256xf32>
    %cst_16 = arith.constant 0.000000e+00 : f32
    %32 = vector.broadcast %cst_16 : f32 to vector<64x256xf32>
    %33 = arith.maximumf %31, %32 : vector<64x256xf32>
    %34 = arith.truncf %33 : vector<64x256xf32> to vector<64x256xbf16>
    %c0_17 = arith.constant 0 : index
    %c0_18 = arith.constant 0 : index
    %c0_19 = arith.constant 0 : index
    %35 = vector.load %arg5[%c0_17, %c0_18, %c0_19] : memref<1x64x256xbf16, #tpu.memory_space<vmem>>, vector<1x64x256xbf16>
    %36 = vector.shape_cast %35 : vector<1x64x256xbf16> to vector<64x256xbf16>
    %37 = vector.shape_cast %34 : vector<64x256xbf16> to vector<1x64x256xbf16>
    tpu.vector_store %arg5[%c0_17, %c0_18, %c0_19], %37 {strides = array<i32>} : memref<1x64x256xbf16, #tpu.memory_space<vmem>>, vector<1x64x256xbf16>,
    return
  }
  func.func @transform_0(%arg0: i32) -> (i32, i32, i32) {
    %c0_i32 = arith.constant 0 : i32
    %c0_i32_0 = arith.constant 0 : i32
    %c0_i32_1 = arith.constant 0 : i32
    %c0_i32_2 = arith.constant 0 : i32
    return %c0_i32, %c0_i32_0, %c0_i32_1 : i32, i32, i32
  }
  func.func @transform_1(%arg0: i32) -> (i32, i32, i32) {
    %c0_i32 = arith.constant 0 : i32
    %c0_i32_0 = arith.constant 0 : i32
    %c0_i32_1 = arith.constant 0 : i32
    %c0_i32_2 = arith.constant 0 : i32
    return %c0_i32, %c0_i32_0, %c0_i32_1 : i32, i32, i32
  }
  func.func @transform_2(%arg0: i32) -> (i32, i32) {
    %c0_i32 = arith.constant 0 : i32
    %c0_i32_0 = arith.constant 0 : i32
    %c0_i32_1 = arith.constant 0 : i32
    return %c0_i32, %c0_i32_0 : i32, i32
  }
  func.func @transform_3(%arg0: i32) -> (i32, i32) {
    %c0_i32 = arith.constant 0 : i32
    %c0_i32_0 = arith.constant 0 : i32
    %c0_i32_1 = arith.constant 0 : i32
    return %c0_i32, %c0_i32_0 : i32, i32
  }
  func.func @transform_4(%arg0: i32) -> (i32, i32, i32) {
    %c0_i32 = arith.constant 0 : i32
    %c0_i32_0 = arith.constant 0 : i32
    %c0_i32_1 = arith.constant 0 : i32
    %c0_i32_2 = arith.constant 0 : i32
    return %c0_i32, %c0_i32_0, %c0_i32_1 : i32, i32, i32
  }
}

module attributes {stable_mosaic.version = 11 : i64} {
  func.func @fused_conv_bn_relu_kernel(%arg0: i32, %arg1: memref<4x80x1024xbf16, #tpu.memory_space<vmem>>, %arg2: memref<4x1024x128xbf16, #tpu.memory_space<vmem>>, %arg3: memref<1x128xf32, #tpu.memory_space<vmem>>, %arg4: memref<1x128xf32, #tpu.memory_space<vmem>>, %arg5: memref<4x80x128xbf16, #tpu.memory_space<vmem>>) attributes {dimension_semantics = [#tpu.dimension_semantics<arbitrary>], iteration_bounds = array<i64: 1>, scalar_prefetch = 0 : i64, scratch_operands = 0 : i64, tpu.core_type = #tpu.core_type<tc>, window_params = [{pipeline_mode = #tpu.pipeline_mode<synchronous>, transform_indices = @transform_0, window_bounds = array<i64: 4, 80, 1024>}, {pipeline_mode = #tpu.pipeline_mode<synchronous>, transform_indices = @transform_1, window_bounds = array<i64: 4, 1024, 128>}, {pipeline_mode = #tpu.pipeline_mode<synchronous>, transform_indices = @transform_2, window_bounds = array<i64: 1, 128>}, {pipeline_mode = #tpu.pipeline_mode<synchronous>, transform_indices = @transform_3, window_bounds = array<i64: 1, 128>}, {pipeline_mode = #tpu.pipeline_mode<synchronous>, transform_indices = @transform_4, window_bounds = array<i64: 4, 80, 128>}]} {
    %cst = arith.constant 0.000000e+00 : f32
    %0 = vector.broadcast %cst : f32 to vector<1x128xf32>
    %cst_0 = arith.constant 0.000000e+00 : f32
    %1 = vector.broadcast %cst_0 : f32 to vector<1x128xf32>
    %c0 = arith.constant 0 : index
    %c0_1 = arith.constant 0 : index
    %c0_2 = arith.constant 0 : index
    %2 = vector.load %arg1[%c0, %c0_1, %c0_2] : memref<4x80x1024xbf16, #tpu.memory_space<vmem>>, vector<1x80x1024xbf16>
    %3 = vector.shape_cast %2 : vector<1x80x1024xbf16> to vector<80x1024xbf16>
    %c0_3 = arith.constant 0 : index
    %c0_4 = arith.constant 0 : index
    %c0_5 = arith.constant 0 : index
    %4 = vector.load %arg2[%c0_3, %c0_4, %c0_5] : memref<4x1024x128xbf16, #tpu.memory_space<vmem>>, vector<1x1024x128xbf16>
    %5 = vector.shape_cast %4 : vector<1x1024x128xbf16> to vector<1024x128xbf16>
    %cst_6 = arith.constant dense<0.000000e+00> : vector<80x128xf32>
    %6 = tpu.matmul %3, %5, %cst_6 {dimension_numbers = #tpu.dot_dimension_numbers<[1], [0], [0], [1], [0, 0, 1, 1], [], []>} : vector<80x1024xbf16>, vector<1024x128xbf16>, vector<80x128xf32> -> vector<80x128xf32>
    %cst_7 = arith.constant dense<0.000000e+00> : vector<128xf32>
    %7 = vector.multi_reduction <add>, %6, %cst_7 [0] : vector<80x128xf32> to vector<128xf32>
    %8 = vector.shape_cast %7 : vector<128xf32> to vector<1x128xf32>
    %9 = arith.addf %0, %8 : vector<1x128xf32>
    %10 = arith.mulf %6, %6 : vector<80x128xf32>
    %cst_8 = arith.constant dense<0.000000e+00> : vector<128xf32>
    %11 = vector.multi_reduction <add>, %10, %cst_8 [0] : vector<80x128xf32> to vector<128xf32>
    %12 = vector.shape_cast %11 : vector<128xf32> to vector<1x128xf32>
    %13 = arith.addf %1, %12 : vector<1x128xf32>
    %c1 = arith.constant 1 : index
    %c0_9 = arith.constant 0 : index
    %c0_10 = arith.constant 0 : index
    %14 = vector.load %arg1[%c1, %c0_9, %c0_10] : memref<4x80x1024xbf16, #tpu.memory_space<vmem>>, vector<1x80x1024xbf16>
    %15 = vector.shape_cast %14 : vector<1x80x1024xbf16> to vector<80x1024xbf16>
    %c1_11 = arith.constant 1 : index
    %c0_12 = arith.constant 0 : index
    %c0_13 = arith.constant 0 : index
    %16 = vector.load %arg2[%c1_11, %c0_12, %c0_13] : memref<4x1024x128xbf16, #tpu.memory_space<vmem>>, vector<1x1024x128xbf16>
    %17 = vector.shape_cast %16 : vector<1x1024x128xbf16> to vector<1024x128xbf16>
    %cst_14 = arith.constant dense<0.000000e+00> : vector<80x128xf32>
    %18 = tpu.matmul %15, %17, %cst_14 {dimension_numbers = #tpu.dot_dimension_numbers<[1], [0], [0], [1], [0, 0, 1, 1], [], []>} : vector<80x1024xbf16>, vector<1024x128xbf16>, vector<80x128xf32> -> vector<80x128xf32>
    %cst_15 = arith.constant dense<0.000000e+00> : vector<128xf32>
    %19 = vector.multi_reduction <add>, %18, %cst_15 [0] : vector<80x128xf32> to vector<128xf32>
    %20 = vector.shape_cast %19 : vector<128xf32> to vector<1x128xf32>
    %21 = arith.addf %9, %20 : vector<1x128xf32>
    %22 = arith.mulf %18, %18 : vector<80x128xf32>
    %cst_16 = arith.constant dense<0.000000e+00> : vector<128xf32>
    %23 = vector.multi_reduction <add>, %22, %cst_16 [0] : vector<80x128xf32> to vector<128xf32>
    %24 = vector.shape_cast %23 : vector<128xf32> to vector<1x128xf32>
    %25 = arith.addf %13, %24 : vector<1x128xf32>
    %c2 = arith.constant 2 : index
    %c0_17 = arith.constant 0 : index
    %c0_18 = arith.constant 0 : index
    %26 = vector.load %arg1[%c2, %c0_17, %c0_18] : memref<4x80x1024xbf16, #tpu.memory_space<vmem>>, vector<1x80x1024xbf16>
    %27 = vector.shape_cast %26 : vector<1x80x1024xbf16> to vector<80x1024xbf16>
    %c2_19 = arith.constant 2 : index
    %c0_20 = arith.constant 0 : index
    %c0_21 = arith.constant 0 : index
    %28 = vector.load %arg2[%c2_19, %c0_20, %c0_21] : memref<4x1024x128xbf16, #tpu.memory_space<vmem>>, vector<1x1024x128xbf16>
    %29 = vector.shape_cast %28 : vector<1x1024x128xbf16> to vector<1024x128xbf16>
    %cst_22 = arith.constant dense<0.000000e+00> : vector<80x128xf32>
    %30 = tpu.matmul %27, %29, %cst_22 {dimension_numbers = #tpu.dot_dimension_numbers<[1], [0], [0], [1], [0, 0, 1, 1], [], []>} : vector<80x1024xbf16>, vector<1024x128xbf16>, vector<80x128xf32> -> vector<80x128xf32>
    %cst_23 = arith.constant dense<0.000000e+00> : vector<128xf32>
    %31 = vector.multi_reduction <add>, %30, %cst_23 [0] : vector<80x128xf32> to vector<128xf32>
    %32 = vector.shape_cast %31 : vector<128xf32> to vector<1x128xf32>
    %33 = arith.addf %21, %32 : vector<1x128xf32>
    %34 = arith.mulf %30, %30 : vector<80x128xf32>
    %cst_24 = arith.constant dense<0.000000e+00> : vector<128xf32>
    %35 = vector.multi_reduction <add>, %34, %cst_24 [0] : vector<80x128xf32> to vector<128xf32>
    %36 = vector.shape_cast %35 : vector<128xf32> to vector<1x128xf32>
    %37 = arith.addf %25, %36 : vector<1x128xf32>
    %c3 = arith.constant 3 : index
    %c0_25 = arith.constant 0 : index
    %c0_26 = arith.constant 0 : index
    %38 = vector.load %arg1[%c3, %c0_25, %c0_26] : memref<4x80x1024xbf16, #tpu.memory_space<vmem>>, vector<1x80x1024xbf16>
    %39 = vector.shape_cast %38 : vector<1x80x1024xbf16> to vector<80x1024xbf16>
    %c3_27 = arith.constant 3 : index
    %c0_28 = arith.constant 0 : index
    %c0_29 = arith.constant 0 : index
    %40 = vector.load %arg2[%c3_27, %c0_28, %c0_29] : memref<4x1024x128xbf16, #tpu.memory_space<vmem>>, vector<1x1024x128xbf16>
    %41 = vector.shape_cast %40 : vector<1x1024x128xbf16> to vector<1024x128xbf16>
    %cst_30 = arith.constant dense<0.000000e+00> : vector<80x128xf32>
    %42 = tpu.matmul %39, %41, %cst_30 {dimension_numbers = #tpu.dot_dimension_numbers<[1], [0], [0], [1], [0, 0, 1, 1], [], []>} : vector<80x1024xbf16>, vector<1024x128xbf16>, vector<80x128xf32> -> vector<80x128xf32>
    %cst_31 = arith.constant dense<0.000000e+00> : vector<128xf32>
    %43 = vector.multi_reduction <add>, %42, %cst_31 [0] : vector<80x128xf32> to vector<128xf32>
    %44 = vector.shape_cast %43 : vector<128xf32> to vector<1x128xf32>
    %45 = arith.addf %33, %44 : vector<1x128xf32>
    %46 = arith.mulf %42, %42 : vector<80x128xf32>
    %cst_32 = arith.constant dense<0.000000e+00> : vector<128xf32>
    %47 = vector.multi_reduction <add>, %46, %cst_32 [0] : vector<80x128xf32> to vector<128xf32>
    %48 = vector.shape_cast %47 : vector<128xf32> to vector<1x128xf32>
    %49 = arith.addf %37, %48 : vector<1x128xf32>
    %cst_33 = arith.constant 0.00413223123 : f32
    %50 = vector.broadcast %cst_33 : f32 to vector<1x128xf32>
    %51 = arith.mulf %45, %50 : vector<1x128xf32>
    %cst_34 = arith.constant 0.00413223123 : f32
    %52 = vector.broadcast %cst_34 : f32 to vector<1x128xf32>
    %53 = arith.mulf %49, %52 : vector<1x128xf32>
    %54 = arith.mulf %51, %51 : vector<1x128xf32>
    %55 = arith.subf %53, %54 : vector<1x128xf32>
    %c0_35 = arith.constant 0 : index
    %c0_36 = arith.constant 0 : index
    %56 = vector.load %arg3[%c0_35, %c0_36] : memref<1x128xf32, #tpu.memory_space<vmem>>, vector<1x128xf32>
    %cst_37 = arith.constant 9.99999974E-6 : f32
    %57 = vector.broadcast %cst_37 : f32 to vector<1x128xf32>
    %58 = arith.addf %55, %57 : vector<1x128xf32>
    %59 = math.rsqrt %58 : vector<1x128xf32>
    %60 = arith.mulf %56, %59 : vector<1x128xf32>
    %c0_38 = arith.constant 0 : index
    %c0_39 = arith.constant 0 : index
    %61 = vector.load %arg4[%c0_38, %c0_39] : memref<1x128xf32, #tpu.memory_space<vmem>>, vector<1x128xf32>
    %62 = arith.mulf %51, %60 : vector<1x128xf32>
    %63 = arith.subf %61, %62 : vector<1x128xf32>
    %64 = vector.broadcast %60 : vector<1x128xf32> to vector<80x128xf32>
    %65 = arith.mulf %6, %64 : vector<80x128xf32>
    %66 = vector.broadcast %63 : vector<1x128xf32> to vector<80x128xf32>
    %67 = arith.addf %65, %66 : vector<80x128xf32>
    %cst_40 = arith.constant 0.000000e+00 : f32
    %68 = vector.broadcast %cst_40 : f32 to vector<80x128xf32>
    %69 = arith.maximumf %67, %68 : vector<80x128xf32>
    %70 = arith.truncf %69 : vector<80x128xf32> to vector<80x128xbf16>
    %c0_41 = arith.constant 0 : index
    %c0_42 = arith.constant 0 : index
    %c0_43 = arith.constant 0 : index
    %71 = vector.load %arg5[%c0_41, %c0_42, %c0_43] : memref<4x80x128xbf16, #tpu.memory_space<vmem>>, vector<1x80x128xbf16>
    %72 = vector.shape_cast %71 : vector<1x80x128xbf16> to vector<80x128xbf16>
    %73 = vector.shape_cast %70 : vector<80x128xbf16> to vector<1x80x128xbf16>
    tpu.vector_store %arg5[%c0_41, %c0_42, %c0_43], %73 {strides = array<i32>} : memref<4x80x128xbf16, #tpu.memory_space<vmem>>, vector<1x80x128xbf16>,
    %74 = vector.broadcast %60 : vector<1x128xf32> to vector<80x128xf32>
    %75 = arith.mulf %18, %74 : vector<80x128xf32>
    %76 = vector.broadcast %63 : vector<1x128xf32> to vector<80x128xf32>
    %77 = arith.addf %75, %76 : vector<80x128xf32>
    %cst_44 = arith.constant 0.000000e+00 : f32
    %78 = vector.broadcast %cst_44 : f32 to vector<80x128xf32>
    %79 = arith.maximumf %77, %78 : vector<80x128xf32>
    %80 = arith.truncf %79 : vector<80x128xf32> to vector<80x128xbf16>
    %c1_45 = arith.constant 1 : index
    %c0_46 = arith.constant 0 : index
    %c0_47 = arith.constant 0 : index
    %81 = vector.load %arg5[%c1_45, %c0_46, %c0_47] : memref<4x80x128xbf16, #tpu.memory_space<vmem>>, vector<1x80x128xbf16>
    %82 = vector.shape_cast %81 : vector<1x80x128xbf16> to vector<80x128xbf16>
    %83 = vector.shape_cast %80 : vector<80x128xbf16> to vector<1x80x128xbf16>
    tpu.vector_store %arg5[%c1_45, %c0_46, %c0_47], %83 {strides = array<i32>} : memref<4x80x128xbf16, #tpu.memory_space<vmem>>, vector<1x80x128xbf16>,
    %84 = vector.broadcast %60 : vector<1x128xf32> to vector<80x128xf32>
    %85 = arith.mulf %30, %84 : vector<80x128xf32>
    %86 = vector.broadcast %63 : vector<1x128xf32> to vector<80x128xf32>
    %87 = arith.addf %85, %86 : vector<80x128xf32>
    %cst_48 = arith.constant 0.000000e+00 : f32
    %88 = vector.broadcast %cst_48 : f32 to vector<80x128xf32>
    %89 = arith.maximumf %87, %88 : vector<80x128xf32>
    %90 = arith.truncf %89 : vector<80x128xf32> to vector<80x128xbf16>
    %c2_49 = arith.constant 2 : index
    %c0_50 = arith.constant 0 : index
    %c0_51 = arith.constant 0 : index
    %91 = vector.load %arg5[%c2_49, %c0_50, %c0_51] : memref<4x80x128xbf16, #tpu.memory_space<vmem>>, vector<1x80x128xbf16>
    %92 = vector.shape_cast %91 : vector<1x80x128xbf16> to vector<80x128xbf16>
    %93 = vector.shape_cast %90 : vector<80x128xbf16> to vector<1x80x128xbf16>
    tpu.vector_store %arg5[%c2_49, %c0_50, %c0_51], %93 {strides = array<i32>} : memref<4x80x128xbf16, #tpu.memory_space<vmem>>, vector<1x80x128xbf16>,
    %94 = vector.broadcast %60 : vector<1x128xf32> to vector<80x128xf32>
    %95 = arith.mulf %42, %94 : vector<80x128xf32>
    %96 = vector.broadcast %63 : vector<1x128xf32> to vector<80x128xf32>
    %97 = arith.addf %95, %96 : vector<80x128xf32>
    %cst_52 = arith.constant 0.000000e+00 : f32
    %98 = vector.broadcast %cst_52 : f32 to vector<80x128xf32>
    %99 = arith.maximumf %97, %98 : vector<80x128xf32>
    %100 = arith.truncf %99 : vector<80x128xf32> to vector<80x128xbf16>
    %c3_53 = arith.constant 3 : index
    %c0_54 = arith.constant 0 : index
    %c0_55 = arith.constant 0 : index
    %101 = vector.load %arg5[%c3_53, %c0_54, %c0_55] : memref<4x80x128xbf16, #tpu.memory_space<vmem>>, vector<1x80x128xbf16>
    %102 = vector.shape_cast %101 : vector<1x80x128xbf16> to vector<80x128xbf16>
    %103 = vector.shape_cast %100 : vector<80x128xbf16> to vector<1x80x128xbf16>
    tpu.vector_store %arg5[%c3_53, %c0_54, %c0_55], %103 {strides = array<i32>} : memref<4x80x128xbf16, #tpu.memory_space<vmem>>, vector<1x80x128xbf16>,
    return
  }
  func.func @transform_0(%arg0: i32) -> (i32, i32, i32) {
    %c0_i32 = arith.constant 0 : i32
    %c0_i32_0 = arith.constant 0 : i32
    %c0_i32_1 = arith.constant 0 : i32
    %c0_i32_2 = arith.constant 0 : i32
    return %c0_i32, %c0_i32_0, %c0_i32_1 : i32, i32, i32
  }
  func.func @transform_1(%arg0: i32) -> (i32, i32, i32) {
    %c0_i32 = arith.constant 0 : i32
    %c0_i32_0 = arith.constant 0 : i32
    %c0_i32_1 = arith.constant 0 : i32
    %c0_i32_2 = arith.constant 0 : i32
    return %c0_i32, %c0_i32_0, %c0_i32_1 : i32, i32, i32
  }
  func.func @transform_2(%arg0: i32) -> (i32, i32) {
    %c0_i32 = arith.constant 0 : i32
    %c0_i32_0 = arith.constant 0 : i32
    %c0_i32_1 = arith.constant 0 : i32
    return %c0_i32, %c0_i32_0 : i32, i32
  }
  func.func @transform_3(%arg0: i32) -> (i32, i32) {
    %c0_i32 = arith.constant 0 : i32
    %c0_i32_0 = arith.constant 0 : i32
    %c0_i32_1 = arith.constant 0 : i32
    return %c0_i32, %c0_i32_0 : i32, i32
  }
  func.func @transform_4(%arg0: i32) -> (i32, i32, i32) {
    %c0_i32 = arith.constant 0 : i32
    %c0_i32_0 = arith.constant 0 : i32
    %c0_i32_1 = arith.constant 0 : i32
    %c0_i32_2 = arith.constant 0 : i32
    return %c0_i32, %c0_i32_0, %c0_i32_1 : i32, i32, i32
  }
}

module attributes {stable_mosaic.version = 11 : i64} {
  func.func @conv_stats_kernel(%arg0: i32, %arg1: i32, %arg2: memref<1x288x512xbf16, #tpu.memory_space<vmem>>, %arg3: memref<1x512x128xbf16, #tpu.memory_space<vmem>>, %arg4: memref<1x288x128xbf16, #tpu.memory_space<vmem>>, %arg5: memref<1x1x128xf32, #tpu.memory_space<vmem>>, %arg6: memref<1x1x128xf32, #tpu.memory_space<vmem>>) attributes {dimension_semantics = [#tpu.dimension_semantics<parallel>, #tpu.dimension_semantics<parallel>], iteration_bounds = array<i64: 4, 1>, scalar_prefetch = 0 : i64, scratch_operands = 0 : i64, tpu.core_type = #tpu.core_type<tc>, window_params = [{transform_indices = @transform_0, window_bounds = array<i64: 1, 288, 512>}, {transform_indices = @transform_1, window_bounds = array<i64: 1, 512, 128>}, {transform_indices = @transform_2, window_bounds = array<i64: 1, 288, 128>}, {transform_indices = @transform_3, window_bounds = array<i64: 1, 1, 128>}, {transform_indices = @transform_4, window_bounds = array<i64: 1, 1, 128>}]} {
    %c0 = arith.constant 0 : index
    %c0_0 = arith.constant 0 : index
    %c0_1 = arith.constant 0 : index
    %0 = vector.load %arg2[%c0, %c0_0, %c0_1] : memref<1x288x512xbf16, #tpu.memory_space<vmem>>, vector<1x288x512xbf16>
    %1 = vector.shape_cast %0 : vector<1x288x512xbf16> to vector<288x512xbf16>
    %c0_2 = arith.constant 0 : index
    %c0_3 = arith.constant 0 : index
    %c0_4 = arith.constant 0 : index
    %2 = vector.load %arg3[%c0_2, %c0_3, %c0_4] : memref<1x512x128xbf16, #tpu.memory_space<vmem>>, vector<1x512x128xbf16>
    %3 = vector.shape_cast %2 : vector<1x512x128xbf16> to vector<512x128xbf16>
    %cst = arith.constant dense<0.000000e+00> : vector<288x128xf32>
    %4 = tpu.matmul %1, %3, %cst {dimension_numbers = #tpu.dot_dimension_numbers<[1], [0], [0], [1], [0, 0, 1, 1], [], []>} : vector<288x512xbf16>, vector<512x128xbf16>, vector<288x128xf32> -> vector<288x128xf32>
    %5 = arith.truncf %4 : vector<288x128xf32> to vector<288x128xbf16>
    %c0_5 = arith.constant 0 : index
    %c0_6 = arith.constant 0 : index
    %c0_7 = arith.constant 0 : index
    %6 = vector.load %arg4[%c0_5, %c0_6, %c0_7] : memref<1x288x128xbf16, #tpu.memory_space<vmem>>, vector<1x288x128xbf16>
    %7 = vector.shape_cast %6 : vector<1x288x128xbf16> to vector<288x128xbf16>
    %8 = vector.shape_cast %5 : vector<288x128xbf16> to vector<1x288x128xbf16>
    tpu.vector_store %arg4[%c0_5, %c0_6, %c0_7], %8 {strides = array<i32>} : memref<1x288x128xbf16, #tpu.memory_space<vmem>>, vector<1x288x128xbf16>,
    %cst_8 = arith.constant dense<0.000000e+00> : vector<128xf32>
    %9 = vector.multi_reduction <add>, %4, %cst_8 [0] : vector<288x128xf32> to vector<128xf32>
    %10 = vector.shape_cast %9 : vector<128xf32> to vector<1x128xf32>
    %11 = vector.shape_cast %10 : vector<1x128xf32> to vector<1x1x128xf32>
    %c0_9 = arith.constant 0 : index
    %c0_10 = arith.constant 0 : index
    %c0_11 = arith.constant 0 : index
    %12 = vector.load %arg5[%c0_9, %c0_10, %c0_11] : memref<1x1x128xf32, #tpu.memory_space<vmem>>, vector<1x1x128xf32>
    tpu.vector_store %arg5[%c0_9, %c0_10, %c0_11], %11 {strides = array<i32>} : memref<1x1x128xf32, #tpu.memory_space<vmem>>, vector<1x1x128xf32>,
    %13 = arith.mulf %4, %4 : vector<288x128xf32>
    %cst_12 = arith.constant dense<0.000000e+00> : vector<128xf32>
    %14 = vector.multi_reduction <add>, %13, %cst_12 [0] : vector<288x128xf32> to vector<128xf32>
    %15 = vector.shape_cast %14 : vector<128xf32> to vector<1x128xf32>
    %16 = vector.shape_cast %15 : vector<1x128xf32> to vector<1x1x128xf32>
    %c0_13 = arith.constant 0 : index
    %c0_14 = arith.constant 0 : index
    %c0_15 = arith.constant 0 : index
    %17 = vector.load %arg6[%c0_13, %c0_14, %c0_15] : memref<1x1x128xf32, #tpu.memory_space<vmem>>, vector<1x1x128xf32>
    tpu.vector_store %arg6[%c0_13, %c0_14, %c0_15], %16 {strides = array<i32>} : memref<1x1x128xf32, #tpu.memory_space<vmem>>, vector<1x1x128xf32>,
    return
  }
  func.func @transform_0(%arg0: i32, %arg1: i32) -> (i32, i32, i32) {
    %c0_i32 = arith.constant 0 : i32
    %c0_i32_0 = arith.constant 0 : i32
    return %arg0, %arg1, %c0_i32 : i32, i32, i32
  }
  func.func @transform_1(%arg0: i32, %arg1: i32) -> (i32, i32, i32) {
    %c0_i32 = arith.constant 0 : i32
    %c0_i32_0 = arith.constant 0 : i32
    %c0_i32_1 = arith.constant 0 : i32
    return %arg0, %c0_i32, %c0_i32_0 : i32, i32, i32
  }
  func.func @transform_2(%arg0: i32, %arg1: i32) -> (i32, i32, i32) {
    %c0_i32 = arith.constant 0 : i32
    %c0_i32_0 = arith.constant 0 : i32
    return %arg0, %arg1, %c0_i32 : i32, i32, i32
  }
  func.func @transform_3(%arg0: i32, %arg1: i32) -> (i32, i32, i32) {
    %c1_i32 = arith.constant 1 : i32
    %0 = arith.muli %arg0, %c1_i32 : i32
    %1 = arith.addi %0, %arg1 : i32
    %c0_i32 = arith.constant 0 : i32
    %c0_i32_0 = arith.constant 0 : i32
    %c0_i32_1 = arith.constant 0 : i32
    return %1, %c0_i32, %c0_i32_0 : i32, i32, i32
  }
  func.func @transform_4(%arg0: i32, %arg1: i32) -> (i32, i32, i32) {
    %c1_i32 = arith.constant 1 : i32
    %0 = arith.muli %arg0, %c1_i32 : i32
    %1 = arith.addi %0, %arg1 : i32
    %c0_i32 = arith.constant 0 : i32
    %c0_i32_0 = arith.constant 0 : i32
    %c0_i32_1 = arith.constant 0 : i32
    return %1, %c0_i32, %c0_i32_0 : i32, i32, i32
  }
}

module attributes {stable_mosaic.version = 11 : i64} {
  func.func @bn_relu_kernel(%arg0: i32, %arg1: i32, %arg2: memref<1x288x128xbf16, #tpu.memory_space<vmem>>, %arg3: memref<4x1x128xf32, #tpu.memory_space<vmem>>, %arg4: memref<4x1x128xf32, #tpu.memory_space<vmem>>, %arg5: memref<1x128xf32, #tpu.memory_space<vmem>>, %arg6: memref<1x128xf32, #tpu.memory_space<vmem>>, %arg7: memref<1x288x128xbf16, #tpu.memory_space<vmem>>) attributes {dimension_semantics = [#tpu.dimension_semantics<parallel>, #tpu.dimension_semantics<parallel>], iteration_bounds = array<i64: 4, 1>, scalar_prefetch = 0 : i64, scratch_operands = 0 : i64, tpu.core_type = #tpu.core_type<tc>, window_params = [{transform_indices = @transform_0, window_bounds = array<i64: 1, 288, 128>}, {pipeline_mode = #tpu.pipeline_mode<synchronous>, transform_indices = @transform_1, window_bounds = array<i64: 4, 1, 128>}, {pipeline_mode = #tpu.pipeline_mode<synchronous>, transform_indices = @transform_2, window_bounds = array<i64: 4, 1, 128>}, {pipeline_mode = #tpu.pipeline_mode<synchronous>, transform_indices = @transform_3, window_bounds = array<i64: 1, 128>}, {pipeline_mode = #tpu.pipeline_mode<synchronous>, transform_indices = @transform_4, window_bounds = array<i64: 1, 128>}, {transform_indices = @transform_5, window_bounds = array<i64: 1, 288, 128>}]} {
    %c0 = arith.constant 0 : index
    %c0_0 = arith.constant 0 : index
    %c0_1 = arith.constant 0 : index
    %0 = vector.load %arg3[%c0, %c0_0, %c0_1] : memref<4x1x128xf32, #tpu.memory_space<vmem>>, vector<4x1x128xf32>
    %cst = arith.constant dense<0.000000e+00> : vector<1x128xf32>
    %1 = vector.multi_reduction <add>, %0, %cst [0] : vector<4x1x128xf32> to vector<1x128xf32>
    %c0_2 = arith.constant 0 : index
    %c0_3 = arith.constant 0 : index
    %c0_4 = arith.constant 0 : index
    %2 = vector.load %arg4[%c0_2, %c0_3, %c0_4] : memref<4x1x128xf32, #tpu.memory_space<vmem>>, vector<4x1x128xf32>
    %cst_5 = arith.constant dense<0.000000e+00> : vector<1x128xf32>
    %3 = vector.multi_reduction <add>, %2, %cst_5 [0] : vector<4x1x128xf32> to vector<1x128xf32>
    %cst_6 = arith.constant 9.45179606E-4 : f32
    %4 = vector.broadcast %cst_6 : f32 to vector<1x128xf32>
    %5 = arith.mulf %1, %4 : vector<1x128xf32>
    %cst_7 = arith.constant 9.45179606E-4 : f32
    %6 = vector.broadcast %cst_7 : f32 to vector<1x128xf32>
    %7 = arith.mulf %3, %6 : vector<1x128xf32>
    %8 = arith.mulf %5, %5 : vector<1x128xf32>
    %9 = arith.subf %7, %8 : vector<1x128xf32>
    %c0_8 = arith.constant 0 : index
    %c0_9 = arith.constant 0 : index
    %10 = vector.load %arg5[%c0_8, %c0_9] : memref<1x128xf32, #tpu.memory_space<vmem>>, vector<1x128xf32>
    %cst_10 = arith.constant 9.99999974E-6 : f32
    %11 = vector.broadcast %cst_10 : f32 to vector<1x128xf32>
    %12 = arith.addf %9, %11 : vector<1x128xf32>
    %13 = math.rsqrt %12 : vector<1x128xf32>
    %14 = arith.mulf %10, %13 : vector<1x128xf32>
    %c0_11 = arith.constant 0 : index
    %c0_12 = arith.constant 0 : index
    %15 = vector.load %arg6[%c0_11, %c0_12] : memref<1x128xf32, #tpu.memory_space<vmem>>, vector<1x128xf32>
    %16 = arith.mulf %5, %14 : vector<1x128xf32>
    %17 = arith.subf %15, %16 : vector<1x128xf32>
    %c0_13 = arith.constant 0 : index
    %c0_14 = arith.constant 0 : index
    %c0_15 = arith.constant 0 : index
    %18 = vector.load %arg2[%c0_13, %c0_14, %c0_15] : memref<1x288x128xbf16, #tpu.memory_space<vmem>>, vector<1x288x128xbf16>
    %19 = vector.shape_cast %18 : vector<1x288x128xbf16> to vector<288x128xbf16>
    %20 = arith.extf %19 : vector<288x128xbf16> to vector<288x128xf32>
    %21 = vector.broadcast %14 : vector<1x128xf32> to vector<288x128xf32>
    %22 = arith.mulf %20, %21 : vector<288x128xf32>
    %23 = vector.broadcast %17 : vector<1x128xf32> to vector<288x128xf32>
    %24 = arith.addf %22, %23 : vector<288x128xf32>
    %cst_16 = arith.constant 0.000000e+00 : f32
    %25 = vector.broadcast %cst_16 : f32 to vector<288x128xf32>
    %26 = arith.maximumf %24, %25 : vector<288x128xf32>
    %27 = arith.truncf %26 : vector<288x128xf32> to vector<288x128xbf16>
    %c0_17 = arith.constant 0 : index
    %c0_18 = arith.constant 0 : index
    %c0_19 = arith.constant 0 : index
    %28 = vector.load %arg7[%c0_17, %c0_18, %c0_19] : memref<1x288x128xbf16, #tpu.memory_space<vmem>>, vector<1x288x128xbf16>
    %29 = vector.shape_cast %28 : vector<1x288x128xbf16> to vector<288x128xbf16>
    %30 = vector.shape_cast %27 : vector<288x128xbf16> to vector<1x288x128xbf16>
    tpu.vector_store %arg7[%c0_17, %c0_18, %c0_19], %30 {strides = array<i32>} : memref<1x288x128xbf16, #tpu.memory_space<vmem>>, vector<1x288x128xbf16>,
    return
  }
  func.func @transform_0(%arg0: i32, %arg1: i32) -> (i32, i32, i32) {
    %c0_i32 = arith.constant 0 : i32
    %c0_i32_0 = arith.constant 0 : i32
    return %arg0, %arg1, %c0_i32 : i32, i32, i32
  }
  func.func @transform_1(%arg0: i32, %arg1: i32) -> (i32, i32, i32) {
    %c0_i32 = arith.constant 0 : i32
    %c0_i32_0 = arith.constant 0 : i32
    %c0_i32_1 = arith.constant 0 : i32
    %c0_i32_2 = arith.constant 0 : i32
    return %c0_i32, %c0_i32_0, %c0_i32_1 : i32, i32, i32
  }
  func.func @transform_2(%arg0: i32, %arg1: i32) -> (i32, i32, i32) {
    %c0_i32 = arith.constant 0 : i32
    %c0_i32_0 = arith.constant 0 : i32
    %c0_i32_1 = arith.constant 0 : i32
    %c0_i32_2 = arith.constant 0 : i32
    return %c0_i32, %c0_i32_0, %c0_i32_1 : i32, i32, i32
  }
  func.func @transform_3(%arg0: i32, %arg1: i32) -> (i32, i32) {
    %c0_i32 = arith.constant 0 : i32
    %c0_i32_0 = arith.constant 0 : i32
    %c0_i32_1 = arith.constant 0 : i32
    return %c0_i32, %c0_i32_0 : i32, i32
  }
  func.func @transform_4(%arg0: i32, %arg1: i32) -> (i32, i32) {
    %c0_i32 = arith.constant 0 : i32
    %c0_i32_0 = arith.constant 0 : i32
    %c0_i32_1 = arith.constant 0 : i32
    return %c0_i32, %c0_i32_0 : i32, i32
  }
  func.func @transform_5(%arg0: i32, %arg1: i32) -> (i32, i32, i32) {
    %c0_i32 = arith.constant 0 : i32
    %c0_i32_0 = arith.constant 0 : i32
    return %arg0, %arg1, %c0_i32 : i32, i32, i32
  }
}

module attributes {stable_mosaic.version = 11 : i64} {
  func.func @conv_tanh_kernel(%arg0: i32, %arg1: i32, %arg2: memref<1x576x256xbf16, #tpu.memory_space<vmem>>, %arg3: memref<1x256x128xbf16, #tpu.memory_space<vmem>>, %arg4: memref<1x576x128xf32, #tpu.memory_space<vmem>>) attributes {dimension_semantics = [#tpu.dimension_semantics<parallel>, #tpu.dimension_semantics<parallel>], iteration_bounds = array<i64: 4, 2>, scalar_prefetch = 0 : i64, scratch_operands = 0 : i64, tpu.core_type = #tpu.core_type<tc>, window_params = [{transform_indices = @transform_0, window_bounds = array<i64: 1, 576, 256>}, {transform_indices = @transform_1, window_bounds = array<i64: 1, 256, 128>}, {transform_indices = @transform_2, window_bounds = array<i64: 1, 576, 128>}]} {
    %c0 = arith.constant 0 : index
    %c0_0 = arith.constant 0 : index
    %c0_1 = arith.constant 0 : index
    %0 = vector.load %arg2[%c0, %c0_0, %c0_1] : memref<1x576x256xbf16, #tpu.memory_space<vmem>>, vector<1x576x256xbf16>
    %1 = vector.shape_cast %0 : vector<1x576x256xbf16> to vector<576x256xbf16>
    %c0_2 = arith.constant 0 : index
    %c0_3 = arith.constant 0 : index
    %c0_4 = arith.constant 0 : index
    %2 = vector.load %arg3[%c0_2, %c0_3, %c0_4] : memref<1x256x128xbf16, #tpu.memory_space<vmem>>, vector<1x256x128xbf16>
    %3 = vector.shape_cast %2 : vector<1x256x128xbf16> to vector<256x128xbf16>
    %cst = arith.constant dense<0.000000e+00> : vector<576x128xf32>
    %4 = tpu.matmul %1, %3, %cst {dimension_numbers = #tpu.dot_dimension_numbers<[1], [0], [0], [1], [0, 0, 1, 1], [], []>} : vector<576x256xbf16>, vector<256x128xbf16>, vector<576x128xf32> -> vector<576x128xf32>
    %5 = math.tanh %4 : vector<576x128xf32>
    %c0_5 = arith.constant 0 : index
    %c0_6 = arith.constant 0 : index
    %c0_7 = arith.constant 0 : index
    %6 = vector.load %arg4[%c0_5, %c0_6, %c0_7] : memref<1x576x128xf32, #tpu.memory_space<vmem>>, vector<1x576x128xf32>
    %7 = vector.shape_cast %6 : vector<1x576x128xf32> to vector<576x128xf32>
    %8 = vector.shape_cast %5 : vector<576x128xf32> to vector<1x576x128xf32>
    tpu.vector_store %arg4[%c0_5, %c0_6, %c0_7], %8 {strides = array<i32>} : memref<1x576x128xf32, #tpu.memory_space<vmem>>, vector<1x576x128xf32>,
    return
  }
  func.func @transform_0(%arg0: i32, %arg1: i32) -> (i32, i32, i32) {
    %c0_i32 = arith.constant 0 : i32
    %c0_i32_0 = arith.constant 0 : i32
    return %arg0, %arg1, %c0_i32 : i32, i32, i32
  }
  func.func @transform_1(%arg0: i32, %arg1: i32) -> (i32, i32, i32) {
    %c0_i32 = arith.constant 0 : i32
    %c0_i32_0 = arith.constant 0 : i32
    %c0_i32_1 = arith.constant 0 : i32
    return %arg0, %c0_i32, %c0_i32_0 : i32, i32, i32
  }
  func.func @transform_2(%arg0: i32, %arg1: i32) -> (i32, i32, i32) {
    %c0_i32 = arith.constant 0 : i32
    %c0_i32_0 = arith.constant 0 : i32
    return %arg0, %arg1, %c0_i32 : i32, i32, i32
  }
}

</mosaic_0001>

<bundles_post_ra>
// kernel: squeeze.49
= control target key start
LH: loop header
LB: loop body
LE: loop exit
PB: predicated region body
PF: predicated region fallthrough
CT: control target
= control target key end

     0   :  { %s689_s0 = inlined_call_operand.vmem [shape: bf16[1,50,256], index: 0, kind: input, shape index: {}]   ;;  %s690_s1 = inlined_call_operand.vmem [shape: bf16[2,5,5,256], index: 1, kind: output, shape index: {}]  }
   0x1   :  { %v613_v0 = vld [vmem:[%s689_s0 + $0x30] sm:$0xff]   ;;  %v614_v1 = vld [vmem:[%s689_s0 + $0x28] sm:$0xff]   ;;  %v615_v2 = vld [vmem:[%s689_s0 + $0x20] sm:$0xff]  }
   0x2   :  { %v537_v3 = vunpack.c.l.bf16 %v613_v0  ;;  %v538_v4 = vunpack.c.h.bf16 %v613_v0  ;;  %v541_v5 = vunpack.c.l.bf16 %v614_v1  ;;  %v542_v6 = vunpack.c.h.bf16 %v614_v1  ;;  %v616_v7 = vld [vmem:[%s689_s0 + $0x18] sm:$0xff]   ;;  %v617_v8 = vld [vmem:[%s689_s0 + $0x10] sm:$0xff]   ;;  %v618_v9 = vld [vmem:[%s689_s0 + $0x8] sm:$0xff]  }
   0x3   :  { %v545_v10 = vunpack.c.l.bf16 %v615_v2  ;;  %v546_v11 = vunpack.c.h.bf16 %v615_v2  ;;  %v549_v12 = vunpack.c.l.bf16 %v616_v7  ;;  %v550_v13 = vunpack.c.h.bf16 %v616_v7  ;;  %v560_v14 = vld [vmem:[%s689_s0] sm:$0xff]  }
   0x4   :  { %21 = vst [vmem:[#allocation1 + $0x38] sm:$0xff] %v538_v4  ;;  %37 = vst [vmem:[#allocation1 + $0x68] sm:$0xff] %v537_v3  ;;  %v553_v15 = vunpack.c.l.bf16 %v617_v8  ;;  %v554_v16 = vunpack.c.h.bf16 %v617_v8  ;;  %v557_v17 = vunpack.c.l.bf16 %v618_v9  ;;  %v558_v18 = vunpack.c.h.bf16 %v618_v9 }
   0x5   :  { %295 = vst [vmem:[#allocation0 + $0x80] sm:$0x1f] %v541_v5   ;;  %297 = vst [vmem:[#allocation0 + $0x8b] sm:$0xe0] %v541_v5   ;;  %v561_v19 = vunpack.c.l.bf16 %v560_v14  ;;  %v562_v20 = vunpack.c.h.bf16 %v560_v14 }
   0x6   :  { %301 = vst [vmem:[#allocation0 + $0x88] sm:$0x1f] %v542_v6   ;;  %303 = vst [vmem:[#allocation0 + $0x93] sm:$0xe0] %v542_v6  }
   0x7   :  { %267 = vst [vmem:[#allocation0 + $0x44] ss:$12 sm:$0x3] %v549_v12   ;;  %269 = vst [vmem:[#allocation0 + $0x4f] sm:$0x3c] %v549_v12  }
   0x8   :  { %271 = vst [vmem:[#allocation0 + $0x5a] sm:$0xc0] %v549_v12   ;;  %275 = vst [vmem:[#allocation0 + $0x4c] ss:$12 sm:$0x3] %v550_v13  }
   0x9   :  { %277 = vst [vmem:[#allocation0 + $0x57] sm:$0x3c] %v550_v13   ;;  %279 = vst [vmem:[#allocation0 + $0x62] sm:$0xc0] %v550_v13  }
   0xa   :  { %283 = vst [vmem:[#allocation0 + $0x62] sm:$0x7] %v545_v10   ;;  %285 = vst [vmem:[#allocation0 + $0x6d] sm:$0xf8] %v545_v10  }
   0xb   :  { %289 = vst [vmem:[#allocation0 + $0x6a] sm:$0x7] %v546_v11   ;;  %291 = vst [vmem:[#allocation0 + $0x75] sm:$0xf8] %v546_v11   ;;  %v305_v21 = vld [vmem:[#allocation1 + $0x68] sm:$0x3]  }
   0xc   :  { %239 = vst [vmem:[#allocation0 + $0x13] ss:$26 sps:$4 sm:$0x83] %v557_v17   ;;  %241 = vst [vmem:[#allocation0 + $0x1e] sm:$0x7c] %v557_v17   ;;  %v442_v30 = vld [vmem:[#allocation0 + $0x80] sm:$0xff] }
   0xd   :  { %247 = vst [vmem:[#allocation0 + $0x1b] ss:$26 sps:$4 sm:$0x83] %v558_v18   ;;  %249 = vst [vmem:[#allocation0 + $0x26] sm:$0x7c] %v558_v18   ;;  %v450_v47 = vld [vmem:[#allocation0 + $0x88] sm:$0xff] }
   0xe   :  { %255 = vst [vmem:[#allocation0 + $0x31] ss:$15 sps:$4 sm:$0xff] %v553_v15   ;;  %261 = vst [vmem:[#allocation0 + $0x39] ss:$15 sps:$4 sm:$0xff] %v554_v16   ;;  %v309_v22 = vld [vmem:[#allocation1 + $0x38] sm:$0x3]   ;;  %v606_v49 = vpack.c.bf16 %v450_v47, %v442_v30 }
   0xf   :  { %227 = vst [vmem:[#allocation0] sm:$0x1f] %v561_v19   ;;  %229 = vst [vmem:[#allocation0 + $0xb] sm:$0xe0] %v561_v19   ;;  %v394_v23 = vld [vmem:[#allocation0 + $0x50] sm:$0xff] }
  0x10   :  { %233 = vst [vmem:[#allocation0 + $0x8] sm:$0x1f] %v562_v20   ;;  %235 = vst [vmem:[#allocation0 + $0x13] sm:$0xe0] %v562_v20   ;;  %v402_v24 = vld [vmem:[#allocation0 + $0x58] sm:$0xff] }
  0x11   :  { %307 = vst [vmem:[#allocation0 + $0x93] sm:$0x3] %v305_v21   ;;  %311 = vst [vmem:[#allocation0 + $0x9b] sm:$0x3] %v309_v22   ;;  %v410_v25 = vld [vmem:[#allocation0 + $0x60] sm:$0xff]  ;;  %v591_v29 = vpack.c.bf16 %v402_v24, %v394_v23  ;;  %v426_v43 = vld [vmem:[#allocation0 + $0x70] sm:$0xff] }
  0x12   :  { %v418_v42 = vld [vmem:[#allocation0 + $0x68] sm:$0xff]  ;;  %v434_v46 = vld [vmem:[#allocation0 + $0x78] sm:$0xff]  ;;  %626 = vst [vmem:[%s690_s1 + $0x40] sm:$0xff] %v606_v49  }
  0x13   :  { %v346_v26 = vld [vmem:[#allocation0 + $0x20] sm:$0xff]  ;;  %623 = vst [vmem:[%s690_s1 + $0x28] sm:$0xff] %v591_v29   ;;  %v596_v45 = vpack.c.bf16 %v418_v42, %v410_v25  ;;  %v601_v48 = vpack.c.bf16 %v434_v46, %v426_v43 }
  0x14   :  { %v354_v27 = vld [vmem:[#allocation0 + $0x28] sm:$0xff] }
  0x15   :  { %v362_v28 = vld [vmem:[#allocation0 + $0x30] sm:$0xff]  ;;  %v576_v34 = vpack.c.bf16 %v354_v27, %v346_v26  ;;  %v370_v37 = vld [vmem:[#allocation0 + $0x38] sm:$0xff]  ;;  %v378_v38 = vld [vmem:[#allocation0 + $0x40] sm:$0xff]  ;;  %624 = vst [vmem:[%s690_s1 + $0x30] sm:$0xff] %v596_v45  }
  0x16   :  { %v317_v31 = vld [vmem:[#allocation0] sm:$0xff]  ;;  %v330_v33 = vld [vmem:[#allocation0 + $0x10] sm:$0xff]  ;;  %v581_v40 = vpack.c.bf16 %v370_v37, %v362_v28  ;;  %v386_v41 = vld [vmem:[#allocation0 + $0x48] sm:$0xff]  ;;  %625 = vst [vmem:[%s690_s1 + $0x38] sm:$0xff] %v601_v48  }
  0x17   :  { %v323_v32 = vld [vmem:[#allocation0 + $0x8] sm:$0xff]  ;;  %v338_v36 = vld [vmem:[#allocation0 + $0x18] sm:$0xff]  ;;  %620 = vst [vmem:[%s690_s1 + $0x10] sm:$0xff] %v576_v34   ;;  %v586_v44 = vpack.c.bf16 %v386_v41, %v378_v38 }
  0x18   :  { %v566_v35 = vpack.c.bf16 %v323_v32, %v317_v31  ;;  %v571_v39 = vpack.c.bf16 %v338_v36, %v330_v33  ;;  %621 = vst [vmem:[%s690_s1 + $0x18] sm:$0xff] %v581_v40   ;;  %v458_v50 = vld [vmem:[#allocation0 + $0x90] sm:$0xff]  ;;  %v466_v51 = vld [vmem:[#allocation0 + $0x98] sm:$0xff] }
  0x19   :  { %622 = vst [vmem:[%s690_s1 + $0x20] sm:$0xff] %v586_v44   ;;  %v611_v52 = vpack.c.bf16 %v466_v51, %v458_v50 }
  0x1a   :  { %567 = vst [vmem:[%s690_s1] sm:$0xff] %v566_v35   ;;  %619 = vst [vmem:[%s690_s1 + $0x8] sm:$0xff] %v571_v39  }
  0x1b   :  { %627 = vst [vmem:[%s690_s1 + $0x48] sm:$0xff] %v611_v52  }

// kernel: generator_forward.5
= control target key start
LH: loop header
LB: loop body
LE: loop exit
PB: predicated region body
PF: predicated region fallthrough
CT: control target
= control target key end

     0   :  { %s1011_s1 = inlined_call_operand.vmem [shape: bf16[1,256,256], index: 1, kind: input, shape index: {}]   ;;  %s1012_s0 = inlined_call_operand.vmem [shape: bf16[1,64,256], index: 0, kind: input, shape index: {}]   ;;  %s1013_s2 = inlined_call_operand.vmem [shape: f32[1,256], index: 2, kind: input, shape index: {}]   ;;  %s1014_s3 = inlined_call_operand.vmem [shape: f32[1,256], index: 3, kind: input, shape index: {}]   ;;  %s1015_s4 = inlined_call_operand.vmem [shape: bf16[1,64,256], index: 4, kind: output, shape index: {}]  }
   0x1   :  { %v675_v0 = vld [vmem:[%s1011_s1 + $0x74] ss:$8 sps:$4 sm:$0xff]   ;;  %v677_v1 = vld [vmem:[%s1011_s1 + $0x70] ss:$8 sps:$4 sm:$0xff]   ;;  %v678_v2 = vld [vmem:[%s1011_s1 + $0x64] ss:$8 sps:$4 sm:$0xff]  }
   0x2   :  { %257 = vmatprep.subr.bf16.mxu0 %v675_v0  ;;  %642 = vmatprep.subr.bf16.mxu1 %v675_v0  ;;  %v680_v3 = vld [vmem:[%s1011_s1 + $0x60] ss:$8 sps:$4 sm:$0xff]   ;;  %v681_v4 = vld [vmem:[%s1011_s1 + $0x54] ss:$8 sps:$4 sm:$0xff]   ;;  %v683_v5 = vld [vmem:[%s1011_s1 + $0x50] ss:$8 sps:$4 sm:$0xff]  }
   0x3   :  { %258 = vmatpush1.bf16.msra.mxu0 %v677_v1  ;;  %658 = vmatpush1.bf16.msra.mxu1 %v677_v1  ;;  %v684_v6 = vld [vmem:[%s1011_s1 + $0x44] ss:$8 sps:$4 sm:$0xff]   ;;  %v686_v7 = vld [vmem:[%s1011_s1 + $0x40] ss:$8 sps:$4 sm:$0xff]   ;;  %v687_v8 = vld [vmem:[%s1011_s1 + $0x34] ss:$8 sps:$4 sm:$0xff]  }
   0x4   :  { %259 = vmatprep.subr.bf16.mxu0 %v678_v2  ;;  %643 = vmatprep.subr.bf16.mxu1 %v678_v2  ;;  %v689_v9 = vld [vmem:[%s1011_s1 + $0x30] ss:$8 sps:$4 sm:$0xff]   ;;  %v690_v10 = vld [vmem:[%s1011_s1 + $0x24] ss:$8 sps:$4 sm:$0xff]   ;;  %v692_v11 = vld [vmem:[%s1011_s1 + $0x20] ss:$8 sps:$4 sm:$0xff]  }
   0x5   :  { %v693_v12 = vld [vmem:[%s1011_s1 + $0x14] ss:$8 sps:$4 sm:$0xff]   ;;  %v725_v13 = vld [vmem:[%s1012_s0 + $0x4] ss:$8 sps:$4 sm:$0xff]   ;;  %v695_v14 = vld [vmem:[%s1011_s1 + $0x10] ss:$8 sps:$4 sm:$0xff]  }
   0x6   :  { %v728_v15 = vld [vmem:[%s1012_s0 + $0x24] ss:$8 sps:$4 sm:$0xff]   ;;  %289 = vmatprep.mubr.bf16.mxu0 %v725_v13  ;;  %v698_v17 = vld [vmem:[%s1011_s1] ss:$8 sps:$4 sm:$0xff]   ;;  %v699_v18 = vld [vmem:[%s1011_s1 + $0xf4] ss:$8 sps:$4 sm:$0xff]  }
   0x7   :  { %260 = vmatpush1.bf16.msra.mxu0 %v680_v3  ;;  %659 = vmatpush1.bf16.msra.mxu1 %v680_v3  ;;  %v696_v16 = vld [vmem:[%s1011_s1 + $0x4] ss:$8 sps:$4 sm:$0xff]   ;;  %v701_v19 = vld [vmem:[%s1011_s1 + $0xf0] ss:$8 sps:$4 sm:$0xff]   ;;  %v704_v21 = vld [vmem:[%s1011_s1 + $0xe0] ss:$8 sps:$4 sm:$0xff]  }
   0x8   :  { %261 = vmatprep.subr.bf16.mxu0 %v681_v4  ;;  %644 = vmatprep.subr.bf16.mxu1 %v681_v4  ;;  %v702_v20 = vld [vmem:[%s1011_s1 + $0xe4] ss:$8 sps:$4 sm:$0xff]   ;;  %v705_v22 = vld [vmem:[%s1011_s1 + $0xd4] ss:$8 sps:$4 sm:$0xff]   ;;  %v707_v23 = vld [vmem:[%s1011_s1 + $0xd0] ss:$8 sps:$4 sm:$0xff]  }
   0x9   :  { %309 = vmatprep.mubr.bf16.mxu1 %v728_v15  ;;  %v708_v24 = vld [vmem:[%s1011_s1 + $0xc4] ss:$8 sps:$4 sm:$0xff]   ;;  %v710_v25 = vld [vmem:[%s1011_s1 + $0xc0] ss:$8 sps:$4 sm:$0xff]   ;;  %v711_v26 = vld [vmem:[%s1011_s1 + $0xb4] ss:$8 sps:$4 sm:$0xff]  }
   0xa   :  { %v713_v27 = vld [vmem:[%s1011_s1 + $0xb0] ss:$8 sps:$4 sm:$0xff]   ;;  %v714_v28 = vld [vmem:[%s1011_s1 + $0xa4] ss:$8 sps:$4 sm:$0xff]   ;;  %v716_v29 = vld [vmem:[%s1011_s1 + $0xa0] ss:$8 sps:$4 sm:$0xff]  }
   0xb   :  { %262 = vmatpush1.bf16.msra.mxu0 %v683_v5  ;;  %660 = vmatpush1.bf16.msra.mxu1 %v683_v5  ;;  %v717_v30 = vld [vmem:[%s1011_s1 + $0x94] ss:$8 sps:$4 sm:$0xff]   ;;  %v719_v31 = vld [vmem:[%s1011_s1 + $0x90] ss:$8 sps:$4 sm:$0xff]   ;;  %v720_v32 = vld [vmem:[%s1011_s1 + $0x84] ss:$8 sps:$4 sm:$0xff]  }
   0xc   :  { %263 = vmatprep.subr.bf16.mxu0 %v684_v6  ;;  %645 = vmatprep.subr.bf16.mxu1 %v684_v6  ;;  %v722_v33 = vld [vmem:[%s1011_s1 + $0x80] ss:$8 sps:$4 sm:$0xff]   ;;  %v729_v36 = vld [vmem:[%s1012_s0 + $0x14] ss:$8 sps:$4 sm:$0xff]   ;;  %v731_v38 = vld [vmem:[%s1012_s0 + $0x10] ss:$8 sps:$4 sm:$0xff]  }
   0xd   :  { %v723_v34 = vld [vmem:[%s1012_s0] ss:$8 sps:$4 sm:$0xff]   ;;  %v732_v37 = vld [vmem:[%s1012_s0 + $0x34] ss:$8 sps:$4 sm:$0xff]   ;;  %v734_v39 = vld [vmem:[%s1012_s0 + $0x30] ss:$8 sps:$4 sm:$0xff]  }
   0xe   :  { %v726_v35 = vld [vmem:[%s1012_s0 + $0x20] ss:$8 sps:$4 sm:$0xff]  }
   0xf   :  { %264 = vmatpush1.bf16.msra.mxu0 %v686_v7  ;;  %661 = vmatpush1.bf16.msra.mxu1 %v686_v7 }
  0x10   :  { %265 = vmatprep.subr.bf16.mxu0 %v687_v8  ;;  %646 = vmatprep.subr.bf16.mxu1 %v687_v8 }
  0x13   :  { %266 = vmatpush1.bf16.msra.mxu0 %v689_v9  ;;  %662 = vmatpush1.bf16.msra.mxu1 %v689_v9 }
  0x14   :  { %267 = vmatprep.subr.bf16.mxu0 %v690_v10  ;;  %647 = vmatprep.subr.bf16.mxu1 %v690_v10 }
  0x17   :  { %268 = vmatpush1.bf16.msra.mxu0 %v692_v11  ;;  %663 = vmatpush1.bf16.msra.mxu1 %v692_v11 }
  0x18   :  { %269 = vmatprep.subr.bf16.mxu0 %v693_v12  ;;  %648 = vmatprep.subr.bf16.mxu1 %v693_v12 }
  0x1b   :  { %270 = vmatpush1.bf16.msra.mxu0 %v695_v14  ;;  %664 = vmatpush1.bf16.msra.mxu1 %v695_v14 }
  0x1c   :  { %271 = vmatprep.subr.bf16.mxu0 %v696_v16  ;;  %649 = vmatprep.subr.bf16.mxu1 %v696_v16 }
  0x1f   :  { %272 = vmatpush1.bf16.msra.mxu0 %v698_v17  ;;  %665 = vmatpush1.bf16.msra.mxu1 %v698_v17 }
  0x20   :  { %273 = vmatprep.subr.bf16.mxu0 %v699_v18  ;;  %650 = vmatprep.subr.bf16.mxu1 %v699_v18 }
  0x23   :  { %274 = vmatpush2.bf16.msra.mxu0 %v701_v19  ;;  %666 = vmatpush2.bf16.msra.mxu1 %v701_v19 }
  0x24   :  { %275 = vmatprep.subr.bf16.mxu0 %v702_v20  ;;  %651 = vmatprep.subr.bf16.mxu1 %v702_v20 }
  0x27   :  { %276 = vmatpush2.bf16.msra.mxu0 %v704_v21  ;;  %667 = vmatpush2.bf16.msra.mxu1 %v704_v21 }
  0x28   :  { %277 = vmatprep.subr.bf16.mxu0 %v705_v22  ;;  %652 = vmatprep.subr.bf16.mxu1 %v705_v22 }
  0x2b   :  { %278 = vmatpush2.bf16.msra.mxu0 %v707_v23  ;;  %668 = vmatpush2.bf16.msra.mxu1 %v707_v23 }
  0x2c   :  { %279 = vmatprep.subr.bf16.mxu0 %v708_v24  ;;  %653 = vmatprep.subr.bf16.mxu1 %v708_v24 }
  0x2f   :  { %280 = vmatpush2.bf16.msra.mxu0 %v710_v25  ;;  %669 = vmatpush2.bf16.msra.mxu1 %v710_v25 }
  0x30   :  { %281 = vmatprep.subr.bf16.mxu0 %v711_v26  ;;  %654 = vmatprep.subr.bf16.mxu1 %v711_v26 }
  0x33   :  { %282 = vmatpush2.bf16.msra.mxu0 %v713_v27  ;;  %670 = vmatpush2.bf16.msra.mxu1 %v713_v27 }
  0x34   :  { %283 = vmatprep.subr.bf16.mxu0 %v714_v28  ;;  %655 = vmatprep.subr.bf16.mxu1 %v714_v28 }
  0x37   :  { %284 = vmatpush2.bf16.msra.mxu0 %v716_v29  ;;  %671 = vmatpush2.bf16.msra.mxu1 %v716_v29 }
  0x38   :  { %285 = vmatprep.subr.bf16.mxu0 %v717_v30  ;;  %656 = vmatprep.subr.bf16.mxu1 %v717_v30 }
  0x3b   :  { %286 = vmatpush2.bf16.msra.mxu0 %v719_v31  ;;  %672 = vmatpush2.bf16.msra.mxu1 %v719_v31 }
  0x3c   :  { %287 = vmatprep.subr.bf16.mxu0 %v720_v32  ;;  %657 = vmatprep.subr.bf16.mxu1 %v720_v32 }
  0x3f   :  { %288 = vmatpush2.bf16.msra.mxu0 %v722_v33  ;;  %673 = vmatpush2.bf16.msra.mxu1 %v722_v33 }
  0x42   :  { %290 = vmatmul.mubr.bf16.vlgmr.msra.gmra.mxu0 %v723_v34  ;;  %310 = vmatmul.mubr.bf16.vlgmr.msra.gmra.mxu1 %v726_v35 }
  0x43   :  { %299 = vmatprep.mubr.bf16.mxu0 %v729_v36  ;;  %319 = vmatprep.mubr.bf16.mxu1 %v732_v37 }
  0x4a   :  { %300 = vmatmul.mubr.bf16.gmra.mxu0 %v731_v38  ;;  %320 = vmatmul.mubr.bf16.gmra.mxu1 %v734_v39 }
 0x102   :  { %v885_v40 = vpop.f32.mrf.mxu0  ;;  %v887_v41 = vpop.f32.mrf.mxu1 }
 0x103   :  { %v358_v52 = vmul.f32 %v885_v40, %v885_v40  ;;  %v366_v4 = vmul.f32 %v887_v41, %v887_v41 }
 0x104   :  { %v889_v42 = vpop.f32.mrf.mxu0  ;;  %v891_v43 = vpop.f32.mrf.mxu1 }
 0x105   :  { %v359_v55 = vmul.f32 %v889_v42, %v889_v42  ;;  %v367_v12 = vmul.f32 %v891_v43, %v891_v43 }
 0x106   :  { %v893_v44 = vpop.f32.mrf.mxu0  ;;  %v895_v45 = vpop.f32.mrf.mxu1 }
 0x107   :  { %v360_v48 = vmul.f32 %v893_v44, %v893_v44  ;;  %v330_v53 = vadd.f32 %v893_v44, %v885_v40  ;;  %v368_v13 = vmul.f32 %v895_v45, %v895_v45 }
 0x108   :  { %v897_v46 = vpop.f32.mrf.mxu0  ;;  %v899_v47 = vpop.f32.mrf.mxu1 }
 0x109   :  { %v361_v49 = vmul.f32 %v897_v46, %v897_v46  ;;  %v374_v57 = vadd.f32 %v360_v48, %v358_v52  ;;  %v343_v58 = vadd.f32 %v897_v46, %v889_v42  ;;  %v369_v18 = vmul.f32 %v899_v47, %v899_v47 }
 0x10a   :  { %v905_v50 = vpop.f32.mrf.mxu0  ;;  %v907_v51 = vpop.f32.mrf.mxu1 }
 0x10b   :  { %v362_v54 = vmul.f32 %v905_v50, %v905_v50  ;;  %v331_v59 = vadd.f32 %v330_v53, %v905_v50  ;;  %v387_v62 = vadd.f32 %v361_v49, %v359_v55  ;;  %v370_v19 = vmul.f32 %v907_v51, %v907_v51 }
 0x10c   :  { %v917_v56 = vpop.f32.mrf.mxu0  ;;  %v924_v61 = vpop.f32.mrf.mxu1 }
 0x10d   :  { %v363_v60 = vmul.f32 %v917_v56, %v917_v56  ;;  %v375_v0 = vadd.f32 %v374_v57, %v362_v54  ;;  %v344_v1 = vadd.f32 %v343_v58, %v917_v56  ;;  %v371_v25 = vmul.f32 %v924_v61, %v924_v61 }
 0x10e   :  { %v926_v63 = vpop.f32.mrf.mxu0  ;;  %v940_v11 = vpop.f32.mrf.mxu1 }
 0x10f   :  { %v332_v2 = vadd.f32 %v331_v59, %v926_v63  ;;  %v364_v3 = vmul.f32 %v926_v63, %v926_v63  ;;  %v388_v5 = vadd.f32 %v387_v62, %v363_v60  ;;  %v372_v26 = vmul.f32 %v940_v11, %v940_v11 }
 0x110   :  { %v934_v6 = vpop.f32.mrf.mxu0  ;;  %v953_v23 = vpop.f32.mrf.mxu1 }
 0x111   :  { %v333_v7 = vadd.f32 %v332_v2, %v887_v41  ;;  %v376_v8 = vadd.f32 %v375_v0, %v364_v3  ;;  %v345_v9 = vadd.f32 %v344_v1, %v934_v6  ;;  %v365_v10 = vmul.f32 %v934_v6, %v934_v6 }
 0x112   :  { %v373_v31 = vmul.f32 %v953_v23, %v953_v23 }
 0x113   :  { %v377_v14 = vadd.f32 %v376_v8, %v366_v4  ;;  %v346_v15 = vadd.f32 %v345_v9, %v891_v43  ;;  %v389_v16 = vadd.f32 %v388_v5, %v365_v10  ;;  %v334_v17 = vadd.f32 %v333_v7, %v895_v45 }
 0x115   :  { %v390_v20 = vadd.f32 %v389_v16, %v367_v12  ;;  %v335_v21 = vadd.f32 %v334_v17, %v907_v51  ;;  %v378_v22 = vadd.f32 %v377_v14, %v368_v13  ;;  %v347_v24 = vadd.f32 %v346_v15, %v899_v47 }
 0x117   :  { %v336_v27 = vadd.f32 %v335_v21, %v940_v11  ;;  %v379_v28 = vadd.f32 %v378_v22, %v370_v19  ;;  %v348_v29 = vadd.f32 %v347_v24, %v924_v61  ;;  %v391_v30 = vadd.f32 %v390_v20, %v369_v18 }
 0x118   :  { %v739_v21 = vmov 1966171168   ;;  %v421_v24 = vlaneseq }
 0x119   :  { %v337_v32 = vrot.slane %v336_v27, 4  ;;  %v380_v33 = vadd.f32 %v379_v28, %v372_v26  ;;  %v349_v34 = vadd.f32 %v348_v29, %v953_v23  ;;  %v392_v35 = vadd.f32 %v391_v30, %v371_v25 }
 0x11a   :  { %v419_v22 = vunpack.c.l.s4 %v739_v21  ;;  %v422_v26 = vshrl.u32 %v421_v24, 7 }
 0x11b   :  { %v338_v36 = vadd.f32 %v337_v32, %v336_v27  ;;  %v381_v37 = vrot.slane %v380_v33, 4  ;;  %v350_v38 = vrot.slane %v349_v34, 4  ;;  %v393_v39 = vadd.f32 %v392_v35, %v373_v31  ;;  %v410_v32 = vld [vmem:[%s1013_s2] sm:$0x3] }
 0x11c   :  { %v420_v25 = vunpack.c.0.s8 %v419_v22  ;;  %v442_v35 = vsub.s32 1, %v422_v26 }
 0x11d   :  { %v339_v48 = vrot.slane %v338_v36, 2  ;;  %v382_v49 = vadd.f32 %v381_v37, %v380_v33  ;;  %v351_v52 = vadd.f32 %v350_v38, %v349_v34  ;;  %v394_v53 = vrot.slane %v393_v39, 4 }
 0x11e   :  { %v423_v28 = vsub.s32 %v420_v25, %v422_v26  ;;  %v438_v34 = vsub.s32 0, %v422_v26 }
 0x11f   :  { %v340_v54 = vadd.f32 %v339_v48, %v338_v36  ;;  %v383_v55 = vrot.slane %v382_v49, 2  ;;  %v352_v57 = vrot.slane %v351_v52, 2  ;;  %v395_v58 = vadd.f32 %v394_v53, %v393_v39  ;;  %v434_v53 = vld [vmem:[%s1014_s3] sm:$0x3] }
 0x121   :  { %v341_v59 = vrot.slane %v340_v54, 1  ;;  %v384_v60 = vadd.f32 %v383_v55, %v382_v49  ;;  %v353_v62 = vadd.f32 %v352_v57, %v351_v52  ;;  %v396_v0 = vrot.slane %v395_v58, 2 }
 0x123   :  { %v342_v1 = vadd.f32 %v341_v59, %v340_v54  ;;  %v385_v2 = vrot.slane %v384_v60, 1  ;;  %v354_v3 = vrot.slane %v353_v62, 1  ;;  %v397_v4 = vadd.f32 %v396_v0, %v395_v58 }
 0x125   :  { %v386_v5 = vadd.f32 %v385_v2, %v384_v60  ;;  %v402_v7 = vmul.f32 0.02, %v342_v1  ;;  %v355_v8 = vadd.f32 %v354_v3, %v353_v62  ;;  %v398_v9 = vrot.slane %v397_v4, 1 }
 0x127   :  { %v404_v10 = vmul.f32 0.02, %v386_v5  ;;  %v406_v12 = vmul.f32 %v402_v7, %v402_v7  ;;  %v399_v13 = vadd.f32 %v398_v9, %v397_v4  ;;  %v403_v14 = vmul.f32 0.02, %v355_v8 }
 0x129   :  { %v408_v15 = vsub.f32 %v404_v10, %v406_v12  ;;  %v405_v16 = vmul.f32 0.02, %v399_v13  ;;  %v407_v17 = vmul.f32 %v403_v14, %v403_v14 }
 0x12b   :  { %v411_v18 = vadd.f32 1e-05, %v408_v15  ;;  %v409_v19 = vsub.f32 %v405_v16, %v407_v17 }
 0x12d   :  { %v412_v20 = vadd.f32 1e-05, %v409_v19  ;;  %735 = vrsqrt.f32 %v411_v18 }
 0x12f   :  { %737 = vrsqrt.f32 %v412_v20 }
 0x13a   :  { %v736_v27 = vpop.eup %735 }
 0x13c   :  { %v738_v29 = vpop.eup %737 }
 0x13d   :  { %v417_v30 = vcombine.low %v736_v27, %v738_v29 }
 0x13f   :  { %v424_v31 = vrot.slane %v417_v30, %v423_v28 }
 0x141   :  { %v431_v33 = vrot.slane %v424_v31, %v423_v28 }
 0x143   :  { %v433_v36 = vmul.f32 %v431_v33, %v410_v32 }
 0x145   :  { %v439_v37 = vrot.slane %v433_v36, %v438_v34  ;;  %v443_v38 = vrot.slane %v433_v36, %v442_v35 }
 0x147   :  { %v446_v39 = vmul.f32 %v439_v37, %v402_v7  ;;  %v447_v48 = vmul.f32 %v443_v38, %v403_v14  ;;  %v467_v55 = vmul.f32 %v439_v37, %v885_v40  ;;  %v468_v57 = vmul.f32 %v443_v38, %v889_v42 }
 0x148   :  { %v469_v58 = vmul.f32 %v439_v37, %v893_v44  ;;  %v470_v60 = vmul.f32 %v443_v38, %v897_v46  ;;  %v471_v62 = vmul.f32 %v439_v37, %v905_v50  ;;  %v472_v0 = vmul.f32 %v443_v38, %v917_v56 }
 0x149   :  { %v450_v49 = vcombine.low %v446_v39, %v447_v48  ;;  %v473_v1 = vmul.f32 %v439_v37, %v926_v63  ;;  %v474_v2 = vmul.f32 %v443_v38, %v934_v6  ;;  %v475_v3 = vmul.f32 %v439_v37, %v887_v41 }
 0x14a   :  { %v476_v4 = vmul.f32 %v443_v38, %v891_v43  ;;  %v477_v40 = vmul.f32 %v439_v37, %v895_v45  ;;  %v478_v42 = vmul.f32 %v443_v38, %v899_v47  ;;  %v479_v46 = vmul.f32 %v439_v37, %v907_v51 }
 0x14b   :  { %v457_v52 = vrot.slane %v450_v49, %v423_v28  ;;  %v480_v50 = vmul.f32 %v443_v38, %v924_v61  ;;  %v481_v56 = vmul.f32 %v439_v37, %v940_v11  ;;  %v482_v63 = vmul.f32 %v443_v38, %v953_v23 }
 0x14d   :  { %v464_v54 = vrot.slane %v457_v52, %v423_v28 }
 0x14f   :  { %v466_v59 = vsub.f32 %v434_v53, %v464_v54 }
 0x151   :  { %v487_v44 = vrot.slane %v466_v59, %v438_v34  ;;  %v491_v5 = vrot.slane %v466_v59, %v442_v35 }
 0x153   :  { %v494_v7 = vadd.f32 %v487_v44, %v467_v55  ;;  %v495_v6 = vadd.f32 %v491_v5, %v468_v57  ;;  %v496_v8 = vadd.f32 %v487_v44, %v469_v58  ;;  %v497_v41 = vadd.f32 %v491_v5, %v470_v60 }
 0x154   :  { %v498_v9 = vadd.f32 %v487_v44, %v471_v62  ;;  %v499_v43 = vadd.f32 %v491_v5, %v472_v0  ;;  %v500_v10 = vadd.f32 %v487_v44, %v473_v1  ;;  %v501_v45 = vadd.f32 %v491_v5, %v474_v2 }
 0x155   :  { %v502_v12 = vadd.f32 %v487_v44, %v475_v3  ;;  %v503_v47 = vadd.f32 %v491_v5, %v476_v4  ;;  %v504_v13 = vadd.f32 %v487_v44, %v477_v40  ;;  %v505_v14 = vadd.f32 %v491_v5, %v478_v42 }
 0x156   :  { %v506_v15 = vadd.f32 %v487_v44, %v479_v46  ;;  %v507_v51 = vadd.f32 %v491_v5, %v480_v50  ;;  %v508_v16 = vadd.f32 %v487_v44, %v481_v56  ;;  %v509_v61 = vadd.f32 %v491_v5, %v482_v63 }
 0x157   :  { %v510_v17 = vmax.f32 %v494_v7, 0.0  ;;  %v511_v11 = vmax.f32 %v495_v6, 0.0  ;;  %v512_v18 = vmax.f32 %v496_v8, 0.0  ;;  %v513_v23 = vmax.f32 %v497_v41, 0.0 }
 0x158   :  { %v514_v19 = vmax.f32 %v498_v9, 0.0  ;;  %v515_v20 = vmax.f32 %v499_v43, 0.0  ;;  %v516_v21 = vmax.f32 %v500_v10, 0.0  ;;  %v517_v22 = vmax.f32 %v501_v45, 0.0 }
 0x159   :  { %v518_v24 = vmax.f32 %v502_v12, 0.0  ;;  %v519_v25 = vmax.f32 %v503_v47, 0.0  ;;  %v520_v26 = vmax.f32 %v504_v13, 0.0  ;;  %v521_v27 = vmax.f32 %v505_v14, 0.0 }
 0x15a   :  { %v522_v28 = vmax.f32 %v506_v15, 0.0  ;;  %v523_v29 = vmax.f32 %v507_v51, 0.0  ;;  %v524_v30 = vmax.f32 %v508_v16, 0.0  ;;  %v525_v31 = vmax.f32 %v509_v61, 0.0 }
 0x15b   :  { %v634_v32 = vpack.c.bf16 %v511_v11, %v510_v17  ;;  %v635_v33 = vpack.c.bf16 %v513_v23, %v512_v18  ;;  %v636_v34 = vpack.c.bf16 %v515_v20, %v514_v19  ;;  %v637_v35 = vpack.c.bf16 %v517_v22, %v516_v21 }
 0x15c   :  { %v638_v36 = vpack.c.bf16 %v519_v25, %v518_v24  ;;  %v639_v37 = vpack.c.bf16 %v521_v27, %v520_v26  ;;  %v640_v38 = vpack.c.bf16 %v523_v29, %v522_v28  ;;  %v641_v39 = vpack.c.bf16 %v525_v31, %v524_v30 }
 0x15d   :  { %574 = vst [vmem:[%s1015_s4] sm:$0xff] %v634_v32  ;;  %575 = vst [vmem:[%s1015_s4 + $0x8] sm:$0xff] %v635_v33 }
 0x15e   :  { %576 = vst [vmem:[%s1015_s4 + $0x10] sm:$0xff] %v636_v34  ;;  %577 = vst [vmem:[%s1015_s4 + $0x18] sm:$0xff] %v637_v35 }
 0x15f   :  { %578 = vst [vmem:[%s1015_s4 + $0x20] sm:$0xff] %v638_v36  ;;  %579 = vst [vmem:[%s1015_s4 + $0x28] sm:$0xff] %v639_v37 }
 0x160   :  { %580 = vst [vmem:[%s1015_s4 + $0x30] sm:$0xff] %v640_v38  ;;  %581 = vst [vmem:[%s1015_s4 + $0x38] sm:$0xff] %v641_v39 }

// kernel: generator_forward.6
= control target key start
LH: loop header
LB: loop body
LE: loop exit
PB: predicated region body
PF: predicated region fallthrough
CT: control target
= control target key end

     0   :  { %s8771_s1 = inlined_call_operand.vmem [shape: bf16[4,1024,128], index: 1, kind: input, shape index: {}]   ;;  %s8772_s0 = inlined_call_operand.vmem [shape: bf16[4,80,1024], index: 0, kind: input, shape index: {}]   ;;  %s8773_s2 = inlined_call_operand.vmem [shape: f32[1,128], index: 2, kind: input, shape index: {}]   ;;  %s8774_s3 = inlined_call_operand.vmem [shape: f32[1,128], index: 3, kind: input, shape index: {}]   ;;  %s8775_s4 = inlined_call_operand.vmem [shape: bf16[4,80,128], index: 4, kind: output, shape index: {}]  }
   0x1   :  { %v6603_v0 = vld [vmem:[%s8771_s1 + $0x78] sm:$0xff]   ;;  %v6607_v4 = vld [vmem:[%s8771_s1 + $0x70] sm:$0xff]   ;;  %v6611_v8 = vld [vmem:[%s8771_s1 + $0x68] sm:$0xff]  }
   0x2   :  { %v6604_v1 = vld [vmem:[%s8771_s1 + $0xf8] sm:$0xff]   ;;  %5867 = vmatprep.subr.bf16.mxu0 %v6603_v0  ;;  %v6608_v5 = vld [vmem:[%s8771_s1 + $0xf0] sm:$0xff]   ;;  %v6612_v9 = vld [vmem:[%s8771_s1 + $0xe8] sm:$0xff]  }
   0x3   :  { %v6605_v2 = vld [vmem:[%s8771_s1 + $0x38] sm:$0xff]   ;;  %5913 = vmatprep.subr.bf16.mxu1 %v6604_v1  ;;  %v6609_v6 = vld [vmem:[%s8771_s1 + $0x30] sm:$0xff]   ;;  %v6613_v10 = vld [vmem:[%s8771_s1 + $0x28] sm:$0xff]  }
   0x4   :  { %v6606_v3 = vld [vmem:[%s8771_s1 + $0xb8] sm:$0xff]   ;;  %5868 = vmatpush3.bf16.msra.mxu0 %v6605_v2  ;;  %v6610_v7 = vld [vmem:[%s8771_s1 + $0xb0] sm:$0xff]   ;;  %v6614_v11 = vld [vmem:[%s8771_s1 + $0xa8] sm:$0xff]  }
   0x5   :  { %5914 = vmatpush3.bf16.msra.mxu1 %v6606_v3  ;;  %5869 = vmatprep.subr.bf16.mxu0 %v6607_v4  ;;  %v6615_v12 = vld [vmem:[%s8771_s1 + $0x60] sm:$0xff]   ;;  %v6619_v16 = vld [vmem:[%s8771_s1 + $0x58] sm:$0xff]   ;;  %v6623_v20 = vld [vmem:[%s8771_s1 + $0x50] sm:$0xff]  }
   0x6   :  { %5915 = vmatprep.subr.bf16.mxu1 %v6608_v5  ;;  %v6616_v13 = vld [vmem:[%s8771_s1 + $0xe0] sm:$0xff]   ;;  %v6620_v17 = vld [vmem:[%s8771_s1 + $0xd8] sm:$0xff]   ;;  %v6624_v21 = vld [vmem:[%s8771_s1 + $0xd0] sm:$0xff]  }
   0x7   :  { %v6617_v14 = vld [vmem:[%s8771_s1 + $0x20] sm:$0xff]   ;;  %v6621_v18 = vld [vmem:[%s8771_s1 + $0x18] sm:$0xff]   ;;  %v6625_v22 = vld [vmem:[%s8771_s1 + $0x10] sm:$0xff]  }
   0x8   :  { %5870 = vmatpush3.bf16.msra.mxu0 %v6609_v6  ;;  %v6618_v15 = vld [vmem:[%s8771_s1 + $0xa0] sm:$0xff]   ;;  %v6622_v19 = vld [vmem:[%s8771_s1 + $0x98] sm:$0xff]   ;;  %v6626_v23 = vld [vmem:[%s8771_s1 + $0x90] sm:$0xff]  }
   0x9   :  { %5916 = vmatpush3.bf16.msra.mxu1 %v6610_v7  ;;  %5871 = vmatprep.subr.bf16.mxu0 %v6611_v8  ;;  %v6627_v24 = vld [vmem:[%s8771_s1 + $0x48] sm:$0xff]   ;;  %v6631_v28 = vld [vmem:[%s8771_s1 + $0x40] sm:$0xff]   ;;  %v6635_v40 = vld [vmem:[%s8771_s1 + $0x178] sm:$0xff]  }
   0xa   :  { %5917 = vmatprep.subr.bf16.mxu1 %v6612_v9  ;;  %v6628_v25 = vld [vmem:[%s8771_s1 + $0xc8] sm:$0xff]   ;;  %v6632_v29 = vld [vmem:[%s8771_s1 + $0xc0] sm:$0xff]   ;;  %v6636_v41 = vld [vmem:[%s8771_s1 + $0x138] sm:$0xff]  }
   0xb   :  { %v6629_v26 = vld [vmem:[%s8771_s1 + $0x8] sm:$0xff]   ;;  %v6633_v30 = vld [vmem:[%s8771_s1] sm:$0xff]   ;;  %v6637_v42 = vld [vmem:[%s8771_s1 + $0x1f8] sm:$0xff]  }
   0xc   :  { %5872 = vmatpush3.bf16.msra.mxu0 %v6613_v10  ;;  %v6630_v27 = vld [vmem:[%s8771_s1 + $0x88] sm:$0xff]   ;;  %v6634_v31 = vld [vmem:[%s8771_s1 + $0x80] sm:$0xff]   ;;  %v6638_v43 = vld [vmem:[%s8771_s1 + $0x1b8] sm:$0xff]  }
   0xd   :  { %5918 = vmatpush3.bf16.msra.mxu1 %v6614_v11  ;;  %5873 = vmatprep.subr.bf16.mxu0 %v6615_v12  ;;  %v18_v32 = vld [vmem:[%s8772_s0] sm:$0xff]  ;;  %v19_v34 = vld [vmem:[%s8772_s0 + $0x8] sm:$0xff]  ;;  %v6639_v44 = vld [vmem:[%s8771_s1 + $0x170] sm:$0xff]  }
   0xe   :  { %5919 = vmatprep.subr.bf16.mxu1 %v6616_v13  ;;  %v22_v33 = vld [vmem:[%s8772_s0 + $0x20] sm:$0xff]  ;;  %v23_v37 = vld [vmem:[%s8772_s0 + $0x28] sm:$0xff]  ;;  %v6640_v45 = vld [vmem:[%s8771_s1 + $0x130] sm:$0xff]  }
   0xf   :  { %v4718_v35 = vcombine.low %v18_v32, %v22_v33  ;;  %v4719_v36 = vcombine.high %v18_v32, %v22_v33  ;;  %v4720_v38 = vcombine.low %v19_v34, %v23_v37  ;;  %v4721_v39 = vcombine.high %v19_v34, %v23_v37  ;;  %v26_v46 = vld [vmem:[%s8772_s0 + $0x40] sm:$0xff]  ;;  %v27_v49 = vld [vmem:[%s8772_s0 + $0x48] sm:$0xff]  ;;  %v6641_v53 = vld [vmem:[%s8771_s1 + $0x1f0] sm:$0xff]  }
  0x10   :  { %5874 = vmatpush3.bf16.msra.mxu0 %v6617_v14  ;;  %v30_v47 = vld [vmem:[%s8772_s0 + $0x60] sm:$0xff]  ;;  %v31_v50 = vld [vmem:[%s8772_s0 + $0x68] sm:$0xff]  ;;  %v6642_v55 = vld [vmem:[%s8771_s1 + $0x1b0] sm:$0xff]  }
  0x11   :  { %5920 = vmatpush3.bf16.msra.mxu1 %v6618_v15  ;;  %5875 = vmatprep.subr.bf16.mxu0 %v6619_v16  ;;  %v4727_v48 = vcombine.high %v26_v46, %v30_v47  ;;  %v4726_v51 = vcombine.low %v26_v46, %v30_v47  ;;  %v4729_v52 = vcombine.high %v27_v49, %v31_v50  ;;  %v6643_v56 = vld [vmem:[%s8771_s1 + $0x168] sm:$0xff]   ;;  %v34_v60 = vld [vmem:[%s8772_s0 + $0x80] sm:$0xff]  ;;  %v6651_v8 = vld [vmem:[%s8771_s1 + $0x158] sm:$0xff]  }
  0x12   :  { %5921 = vmatprep.subr.bf16.mxu1 %v6620_v17  ;;  %802 = vmatprep.mubr.bf16.mxu0 %v4719_v36  ;;  %v4728_v54 = vcombine.low %v27_v49, %v31_v50  ;;  %v6644_v57 = vld [vmem:[%s8771_s1 + $0x128] sm:$0xff]   ;;  %v38_v61 = vld [vmem:[%s8772_s0 + $0xa0] sm:$0xff]  ;;  %v6652_v9 = vld [vmem:[%s8771_s1 + $0x118] sm:$0xff]  }
  0x13   :  { %875 = vmatprep.mubr.bf16.mxu1 %v4721_v39  ;;  %v6645_v58 = vld [vmem:[%s8771_s1 + $0x1e8] sm:$0xff]   ;;  %v4735_v0 = vcombine.high %v34_v60, %v38_v61  ;;  %v6647_v2 = vld [vmem:[%s8771_s1 + $0x160] sm:$0xff]   ;;  %v4734_v3 = vcombine.low %v34_v60, %v38_v61  ;;  %v6653_v10 = vld [vmem:[%s8771_s1 + $0x1d8] sm:$0xff]  }
  0x14   :  { %5876 = vmatpush3.bf16.msra.mxu0 %v6621_v18  ;;  %v6646_v59 = vld [vmem:[%s8771_s1 + $0x1a8] sm:$0xff]   ;;  %v6648_v5 = vld [vmem:[%s8771_s1 + $0x120] sm:$0xff]   ;;  %v6654_v18 = vld [vmem:[%s8771_s1 + $0x198] sm:$0xff]  }
  0x15   :  { %5922 = vmatpush3.bf16.msra.mxu1 %v6622_v19  ;;  %5877 = vmatprep.subr.bf16.mxu0 %v6623_v20  ;;  %v35_v62 = vld [vmem:[%s8772_s0 + $0x88] sm:$0xff]  ;;  %v6649_v6 = vld [vmem:[%s8771_s1 + $0x1e0] sm:$0xff]   ;;  %v6655_v20 = vld [vmem:[%s8771_s1 + $0x150] sm:$0xff]  }
  0x16   :  { %5923 = vmatprep.subr.bf16.mxu1 %v6624_v21  ;;  %v39_v63 = vld [vmem:[%s8772_s0 + $0xa8] sm:$0xff]  ;;  %v6650_v7 = vld [vmem:[%s8771_s1 + $0x1a0] sm:$0xff]   ;;  %v6656_v21 = vld [vmem:[%s8771_s1 + $0x110] sm:$0xff]  }
  0x17   :  { %v4737_v1 = vcombine.high %v35_v62, %v39_v63  ;;  %v4736_v4 = vcombine.low %v35_v62, %v39_v63  ;;  %v42_v11 = vld [vmem:[%s8772_s0 + $0xc0] sm:$0xff]  ;;  %v43_v13 = vld [vmem:[%s8772_s0 + $0xc8] sm:$0xff]  ;;  %v6667_v47 = vld [vmem:[%s8771_s1 + $0x278] sm:$0xff]  }
  0x18   :  { %5878 = vmatpush3.bf16.msra.mxu0 %v6625_v22  ;;  %v46_v12 = vld [vmem:[%s8772_s0 + $0xe0] sm:$0xff]  ;;  %v47_v15 = vld [vmem:[%s8772_s0 + $0xe8] sm:$0xff]  ;;  %v6657_v22 = vld [vmem:[%s8771_s1 + $0x1d0] sm:$0xff]  }
  0x19   :  { %5924 = vmatpush3.bf16.msra.mxu1 %v6626_v23  ;;  %5879 = vmatprep.subr.bf16.mxu0 %v6627_v24  ;;  %v4743_v14 = vcombine.high %v42_v11, %v46_v12  ;;  %v4742_v16 = vcombine.low %v42_v11, %v46_v12  ;;  %v4745_v17 = vcombine.high %v43_v13, %v47_v15  ;;  %v6658_v23 = vld [vmem:[%s8771_s1 + $0x190] sm:$0xff]   ;;  %v6659_v24 = vld [vmem:[%s8771_s1 + $0x148] sm:$0xff]   ;;  %v6663_v36 = vld [vmem:[%s8771_s1 + $0x140] sm:$0xff]  }
  0x1a   :  { %5925 = vmatprep.subr.bf16.mxu1 %v6628_v25  ;;  %v4744_v19 = vcombine.low %v43_v13, %v47_v15  ;;  %v50_v25 = vld [vmem:[%s8772_s0 + $0x100] sm:$0xff]  ;;  %v6661_v34 = vld [vmem:[%s8771_s1 + $0x1c8] sm:$0xff]   ;;  %v6668_v49 = vld [vmem:[%s8771_s1 + $0x238] sm:$0xff]  }
  0x1b   :  { %v6664_v37 = vld [vmem:[%s8771_s1 + $0x100] sm:$0xff]   ;;  %v6669_v50 = vld [vmem:[%s8771_s1 + $0x2f8] sm:$0xff]   ;;  %v6673_v60 = vld [vmem:[%s8771_s1 + $0x2f0] sm:$0xff]  }
  0x1c   :  { %5880 = vmatpush3.bf16.msra.mxu0 %v6629_v26  ;;  %v54_v26 = vld [vmem:[%s8772_s0 + $0x120] sm:$0xff]  ;;  %v6674_v63 = vld [vmem:[%s8771_s1 + $0x2b0] sm:$0xff]  }
  0x1d   :  { %5926 = vmatpush3.bf16.msra.mxu1 %v6630_v27  ;;  %5881 = vmatprep.subr.bf16.mxu0 %v6631_v28  ;;  %v4751_v27 = vcombine.high %v50_v25, %v54_v26  ;;  %v51_v28 = vld [vmem:[%s8772_s0 + $0x108] sm:$0xff]  ;;  %v4750_v32 = vcombine.low %v50_v25, %v54_v26  ;;  %v6666_v39 = vld [vmem:[%s8771_s1 + $0x180] sm:$0xff]   ;;  %v6686_v25 = vld [vmem:[%s8771_s1 + $0x298] sm:$0xff]  }
  0x1e   :  { %5927 = vmatprep.subr.bf16.mxu1 %v6632_v29  ;;  %v55_v29 = vld [vmem:[%s8772_s0 + $0x128] sm:$0xff]  ;;  %v6680_v12 = vld [vmem:[%s8771_s1 + $0x220] sm:$0xff]  }
  0x1f   :  { %v4752_v33 = vcombine.low %v51_v28, %v55_v29  ;;  %v6682_v15 = vld [vmem:[%s8771_s1 + $0x2a0] sm:$0xff]  }
  0x20   :  { %5882 = vmatpush3.bf16.msra.mxu0 %v6633_v30  ;;  %v4753_v30 = vcombine.high %v51_v28, %v55_v29  ;;  %v6688_v29 = vld [vmem:[%s8771_s1 + $0x210] sm:$0xff]  }
  0x21   :  { %5928 = vmatpush3.bf16.msra.mxu1 %v6634_v31  ;;  %5959 = vmatprep.subr.bf16.mxu0 %v6635_v40  ;;  %v6660_v31 = vld [vmem:[%s8771_s1 + $0x108] sm:$0xff]   ;;  %v20_v40 = vld [vmem:[%s8772_s0 + $0x10] sm:$0xff] }
  0x22   :  { %6005 = vmatprep.subr.bf16.mxu1 %v6637_v42  ;;  %v21_v42 = vld [vmem:[%s8772_s0 + $0x18] sm:$0xff] }
  0x23   :  { %803 = vmatmul.mubr.bf16.vlgmr.msra.gmra.mxu0 %v4718_v35  ;;  %v6662_v35 = vld [vmem:[%s8771_s1 + $0x188] sm:$0xff]  }
  0x24   :  { %876 = vmatmul.mubr.bf16.vlgmr.msra.gmra.mxu1 %v4720_v38  ;;  %5960 = vmatpush3.bf16.msra.mxu0 %v6636_v41  ;;  %v6665_v38 = vld [vmem:[%s8771_s1 + $0x1c0] sm:$0xff]   ;;  %v24_v41 = vld [vmem:[%s8772_s0 + $0x30] sm:$0xff] }
  0x25   :  { %6006 = vmatpush3.bf16.msra.mxu1 %v6638_v43  ;;  %5961 = vmatprep.subr.bf16.mxu0 %v6639_v44  ;;  %v25_v43 = vld [vmem:[%s8772_s0 + $0x38] sm:$0xff]  ;;  %v4722_v44 = vcombine.low %v20_v40, %v24_v41 }
  0x26   :  { %810 = vmatprep.mubr.bf16.mxu0 %v4727_v48  ;;  %883 = vmatprep.mubr.bf16.mxu1 %v4729_v52  ;;  %v4725_v46 = vcombine.high %v21_v42, %v25_v43  ;;  %v4724_v48 = vcombine.low %v21_v42, %v25_v43  ;;  %v6671_v52 = vld [vmem:[%s8771_s1 + $0x270] sm:$0xff]   ;;  %v6694_v43 = vld [vmem:[%s8771_s1 + $0x288] sm:$0xff]  }
  0x27   :  { %6007 = vmatprep.subr.bf16.mxu1 %v6641_v53  ;;  %v6672_v53 = vld [vmem:[%s8771_s1 + $0x230] sm:$0xff]  }
  0x28   :  { %5962 = vmatpush3.bf16.msra.mxu0 %v6640_v45  ;;  %v4723_v45 = vcombine.high %v20_v40, %v24_v41  ;;  %v6693_v41 = vld [vmem:[%s8771_s1 + $0x2c8] sm:$0xff]  }
  0x29   :  { %6008 = vmatpush3.bf16.msra.mxu1 %v6642_v55  ;;  %5963 = vmatprep.subr.bf16.mxu0 %v6643_v56  ;;  %v32_v55 = vld [vmem:[%s8772_s0 + $0x70] sm:$0xff]  ;;  %v29_v56 = vld [vmem:[%s8772_s0 + $0x58] sm:$0xff] }
  0x2a   :  { %6009 = vmatprep.subr.bf16.mxu1 %v6645_v58  ;;  %v33_v58 = vld [vmem:[%s8772_s0 + $0x78] sm:$0xff] }
  0x2b   :  { %811 = vmatmul.mubr.bf16.gmra.mxu0 %v4726_v51  ;;  %v6670_v51 = vld [vmem:[%s8771_s1 + $0x2b8] sm:$0xff]   ;;  %v4732_v62 = vcombine.low %v29_v56, %v33_v58 }
  0x2c   :  { %884 = vmatmul.mubr.bf16.gmra.mxu1 %v4728_v54  ;;  %5964 = vmatpush3.bf16.msra.mxu0 %v6644_v57  ;;  %v28_v54 = vld [vmem:[%s8772_s0 + $0x50] sm:$0xff] }
  0x2d   :  { %6010 = vmatpush3.bf16.msra.mxu1 %v6646_v59  ;;  %818 = vmatprep.mubr.bf16.mxu0 %v4735_v0  ;;  %v4731_v57 = vcombine.high %v28_v54, %v32_v55  ;;  %v4733_v59 = vcombine.high %v29_v56, %v33_v58  ;;  %v4730_v61 = vcombine.low %v28_v54, %v32_v55  ;;  %v6675_v0 = vld [vmem:[%s8771_s1 + $0x268] sm:$0xff]   ;;  %v6699_v54 = vld [vmem:[%s8771_s1 + $0x378] sm:$0xff]  }
  0x2e   :  { %891 = vmatprep.mubr.bf16.mxu1 %v4737_v1  ;;  %5965 = vmatprep.subr.bf16.mxu0 %v6647_v2  ;;  %v6676_v1 = vld [vmem:[%s8771_s1 + $0x228] sm:$0xff]   ;;  %v6700_v56 = vld [vmem:[%s8771_s1 + $0x338] sm:$0xff]  }
  0x2f   :  { %6011 = vmatprep.subr.bf16.mxu1 %v6649_v6  ;;  %v6677_v2 = vld [vmem:[%s8771_s1 + $0x2e8] sm:$0xff]   ;;  %v6701_v58 = vld [vmem:[%s8771_s1 + $0x3f8] sm:$0xff]  }
  0x30   :  { %5966 = vmatpush3.bf16.msra.mxu0 %v6648_v5  ;;  %v40_v5 = vld [vmem:[%s8772_s0 + $0xb0] sm:$0xff] }
  0x31   :  { %6012 = vmatpush3.bf16.msra.mxu1 %v6650_v7  ;;  %5967 = vmatprep.subr.bf16.mxu0 %v6651_v8  ;;  %v37_v7 = vld [vmem:[%s8772_s0 + $0x98] sm:$0xff] }
  0x32   :  { %6013 = vmatprep.subr.bf16.mxu1 %v6653_v10  ;;  %v41_v8 = vld [vmem:[%s8772_s0 + $0xb8] sm:$0xff]  ;;  %v6679_v10 = vld [vmem:[%s8771_s1 + $0x260] sm:$0xff]  }
  0x33   :  { %819 = vmatmul.mubr.bf16.gmra.mxu0 %v4734_v3  ;;  %v6678_v3 = vld [vmem:[%s8771_s1 + $0x2a8] sm:$0xff]   ;;  %v4740_v13 = vcombine.low %v37_v7, %v41_v8 }
  0x34   :  { %892 = vmatmul.mubr.bf16.gmra.mxu1 %v4736_v4  ;;  %5968 = vmatpush3.bf16.msra.mxu0 %v6652_v9  ;;  %v36_v4 = vld [vmem:[%s8772_s0 + $0x90] sm:$0xff]  ;;  %v4741_v9 = vcombine.high %v37_v7, %v41_v8  ;;  %v6707_v7 = vld [vmem:[%s8771_s1 + $0x368] sm:$0xff]  }
  0x35   :  { %826 = vmatprep.mubr.bf16.mxu0 %v4743_v14  ;;  %899 = vmatprep.mubr.bf16.mxu1 %v4745_v17  ;;  %v4739_v6 = vcombine.high %v36_v4, %v40_v5  ;;  %v4738_v11 = vcombine.low %v36_v4, %v40_v5  ;;  %v6681_v14 = vld [vmem:[%s8771_s1 + $0x2e0] sm:$0xff]   ;;  %v6684_v17 = vld [vmem:[%s8771_s1 + $0x218] sm:$0xff]   ;;  %v6705_v4 = vld [vmem:[%s8771_s1 + $0x3f0] sm:$0xff]  }
  0x36   :  { %6014 = vmatpush3.bf16.msra.mxu1 %v6654_v18  ;;  %5969 = vmatprep.subr.bf16.mxu0 %v6655_v20  ;;  %v6685_v18 = vld [vmem:[%s8771_s1 + $0x2d8] sm:$0xff]   ;;  %v48_v20 = vld [vmem:[%s8772_s0 + $0xf0] sm:$0xff] }
  0x37   :  { %6015 = vmatprep.subr.bf16.mxu1 %v6657_v22  ;;  %v49_v22 = vld [vmem:[%s8772_s0 + $0xf8] sm:$0xff]  ;;  %v6706_v5 = vld [vmem:[%s8771_s1 + $0x3b0] sm:$0xff]  }
  0x38   :  { %5970 = vmatpush3.bf16.msra.mxu0 %v6656_v21  ;;  %v45_v21 = vld [vmem:[%s8772_s0 + $0xd8] sm:$0xff] }
  0x39   :  { %5971 = vmatprep.subr.bf16.mxu0 %v6659_v24  ;;  %v4749_v24 = vcombine.high %v45_v21, %v49_v22  ;;  %v4748_v28 = vcombine.low %v45_v21, %v49_v22  ;;  %v6713_v21 = vld [vmem:[%s8771_s1 + $0x3e0] sm:$0xff]  }
  0x3a   :  { %6016 = vmatpush3.bf16.msra.mxu1 %v6658_v23 }
  0x3b   :  { %827 = vmatmul.mubr.bf16.gmra.mxu0 %v4742_v16  ;;  %6017 = vmatprep.subr.bf16.mxu1 %v6661_v34  ;;  %v6683_v16 = vld [vmem:[%s8771_s1 + $0x258] sm:$0xff]   ;;  %v56_v34 = vld [vmem:[%s8772_s0 + $0x130] sm:$0xff] }
  0x3c   :  { %900 = vmatmul.mubr.bf16.gmra.mxu1 %v4744_v19  ;;  %834 = vmatprep.mubr.bf16.mxu0 %v4751_v27  ;;  %v44_v19 = vld [vmem:[%s8772_s0 + $0xd0] sm:$0xff] }
  0x3d   :  { %907 = vmatprep.mubr.bf16.mxu1 %v4753_v30  ;;  %5972 = vmatpush3.bf16.msra.mxu0 %v6660_v31  ;;  %v4747_v23 = vcombine.high %v44_v19, %v48_v20  ;;  %v4746_v26 = vcombine.low %v44_v19, %v48_v20  ;;  %v6687_v27 = vld [vmem:[%s8771_s1 + $0x250] sm:$0xff]   ;;  %v6712_v19 = vld [vmem:[%s8771_s1 + $0x320] sm:$0xff]  }
  0x3e   :  { %6018 = vmatpush3.bf16.msra.mxu1 %v6662_v35  ;;  %5973 = vmatprep.subr.bf16.mxu0 %v6663_v36  ;;  %v6689_v30 = vld [vmem:[%s8771_s1 + $0x2d0] sm:$0xff]   ;;  %v53_v35 = vld [vmem:[%s8772_s0 + $0x118] sm:$0xff] }
  0x3f   :  { %6019 = vmatprep.subr.bf16.mxu1 %v6665_v38  ;;  %v6690_v31 = vld [vmem:[%s8771_s1 + $0x290] sm:$0xff]  }
  0x41   :  { %5974 = vmatpush3.bf16.msra.mxu0 %v6664_v37  ;;  %v57_v37 = vld [vmem:[%s8772_s0 + $0x138] sm:$0xff] }
  0x42   :  { %6020 = vmatpush3.bf16.msra.mxu1 %v6666_v39  ;;  %6051 = vmatprep.subr.bf16.mxu0 %v6667_v47  ;;  %v4757_v38 = vcombine.high %v53_v35, %v57_v37  ;;  %v6692_v39 = vld [vmem:[%s8771_s1 + $0x208] sm:$0xff]   ;;  %v4756_v42 = vcombine.low %v53_v35, %v57_v37  ;;  %v6698_v47 = vld [vmem:[%s8771_s1 + $0x280] sm:$0xff]  }
  0x43   :  { %835 = vmatmul.mubr.bf16.gmra.mxu0 %v4750_v32  ;;  %6097 = vmatprep.subr.bf16.mxu1 %v6669_v50  ;;  %v6691_v32 = vld [vmem:[%s8771_s1 + $0x248] sm:$0xff]  }
  0x44   :  { %908 = vmatmul.mubr.bf16.gmra.mxu1 %v4752_v33  ;;  %948 = vmatprep.mubr.bf16.mxu0 %v4723_v45  ;;  %v52_v33 = vld [vmem:[%s8772_s0 + $0x110] sm:$0xff]  ;;  %v6696_v45 = vld [vmem:[%s8771_s1 + $0x200] sm:$0xff]  }
  0x45   :  { %1021 = vmatprep.mubr.bf16.mxu1 %v4725_v46  ;;  %v4755_v36 = vcombine.high %v52_v33, %v56_v34  ;;  %v4754_v40 = vcombine.low %v52_v33, %v56_v34  ;;  %v6697_v46 = vld [vmem:[%s8771_s1 + $0x2c0] sm:$0xff]   ;;  %v6718_v33 = vld [vmem:[%s8771_s1 + $0x398] sm:$0xff]   ;;  %v6719_v34 = vld [vmem:[%s8771_s1 + $0x350] sm:$0xff]  }
  0x4b   :  { %949 = vmatmul.mubr.bf16.vlgmr.msra.gmra.mxu0 %v4722_v44  ;;  %v6695_v44 = vld [vmem:[%s8771_s1 + $0x240] sm:$0xff]  }
  0x4c   :  { %1022 = vmatmul.mubr.bf16.vlgmr.msra.gmra.mxu1 %v4724_v48  ;;  %6052 = vmatpush3.bf16.msra.mxu0 %v6668_v49  ;;  %v4822_v48 = vld [vmem:[%s8772_s0 + $0x140] sm:$0xff] }
  0x4d   :  { %6098 = vmatpush3.bf16.msra.mxu1 %v6670_v51  ;;  %6053 = vmatprep.subr.bf16.mxu0 %v6671_v52  ;;  %v4826_v49 = vld [vmem:[%s8772_s0 + $0x160] sm:$0xff]  ;;  %v4823_v51 = vld [vmem:[%s8772_s0 + $0x148] sm:$0xff] }
  0x4e   :  { %956 = vmatprep.mubr.bf16.mxu0 %v4731_v57  ;;  %1029 = vmatprep.mubr.bf16.mxu1 %v4733_v59  ;;  %v4991_v50 = vcombine.high %v4822_v48, %v4826_v49  ;;  %v4827_v52 = vld [vmem:[%s8772_s0 + $0x168] sm:$0xff]  ;;  %v4990_v55 = vcombine.low %v4822_v48, %v4826_v49  ;;  %v6702_v59 = vld [vmem:[%s8771_s1 + $0x3b8] sm:$0xff]  }
  0x4f   :  { %6099 = vmatprep.subr.bf16.mxu1 %v6673_v60  ;;  %v4992_v57 = vcombine.low %v4823_v51, %v4827_v52  ;;  %v6703_v60 = vld [vmem:[%s8771_s1 + $0x370] sm:$0xff]   ;;  %v6725_v48 = vld [vmem:[%s8771_s1 + $0x3c8] sm:$0xff]  }
  0x50   :  { %6054 = vmatpush3.bf16.msra.mxu0 %v6672_v53  ;;  %v4993_v53 = vcombine.high %v4823_v51, %v4827_v52  ;;  %v6726_v49 = vld [vmem:[%s8771_s1 + $0x388] sm:$0xff]   ;;  %v6727_v51 = vld [vmem:[%s8771_s1 + $0x340] sm:$0xff]  }
  0x51   :  { %6100 = vmatpush3.bf16.msra.mxu1 %v6674_v63  ;;  %6055 = vmatprep.subr.bf16.mxu0 %v6675_v0  ;;  %v4834_v63 = vld [vmem:[%s8772_s0 + $0x1a0] sm:$0xff]  ;;  %v4831_v0 = vld [vmem:[%s8772_s0 + $0x188] sm:$0xff] }
  0x52   :  { %6101 = vmatprep.subr.bf16.mxu1 %v6677_v2 }
  0x53   :  { %957 = vmatmul.mubr.bf16.gmra.mxu0 %v4730_v61  ;;  %v6704_v61 = vld [vmem:[%s8771_s1 + $0x330] sm:$0xff]  }
  0x54   :  { %1030 = vmatmul.mubr.bf16.gmra.mxu1 %v4732_v62  ;;  %6056 = vmatpush3.bf16.msra.mxu0 %v6676_v1  ;;  %v4830_v62 = vld [vmem:[%s8772_s0 + $0x180] sm:$0xff]  ;;  %v4835_v1 = vld [vmem:[%s8772_s0 + $0x1a8] sm:$0xff] }
  0x55   :  { %6102 = vmatpush3.bf16.msra.mxu1 %v6678_v3  ;;  %964 = vmatprep.mubr.bf16.mxu0 %v4739_v6  ;;  %v4999_v2 = vcombine.high %v4830_v62, %v4834_v63  ;;  %v5001_v3 = vcombine.high %v4831_v0, %v4835_v1  ;;  %v4998_v6 = vcombine.low %v4830_v62, %v4834_v63  ;;  %v6731_v62 = vld [vmem:[%s8771_s1 + $0x478] sm:$0xff]  }
  0x56   :  { %1037 = vmatprep.mubr.bf16.mxu1 %v4741_v9  ;;  %6057 = vmatprep.subr.bf16.mxu0 %v6679_v10  ;;  %v5000_v8 = vcombine.low %v4831_v0, %v4835_v1  ;;  %v6708_v9 = vld [vmem:[%s8771_s1 + $0x328] sm:$0xff]   ;;  %v6732_v63 = vld [vmem:[%s8771_s1 + $0x438] sm:$0xff]  }
  0x57   :  { %6103 = vmatprep.subr.bf16.mxu1 %v6681_v14  ;;  %v6709_v10 = vld [vmem:[%s8771_s1 + $0x3e8] sm:$0xff]   ;;  %v6733_v1 = vld [vmem:[%s8771_s1 + $0x4f8] sm:$0xff]  }
  0x58   :  { %6058 = vmatpush3.bf16.msra.mxu0 %v6680_v12  ;;  %v4838_v12 = vld [vmem:[%s8772_s0 + $0x1c0] sm:$0xff]  ;;  %v4839_v14 = vld [vmem:[%s8772_s0 + $0x1c8] sm:$0xff] }
  0x59   :  { %6104 = vmatpush3.bf16.msra.mxu1 %v6682_v15  ;;  %6059 = vmatprep.subr.bf16.mxu0 %v6683_v16  ;;  %v4843_v16 = vld [vmem:[%s8772_s0 + $0x1e8] sm:$0xff] }
  0x5a   :  { %6105 = vmatprep.subr.bf16.mxu1 %v6685_v18  ;;  %v6711_v18 = vld [vmem:[%s8771_s1 + $0x360] sm:$0xff]   ;;  %v5008_v22 = vcombine.low %v4839_v14, %v4843_v16 }
  0x5b   :  { %965 = vmatmul.mubr.bf16.gmra.mxu0 %v4738_v11  ;;  %v6710_v11 = vld [vmem:[%s8771_s1 + $0x3a8] sm:$0xff]  }
  0x5c   :  { %1038 = vmatmul.mubr.bf16.gmra.mxu1 %v4740_v13  ;;  %6060 = vmatpush3.bf16.msra.mxu0 %v6684_v17  ;;  %v4842_v13 = vld [vmem:[%s8772_s0 + $0x1e0] sm:$0xff]  ;;  %v5009_v17 = vcombine.high %v4839_v14, %v4843_v16  ;;  %v6739_v14 = vld [vmem:[%s8771_s1 + $0x468] sm:$0xff]  }
  0x5d   :  { %972 = vmatprep.mubr.bf16.mxu0 %v4747_v23  ;;  %1045 = vmatprep.mubr.bf16.mxu1 %v4749_v24  ;;  %v5007_v15 = vcombine.high %v4838_v12, %v4842_v13  ;;  %v5006_v20 = vcombine.low %v4838_v12, %v4842_v13  ;;  %v6714_v23 = vld [vmem:[%s8771_s1 + $0x3a0] sm:$0xff]   ;;  %v6715_v24 = vld [vmem:[%s8771_s1 + $0x358] sm:$0xff]   ;;  %v6737_v12 = vld [vmem:[%s8771_s1 + $0x4f0] sm:$0xff]  }
  0x5e   :  { %6106 = vmatpush3.bf16.msra.mxu1 %v6686_v25  ;;  %6061 = vmatprep.subr.bf16.mxu0 %v6687_v27  ;;  %v6716_v25 = vld [vmem:[%s8771_s1 + $0x318] sm:$0xff]   ;;  %v4846_v27 = vld [vmem:[%s8772_s0 + $0x200] sm:$0xff]  ;;  %v6738_v13 = vld [vmem:[%s8771_s1 + $0x4b0] sm:$0xff]  }
  0x5f   :  { %6107 = vmatprep.subr.bf16.mxu1 %v6689_v30  ;;  %v4847_v30 = vld [vmem:[%s8772_s0 + $0x208] sm:$0xff] }
  0x60   :  { %6062 = vmatpush3.bf16.msra.mxu0 %v6688_v29  ;;  %v6740_v16 = vld [vmem:[%s8771_s1 + $0x428] sm:$0xff]  }
  0x61   :  { %6063 = vmatprep.subr.bf16.mxu0 %v6691_v32 }
  0x62   :  { %6108 = vmatpush3.bf16.msra.mxu1 %v6690_v31  ;;  %v4851_v31 = vld [vmem:[%s8772_s0 + $0x228] sm:$0xff] }
  0x63   :  { %973 = vmatmul.mubr.bf16.gmra.mxu0 %v4746_v26  ;;  %6109 = vmatprep.subr.bf16.mxu1 %v6693_v41  ;;  %v6717_v26 = vld [vmem:[%s8771_s1 + $0x3d8] sm:$0xff]   ;;  %v5017_v32 = vcombine.high %v4847_v30, %v4851_v31  ;;  %v5016_v37 = vcombine.low %v4847_v30, %v4851_v31  ;;  %v4854_v41 = vld [vmem:[%s8772_s0 + $0x240] sm:$0xff] }
  0x64   :  { %1046 = vmatmul.mubr.bf16.gmra.mxu1 %v4748_v28  ;;  %980 = vmatprep.mubr.bf16.mxu0 %v4755_v36  ;;  %v4850_v28 = vld [vmem:[%s8772_s0 + $0x220] sm:$0xff]  ;;  %v6720_v36 = vld [vmem:[%s8771_s1 + $0x310] sm:$0xff]   ;;  %v6747_v31 = vld [vmem:[%s8771_s1 + $0x458] sm:$0xff]  }
  0x65   :  { %1053 = vmatprep.mubr.bf16.mxu1 %v4757_v38  ;;  %6064 = vmatpush3.bf16.msra.mxu0 %v6692_v39  ;;  %v5015_v29 = vcombine.high %v4846_v27, %v4850_v28  ;;  %v5014_v35 = vcombine.low %v4846_v27, %v4850_v28  ;;  %v6721_v38 = vld [vmem:[%s8771_s1 + $0x3d0] sm:$0xff]   ;;  %v6744_v27 = vld [vmem:[%s8771_s1 + $0x420] sm:$0xff]  }
  0x66   :  { %6110 = vmatpush3.bf16.msra.mxu1 %v6694_v43  ;;  %6065 = vmatprep.subr.bf16.mxu0 %v6695_v44  ;;  %v6722_v39 = vld [vmem:[%s8771_s1 + $0x390] sm:$0xff]   ;;  %v4855_v43 = vld [vmem:[%s8772_s0 + $0x248] sm:$0xff]  ;;  %v6745_v28 = vld [vmem:[%s8771_s1 + $0x4e0] sm:$0xff]  }
  0x67   :  { %6111 = vmatprep.subr.bf16.mxu1 %v6697_v46  ;;  %v4859_v44 = vld [vmem:[%s8772_s0 + $0x268] sm:$0xff] }
  0x68   :  { %v5025_v46 = vcombine.high %v4855_v43, %v4859_v44  ;;  %v5024_v52 = vcombine.low %v4855_v43, %v4859_v44  ;;  %v6752_v43 = vld [vmem:[%s8771_s1 + $0x410] sm:$0xff]  }
  0x69   :  { %6066 = vmatpush3.bf16.msra.mxu0 %v6696_v45 }
  0x6a   :  { %6112 = vmatpush3.bf16.msra.mxu1 %v6698_v47  ;;  %6143 = vmatprep.subr.bf16.mxu0 %v6699_v54  ;;  %v6724_v47 = vld [vmem:[%s8771_s1 + $0x308] sm:$0xff]   ;;  %v6729_v54 = vld [vmem:[%s8771_s1 + $0x3c0] sm:$0xff]  }
  0x6b   :  { %981 = vmatmul.mubr.bf16.gmra.mxu0 %v4754_v40  ;;  %6189 = vmatprep.subr.bf16.mxu1 %v6701_v58  ;;  %v6723_v40 = vld [vmem:[%s8771_s1 + $0x348] sm:$0xff]   ;;  %v4825_v58 = vld [vmem:[%s8772_s0 + $0x158] sm:$0xff] }
  0x6c   :  { %1054 = vmatmul.mubr.bf16.gmra.mxu1 %v4756_v42  ;;  %1890 = vmatprep.mubr.bf16.mxu0 %v4991_v50  ;;  %v4858_v42 = vld [vmem:[%s8772_s0 + $0x260] sm:$0xff] }
  0x6d   :  { %1963 = vmatprep.mubr.bf16.mxu1 %v4993_v53  ;;  %v5023_v45 = vcombine.high %v4854_v41, %v4858_v42  ;;  %v5022_v50 = vcombine.low %v4854_v41, %v4858_v42  ;;  %v6728_v53 = vld [vmem:[%s8771_s1 + $0x300] sm:$0xff]   ;;  %v6750_v41 = vld [vmem:[%s8771_s1 + $0x498] sm:$0xff]   ;;  %v6751_v42 = vld [vmem:[%s8771_s1 + $0x450] sm:$0xff]  }
  0x73   :  { %1891 = vmatmul.mubr.bf16.vlgmr.msra.gmra.mxu0 %v4990_v55  ;;  %v6730_v55 = vld [vmem:[%s8771_s1 + $0x380] sm:$0xff]  }
  0x74   :  { %1964 = vmatmul.mubr.bf16.vlgmr.msra.gmra.mxu1 %v4992_v57  ;;  %6144 = vmatpush3.bf16.msra.mxu0 %v6700_v56  ;;  %v4824_v56 = vld [vmem:[%s8772_s0 + $0x150] sm:$0xff] }
  0x75   :  { %6190 = vmatpush3.bf16.msra.mxu1 %v6702_v59  ;;  %6145 = vmatprep.subr.bf16.mxu0 %v6703_v60  ;;  %v4828_v57 = vld [vmem:[%s8772_s0 + $0x170] sm:$0xff]  ;;  %v4829_v60 = vld [vmem:[%s8772_s0 + $0x178] sm:$0xff] }
  0x76   :  { %1898 = vmatprep.mubr.bf16.mxu0 %v4999_v2  ;;  %1971 = vmatprep.mubr.bf16.mxu1 %v5001_v3  ;;  %v4995_v59 = vcombine.high %v4824_v56, %v4828_v57  ;;  %v4994_v0 = vcombine.low %v4824_v56, %v4828_v57  ;;  %v4996_v2 = vcombine.low %v4825_v58, %v4829_v60  ;;  %v6734_v3 = vld [vmem:[%s8771_s1 + $0x4b8] sm:$0xff]   ;;  %v6757_v56 = vld [vmem:[%s8771_s1 + $0x4c8] sm:$0xff]  }
  0x77   :  { %6191 = vmatprep.subr.bf16.mxu1 %v6705_v4  ;;  %v6735_v4 = vld [vmem:[%s8771_s1 + $0x470] sm:$0xff]   ;;  %v6758_v57 = vld [vmem:[%s8771_s1 + $0x488] sm:$0xff]  }
  0x78   :  { %6146 = vmatpush3.bf16.msra.mxu0 %v6704_v61  ;;  %v4997_v61 = vcombine.high %v4825_v58, %v4829_v60  ;;  %v6759_v58 = vld [vmem:[%s8771_s1 + $0x440] sm:$0xff]  }
  0x79   :  { %6192 = vmatpush3.bf16.msra.mxu1 %v6706_v5  ;;  %6147 = vmatprep.subr.bf16.mxu0 %v6707_v7  ;;  %v6736_v5 = vld [vmem:[%s8771_s1 + $0x430] sm:$0xff]   ;;  %v6760_v60 = vld [vmem:[%s8771_s1 + $0x400] sm:$0xff]  }
  0x7a   :  { %6193 = vmatprep.subr.bf16.mxu1 %v6709_v10  ;;  %v4836_v7 = vld [vmem:[%s8772_s0 + $0x1b0] sm:$0xff]  ;;  %v4837_v10 = vld [vmem:[%s8772_s0 + $0x1b8] sm:$0xff] }
  0x7b   :  { %1899 = vmatmul.mubr.bf16.gmra.mxu0 %v4998_v6  ;;  %v4832_v6 = vld [vmem:[%s8772_s0 + $0x190] sm:$0xff] }
  0x7c   :  { %1972 = vmatmul.mubr.bf16.gmra.mxu1 %v5000_v8  ;;  %6148 = vmatpush3.bf16.msra.mxu0 %v6708_v9  ;;  %v5003_v8 = vcombine.high %v4832_v6, %v4836_v7  ;;  %v4833_v9 = vld [vmem:[%s8772_s0 + $0x198] sm:$0xff] }
  0x7d   :  { %6194 = vmatpush3.bf16.msra.mxu1 %v6710_v11  ;;  %1906 = vmatprep.mubr.bf16.mxu0 %v5007_v15  ;;  %v5005_v11 = vcombine.high %v4833_v9, %v4837_v10  ;;  %v5002_v15 = vcombine.low %v4832_v6, %v4836_v7  ;;  %v6765_v7 = vld [vmem:[%s8771_s1 + $0x5f8] sm:$0xff]  }
  0x7e   :  { %1979 = vmatprep.mubr.bf16.mxu1 %v5009_v17  ;;  %6149 = vmatprep.subr.bf16.mxu0 %v6711_v18  ;;  %v5004_v17 = vcombine.low %v4833_v9, %v4837_v10  ;;  %v6741_v18 = vld [vmem:[%s8771_s1 + $0x4e8] sm:$0xff]   ;;  %v6766_v10 = vld [vmem:[%s8771_s1 + $0x5b8] sm:$0xff]  }
  0x7f   :  { %6195 = vmatprep.subr.bf16.mxu1 %v6713_v21  ;;  %v4844_v21 = vld [vmem:[%s8772_s0 + $0x1f0] sm:$0xff] }
  0x80   :  { %6150 = vmatpush3.bf16.msra.mxu0 %v6712_v19  ;;  %v6742_v19 = vld [vmem:[%s8771_s1 + $0x4a8] sm:$0xff]  }
  0x81   :  { %6196 = vmatpush3.bf16.msra.mxu1 %v6714_v23  ;;  %6151 = vmatprep.subr.bf16.mxu0 %v6715_v24  ;;  %v4845_v23 = vld [vmem:[%s8772_s0 + $0x1f8] sm:$0xff] }
  0x82   :  { %6197 = vmatprep.subr.bf16.mxu1 %v6717_v26  ;;  %v6743_v26 = vld [vmem:[%s8771_s1 + $0x460] sm:$0xff]  }
  0x83   :  { %1907 = vmatmul.mubr.bf16.gmra.mxu0 %v5006_v20  ;;  %v4840_v20 = vld [vmem:[%s8772_s0 + $0x1d0] sm:$0xff] }
  0x84   :  { %1980 = vmatmul.mubr.bf16.gmra.mxu1 %v5008_v22  ;;  %6152 = vmatpush3.bf16.msra.mxu0 %v6716_v25  ;;  %v4841_v22 = vld [vmem:[%s8772_s0 + $0x1d8] sm:$0xff]  ;;  %v5011_v24 = vcombine.high %v4840_v20, %v4844_v21  ;;  %v5010_v30 = vcombine.low %v4840_v20, %v4844_v21  ;;  %v6769_v20 = vld [vmem:[%s8771_s1 + $0x5f0] sm:$0xff]  }
  0x85   :  { %1914 = vmatprep.mubr.bf16.mxu0 %v5015_v29  ;;  %1987 = vmatprep.mubr.bf16.mxu1 %v5017_v32  ;;  %v5013_v25 = vcombine.high %v4841_v22, %v4845_v23  ;;  %v6746_v29 = vld [vmem:[%s8771_s1 + $0x4a0] sm:$0xff]   ;;  %v5012_v32 = vcombine.low %v4841_v22, %v4845_v23  ;;  %v6770_v21 = vld [vmem:[%s8771_s1 + $0x5b0] sm:$0xff]   ;;  %v6771_v22 = vld [vmem:[%s8771_s1 + $0x568] sm:$0xff]  }
  0x86   :  { %6198 = vmatpush3.bf16.msra.mxu1 %v6718_v33  ;;  %6153 = vmatprep.subr.bf16.mxu0 %v6719_v34  ;;  %v6748_v33 = vld [vmem:[%s8771_s1 + $0x418] sm:$0xff]   ;;  %v6772_v23 = vld [vmem:[%s8771_s1 + $0x528] sm:$0xff]  }
  0x87   :  { %6199 = vmatprep.subr.bf16.mxu1 %v6721_v38  ;;  %v6749_v34 = vld [vmem:[%s8771_s1 + $0x4d8] sm:$0xff]  }
  0x88   :  { %6154 = vmatpush3.bf16.msra.mxu0 %v6720_v36  ;;  %v4852_v36 = vld [vmem:[%s8772_s0 + $0x230] sm:$0xff] }
  0x89   :  { %6155 = vmatprep.subr.bf16.mxu0 %v6723_v40 }
  0x8a   :  { %6200 = vmatpush3.bf16.msra.mxu1 %v6722_v39  ;;  %v4853_v39 = vld [vmem:[%s8772_s0 + $0x238] sm:$0xff] }
  0x8b   :  { %1915 = vmatmul.mubr.bf16.gmra.mxu0 %v5014_v35  ;;  %6201 = vmatprep.subr.bf16.mxu1 %v6725_v48  ;;  %v4848_v35 = vld [vmem:[%s8772_s0 + $0x210] sm:$0xff]  ;;  %v6755_v48 = vld [vmem:[%s8771_s1 + $0x448] sm:$0xff]  }
  0x8c   :  { %1988 = vmatmul.mubr.bf16.gmra.mxu1 %v5016_v37  ;;  %1922 = vmatprep.mubr.bf16.mxu0 %v5023_v45  ;;  %v4849_v37 = vld [vmem:[%s8772_s0 + $0x218] sm:$0xff]  ;;  %v5019_v38 = vcombine.high %v4848_v35, %v4852_v36  ;;  %v5018_v44 = vcombine.low %v4848_v35, %v4852_v36  ;;  %v6753_v45 = vld [vmem:[%s8771_s1 + $0x4d0] sm:$0xff]   ;;  %v6776_v35 = vld [vmem:[%s8771_s1 + $0x520] sm:$0xff]  }
  0x8d   :  { %1995 = vmatprep.mubr.bf16.mxu1 %v5025_v46  ;;  %6156 = vmatpush3.bf16.msra.mxu0 %v6724_v47  ;;  %v5021_v40 = vcombine.high %v4849_v37, %v4853_v39  ;;  %v5020_v46 = vcombine.low %v4849_v37, %v4853_v39  ;;  %v6754_v47 = vld [vmem:[%s8771_s1 + $0x490] sm:$0xff]   ;;  %v6777_v36 = vld [vmem:[%s8771_s1 + $0x5e0] sm:$0xff]  }
  0x8e   :  { %6202 = vmatpush3.bf16.msra.mxu1 %v6726_v49  ;;  %6157 = vmatprep.subr.bf16.mxu0 %v6727_v51  ;;  %v4856_v49 = vld [vmem:[%s8772_s0 + $0x250] sm:$0xff]  ;;  %v6778_v37 = vld [vmem:[%s8771_s1 + $0x5a0] sm:$0xff]  }
  0x8f   :  { %6203 = vmatprep.subr.bf16.mxu1 %v6729_v54 }
  0x91   :  { %6158 = vmatpush3.bf16.msra.mxu0 %v6728_v53  ;;  %v4861_v53 = vld [vmem:[%s8772_s0 + $0x278] sm:$0xff] }
  0x92   :  { %6204 = vmatpush3.bf16.msra.mxu1 %v6730_v55  ;;  %6235 = vmatprep.subr.bf16.mxu0 %v6731_v62  ;;  %v6756_v55 = vld [vmem:[%s8771_s1 + $0x408] sm:$0xff]   ;;  %v6761_v62 = vld [vmem:[%s8771_s1 + $0x4c0] sm:$0xff]  }
  0x93   :  { %1923 = vmatmul.mubr.bf16.gmra.mxu0 %v5022_v50  ;;  %6281 = vmatprep.subr.bf16.mxu1 %v6733_v1  ;;  %v4860_v50 = vld [vmem:[%s8772_s0 + $0x270] sm:$0xff]  ;;  %v5098_v1 = vld [vmem:[%s8772_s0 + $0x2a0] sm:$0xff] }
  0x94   :  { %1996 = vmatmul.mubr.bf16.gmra.mxu1 %v5024_v52  ;;  %2036 = vmatprep.mubr.bf16.mxu0 %v4995_v59  ;;  %v5027_v51 = vcombine.high %v4856_v49, %v4860_v50  ;;  %v4857_v52 = vld [vmem:[%s8772_s0 + $0x258] sm:$0xff]  ;;  %v5026_v59 = vcombine.low %v4856_v49, %v4860_v50  ;;  %v6783_v50 = vld [vmem:[%s8771_s1 + $0x550] sm:$0xff]  }
  0x95   :  { %2109 = vmatprep.mubr.bf16.mxu1 %v4997_v61  ;;  %v5029_v54 = vcombine.high %v4857_v52, %v4861_v53  ;;  %v5028_v61 = vcombine.low %v4857_v52, %v4861_v53  ;;  %v6782_v49 = vld [vmem:[%s8771_s1 + $0x598] sm:$0xff]   ;;  %v6785_v52 = vld [vmem:[%s8771_s1 + $0x5d0] sm:$0xff]  }
  0x96   :  { %v6786_v53 = vld [vmem:[%s8771_s1 + $0x590] sm:$0xff]  }
  0x9b   :  { %2037 = vmatmul.mubr.bf16.vlgmr.msra.gmra.mxu0 %v4994_v0  ;;  %v5094_v0 = vld [vmem:[%s8772_s0 + $0x280] sm:$0xff] }
  0x9c   :  { %2110 = vmatmul.mubr.bf16.vlgmr.msra.gmra.mxu1 %v4996_v2  ;;  %6236 = vmatpush3.bf16.msra.mxu0 %v6732_v63  ;;  %v6762_v63 = vld [vmem:[%s8771_s1 + $0x480] sm:$0xff]   ;;  %v5095_v2 = vld [vmem:[%s8772_s0 + $0x288] sm:$0xff]  ;;  %v5262_v9 = vcombine.low %v5094_v0, %v5098_v1 }
  0x9d   :  { %6282 = vmatpush3.bf16.msra.mxu1 %v6734_v3  ;;  %6237 = vmatprep.subr.bf16.mxu0 %v6735_v4  ;;  %v5099_v3 = vld [vmem:[%s8772_s0 + $0x2a8] sm:$0xff]  ;;  %v5263_v4 = vcombine.high %v5094_v0, %v5098_v1 }
  0x9e   :  { %2044 = vmatprep.mubr.bf16.mxu0 %v5003_v8  ;;  %2117 = vmatprep.mubr.bf16.mxu1 %v5005_v11  ;;  %v5265_v6 = vcombine.high %v5095_v2, %v5099_v3  ;;  %v6764_v8 = vld [vmem:[%s8771_s1 + $0x538] sm:$0xff]   ;;  %v5264_v11 = vcombine.low %v5095_v2, %v5099_v3  ;;  %v6789_v0 = vld [vmem:[%s8771_s1 + $0x5c8] sm:$0xff]   ;;  %v6791_v2 = vld [vmem:[%s8771_s1 + $0x540] sm:$0xff]  }
  0x9f   :  { %6283 = vmatprep.subr.bf16.mxu1 %v6737_v12  ;;  %v6767_v12 = vld [vmem:[%s8771_s1 + $0x570] sm:$0xff]   ;;  %v6790_v1 = vld [vmem:[%s8771_s1 + $0x588] sm:$0xff]   ;;  %v6792_v3 = vld [vmem:[%s8771_s1 + $0x500] sm:$0xff]  }
  0xa0   :  { %6238 = vmatpush3.bf16.msra.mxu0 %v6736_v5  ;;  %v6763_v5 = vld [vmem:[%s8771_s1 + $0x578] sm:$0xff]  }
  0xa1   :  { %6284 = vmatpush3.bf16.msra.mxu1 %v6738_v13  ;;  %6239 = vmatprep.subr.bf16.mxu0 %v6739_v14  ;;  %v5102_v13 = vld [vmem:[%s8772_s0 + $0x2c0] sm:$0xff] }
  0xa2   :  { %6285 = vmatprep.subr.bf16.mxu1 %v6741_v18  ;;  %v5106_v14 = vld [vmem:[%s8772_s0 + $0x2e0] sm:$0xff]  ;;  %v5107_v18 = vld [vmem:[%s8772_s0 + $0x2e8] sm:$0xff] }
  0xa3   :  { %2045 = vmatmul.mubr.bf16.gmra.mxu0 %v5002_v15  ;;  %v5103_v15 = vld [vmem:[%s8772_s0 + $0x2c8] sm:$0xff] }
  0xa4   :  { %2118 = vmatmul.mubr.bf16.gmra.mxu1 %v5004_v17  ;;  %6240 = vmatpush3.bf16.msra.mxu0 %v6740_v16  ;;  %v6768_v16 = vld [vmem:[%s8771_s1 + $0x530] sm:$0xff]   ;;  %v5271_v17 = vcombine.high %v5102_v13, %v5106_v14 }
  0xa5   :  { %6286 = vmatpush3.bf16.msra.mxu1 %v6742_v19  ;;  %2052 = vmatprep.mubr.bf16.mxu0 %v5011_v24  ;;  %v5273_v19 = vcombine.high %v5103_v15, %v5107_v18  ;;  %v5270_v24 = vcombine.low %v5102_v13, %v5106_v14  ;;  %v6795_v14 = vld [vmem:[%s8771_s1 + $0x678] sm:$0xff]  }
  0xa6   :  { %2125 = vmatprep.mubr.bf16.mxu1 %v5013_v25  ;;  %6241 = vmatprep.subr.bf16.mxu0 %v6743_v26  ;;  %v6773_v25 = vld [vmem:[%s8771_s1 + $0x5e8] sm:$0xff]   ;;  %v5272_v26 = vcombine.low %v5103_v15, %v5107_v18 }
  0xa7   :  { %6287 = vmatprep.subr.bf16.mxu1 %v6745_v28  ;;  %v5110_v28 = vld [vmem:[%s8772_s0 + $0x300] sm:$0xff] }
  0xa8   :  { %6242 = vmatpush3.bf16.msra.mxu0 %v6744_v27  ;;  %v6774_v27 = vld [vmem:[%s8771_s1 + $0x5a8] sm:$0xff]  }
  0xa9   :  { %6288 = vmatpush3.bf16.msra.mxu1 %v6746_v29  ;;  %6243 = vmatprep.subr.bf16.mxu0 %v6747_v31  ;;  %v5114_v29 = vld [vmem:[%s8772_s0 + $0x320] sm:$0xff]  ;;  %v5111_v31 = vld [vmem:[%s8772_s0 + $0x308] sm:$0xff] }
  0xaa   :  { %6289 = vmatprep.subr.bf16.mxu1 %v6749_v34  ;;  %v6775_v34 = vld [vmem:[%s8771_s1 + $0x560] sm:$0xff]   ;;  %v5278_v39 = vcombine.low %v5110_v28, %v5114_v29 }
  0xab   :  { %2053 = vmatmul.mubr.bf16.gmra.mxu0 %v5010_v30  ;;  %v5279_v30 = vcombine.high %v5110_v28, %v5114_v29  ;;  %v5108_v29 = vld [vmem:[%s8772_s0 + $0x2f0] sm:$0xff] }
  0xac   :  { %2126 = vmatmul.mubr.bf16.gmra.mxu1 %v5012_v32  ;;  %6244 = vmatpush3.bf16.msra.mxu0 %v6748_v33  ;;  %v5115_v32 = vld [vmem:[%s8772_s0 + $0x328] sm:$0xff] }
  0xad   :  { %2060 = vmatprep.mubr.bf16.mxu0 %v5019_v38  ;;  %2133 = vmatprep.mubr.bf16.mxu1 %v5021_v40  ;;  %v5281_v33 = vcombine.high %v5111_v31, %v5115_v32  ;;  %v6779_v38 = vld [vmem:[%s8771_s1 + $0x558] sm:$0xff]  }
  0xae   :  { %6290 = vmatpush3.bf16.msra.mxu1 %v6750_v41  ;;  %6245 = vmatprep.subr.bf16.mxu0 %v6751_v42  ;;  %v6780_v40 = vld [vmem:[%s8771_s1 + $0x518] sm:$0xff]   ;;  %v5280_v41 = vcombine.low %v5111_v31, %v5115_v32 }
  0xaf   :  { %6291 = vmatprep.subr.bf16.mxu1 %v6753_v45  ;;  %v6781_v42 = vld [vmem:[%s8771_s1 + $0x5d8] sm:$0xff]   ;;  %v5119_v45 = vld [vmem:[%s8772_s0 + $0x348] sm:$0xff] }
  0xb0   :  { %6246 = vmatpush3.bf16.msra.mxu0 %v6752_v43  ;;  %v5118_v43 = vld [vmem:[%s8772_s0 + $0x340] sm:$0xff]  ;;  %v5109_v31 = vld [vmem:[%s8772_s0 + $0x2f8] sm:$0xff] }
  0xb1   :  { %6247 = vmatprep.subr.bf16.mxu0 %v6755_v48 }
  0xb2   :  { %6292 = vmatpush3.bf16.msra.mxu1 %v6754_v47 }
  0xb3   :  { %2061 = vmatmul.mubr.bf16.gmra.mxu0 %v5018_v44  ;;  %6293 = vmatprep.subr.bf16.mxu1 %v6757_v56  ;;  %v5122_v44 = vld [vmem:[%s8772_s0 + $0x360] sm:$0xff] }
  0xb4   :  { %2134 = vmatmul.mubr.bf16.gmra.mxu1 %v5020_v46  ;;  %2068 = vmatprep.mubr.bf16.mxu0 %v5027_v51  ;;  %v5123_v46 = vld [vmem:[%s8772_s0 + $0x368] sm:$0xff]  ;;  %v5287_v47 = vcombine.high %v5118_v43, %v5122_v44  ;;  %v6784_v51 = vld [vmem:[%s8771_s1 + $0x510] sm:$0xff]  }
  0xb5   :  { %2141 = vmatprep.mubr.bf16.mxu1 %v5029_v54  ;;  %6248 = vmatpush3.bf16.msra.mxu0 %v6756_v55  ;;  %v5289_v48 = vcombine.high %v5119_v45, %v5123_v46  ;;  %v5286_v54 = vcombine.low %v5118_v43, %v5122_v44  ;;  %v6787_v55 = vld [vmem:[%s8771_s1 + $0x548] sm:$0xff]   ;;  %v5288_v56 = vcombine.low %v5119_v45, %v5123_v46  ;;  %v6802_v44 = vld [vmem:[%s8771_s1 + $0x6b0] sm:$0xff]  }
  0xb6   :  { %6294 = vmatpush3.bf16.msra.mxu1 %v6758_v57  ;;  %6249 = vmatprep.subr.bf16.mxu0 %v6759_v58  ;;  %v5126_v57 = vld [vmem:[%s8772_s0 + $0x380] sm:$0xff] }
  0xb7   :  { %6295 = vmatprep.subr.bf16.mxu1 %v6761_v62  ;;  %v5130_v58 = vld [vmem:[%s8772_s0 + $0x3a0] sm:$0xff] }
  0xb9   :  { %6250 = vmatpush3.bf16.msra.mxu0 %v6760_v60  ;;  %v5295_v60 = vcombine.high %v5126_v57, %v5130_v58 }
  0xba   :  { %6296 = vmatpush3.bf16.msra.mxu1 %v6762_v63  ;;  %6327 = vmatprep.subr.bf16.mxu0 %v6763_v5  ;;  %v6788_v63 = vld [vmem:[%s8771_s1 + $0x508] sm:$0xff]   ;;  %v6793_v5 = vld [vmem:[%s8771_s1 + $0x5c0] sm:$0xff]  }
  0xbb   :  { %2069 = vmatmul.mubr.bf16.gmra.mxu0 %v5026_v59  ;;  %6373 = vmatprep.subr.bf16.mxu1 %v6765_v7  ;;  %v5127_v59 = vld [vmem:[%s8772_s0 + $0x388] sm:$0xff]  ;;  %v6794_v7 = vld [vmem:[%s8771_s1 + $0x580] sm:$0xff]  }
  0xbc   :  { %2142 = vmatmul.mubr.bf16.gmra.mxu1 %v5028_v61  ;;  %2978 = vmatprep.mubr.bf16.mxu0 %v5263_v4  ;;  %v5131_v61 = vld [vmem:[%s8772_s0 + $0x3a8] sm:$0xff]  ;;  %v5294_v4 = vcombine.low %v5126_v57, %v5130_v58  ;;  %v5116_v57 = vld [vmem:[%s8772_s0 + $0x330] sm:$0xff]  ;;  %v5113_v58 = vld [vmem:[%s8772_s0 + $0x318] sm:$0xff] }
  0xbd   :  { %3051 = vmatprep.mubr.bf16.mxu1 %v5265_v6  ;;  %v5297_v62 = vcombine.high %v5127_v59, %v5131_v61  ;;  %v5296_v6 = vcombine.low %v5127_v59, %v5131_v61  ;;  %v5117_v61 = vld [vmem:[%s8772_s0 + $0x338] sm:$0xff] }
  0xc3   :  { %2979 = vmatmul.mubr.bf16.vlgmr.msra.gmra.mxu0 %v5262_v9  ;;  %v5100_v9 = vld [vmem:[%s8772_s0 + $0x2b0] sm:$0xff] }
  0xc4   :  { %3052 = vmatmul.mubr.bf16.vlgmr.msra.gmra.mxu1 %v5264_v11  ;;  %6328 = vmatpush3.bf16.msra.mxu0 %v6764_v8  ;;  %v5096_v8 = vld [vmem:[%s8772_s0 + $0x290] sm:$0xff]  ;;  %v5097_v11 = vld [vmem:[%s8772_s0 + $0x298] sm:$0xff] }
  0xc5   :  { %6374 = vmatpush3.bf16.msra.mxu1 %v6766_v10  ;;  %6329 = vmatprep.subr.bf16.mxu0 %v6767_v12  ;;  %v5267_v10 = vcombine.high %v5096_v8, %v5100_v9  ;;  %v5101_v12 = vld [vmem:[%s8772_s0 + $0x2b8] sm:$0xff] }
  0xc6   :  { %2986 = vmatprep.mubr.bf16.mxu0 %v5271_v17  ;;  %3059 = vmatprep.mubr.bf16.mxu1 %v5273_v19  ;;  %v5269_v13 = vcombine.high %v5097_v11, %v5101_v12  ;;  %v6797_v17 = vld [vmem:[%s8771_s1 + $0x6f8] sm:$0xff]   ;;  %v5268_v28 = vcombine.low %v5097_v11, %v5101_v12 }
  0xc7   :  { %6375 = vmatprep.subr.bf16.mxu1 %v6769_v20 }
  0xc8   :  { %6330 = vmatpush3.bf16.msra.mxu0 %v6768_v16 }
  0xc9   :  { %6376 = vmatpush3.bf16.msra.mxu1 %v6770_v21  ;;  %6331 = vmatprep.subr.bf16.mxu0 %v6771_v22  ;;  %v6796_v21 = vld [vmem:[%s8771_s1 + $0x638] sm:$0xff]  }
  0xca   :  { %6377 = vmatprep.subr.bf16.mxu1 %v6773_v25  ;;  %v6798_v25 = vld [vmem:[%s8771_s1 + $0x6b8] sm:$0xff]  }
  0xcb   :  { %2987 = vmatmul.mubr.bf16.gmra.mxu0 %v5270_v24  ;;  %v5266_v24 = vcombine.low %v5096_v8, %v5100_v9  ;;  %v6809_v8 = vld [vmem:[%s8771_s1 + $0x6e0] sm:$0xff]  }
  0xcc   :  { %3060 = vmatmul.mubr.bf16.gmra.mxu1 %v5272_v26  ;;  %6332 = vmatpush3.bf16.msra.mxu0 %v6772_v23  ;;  %v5104_v26 = vld [vmem:[%s8772_s0 + $0x2d0] sm:$0xff] }
  0xcd   :  { %6378 = vmatpush3.bf16.msra.mxu1 %v6774_v27  ;;  %2994 = vmatprep.mubr.bf16.mxu0 %v5279_v30  ;;  %v5105_v30 = vld [vmem:[%s8772_s0 + $0x2d8] sm:$0xff] }
  0xce   :  { %3067 = vmatprep.mubr.bf16.mxu1 %v5281_v33  ;;  %6333 = vmatprep.subr.bf16.mxu0 %v6775_v34  ;;  %v6799_v34 = vld [vmem:[%s8771_s1 + $0x670] sm:$0xff]  }
  0xcf   :  { %6379 = vmatprep.subr.bf16.mxu1 %v6777_v36 }
  0xd0   :  { %6334 = vmatpush3.bf16.msra.mxu0 %v6776_v35 }
  0xd1   :  { %6380 = vmatpush3.bf16.msra.mxu1 %v6778_v37  ;;  %6335 = vmatprep.subr.bf16.mxu0 %v6779_v38  ;;  %v6800_v37 = vld [vmem:[%s8771_s1 + $0x630] sm:$0xff]   ;;  %v5275_v38 = vcombine.high %v5104_v26, %v5108_v29 }
  0xd2   :  { %6381 = vmatprep.subr.bf16.mxu1 %v6781_v42  ;;  %v6801_v42 = vld [vmem:[%s8771_s1 + $0x6f0] sm:$0xff]  }
  0xd3   :  { %2995 = vmatmul.mubr.bf16.gmra.mxu0 %v5278_v39  ;;  %v5277_v39 = vcombine.high %v5105_v30, %v5109_v31 }
  0xd4   :  { %3068 = vmatmul.mubr.bf16.gmra.mxu1 %v5280_v41  ;;  %6336 = vmatpush3.bf16.msra.mxu0 %v6780_v40 }
  0xd5   :  { %3002 = vmatprep.mubr.bf16.mxu0 %v5287_v47  ;;  %3075 = vmatprep.mubr.bf16.mxu1 %v5289_v48  ;;  %v6803_v47 = vld [vmem:[%s8771_s1 + $0x668] sm:$0xff]  }
  0xd6   :  { %6382 = vmatpush3.bf16.msra.mxu1 %v6782_v49  ;;  %6337 = vmatprep.subr.bf16.mxu0 %v6783_v50  ;;  %v6804_v50 = vld [vmem:[%s8771_s1 + $0x628] sm:$0xff]  }
  0xd7   :  { %6383 = vmatprep.subr.bf16.mxu1 %v6785_v52 }
  0xd8   :  { %6338 = vmatpush3.bf16.msra.mxu0 %v6784_v51  ;;  %v6805_v51 = vld [vmem:[%s8771_s1 + $0x6e8] sm:$0xff]  }
  0xd9   :  { %6339 = vmatprep.subr.bf16.mxu0 %v6787_v55  ;;  %v6806_v55 = vld [vmem:[%s8771_s1 + $0x6a8] sm:$0xff]  }
  0xda   :  { %6384 = vmatpush3.bf16.msra.mxu1 %v6786_v53 }
  0xdb   :  { %3003 = vmatmul.mubr.bf16.gmra.mxu0 %v5286_v54  ;;  %6385 = vmatprep.subr.bf16.mxu1 %v6789_v0  ;;  %v5274_v54 = vcombine.low %v5104_v26, %v5108_v29  ;;  %v5125_v26 = vld [vmem:[%s8772_s0 + $0x378] sm:$0xff] }
  0xdc   :  { %3076 = vmatmul.mubr.bf16.gmra.mxu1 %v5288_v56  ;;  %3010 = vmatprep.mubr.bf16.mxu0 %v5295_v60  ;;  %v5112_v56 = vld [vmem:[%s8772_s0 + $0x310] sm:$0xff]  ;;  %v5276_v60 = vcombine.low %v5105_v30, %v5109_v31  ;;  %v6814_v31 = vld [vmem:[%s8771_s1 + $0x698] sm:$0xff]  }
  0xdd   :  { %3083 = vmatprep.mubr.bf16.mxu1 %v5297_v62  ;;  %6340 = vmatpush3.bf16.msra.mxu0 %v6788_v63  ;;  %v5283_v0 = vcombine.high %v5112_v56, %v5116_v57 }
  0xde   :  { %6386 = vmatpush3.bf16.msra.mxu1 %v6790_v1  ;;  %6341 = vmatprep.subr.bf16.mxu0 %v6791_v2  ;;  %v6807_v1 = vld [vmem:[%s8771_s1 + $0x660] sm:$0xff]  }
  0xdf   :  { %6387 = vmatprep.subr.bf16.mxu1 %v6793_v5  ;;  %v6808_v5 = vld [vmem:[%s8771_s1 + $0x620] sm:$0xff]  }
  0xe1   :  { %6342 = vmatpush3.bf16.msra.mxu0 %v6792_v3 }
  0xe2   :  { %6388 = vmatpush3.bf16.msra.mxu1 %v6794_v7  ;;  %6419 = vmatprep.subr.bf16.mxu0 %v6795_v14 }
  0xe3   :  { %v5883_v15 = vpop.f32.mrf.mxu0  ;;  %3011 = vmatmul.mubr.bf16.gmra.mxu0 %v5294_v4  ;;  %6465 = vmatprep.subr.bf16.mxu1 %v6797_v17  ;;  %v5285_v4 = vcombine.high %v5113_v58, %v5117_v61 }
  0xe4   :  { %v5929_v16 = vpop.f32.mrf.mxu1  ;;  %3084 = vmatmul.mubr.bf16.gmra.mxu1 %v5296_v6  ;;  %3124 = vmatprep.mubr.bf16.mxu0 %v5267_v10  ;;  %v6810_v10 = vld [vmem:[%s8771_s1 + $0x6a0] sm:$0xff]  }
  0xe5   :  { %v5884_v18 = vpop.f32.mrf.mxu0  ;;  %3197 = vmatprep.mubr.bf16.mxu1 %v5269_v13  ;;  %v6811_v13 = vld [vmem:[%s8771_s1 + $0x658] sm:$0xff]  }
  0xe6   :  { %v5885_v19 = vadd.f32 %v5884_v18, %v5883_v15  ;;  %v5930_v20 = vpop.f32.mrf.mxu1 }
  0xe7   :  { %v5931_v22 = vadd.f32 %v5930_v20, %v5929_v16  ;;  %v5886_v23 = vpop.f32.mrf.mxu0  ;;  %v6812_v16 = vld [vmem:[%s8771_s1 + $0x618] sm:$0xff]  }
  0xe8   :  { %v5932_v27 = vpop.f32.mrf.mxu1  ;;  %v6813_v20 = vld [vmem:[%s8771_s1 + $0x6d8] sm:$0xff]  }
  0xe9   :  { %v7798_v32 = vadd.f32 %v5931_v22, %v5885_v19  ;;  %v5887_v33 = vpop.f32.mrf.mxu0  ;;  %v5282_v19 = vcombine.low %v5112_v56, %v5116_v57  ;;  %v5124_v22 = vld [vmem:[%s8772_s0 + $0x370] sm:$0xff] }
  0xea   :  { %v5888_v35 = vadd.f32 %v5887_v33, %v5886_v23  ;;  %v5933_v36 = vpop.f32.mrf.mxu1 }
  0xeb   :  { %v5934_v40 = vadd.f32 %v5933_v36, %v5932_v27  ;;  %v5889_v41 = vpop.f32.mrf.mxu0  ;;  %3125 = vmatmul.mubr.bf16.vlgmr.msra.gmra.mxu0 %v5266_v24  ;;  %v5284_v24 = vcombine.low %v5113_v58, %v5117_v61  ;;  %v6820_v58 = vld [vmem:[%s8771_s1 + $0x608] sm:$0xff]  }
  0xec   :  { %v5935_v43 = vpop.f32.mrf.mxu1  ;;  %3198 = vmatmul.mubr.bf16.vlgmr.msra.gmra.mxu1 %v5268_v28  ;;  %6420 = vmatpush3.bf16.msra.mxu0 %v6796_v21  ;;  %v5120_v21 = vld [vmem:[%s8772_s0 + $0x350] sm:$0xff] }
  0xed   :  { %v7812_v45 = vadd.f32 %v5934_v40, %v5888_v35  ;;  %v5890_v46 = vpop.f32.mrf.mxu0  ;;  %6466 = vmatpush3.bf16.msra.mxu1 %v6798_v25  ;;  %6421 = vmatprep.subr.bf16.mxu0 %v6799_v34  ;;  %v5121_v25 = vld [vmem:[%s8772_s0 + $0x358] sm:$0xff]  ;;  %v5291_v29 = vcombine.high %v5120_v21, %v5124_v22  ;;  %v6815_v35 = vld [vmem:[%s8771_s1 + $0x650] sm:$0xff]  }
  0xee   :  { %v5891_v48 = vadd.f32 %v5890_v46, %v5889_v41  ;;  %v5936_v49 = vpop.f32.mrf.mxu1  ;;  %3132 = vmatprep.mubr.bf16.mxu0 %v5275_v38  ;;  %3205 = vmatprep.mubr.bf16.mxu1 %v5277_v39  ;;  %v5293_v30 = vcombine.high %v5121_v25, %v5125_v26  ;;  %v6816_v38 = vld [vmem:[%s8771_s1 + $0x610] sm:$0xff]   ;;  %v5292_v56 = vcombine.low %v5121_v25, %v5125_v26 }
  0xef   :  { %v5937_v52 = vadd.f32 %v5936_v49, %v5935_v43  ;;  %v5892_v53 = vpop.f32.mrf.mxu0  ;;  %6467 = vmatprep.subr.bf16.mxu1 %v6801_v42  ;;  %v6817_v40 = vld [vmem:[%s8771_s1 + $0x6d0] sm:$0xff]  }
  0xf0   :  { %v5938_v59 = vpop.f32.mrf.mxu1  ;;  %6422 = vmatpush3.bf16.msra.mxu0 %v6800_v37  ;;  %v6818_v43 = vld [vmem:[%s8771_s1 + $0x690] sm:$0xff]  }
  0xf1   :  { %v7838_v62 = vadd.f32 %v5937_v52, %v5891_v48  ;;  %v5893_v63 = vpop.f32.mrf.mxu0  ;;  %6468 = vmatpush3.bf16.msra.mxu1 %v6802_v44  ;;  %6423 = vmatprep.subr.bf16.mxu0 %v6803_v47  ;;  %v6819_v47 = vld [vmem:[%s8771_s1 + $0x648] sm:$0xff]   ;;  %v5128_v48 = vld [vmem:[%s8772_s0 + $0x390] sm:$0xff] }
  0xf2   :  { %v5894_v2 = vadd.f32 %v5893_v63, %v5892_v53  ;;  %v5939_v3 = vpop.f32.mrf.mxu1  ;;  %6469 = vmatprep.subr.bf16.mxu1 %v6805_v51  ;;  %v5290_v51 = vcombine.low %v5120_v21, %v5124_v22  ;;  %v5132_v52 = vld [vmem:[%s8772_s0 + $0x3b0] sm:$0xff]  ;;  %v5129_v53 = vld [vmem:[%s8772_s0 + $0x398] sm:$0xff]  ;;  %v6821_v63 = vld [vmem:[%s8771_s1 + $0x6c8] sm:$0xff]  }
  0xf3   :  { %v5940_v6 = vadd.f32 %v5939_v3, %v5938_v59  ;;  %v5895_v7 = vpop.f32.mrf.mxu0  ;;  %3133 = vmatmul.mubr.bf16.gmra.mxu0 %v5274_v54  ;;  %v5133_v54 = vld [vmem:[%s8772_s0 + $0x3b8] sm:$0xff]  ;;  %v5299_v57 = vcombine.high %v5128_v48, %v5132_v52 }
  0xf4   :  { %v5941_v9 = vpop.f32.mrf.mxu1  ;;  %3206 = vmatmul.mubr.bf16.gmra.mxu1 %v5276_v60  ;;  %6424 = vmatpush3.bf16.msra.mxu0 %v6804_v50  ;;  %v5301_v61 = vcombine.high %v5129_v53, %v5133_v54  ;;  %v5300_v22 = vcombine.low %v5129_v53, %v5133_v54  ;;  %v6830_v54 = vld [vmem:[%s8771_s1 + $0x7b8] sm:$0xff]  }
  0xf5   :  { %v7852_v11 = vadd.f32 %v5940_v6, %v5894_v2  ;;  %v5896_v12 = vpop.f32.mrf.mxu0  ;;  %6470 = vmatpush3.bf16.msra.mxu1 %v6806_v55  ;;  %3140 = vmatprep.mubr.bf16.mxu0 %v5283_v0  ;;  %v6822_v2 = vld [vmem:[%s8771_s1 + $0x688] sm:$0xff]  }
  0xf6   :  { %v5897_v14 = vadd.f32 %v5896_v12, %v5895_v7  ;;  %v5942_v15 = vpop.f32.mrf.mxu1  ;;  %3213 = vmatprep.mubr.bf16.mxu1 %v5285_v4  ;;  %6425 = vmatprep.subr.bf16.mxu0 %v6807_v1  ;;  %v6824_v7 = vld [vmem:[%s8771_s1 + $0x600] sm:$0xff]  }
  0xf7   :  { %v5943_v17 = vadd.f32 %v5942_v15, %v5941_v9  ;;  %v5898_v18 = vpop.f32.mrf.mxu0  ;;  %6471 = vmatprep.subr.bf16.mxu1 %v6809_v8 }
  0xf8   :  { %v5944_v23 = vpop.f32.mrf.mxu1  ;;  %6426 = vmatpush3.bf16.msra.mxu0 %v6808_v5  ;;  %v6823_v5 = vld [vmem:[%s8771_s1 + $0x640] sm:$0xff]  }
  0xf9   :  { %v7875_v27 = vadd.f32 %v5943_v17, %v5897_v14  ;;  %v5899_v28 = vpop.f32.mrf.mxu0  ;;  %6472 = vmatpush3.bf16.msra.mxu1 %v6810_v10  ;;  %6427 = vmatprep.subr.bf16.mxu0 %v6811_v13  ;;  %v6825_v10 = vld [vmem:[%s8771_s1 + $0x6c0] sm:$0xff]   ;;  %v5298_v17 = vcombine.low %v5128_v48, %v5132_v52 }
  0xfa   :  { %v5900_v33 = vadd.f32 %v5899_v28, %v5898_v18  ;;  %v5945_v34 = vpop.f32.mrf.mxu1  ;;  %6473 = vmatprep.subr.bf16.mxu1 %v6813_v20  ;;  %v6826_v14 = vld [vmem:[%s8771_s1 + $0x680] sm:$0xff]   ;;  %v5367_v20 = vld [vmem:[%s8772_s0 + $0x3c8] sm:$0xff] }
  0xfb   :  { %v5946_v36 = vadd.f32 %v5945_v34, %v5944_v23  ;;  %v5901_v37 = vpop.f32.mrf.mxu0  ;;  %3141 = vmatmul.mubr.bf16.gmra.mxu0 %v5282_v19  ;;  %v5366_v18 = vld [vmem:[%s8772_s0 + $0x3c0] sm:$0xff] }
  0xfc   :  { %v5947_v39 = vpop.f32.mrf.mxu1  ;;  %3214 = vmatmul.mubr.bf16.gmra.mxu1 %v5284_v24  ;;  %6428 = vmatpush3.bf16.msra.mxu0 %v6812_v16  ;;  %v5370_v19 = vld [vmem:[%s8772_s0 + $0x3e0] sm:$0xff]  ;;  %v5371_v24 = vld [vmem:[%s8772_s0 + $0x3e8] sm:$0xff] }
  0xfd   :  { %v7889_v41 = vadd.f32 %v5946_v36, %v5900_v33  ;;  %v5902_v42 = vpop.f32.mrf.mxu0  ;;  %3148 = vmatprep.mubr.bf16.mxu0 %v5291_v29  ;;  %3221 = vmatprep.mubr.bf16.mxu1 %v5293_v30  ;;  %v5535_v23 = vcombine.high %v5366_v18, %v5370_v19  ;;  %v5537_v28 = vcombine.high %v5367_v20, %v5371_v24  ;;  %v6827_v29 = vld [vmem:[%s8771_s1 + $0x778] sm:$0xff]  }
  0xfe   :  { %v5903_v44 = vadd.f32 %v5902_v42, %v5901_v37  ;;  %v5948_v46 = vpop.f32.mrf.mxu1  ;;  %6474 = vmatpush3.bf16.msra.mxu1 %v6814_v31  ;;  %6429 = vmatprep.subr.bf16.mxu0 %v6815_v35  ;;  %v6829_v35 = vld [vmem:[%s8771_s1 + $0x7f8] sm:$0xff]   ;;  %v5534_v48 = vcombine.low %v5366_v18, %v5370_v19  ;;  %v5536_v53 = vcombine.low %v5367_v20, %v5371_v24 }
  0xff   :  { %v5949_v49 = vadd.f32 %v5948_v46, %v5947_v39  ;;  %v5904_v50 = vpop.f32.mrf.mxu0  ;;  %6475 = vmatprep.subr.bf16.mxu1 %v6817_v40  ;;  %v6828_v42 = vld [vmem:[%s8771_s1 + $0x738] sm:$0xff]  }
 0x100   :  { %v5950_v55 = vpop.f32.mrf.mxu1  ;;  %6430 = vmatpush3.bf16.msra.mxu0 %v6816_v38 }
 0x101   :  { %v7912_v59 = vadd.f32 %v5949_v49, %v5903_v44  ;;  %v5905_v60 = vpop.f32.mrf.mxu0  ;;  %6431 = vmatprep.subr.bf16.mxu0 %v6819_v47  ;;  %v7967_v44 = vld [vmem:[%s8772_s0 + $0x420] sm:$0xff]  ;;  %v7972_v49 = vld [vmem:[%s8772_s0 + $0x408] sm:$0xff] }
 0x102   :  { %v5906_v0 = vadd.f32 %v5905_v60, %v5904_v50  ;;  %v5951_v1 = vpop.f32.mrf.mxu1  ;;  %6476 = vmatpush3.bf16.msra.mxu1 %v6818_v43  ;;  %v7962_v43 = vld [vmem:[%s8772_s0 + $0x400] sm:$0xff]  ;;  %v7977_v50 = vld [vmem:[%s8772_s0 + $0x428] sm:$0xff] }
 0x103   :  { %v5952_v3 = vadd.f32 %v5951_v1, %v5950_v55  ;;  %v5907_v4 = vpop.f32.mrf.mxu0  ;;  %3149 = vmatmul.mubr.bf16.gmra.mxu0 %v5290_v51  ;;  %6477 = vmatprep.subr.bf16.mxu1 %v6821_v63  ;;  %v5545_v63 = vcombine.high %v7972_v49, %v7977_v50  ;;  %v5542_v19 = vcombine.low %v7962_v43, %v7967_v44 }
 0x104   :  { %v5953_v6 = vpop.f32.mrf.mxu1  ;;  %3222 = vmatmul.mubr.bf16.gmra.mxu1 %v5292_v56  ;;  %3156 = vmatprep.mubr.bf16.mxu0 %v5299_v57  ;;  %v6831_v56 = vld [vmem:[%s8771_s1 + $0x770] sm:$0xff]   ;;  %v5544_v20 = vcombine.low %v7972_v49, %v7977_v50  ;;  %v6843_v50 = vld [vmem:[%s8771_s1 + $0x758] sm:$0xff]  }
 0x105   :  { %v7926_v8 = vadd.f32 %v5952_v3, %v5906_v0  ;;  %v5908_v9 = vpop.f32.mrf.mxu0  ;;  %3229 = vmatprep.mubr.bf16.mxu1 %v5301_v61  ;;  %6432 = vmatpush3.bf16.msra.mxu0 %v6820_v58  ;;  %v6832_v61 = vld [vmem:[%s8771_s1 + $0x730] sm:$0xff]  }
 0x106   :  { %v5909_v12 = vadd.f32 %v5908_v9, %v5907_v4  ;;  %v5954_v13 = vpop.f32.mrf.mxu1  ;;  %6478 = vmatpush3.bf16.msra.mxu1 %v6822_v2  ;;  %6433 = vmatprep.subr.bf16.mxu0 %v6823_v5  ;;  %v6833_v2 = vld [vmem:[%s8771_s1 + $0x7f0] sm:$0xff]   ;;  %v6837_v9 = vld [vmem:[%s8771_s1 + $0x7e8] sm:$0xff]  }
 0x107   :  { %v5955_v15 = vadd.f32 %v5954_v13, %v5953_v6  ;;  %v5910_v16 = vpop.f32.mrf.mxu0  ;;  %6479 = vmatprep.subr.bf16.mxu1 %v6825_v10  ;;  %v6834_v5 = vld [vmem:[%s8771_s1 + $0x7b0] sm:$0xff]   ;;  %v6836_v13 = vld [vmem:[%s8771_s1 + $0x728] sm:$0xff]  }
 0x108   :  { %v5956_v21 = vpop.f32.mrf.mxu1 }
 0x109   :  { %v7946_v25 = vadd.f32 %v5955_v15, %v5909_v12  ;;  %v5911_v26 = vpop.f32.mrf.mxu0  ;;  %6434 = vmatpush3.bf16.msra.mxu0 %v6824_v7  ;;  %v6835_v7 = vld [vmem:[%s8771_s1 + $0x768] sm:$0xff]   ;;  %v8021_v15 = vld [vmem:[%s8772_s0 + $0x460] sm:$0xff] }
 0x10a   :  { %v5912_v30 = vadd.f32 %v5911_v26, %v5910_v16  ;;  %v5957_v31 = vpop.f32.mrf.mxu1  ;;  %6480 = vmatpush3.bf16.msra.mxu1 %v6826_v14  ;;  %6511 = vmatprep.subr.bf16.mxu0 %v6827_v29  ;;  %v8016_v14 = vld [vmem:[%s8772_s0 + $0x440] sm:$0xff]  ;;  %v8026_v16 = vld [vmem:[%s8772_s0 + $0x448] sm:$0xff] }
 0x10b   :  { %v5958_v33 = vadd.f32 %v5957_v31, %v5956_v21  ;;  %v5975_v34 = vpop.f32.mrf.mxu0  ;;  %3157 = vmatmul.mubr.bf16.gmra.mxu0 %v5298_v17  ;;  %6557 = vmatprep.subr.bf16.mxu1 %v6829_v35  ;;  %v8035_v21 = vld [vmem:[%s8772_s0 + $0x468] sm:$0xff]  ;;  %v5551_v31 = vcombine.high %v8016_v14, %v8021_v15 }
 0x10c   :  { %v6021_v36 = vpop.f32.mrf.mxu1  ;;  %3230 = vmatmul.mubr.bf16.gmra.mxu1 %v5300_v22  ;;  %4066 = vmatprep.mubr.bf16.mxu0 %v5535_v23  ;;  %v6838_v29 = vld [vmem:[%s8771_s1 + $0x7a8] sm:$0xff]  }
 0x10d   :  { %v7954_v37 = vadd.f32 %v5958_v33, %v5912_v30  ;;  %v5976_v38 = vpop.f32.mrf.mxu0  ;;  %4139 = vmatprep.mubr.bf16.mxu1 %v5537_v28  ;;  %v6839_v33 = vld [vmem:[%s8771_s1 + $0x760] sm:$0xff]  }
 0x10e   :  { %v5977_v39 = vadd.f32 %v5976_v38, %v5975_v34  ;;  %v6022_v40 = vpop.f32.mrf.mxu1  ;;  %v5553_v38 = vcombine.high %v8026_v16, %v8035_v21 }
 0x10f   :  { %v6023_v46 = vadd.f32 %v6022_v40, %v6021_v36  ;;  %v5978_v47 = vpop.f32.mrf.mxu0  ;;  %v6841_v40 = vld [vmem:[%s8771_s1 + $0x7e0] sm:$0xff]  }
 0x110   :  { %v951_v51 = vadd.f32 %v5977_v39, %v7798_v32  ;;  %v6024_v52 = vpop.f32.mrf.mxu1  ;;  %v5543_v32 = vcombine.high %v7962_v43, %v7967_v44  ;;  %v6840_v39 = vld [vmem:[%s8771_s1 + $0x720] sm:$0xff]  }
 0x111   :  { %v5979_v55 = vpop.f32.mrf.mxu0  ;;  %v6842_v44 = vld [vmem:[%s8771_s1 + $0x7a0] sm:$0xff]  }
 0x112   :  { %v7986_v57 = vadd.f32 %v6023_v46, %v951_v51  ;;  %v5980_v58 = vadd.f32 %v5979_v55, %v5978_v47  ;;  %v6025_v60 = vpop.f32.mrf.mxu1 }
 0x113   :  { %v6026_v0 = vadd.f32 %v6025_v60, %v6024_v52  ;;  %v5981_v1 = vpop.f32.mrf.mxu0  ;;  %4067 = vmatmul.mubr.bf16.vlgmr.msra.gmra.mxu0 %v5534_v48  ;;  %v6845_v52 = vld [vmem:[%s8771_s1 + $0x7d8] sm:$0xff]   ;;  %v8088_v60 = vld [vmem:[%s8772_s0 + $0x4a0] sm:$0xff] }
 0x114   :  { %8806 = vst [vmem:[#allocation2_spill] sm:$0xff] %v7986_v57  ;;  %v954_v3 = vadd.f32 %v5980_v58, %v7812_v45  ;;  %v6027_v4 = vpop.f32.mrf.mxu1  ;;  %4140 = vmatmul.mubr.bf16.vlgmr.msra.gmra.mxu1 %v5536_v53  ;;  %6512 = vmatpush3.bf16.msra.mxu0 %v6828_v42  ;;  %v1078_v22 = vmul.f32 %v7986_v57, %v7986_v57  ;;  %v8083_v58 = vld [vmem:[%s8772_s0 + $0x480] sm:$0xff] }
 0x115   :  { %v5982_v6 = vpop.f32.mrf.mxu0  ;;  %6558 = vmatpush3.bf16.msra.mxu1 %v6830_v54  ;;  %6513 = vmatprep.subr.bf16.mxu0 %v6831_v56 }
 0x116   :  { %v8008_v10 = vadd.f32 %v6026_v0, %v954_v3  ;;  %v5983_v45 = vadd.f32 %v5982_v6, %v5981_v1  ;;  %v6028_v12 = vpop.f32.mrf.mxu1  ;;  %4074 = vmatprep.mubr.bf16.mxu0 %v5543_v32  ;;  %4147 = vmatprep.mubr.bf16.mxu1 %v5545_v63  ;;  %v5550_v0 = vcombine.low %v8016_v14, %v8021_v15  ;;  %v8100_v1 = vld [vmem:[%s8772_s0 + $0x4a8] sm:$0xff] }
 0x117   :  { %v6029_v17 = vadd.f32 %v6028_v12, %v6027_v4  ;;  %v5984_v18 = vpop.f32.mrf.mxu0  ;;  %6559 = vmatprep.subr.bf16.mxu1 %v6833_v2  ;;  %v5552_v6 = vcombine.low %v8026_v16, %v8035_v21 }
 0x118   :  { %8807 = vst [vmem:[#allocation3_spill] sm:$0xff] %v8008_v10  ;;  %v1062_v23 = vadd.f32 %v8008_v10, %v7986_v57  ;;  %v1079_v24 = vmul.f32 %v8008_v10, %v8008_v10  ;;  %v959_v26 = vadd.f32 %v5983_v45, %v7838_v62  ;;  %v6030_v28 = vpop.f32.mrf.mxu1  ;;  %6514 = vmatpush3.bf16.msra.mxu0 %v6832_v61  ;;  %v8093_v61 = vld [vmem:[%s8772_s0 + $0x488] sm:$0xff] }
 0x119   :  { %v5985_v30 = vpop.f32.mrf.mxu0  ;;  %6560 = vmatpush3.bf16.msra.mxu1 %v6834_v5  ;;  %6515 = vmatprep.subr.bf16.mxu0 %v6835_v7  ;;  %v6846_v7 = vld [vmem:[%s8771_s1 + $0x798] sm:$0xff]   ;;  %v5559_v45 = vcombine.high %v8083_v58, %v8088_v60  ;;  %v5561_v12 = vcombine.high %v8093_v61, %v8100_v1 }
 0x11a   :  { %v1088_v34 = vadd.f32 %v1079_v24, %v1078_v22  ;;  %v8052_v35 = vadd.f32 %v6029_v17, %v959_v26  ;;  %v5986_v62 = vadd.f32 %v5985_v30, %v5984_v18  ;;  %v6031_v36 = vpop.f32.mrf.mxu1  ;;  %6561 = vmatprep.subr.bf16.mxu1 %v6837_v9  ;;  %v6848_v17 = vld [vmem:[%s8771_s1 + $0x710] sm:$0xff]   ;;  %v8139_v30 = vld [vmem:[%s8772_s0 + $0x4c0] sm:$0xff] }
 0x11b   :  { %v6032_v42 = vadd.f32 %v6031_v36, %v6030_v28  ;;  %v5987_v43 = vpop.f32.mrf.mxu0  ;;  %4075 = vmatmul.mubr.bf16.gmra.mxu0 %v5542_v19  ;;  %v6850_v26 = vld [vmem:[%s8771_s1 + $0x790] sm:$0xff]   ;;  %v8151_v36 = vld [vmem:[%s8772_s0 + $0x4c8] sm:$0xff] }
 0x11c   :  { %8808 = vst [vmem:[#allocation4_spill] sm:$0xff] %v8052_v35  ;;  %v1063_v46 = vadd.f32 %v1062_v23, %v8052_v35  ;;  %v1080_v47 = vmul.f32 %v8052_v35, %v8052_v35  ;;  %v962_v48 = vadd.f32 %v5986_v62, %v7852_v11  ;;  %v6033_v49 = vpop.f32.mrf.mxu1  ;;  %4148 = vmatmul.mubr.bf16.gmra.mxu1 %v5544_v20  ;;  %v6844_v11 = vld [vmem:[%s8771_s1 + $0x718] sm:$0xff]   ;;  %v6849_v20 = vld [vmem:[%s8771_s1 + $0x7d0] sm:$0xff]  }
 0x11d   :  { %6516 = vmatpush3.bf16.msra.mxu0 %v6836_v13  ;;  %v5988_v51 = vpop.f32.mrf.mxu0  ;;  %6562 = vmatpush3.bf16.msra.mxu1 %v6838_v29  ;;  %v6851_v29 = vld [vmem:[%s8771_s1 + $0x748] sm:$0xff]  }
 0x11e   :  { %4082 = vmatprep.mubr.bf16.mxu0 %v5551_v31  ;;  %v1089_v53 = vadd.f32 %v1088_v34, %v1080_v47  ;;  %v8075_v54 = vadd.f32 %v6032_v42, %v962_v48  ;;  %v5989_v55 = vadd.f32 %v5988_v51, %v5987_v43  ;;  %v6034_v56 = vpop.f32.mrf.mxu1  ;;  %4155 = vmatprep.mubr.bf16.mxu1 %v5553_v38  ;;  %v8156_v38 = vld [vmem:[%s8772_s0 + $0x4e8] sm:$0xff] }
 0x11f   :  { %6517 = vmatprep.subr.bf16.mxu0 %v6839_v33  ;;  %v6035_v32 = vadd.f32 %v6034_v56, %v6033_v49  ;;  %v5990_v63 = vpop.f32.mrf.mxu0  ;;  %6563 = vmatprep.subr.bf16.mxu1 %v6841_v40  ;;  %v5558_v42 = vcombine.low %v8083_v58, %v8088_v60  ;;  %v5560_v43 = vcombine.low %v8093_v61, %v8100_v1  ;;  %v6853_v51 = vld [vmem:[%s8771_s1 + $0x7c8] sm:$0xff]   ;;  %v6855_v60 = vld [vmem:[%s8771_s1 + $0x740] sm:$0xff]  }
 0x120   :  { %8809 = vst [vmem:[#allocation5_spill] sm:$0xff] %v8075_v54  ;;  %v1064_v2 = vadd.f32 %v1063_v46, %v8075_v54  ;;  %v1081_v3 = vmul.f32 %v8075_v54, %v8075_v54  ;;  %v967_v4 = vadd.f32 %v5989_v55, %v7875_v27  ;;  %v6036_v5 = vpop.f32.mrf.mxu1  ;;  %v6847_v27 = vld [vmem:[%s8771_s1 + $0x750] sm:$0xff]   ;;  %v6854_v55 = vld [vmem:[%s8771_s1 + $0x788] sm:$0xff]  }
 0x121   :  { %6518 = vmatpush3.bf16.msra.mxu0 %v6840_v39  ;;  %v5991_v9 = vpop.f32.mrf.mxu0  ;;  %6564 = vmatpush3.bf16.msra.mxu1 %v6842_v44  ;;  %v6852_v44 = vld [vmem:[%s8771_s1 + $0x708] sm:$0xff]  }
 0x122   :  { %6519 = vmatprep.subr.bf16.mxu0 %v6843_v50  ;;  %v1090_v13 = vadd.f32 %v1089_v53, %v1081_v3  ;;  %v8118_v14 = vadd.f32 %v6035_v32, %v967_v4  ;;  %v5992_v15 = vadd.f32 %v5991_v9, %v5990_v63  ;;  %v6037_v16 = vpop.f32.mrf.mxu1  ;;  %6565 = vmatprep.subr.bf16.mxu1 %v6845_v52  ;;  %v6856_v63 = vld [vmem:[%s8771_s1 + $0x700] sm:$0xff]  }
 0x123   :  { %v6038_v18 = vadd.f32 %v6037_v16, %v6036_v5  ;;  %v5993_v19 = vpop.f32.mrf.mxu0  ;;  %4083 = vmatmul.mubr.bf16.gmra.mxu0 %v5550_v0  ;;  %v5569_v53 = vcombine.high %v8151_v36, %v8156_v38  ;;  %v6857_v4 = vld [vmem:[%s8771_s1 + $0x7c0] sm:$0xff]  }
 0x124   :  { %8810 = vst [vmem:[#allocation6_spill] sm:$0xff] %v8118_v14  ;;  %v1065_v21 = vadd.f32 %v1064_v2, %v8118_v14  ;;  %v1082_v22 = vmul.f32 %v8118_v14, %v8118_v14  ;;  %v970_v23 = vadd.f32 %v5992_v15, %v7889_v41  ;;  %v6039_v24 = vpop.f32.mrf.mxu1  ;;  %4156 = vmatmul.mubr.bf16.gmra.mxu1 %v5552_v6  ;;  %v8144_v41 = vld [vmem:[%s8772_s0 + $0x4e0] sm:$0xff]  ;;  %v5373_v15 = vld [vmem:[%s8772_s0 + $0x3f8] sm:$0xff] }
 0x125   :  { %6520 = vmatpush3.bf16.msra.mxu0 %v6844_v11  ;;  %v5994_v28 = vpop.f32.mrf.mxu0  ;;  %4090 = vmatprep.mubr.bf16.mxu0 %v5559_v45  ;;  %v5567_v50 = vcombine.high %v8139_v30, %v8144_v41  ;;  %v6858_v6 = vld [vmem:[%s8771_s1 + $0x780] sm:$0xff]  }
 0x126   :  { %4163 = vmatprep.mubr.bf16.mxu1 %v5561_v12  ;;  %v1091_v31 = vadd.f32 %v1090_v13, %v1082_v22  ;;  %v8146_v33 = vadd.f32 %v6038_v18, %v970_v23  ;;  %v5995_v34 = vadd.f32 %v5994_v28, %v5993_v19  ;;  %v6040_v62 = vpop.f32.mrf.mxu1  ;;  %6566 = vmatpush3.bf16.msra.mxu1 %v6846_v7  ;;  %v8200_v7 = vld [vmem:[%s8772_s0 + $0x3d0] sm:$0xff]  ;;  %v5369_v13 = vld [vmem:[%s8772_s0 + $0x3d8] sm:$0xff] }
 0x127   :  { %6521 = vmatprep.subr.bf16.mxu0 %v6847_v27  ;;  %v6041_v39 = vadd.f32 %v6040_v62, %v6039_v24  ;;  %v5996_v40 = vpop.f32.mrf.mxu0  ;;  %6567 = vmatprep.subr.bf16.mxu1 %v6849_v20  ;;  %v5372_v27 = vld [vmem:[%s8772_s0 + $0x3f0] sm:$0xff]  ;;  %v5566_v18 = vcombine.low %v8139_v30, %v8144_v41  ;;  %v5568_v19 = vcombine.low %v8151_v36, %v8156_v38 }
 0x128   :  { %8811 = vst [vmem:[#allocation7_spill] sm:$0xff] %v8146_v33  ;;  %v1066_v46 = vadd.f32 %v1065_v21, %v8146_v33  ;;  %v1083_v47 = vmul.f32 %v8146_v33, %v8146_v33  ;;  %v975_v48 = vadd.f32 %v5995_v34, %v7912_v59  ;;  %v6042_v49 = vpop.f32.mrf.mxu1  ;;  %v5539_v24 = vcombine.high %v8200_v7, %v5372_v27 }
 0x129   :  { %6522 = vmatpush3.bf16.msra.mxu0 %v6848_v17  ;;  %v5997_v52 = vpop.f32.mrf.mxu0  ;;  %v5541_v28 = vcombine.high %v5369_v13, %v5373_v15 }
 0x12a   :  { %6523 = vmatprep.subr.bf16.mxu0 %v6851_v29  ;;  %v1092_v56 = vadd.f32 %v1091_v31, %v1083_v47  ;;  %v8179_v59 = vadd.f32 %v6041_v39, %v975_v48  ;;  %v5998_v11 = vadd.f32 %v5997_v52, %v5996_v40  ;;  %v6043_v58 = vpop.f32.mrf.mxu1  ;;  %6568 = vmatpush3.bf16.msra.mxu1 %v6850_v26 }
 0x12b   :  { %v6044_v61 = vadd.f32 %v6043_v58, %v6042_v49  ;;  %v5999_v32 = vpop.f32.mrf.mxu0  ;;  %4091 = vmatmul.mubr.bf16.gmra.mxu0 %v5558_v42  ;;  %6569 = vmatprep.subr.bf16.mxu1 %v6853_v51  ;;  %v5376_v42 = vld [vmem:[%s8772_s0 + $0x410] sm:$0xff]  ;;  %v5381_v49 = vld [vmem:[%s8772_s0 + $0x438] sm:$0xff]  ;;  %v5538_v52 = vcombine.low %v8200_v7, %v5372_v27 }
 0x12c   :  { %8812 = vst [vmem:[#allocation8_spill] sm:$0xff] %v8179_v59  ;;  %v1067_v0 = vadd.f32 %v1066_v46, %v8179_v59  ;;  %v1084_v1 = vmul.f32 %v8179_v59, %v8179_v59  ;;  %v978_v2 = vadd.f32 %v5998_v11, %v7926_v8  ;;  %v6045_v3 = vpop.f32.mrf.mxu1  ;;  %4164 = vmatmul.mubr.bf16.gmra.mxu1 %v5560_v43  ;;  %v5380_v43 = vld [vmem:[%s8772_s0 + $0x430] sm:$0xff]  ;;  %v5385_v27 = vld [vmem:[%s8772_s0 + $0x458] sm:$0xff] }
 0x12d   :  { %4098 = vmatprep.mubr.bf16.mxu0 %v5567_v50  ;;  %v6000_v5 = vpop.f32.mrf.mxu0  ;;  %4171 = vmatprep.mubr.bf16.mxu1 %v5569_v53  ;;  %v5540_v11 = vcombine.low %v5369_v13, %v5373_v15  ;;  %v5547_v58 = vcombine.high %v5376_v42, %v5380_v43  ;;  %v5384_v7 = vld [vmem:[%s8772_s0 + $0x450] sm:$0xff]  ;;  %v5389_v13 = vld [vmem:[%s8772_s0 + $0x478] sm:$0xff] }
 0x12e   :  { %6524 = vmatpush3.bf16.msra.mxu0 %v6852_v44  ;;  %v1093_v8 = vadd.f32 %v1092_v56, %v1084_v1  ;;  %v8202_v9 = vadd.f32 %v6044_v61, %v978_v2  ;;  %v6001_v45 = vadd.f32 %v6000_v5, %v5999_v32  ;;  %v6046_v12 = vpop.f32.mrf.mxu1  ;;  %6570 = vmatpush3.bf16.msra.mxu1 %v6854_v55 }
 0x12f   :  { %6525 = vmatprep.subr.bf16.mxu0 %v6855_v60  ;;  %v6047_v16 = vadd.f32 %v6046_v12, %v6045_v3  ;;  %v6002_v17 = vpop.f32.mrf.mxu0  ;;  %6571 = vmatprep.subr.bf16.mxu1 %v6857_v4 }
 0x130   :  { %8813 = vst [vmem:[#allocation9_spill] sm:$0xff] %v8202_v9  ;;  %v1068_v20 = vadd.f32 %v1067_v0, %v8202_v9  ;;  %v1085_v21 = vmul.f32 %v8202_v9, %v8202_v9  ;;  %v983_v22 = vadd.f32 %v6001_v45, %v7946_v25  ;;  %v6048_v23 = vpop.f32.mrf.mxu1 }
 0x131   :  { %v6003_v26 = vpop.f32.mrf.mxu0 }
 0x132   :  { %6526 = vmatpush3.bf16.msra.mxu0 %v6856_v63  ;;  %v1094_v29 = vadd.f32 %v1093_v8, %v1085_v21  ;;  %v8222_v31 = vadd.f32 %v6047_v16, %v983_v22  ;;  %v6004_v30 = vadd.f32 %v6003_v26, %v6002_v17  ;;  %v6049_v41 = vpop.f32.mrf.mxu1  ;;  %6572 = vmatpush3.bf16.msra.mxu1 %v6858_v6  ;;  %v5388_v8 = vld [vmem:[%s8772_s0 + $0x470] sm:$0xff] }
 0x133   :  { %v6050_v34 = vadd.f32 %v6049_v41, %v6048_v23  ;;  %v6067_v62 = vpop.f32.mrf.mxu0  ;;  %4099 = vmatmul.mubr.bf16.gmra.mxu0 %v5566_v18  ;;  %v5546_v17 = vcombine.low %v5376_v42, %v5380_v43  ;;  %v5557_v23 = vcombine.high %v5385_v27, %v5389_v13 }
 0x134   :  { %8814 = vst [vmem:[#allocation10_spill] sm:$0xff] %v8222_v31  ;;  %v1069_v36 = vadd.f32 %v1068_v20, %v8222_v31  ;;  %v1086_v25 = vmul.f32 %v8222_v31, %v8222_v31  ;;  %v986_v38 = vadd.f32 %v6004_v30, %v7954_v37  ;;  %v6113_v39 = vpop.f32.mrf.mxu1  ;;  %4172 = vmatmul.mubr.bf16.gmra.mxu1 %v5568_v19  ;;  %v5377_v37 = vld [vmem:[%s8772_s0 + $0x418] sm:$0xff] }
 0x135   :  { %4212 = vmatprep.mubr.bf16.mxu0 %v5539_v24  ;;  %v6068_v40 = vpop.f32.mrf.mxu0  ;;  %4285 = vmatprep.mubr.bf16.mxu1 %v5541_v28  ;;  %v5549_v32 = vcombine.high %v5377_v37, %v5381_v49  ;;  %v5548_v19 = vcombine.low %v5377_v37, %v5381_v49  ;;  %v5555_v20 = vcombine.high %v5384_v7, %v5388_v8 }
 0x136   :  { %v1095_v44 = vadd.f32 %v1094_v29, %v1086_v25  ;;  %v8234_v46 = vadd.f32 %v6050_v34, %v986_v38  ;;  %v6069_v47 = vadd.f32 %v6068_v40, %v6067_v62  ;;  %v6114_v48 = vpop.f32.mrf.mxu1  ;;  %v5392_v62 = vld [vmem:[%s8772_s0 + $0x490] sm:$0xff]  ;;  %v5397_v40 = vld [vmem:[%s8772_s0 + $0x4b8] sm:$0xff] }
 0x137   :  { %v6115_v50 = vadd.f32 %v6114_v48, %v6113_v39  ;;  %v6070_v51 = vpop.f32.mrf.mxu0  ;;  %v5393_v39 = vld [vmem:[%s8772_s0 + $0x498] sm:$0xff]  ;;  %v5556_v48 = vcombine.low %v5385_v27, %v5389_v13 }
 0x138   :  { %8815 = vst [vmem:[#allocation11_spill] sm:$0xff] %v8234_v46  ;;  %v8244_v53 = vadd.f32 %v1069_v36, %v8234_v46  ;;  %v1087_v55 = vmul.f32 %v8234_v46, %v8234_v46  ;;  %v6116_v56 = vpop.f32.mrf.mxu1  ;;  %v5396_v36 = vld [vmem:[%s8772_s0 + $0x4b0] sm:$0xff]  ;;  %v5564_v27 = vcombine.low %v5393_v39, %v5397_v40 }
 0x139   :  { %v8248_v60 = vadd.f32 %v6115_v50, %v6069_v47  ;;  %v6071_v61 = vpop.f32.mrf.mxu0  ;;  %v5563_v37 = vcombine.high %v5392_v62, %v5396_v36 }
 0x13a   :  { %v8250_v63 = vadd.f32 %v1095_v44, %v1087_v55  ;;  %v6072_v0 = vadd.f32 %v6071_v61, %v6070_v51  ;;  %v6117_v1 = vpop.f32.mrf.mxu1  ;;  %v5554_v44 = vcombine.low %v5384_v7, %v5388_v8  ;;  %v5565_v51 = vcombine.high %v5393_v39, %v5397_v40 }
 0x13b   :  { %v6118_v2 = vadd.f32 %v6117_v1, %v6116_v56  ;;  %v6073_v3 = vpop.f32.mrf.mxu0  ;;  %4213 = vmatmul.mubr.bf16.vlgmr.msra.gmra.mxu0 %v5538_v52  ;;  %v5404_v1 = vld [vmem:[%s8772_s0 + $0x4f0] sm:$0xff] }
 0x13c   :  { %v6119_v4 = vpop.f32.mrf.mxu1  ;;  %4286 = vmatmul.mubr.bf16.vlgmr.msra.gmra.mxu1 %v5540_v11  ;;  %4220 = vmatprep.mubr.bf16.mxu0 %v5547_v58 }
 0x13d   :  { %v8252_v5 = vadd.f32 %v6118_v2, %v6072_v0  ;;  %v6074_v6 = vpop.f32.mrf.mxu0  ;;  %4293 = vmatprep.mubr.bf16.mxu1 %v5549_v32  ;;  %v5400_v0 = vld [vmem:[%s8772_s0 + $0x4d0] sm:$0xff] }
 0x13e   :  { %v6075_v45 = vadd.f32 %v6074_v6, %v6073_v3  ;;  %v6120_v12 = vpop.f32.mrf.mxu1  ;;  %v5405_v6 = vld [vmem:[%s8772_s0 + $0x4f8] sm:$0xff]  ;;  %v5571_v13 = vcombine.high %v5400_v0, %v5404_v1 }
 0x13f   :  { %v6121_v15 = vadd.f32 %v6120_v12, %v6119_v4  ;;  %v6076_v16 = vpop.f32.mrf.mxu0  ;;  %v5401_v4 = vld [vmem:[%s8772_s0 + $0x4d8] sm:$0xff] }
 0x140   :  { %v6122_v18 = vpop.f32.mrf.mxu1 }
 0x141   :  { %v8266_v21 = vadd.f32 %v6121_v15, %v6075_v45  ;;  %v6077_v22 = vpop.f32.mrf.mxu0  ;;  %v5562_v45 = vcombine.low %v5392_v62, %v5396_v36  ;;  %v5570_v62 = vcombine.low %v5400_v0, %v5404_v1 }
 0x142   :  { %v6078_v24 = vadd.f32 %v6077_v22, %v6076_v16  ;;  %v6123_v26 = vpop.f32.mrf.mxu1 }
 0x143   :  { %v6124_v28 = vadd.f32 %v6123_v26, %v6122_v18  ;;  %v6079_v29 = vpop.f32.mrf.mxu0  ;;  %4221 = vmatmul.mubr.bf16.gmra.mxu0 %v5546_v17  ;;  %v5573_v17 = vcombine.high %v5401_v4, %v5405_v6 }
 0x144   :  { %v6125_v30 = vpop.f32.mrf.mxu1  ;;  %4294 = vmatmul.mubr.bf16.gmra.mxu1 %v5548_v19  ;;  %4228 = vmatprep.mubr.bf16.mxu0 %v5555_v20 }
 0x145   :  { %v8268_v41 = vadd.f32 %v6124_v28, %v6078_v24  ;;  %v6080_v34 = vpop.f32.mrf.mxu0  ;;  %4301 = vmatprep.mubr.bf16.mxu1 %v5557_v23 }
 0x146   :  { %v6081_v25 = vadd.f32 %v6080_v34, %v6079_v29  ;;  %v6126_v38 = vpop.f32.mrf.mxu1 }
 0x147   :  { %v6127_v42 = vadd.f32 %v6126_v38, %v6125_v30  ;;  %v6082_v43 = vpop.f32.mrf.mxu0 }
 0x148   :  { %v6128_v47 = vpop.f32.mrf.mxu1 }
 0x149   :  { %v8282_v49 = vadd.f32 %v6127_v42, %v6081_v25  ;;  %v6083_v50 = vpop.f32.mrf.mxu0  ;;  %v5572_v25 = vcombine.low %v5401_v4, %v5405_v6 }
 0x14a   :  { %v6084_v52 = vadd.f32 %v6083_v50, %v6082_v43  ;;  %v6129_v55 = vpop.f32.mrf.mxu1 }
 0x14b   :  { %v6130_v56 = vadd.f32 %v6129_v55, %v6128_v47  ;;  %v6085_v11 = vpop.f32.mrf.mxu0  ;;  %4229 = vmatmul.mubr.bf16.gmra.mxu0 %v5554_v44 }
 0x14c   :  { %v6131_v58 = vpop.f32.mrf.mxu1  ;;  %4302 = vmatmul.mubr.bf16.gmra.mxu1 %v5556_v48  ;;  %4236 = vmatprep.mubr.bf16.mxu0 %v5563_v37 }
 0x14d   :  { %v8284_v61 = vadd.f32 %v6130_v56, %v6084_v52  ;;  %v6086_v32 = vpop.f32.mrf.mxu0  ;;  %4309 = vmatprep.mubr.bf16.mxu1 %v5565_v51 }
 0x14e   :  { %v6087_v2 = vadd.f32 %v6086_v32, %v6085_v11  ;;  %v6132_v3 = vpop.f32.mrf.mxu1 }
 0x14f   :  { %v6133_v7 = vadd.f32 %v6132_v3, %v6131_v58  ;;  %v6088_v8 = vpop.f32.mrf.mxu0 }
 0x150   :  { %v6134_v12 = vpop.f32.mrf.mxu1 }
 0x151   :  { %v8298_v15 = vadd.f32 %v6133_v7, %v6087_v2  ;;  %v6089_v16 = vpop.f32.mrf.mxu0 }
 0x152   :  { %v6090_v18 = vadd.f32 %v6089_v16, %v6088_v8  ;;  %v6135_v19 = vpop.f32.mrf.mxu1 }
 0x153   :  { %v6136_v20 = vadd.f32 %v6135_v19, %v6134_v12  ;;  %v6091_v22 = vpop.f32.mrf.mxu0  ;;  %4237 = vmatmul.mubr.bf16.gmra.mxu0 %v5562_v45 }
 0x154   :  { %v6137_v23 = vpop.f32.mrf.mxu1  ;;  %4310 = vmatmul.mubr.bf16.gmra.mxu1 %v5564_v27  ;;  %4244 = vmatprep.mubr.bf16.mxu0 %v5571_v13 }
 0x155   :  { %v8300_v24 = vadd.f32 %v6136_v20, %v6090_v18  ;;  %v6092_v26 = vpop.f32.mrf.mxu0  ;;  %4317 = vmatprep.mubr.bf16.mxu1 %v5573_v17 }
 0x156   :  { %v6093_v28 = vadd.f32 %v6092_v26, %v6091_v22  ;;  %v6138_v29 = vpop.f32.mrf.mxu1 }
 0x157   :  { %v6139_v30 = vadd.f32 %v6138_v29, %v6137_v23  ;;  %v6094_v34 = vpop.f32.mrf.mxu0 }
 0x158   :  { %v6140_v36 = vpop.f32.mrf.mxu1 }
 0x159   :  { %v8302_v38 = vadd.f32 %v6139_v30, %v6093_v28  ;;  %v6095_v39 = vpop.f32.mrf.mxu0 }
 0x15a   :  { %v6096_v40 = vadd.f32 %v6095_v39, %v6094_v34  ;;  %v6141_v42 = vpop.f32.mrf.mxu1 }
 0x15b   :  { %v6142_v43 = vadd.f32 %v6141_v42, %v6140_v36  ;;  %v6159_v44 = vpop.f32.mrf.mxu0  ;;  %4245 = vmatmul.mubr.bf16.gmra.mxu0 %v5570_v62 }
 0x15c   :  { %v6205_v47 = vpop.f32.mrf.mxu1  ;;  %4318 = vmatmul.mubr.bf16.gmra.mxu1 %v5572_v25 }
 0x15d   :  { %v8304_v48 = vadd.f32 %v6142_v43, %v6096_v40  ;;  %v6160_v37 = vpop.f32.mrf.mxu0 }
 0x15e   :  { %v6161_v50 = vadd.f32 %v6160_v37, %v6159_v44  ;;  %v6206_v51 = vpop.f32.mrf.mxu1 }
 0x15f   :  { %v6207_v52 = vadd.f32 %v6206_v51, %v6205_v47  ;;  %v6162_v55 = vpop.f32.mrf.mxu0 }
 0x160   :  { %v2039_v56 = vadd.f32 %v6161_v50, %v8248_v60  ;;  %v6208_v11 = vpop.f32.mrf.mxu1 }
 0x161   :  { %v6163_v58 = vpop.f32.mrf.mxu0 }
 0x162   :  { %v8307_v32 = vadd.f32 %v6207_v52, %v2039_v56  ;;  %v6164_v0 = vadd.f32 %v6163_v58, %v6162_v55  ;;  %v6209_v1 = vpop.f32.mrf.mxu1 }
 0x163   :  { %v6210_v2 = vadd.f32 %v6209_v1, %v6208_v11  ;;  %v6165_v3 = vpop.f32.mrf.mxu0 }
 0x164   :  { %8816 = vst [vmem:[#allocation12_spill] sm:$0xff] %v8307_v32  ;;  %v2042_v4 = vadd.f32 %v6164_v0, %v8252_v5  ;;  %v6211_v6 = vpop.f32.mrf.mxu1  ;;  %v2166_v40 = vmul.f32 %v8307_v32, %v8307_v32 }
 0x165   :  { %v6166_v7 = vpop.f32.mrf.mxu0 }
 0x166   :  { %v8310_v8 = vadd.f32 %v6210_v2, %v2042_v4  ;;  %v6167_v45 = vadd.f32 %v6166_v7, %v6165_v3  ;;  %v6212_v12 = vpop.f32.mrf.mxu1 }
 0x167   :  { %v6213_v27 = vadd.f32 %v6212_v12, %v6211_v6  ;;  %v6168_v13 = vpop.f32.mrf.mxu0 }
 0x168   :  { %8817 = vst [vmem:[#allocation13_spill] sm:$0xff] %v8310_v8  ;;  %v2047_v60 = vadd.f32 %v6167_v45, %v8266_v21  ;;  %v6214_v16 = vpop.f32.mrf.mxu1  ;;  %v2167_v62 = vmul.f32 %v8310_v8, %v8310_v8  ;;  %v2150_v43 = vadd.f32 %v8310_v8, %v8307_v32 }
 0x169   :  { %v6169_v17 = vpop.f32.mrf.mxu0 }
 0x16a   :  { %v8313_v18 = vadd.f32 %v6213_v27, %v2047_v60  ;;  %v6170_v19 = vadd.f32 %v6169_v17, %v6168_v13  ;;  %v6215_v20 = vpop.f32.mrf.mxu1  ;;  %v2176_v50 = vadd.f32 %v2167_v62, %v2166_v40 }
 0x16b   :  { %v6216_v22 = vadd.f32 %v6215_v20, %v6214_v16  ;;  %v6171_v23 = vpop.f32.mrf.mxu0 }
 0x16c   :  { %8818 = vst [vmem:[#allocation14_spill] sm:$0xff] %v8313_v18  ;;  %v2050_v5 = vadd.f32 %v6170_v19, %v8268_v41  ;;  %v6217_v26 = vpop.f32.mrf.mxu1  ;;  %v2168_v41 = vmul.f32 %v8313_v18, %v8313_v18 }
 0x16d   :  { %v6172_v28 = vpop.f32.mrf.mxu0 }
 0x16e   :  { %v8316_v29 = vadd.f32 %v6216_v22, %v2050_v5  ;;  %v6173_v30 = vadd.f32 %v6172_v28, %v6171_v23  ;;  %v6218_v34 = vpop.f32.mrf.mxu1  ;;  %v2177_v58 = vadd.f32 %v2176_v50, %v2168_v41 }
 0x16f   :  { %v6219_v21 = vadd.f32 %v6218_v34, %v6217_v26  ;;  %v6174_v36 = vpop.f32.mrf.mxu0 }
 0x170   :  { %8819 = vst [vmem:[#allocation15_spill] sm:$0xff] %v8316_v29  ;;  %v2055_v25 = vadd.f32 %v6173_v30, %v8282_v49  ;;  %v6220_v39 = vpop.f32.mrf.mxu1  ;;  %v2151_v49 = vadd.f32 %v2150_v43, %v8313_v18  ;;  %v2169_v55 = vmul.f32 %v8316_v29, %v8316_v29  ;;  %v1071_v43 = vrot.slane %v8244_v53, 4 }
 0x171   :  { %v6175_v42 = vpop.f32.mrf.mxu0 }
 0x172   :  { %v8327_v44 = vadd.f32 %v6219_v21, %v2055_v25  ;;  %v6176_v47 = vadd.f32 %v6175_v42, %v6174_v36  ;;  %v6221_v37 = vpop.f32.mrf.mxu1  ;;  %v2152_v1 = vadd.f32 %v2151_v49, %v8316_v29  ;;  %v2178_v12 = vadd.f32 %v2177_v58, %v2169_v55 }
 0x173   :  { %v6222_v51 = vadd.f32 %v6221_v37, %v6220_v39  ;;  %v6177_v52 = vpop.f32.mrf.mxu0 }
 0x174   :  { %8820 = vst [vmem:[#allocation16_spill] sm:$0xff] %v8327_v44  ;;  %v2058_v56 = vadd.f32 %v6176_v47, %v8284_v61  ;;  %v6223_v11 = vpop.f32.mrf.mxu1  ;;  %v2170_v2 = vmul.f32 %v8327_v44, %v8327_v44  ;;  %v2153_v27 = vadd.f32 %v2152_v1, %v8327_v44  ;;  %v1072_v1 = vadd.f32 %v1071_v43, %v8244_v53 }
 0x175   :  { %v6178_v0 = vpop.f32.mrf.mxu0 }
 0x176   :  { %v8336_v3 = vadd.f32 %v6222_v51, %v2058_v56  ;;  %v6179_v4 = vadd.f32 %v6178_v0, %v6177_v52  ;;  %v6224_v6 = vpop.f32.mrf.mxu1  ;;  %v2179_v17 = vadd.f32 %v2178_v12, %v2170_v2  ;;  %v1097_v52 = vrot.slane %v8250_v63, 4 }
 0x177   :  { %v6225_v7 = vadd.f32 %v6224_v6, %v6223_v11  ;;  %v6180_v45 = vpop.f32.mrf.mxu0 }
 0x178   :  { %8821 = vst [vmem:[#allocation17_spill] sm:$0xff] %v8336_v3  ;;  %v2171_v61 = vmul.f32 %v8336_v3, %v8336_v3  ;;  %v2063_v13 = vadd.f32 %v6179_v4, %v8298_v15  ;;  %v6226_v60 = vpop.f32.mrf.mxu1  ;;  %v2154_v19 = vadd.f32 %v2153_v27, %v8336_v3 }
 0x179   :  { %v6181_v16 = vpop.f32.mrf.mxu0 }
 0x17a   :  { %v8343_v20 = vadd.f32 %v6225_v7, %v2063_v13  ;;  %v6182_v22 = vadd.f32 %v6181_v16, %v6180_v45  ;;  %v6227_v23 = vpop.f32.mrf.mxu1  ;;  %v2180_v28 = vadd.f32 %v2179_v17, %v2171_v61  ;;  %v1098_v45 = vadd.f32 %v1097_v52, %v8250_v63 }
 0x17b   :  { %v6228_v5 = vadd.f32 %v6227_v23, %v6226_v60  ;;  %v6183_v26 = vpop.f32.mrf.mxu0  ;;  %v1073_v17 = vrot.slane %v1072_v1, 2 }
 0x17c   :  { %8822 = vst [vmem:[#allocation18_spill] sm:$0xff] %v8343_v20  ;;  %v2155_v30 = vadd.f32 %v2154_v19, %v8343_v20  ;;  %v2172_v34 = vmul.f32 %v8343_v20, %v8343_v20  ;;  %v2066_v62 = vadd.f32 %v6182_v22, %v8300_v24  ;;  %v6229_v15 = vpop.f32.mrf.mxu1 }
 0x17d   :  { %v6184_v21 = vpop.f32.mrf.mxu0 }
 0x17e   :  { %v2181_v36 = vadd.f32 %v2180_v28, %v2172_v34  ;;  %v8349_v25 = vadd.f32 %v6228_v5, %v2066_v62  ;;  %v6185_v39 = vadd.f32 %v6184_v21, %v6183_v26  ;;  %v6230_v40 = vpop.f32.mrf.mxu1  ;;  %v1099_v5 = vrot.slane %v1098_v45, 2 }
 0x17f   :  { %v6231_v41 = vadd.f32 %v6230_v40, %v6229_v15  ;;  %v6186_v42 = vpop.f32.mrf.mxu0  ;;  %v1074_v15 = vadd.f32 %v1073_v17, %v1072_v1 }
 0x180   :  { %8823 = vst [vmem:[#allocation19_spill] sm:$0xff] %v8349_v25  ;;  %v2156_v47 = vadd.f32 %v2155_v30, %v8349_v25  ;;  %v2173_v37 = vmul.f32 %v8349_v25, %v8349_v25  ;;  %v2071_v50 = vadd.f32 %v6185_v39, %v8302_v38  ;;  %v6232_v51 = vpop.f32.mrf.mxu1 }
 0x181   :  { %v6187_v24 = vpop.f32.mrf.mxu0  ;;  %v1075_v52 = vrot.slane %v1074_v15, 1 }
 0x182   :  { %v2182_v49 = vadd.f32 %v2181_v36, %v2173_v37  ;;  %v8357_v55 = vadd.f32 %v6231_v41, %v2071_v50  ;;  %v6188_v56 = vadd.f32 %v6187_v24, %v6186_v42  ;;  %v6233_v11 = vpop.f32.mrf.mxu1  ;;  %v1100_v42 = vadd.f32 %v1099_v5, %v1098_v45 }
 0x183   :  { %v6234_v58 = vadd.f32 %v6233_v11, %v6232_v51  ;;  %v6251_v0 = vpop.f32.mrf.mxu0 }
 0x184   :  { %8824 = vst [vmem:[#allocation20_spill] sm:$0xff] %v8357_v55  ;;  %v2157_v2 = vadd.f32 %v2156_v47, %v8357_v55  ;;  %v2174_v4 = vmul.f32 %v8357_v55, %v8357_v55  ;;  %v2074_v38 = vadd.f32 %v6188_v56, %v8304_v48  ;;  %v6297_v6 = vpop.f32.mrf.mxu1  ;;  %v1101_v1 = vrot.slane %v1100_v42, 1 }
 0x185   :  { %v6252_v7 = vpop.f32.mrf.mxu0 }
 0x186   :  { %v2183_v12 = vadd.f32 %v2182_v49, %v2174_v4  ;;  %v8365_v27 = vadd.f32 %v6234_v58, %v2074_v38  ;;  %v6253_v61 = vadd.f32 %v6252_v7, %v6251_v0  ;;  %v6298_v13 = vpop.f32.mrf.mxu1 }
 0x187   :  { %v6299_v60 = vadd.f32 %v6298_v13, %v6297_v6  ;;  %v6254_v16 = vpop.f32.mrf.mxu0 }
 0x188   :  { %8825 = vst [vmem:[#allocation21_spill] sm:$0xff] %v8365_v27  ;;  %v2158_v53 = vadd.f32 %v2157_v2, %v8365_v27  ;;  %v2175_v19 = vmul.f32 %v8365_v27, %v8365_v27  ;;  %v6300_v22 = vpop.f32.mrf.mxu1 }
 0x189   :  { %v8370_v23 = vadd.f32 %v6299_v60, %v6253_v61  ;;  %v6255_v48 = vpop.f32.mrf.mxu0 }
 0x18a   :  { %v2159_v26 = vrot.slane %v2158_v53, 4  ;;  %v2184_v63 = vadd.f32 %v2183_v12, %v2175_v19  ;;  %v6256_v28 = vadd.f32 %v6255_v48, %v6254_v16  ;;  %v6301_v30 = vpop.f32.mrf.mxu1  ;;  %v1076_v12 = vadd.f32 %v1075_v52, %v1074_v15 }
 0x18b   :  { %v6302_v34 = vadd.f32 %v6301_v30, %v6300_v22  ;;  %v6257_v62 = vpop.f32.mrf.mxu0 }
 0x18c   :  { %v2160_v21 = vadd.f32 %v2159_v26, %v2158_v53  ;;  %v2185_v36 = vrot.slane %v2184_v63, 4  ;;  %v6303_v39 = vpop.f32.mrf.mxu1  ;;  %v1102_v53 = vadd.f32 %v1101_v1, %v1100_v42 }
 0x18d   :  { %v8372_v40 = vadd.f32 %v6302_v34, %v6256_v28  ;;  %v6258_v41 = vpop.f32.mrf.mxu0 }
 0x18e   :  { %v2161_v43 = vrot.slane %v2160_v21, 2  ;;  %v2186_v47 = vadd.f32 %v2185_v36, %v2184_v63  ;;  %v6259_v37 = vadd.f32 %v6258_v41, %v6257_v62  ;;  %v6304_v50 = vpop.f32.mrf.mxu1 }
 0x18f   :  { %v6305_v51 = vadd.f32 %v6304_v50, %v6303_v39  ;;  %v6260_v24 = vpop.f32.mrf.mxu0 }
 0x190   :  { %v2162_v49 = vadd.f32 %v2161_v43, %v2160_v21  ;;  %v2187_v56 = vrot.slane %v2186_v47, 2  ;;  %v6306_v11 = vpop.f32.mrf.mxu1 }
 0x191   :  { %v8374_v58 = vadd.f32 %v6305_v51, %v6259_v37  ;;  %v6261_v0 = vpop.f32.mrf.mxu0 }
 0x192   :  { %v2163_v2 = vrot.slane %v2162_v49, 1  ;;  %v2188_v4 = vadd.f32 %v2187_v56, %v2186_v47  ;;  %v6262_v38 = vadd.f32 %v6261_v0, %v6260_v24  ;;  %v6307_v6 = vpop.f32.mrf.mxu1 }
 0x193   :  { %v6308_v7 = vadd.f32 %v6307_v6, %v6306_v11  ;;  %v6263_v45 = vpop.f32.mrf.mxu0 }
 0x194   :  { %v2164_v61 = vadd.f32 %v2163_v2, %v2162_v49  ;;  %v2189_v13 = vrot.slane %v2188_v4, 1  ;;  %v6309_v60 = vpop.f32.mrf.mxu1 }
 0x195   :  { %v8376_v16 = vadd.f32 %v6308_v7, %v6262_v38  ;;  %v6264_v17 = vpop.f32.mrf.mxu0 }
 0x196   :  { %v8378_v19 = vadd.f32 %v2164_v61, %v1076_v12  ;;  %v2190_v22 = vadd.f32 %v2189_v13, %v2188_v4  ;;  %v6265_v48 = vadd.f32 %v6264_v17, %v6263_v45  ;;  %v6310_v5 = vpop.f32.mrf.mxu1 }
 0x197   :  { %v6311_v26 = vadd.f32 %v6310_v5, %v6309_v60  ;;  %v6266_v63 = vpop.f32.mrf.mxu0 }
 0x198   :  { %v8380_v28 = vadd.f32 %v2190_v22, %v1102_v53  ;;  %v6312_v30 = vpop.f32.mrf.mxu1 }
 0x199   :  { %v8382_v34 = vadd.f32 %v6311_v26, %v6265_v48  ;;  %v6267_v62 = vpop.f32.mrf.mxu0 }
 0x19a   :  { %v6268_v15 = vadd.f32 %v6267_v62, %v6266_v63  ;;  %v6313_v21 = vpop.f32.mrf.mxu1 }
 0x19b   :  { %v6314_v36 = vadd.f32 %v6313_v21, %v6312_v30  ;;  %v6269_v39 = vpop.f32.mrf.mxu0 }
 0x19c   :  { %v6315_v41 = vpop.f32.mrf.mxu1 }
 0x19d   :  { %v8384_v43 = vadd.f32 %v6314_v36, %v6268_v15  ;;  %v6270_v42 = vpop.f32.mrf.mxu0 }
 0x19e   :  { %v6271_v47 = vadd.f32 %v6270_v42, %v6269_v39  ;;  %v6316_v37 = vpop.f32.mrf.mxu1 }
 0x19f   :  { %v6317_v50 = vadd.f32 %v6316_v37, %v6315_v41  ;;  %v6272_v51 = vpop.f32.mrf.mxu0 }
 0x1a0   :  { %v6318_v24 = vpop.f32.mrf.mxu1 }
 0x1a1   :  { %v8386_v52 = vadd.f32 %v6317_v50, %v6271_v47  ;;  %v6273_v49 = vpop.f32.mrf.mxu0 }
 0x1a2   :  { %v6274_v56 = vadd.f32 %v6273_v49, %v6272_v51  ;;  %v6319_v11 = vpop.f32.mrf.mxu1 }
 0x1a3   :  { %v6320_v0 = vadd.f32 %v6319_v11, %v6318_v24  ;;  %v6275_v1 = vpop.f32.mrf.mxu0 }
 0x1a4   :  { %v6321_v2 = vpop.f32.mrf.mxu1 }
 0x1a5   :  { %v8388_v4 = vadd.f32 %v6320_v0, %v6274_v56  ;;  %v6276_v38 = vpop.f32.mrf.mxu0 }
 0x1a6   :  { %v6277_v6 = vadd.f32 %v6276_v38, %v6275_v1  ;;  %v6322_v7 = vpop.f32.mrf.mxu1 }
 0x1a7   :  { %v6323_v45 = vadd.f32 %v6322_v7, %v6321_v2  ;;  %v6278_v12 = vpop.f32.mrf.mxu0 }
 0x1a8   :  { %v6324_v61 = vpop.f32.mrf.mxu1 }
 0x1a9   :  { %v8390_v13 = vadd.f32 %v6323_v45, %v6277_v6  ;;  %v6279_v60 = vpop.f32.mrf.mxu0 }
 0x1aa   :  { %v6280_v17 = vadd.f32 %v6279_v60, %v6278_v12  ;;  %v6325_v53 = vpop.f32.mrf.mxu1 }
 0x1ab   :  { %v6326_v22 = vadd.f32 %v6325_v53, %v6324_v61  ;;  %v6343_v48 = vpop.f32.mrf.mxu0 }
 0x1ac   :  { %v6389_v5 = vpop.f32.mrf.mxu1 }
 0x1ad   :  { %v8392_v26 = vadd.f32 %v6326_v22, %v6280_v17  ;;  %v6344_v63 = vpop.f32.mrf.mxu0 }
 0x1ae   :  { %v6345_v30 = vadd.f32 %v6344_v63, %v6343_v48  ;;  %v6390_v62 = vpop.f32.mrf.mxu1 }
 0x1af   :  { %v6391_v15 = vadd.f32 %v6390_v62, %v6389_v5  ;;  %v6346_v21 = vpop.f32.mrf.mxu0 }
 0x1b0   :  { %v3127_v36 = vadd.f32 %v6345_v30, %v8370_v23  ;;  %v6392_v39 = vpop.f32.mrf.mxu1 }
 0x1b1   :  { %v6347_v41 = vpop.f32.mrf.mxu0 }
 0x1b2   :  { %v8395_v42 = vadd.f32 %v6391_v15, %v3127_v36  ;;  %v6348_v47 = vadd.f32 %v6347_v41, %v6346_v21  ;;  %v6393_v37 = vpop.f32.mrf.mxu1 }
 0x1b3   :  { %v6394_v50 = vadd.f32 %v6393_v37, %v6392_v39  ;;  %v6349_v51 = vpop.f32.mrf.mxu0 }
 0x1b4   :  { %8826 = vst [vmem:[#allocation22_spill] sm:$0xff] %v8395_v42  ;;  %v3130_v24 = vadd.f32 %v6348_v47, %v8372_v40  ;;  %v6395_v49 = vpop.f32.mrf.mxu1 }
 0x1b5   :  { %v6350_v56 = vpop.f32.mrf.mxu0 }
 0x1b6   :  { %v8398_v11 = vadd.f32 %v6394_v50, %v3130_v24  ;;  %v6351_v0 = vadd.f32 %v6350_v56, %v6349_v51  ;;  %v6396_v1 = vpop.f32.mrf.mxu1 }
 0x1b7   :  { %v6397_v2 = vadd.f32 %v6396_v1, %v6395_v49  ;;  %v6352_v38 = vpop.f32.mrf.mxu0 }
 0x1b8   :  { %8827 = vst [vmem:[#allocation23_spill] sm:$0xff] %v8398_v11  ;;  %v3135_v23 = vadd.f32 %v6351_v0, %v8374_v58  ;;  %v6398_v6 = vpop.f32.mrf.mxu1  ;;  %v3255_v51 = vmul.f32 %v8398_v11, %v8398_v11 }
 0x1b9   :  { %v6353_v7 = vpop.f32.mrf.mxu0 }
 0x1ba   :  { %v8401_v45 = vadd.f32 %v6397_v2, %v3135_v23  ;;  %v6354_v12 = vadd.f32 %v6353_v7, %v6352_v38  ;;  %v6399_v61 = vpop.f32.mrf.mxu1 }
 0x1bb   :  { %v6400_v60 = vadd.f32 %v6399_v61, %v6398_v6  ;;  %v6355_v17 = vpop.f32.mrf.mxu0 }
 0x1bc   :  { %8828 = vst [vmem:[#allocation24_spill] sm:$0xff] %v8401_v45  ;;  %v3138_v40 = vadd.f32 %v6354_v12, %v8376_v16  ;;  %v6401_v53 = vpop.f32.mrf.mxu1  ;;  %v3256_v1 = vmul.f32 %v8401_v45, %v8401_v45 }
 0x1bd   :  { %v6356_v22 = vpop.f32.mrf.mxu0 }
 0x1be   :  { %v8404_v48 = vadd.f32 %v6400_v60, %v3138_v40  ;;  %v6357_v5 = vadd.f32 %v6356_v22, %v6355_v17  ;;  %v6402_v63 = vpop.f32.mrf.mxu1 }
 0x1bf   :  { %v6403_v30 = vadd.f32 %v6402_v63, %v6401_v53  ;;  %v6358_v62 = vpop.f32.mrf.mxu0 }
 0x1c0   :  { %8829 = vst [vmem:[#allocation25_spill] sm:$0xff] %v8404_v48  ;;  %v3143_v58 = vadd.f32 %v6357_v5, %v8382_v34  ;;  %v6404_v15 = vpop.f32.mrf.mxu1  ;;  %v3254_v34 = vmul.f32 %v8395_v42, %v8395_v42  ;;  %v3257_v12 = vmul.f32 %v8404_v48, %v8404_v48 }
 0x1c1   :  { %v6359_v21 = vpop.f32.mrf.mxu0 }
 0x1c2   :  { %v8407_v36 = vadd.f32 %v6403_v30, %v3143_v58  ;;  %v6360_v39 = vadd.f32 %v6359_v21, %v6358_v62  ;;  %v6405_v41 = vpop.f32.mrf.mxu1  ;;  %v3264_v7 = vadd.f32 %v3255_v51, %v3254_v34 }
 0x1c3   :  { %v6406_v47 = vadd.f32 %v6405_v41, %v6404_v15  ;;  %v6361_v37 = vpop.f32.mrf.mxu0 }
 0x1c4   :  { %8830 = vst [vmem:[#allocation26_spill] sm:$0xff] %v8407_v36  ;;  %v3146_v16 = vadd.f32 %v6360_v39, %v8384_v43  ;;  %v6407_v50 = vpop.f32.mrf.mxu1  ;;  %v3238_v43 = vadd.f32 %v8398_v11, %v8395_v42  ;;  %v3265_v22 = vadd.f32 %v3264_v7, %v3256_v1  ;;  %v3258_v5 = vmul.f32 %v8407_v36, %v8407_v36 }
 0x1c5   :  { %v6362_v24 = vpop.f32.mrf.mxu0 }
 0x1c6   :  { %v8412_v49 = vadd.f32 %v6406_v47, %v3146_v16  ;;  %v6363_v56 = vadd.f32 %v6362_v24, %v6361_v37  ;;  %v6408_v0 = vpop.f32.mrf.mxu1  ;;  %v3239_v60 = vadd.f32 %v3238_v43, %v8401_v45  ;;  %v3266_v15 = vadd.f32 %v3265_v22, %v3257_v12 }
 0x1c7   :  { %v6409_v2 = vadd.f32 %v6408_v0, %v6407_v50  ;;  %v6364_v38 = vpop.f32.mrf.mxu0 }
 0x1c8   :  { %8831 = vst [vmem:[#allocation27_spill] sm:$0xff] %v8412_v49  ;;  %v3151_v23 = vadd.f32 %v6363_v56, %v8386_v52  ;;  %v6410_v6 = vpop.f32.mrf.mxu1  ;;  %v3240_v52 = vadd.f32 %v3239_v60, %v8404_v48  ;;  %v3259_v21 = vmul.f32 %v8412_v49, %v8412_v49  ;;  %v3267_v50 = vadd.f32 %v3266_v15, %v3258_v5 }
 0x1c9   :  { %v6365_v61 = vpop.f32.mrf.mxu0 }
 0x1ca   :  { %v8424_v17 = vadd.f32 %v6409_v2, %v3151_v23  ;;  %v6366_v40 = vadd.f32 %v6365_v61, %v6364_v38  ;;  %v6411_v53 = vpop.f32.mrf.mxu1  ;;  %v3241_v41 = vadd.f32 %v3240_v52, %v8407_v36  ;;  %v3268_v1 = vadd.f32 %v3267_v50, %v3259_v21 }
 0x1cb   :  { %v6412_v63 = vadd.f32 %v6411_v53, %v6410_v6  ;;  %v6367_v30 = vpop.f32.mrf.mxu0 }
 0x1cc   :  { %8832 = vst [vmem:[#allocation28_spill] sm:$0xff] %v8424_v17  ;;  %v3154_v62 = vadd.f32 %v6366_v40, %v8388_v4  ;;  %v6413_v58 = vpop.f32.mrf.mxu1  ;;  %v3242_v56 = vadd.f32 %v3241_v41, %v8412_v49  ;;  %v3260_v4 = vmul.f32 %v8424_v17, %v8424_v17 }
 0x1cd   :  { %v6368_v39 = vpop.f32.mrf.mxu0 }
 0x1ce   :  { %v8433_v47 = vadd.f32 %v6412_v63, %v3154_v62  ;;  %v6369_v37 = vadd.f32 %v6368_v39, %v6367_v30  ;;  %v6414_v16 = vpop.f32.mrf.mxu1  ;;  %v3243_v38 = vadd.f32 %v3242_v56, %v8424_v17  ;;  %v3269_v60 = vadd.f32 %v3268_v1, %v3260_v4 }
 0x1cf   :  { %v6415_v51 = vadd.f32 %v6414_v16, %v6413_v58  ;;  %v6370_v24 = vpop.f32.mrf.mxu0 }
 0x1d0   :  { %8833 = vst [vmem:[#allocation29_spill] sm:$0xff] %v8433_v47  ;;  %v3159_v0 = vadd.f32 %v6369_v37, %v8390_v13  ;;  %v6416_v34 = vpop.f32.mrf.mxu1  ;;  %v3261_v43 = vmul.f32 %v8433_v47, %v8433_v47  ;;  %v3244_v40 = vadd.f32 %v3243_v38, %v8433_v47 }
 0x1d1   :  { %v6371_v2 = vpop.f32.mrf.mxu0 }
 0x1d2   :  { %v8442_v23 = vadd.f32 %v6415_v51, %v3159_v0  ;;  %v6372_v6 = vadd.f32 %v6371_v2, %v6370_v24  ;;  %v6417_v7 = vpop.f32.mrf.mxu1  ;;  %v3270_v63 = vadd.f32 %v3269_v60, %v3261_v43 }
 0x1d3   :  { %v6418_v12 = vadd.f32 %v6417_v7, %v6416_v34  ;;  %v8444_v61 = vpop.f32.mrf.mxu0 }
 0x1d4   :  { %8834 = vst [vmem:[#allocation30_spill] sm:$0xff] %v8442_v23  ;;  %v3262_v13 = vmul.f32 %v8442_v23, %v8442_v23  ;;  %v3162_v53 = vadd.f32 %v6372_v6, %v8392_v26  ;;  %v8450_v22 = vpop.f32.mrf.mxu1  ;;  %v3245_v30 = vadd.f32 %v3244_v40, %v8442_v23 }
 0x1d5   :  { %v8452_v5 = vpop.f32.mrf.mxu0 }
 0x1d6   :  { %v8455_v52 = vadd.f32 %v6418_v12, %v3162_v53  ;;  %v8457_v62 = vpop.f32.mrf.mxu1  ;;  %v3271_v15 = vadd.f32 %v3270_v63, %v3262_v13  ;;  %v6437_v59 = vadd.f32 %v8452_v5, %v8444_v61 }
 0x1d7   :  { %v8459_v58 = vpop.f32.mrf.mxu0  ;;  %v6483_v14 = vadd.f32 %v8457_v62, %v8450_v22 }
 0x1d8   :  { %8835 = vst [vmem:[#allocation31_spill] sm:$0xff] %v8455_v52  ;;  %v3246_v21 = vadd.f32 %v3245_v30, %v8455_v52  ;;  %v3263_v39 = vmul.f32 %v8455_v52, %v8455_v52  ;;  %v8464_v26 = vpop.f32.mrf.mxu1 }
 0x1d9   :  { %v6439_v41 = vpop.f32.mrf.mxu0  ;;  %v4142_v61 = vadd.f32 %v6483_v14, %v6437_v59 }
 0x1da   :  { %v3247_v37 = vrot.slane %v3246_v21, 4  ;;  %v3272_v16 = vadd.f32 %v3271_v15, %v3263_v39  ;;  %v6485_v50 = vpop.f32.mrf.mxu1  ;;  %v6440_v46 = vadd.f32 %v6439_v41, %v8459_v58 }
 0x1db   :  { %v8466_v51 = vpop.f32.mrf.mxu0  ;;  %v6486_v31 = vadd.f32 %v6485_v50, %v8464_v26 }
 0x1dc   :  { %v3248_v24 = vadd.f32 %v3247_v37, %v3246_v21  ;;  %v3273_v56 = vrot.slane %v3272_v16, 4  ;;  %v6487_v4 = vpop.f32.mrf.mxu1 }
 0x1dd   :  { %v6442_v0 = vpop.f32.mrf.mxu0 }
 0x1de   :  { %v3249_v34 = vrot.slane %v3248_v24, 2  ;;  %v3274_v1 = vadd.f32 %v3273_v56, %v3272_v16  ;;  %v6488_v2 = vpop.f32.mrf.mxu1  ;;  %v6443_v54 = vadd.f32 %v6442_v0, %v8466_v51 }
 0x1df   :  { %v6444_v38 = vpop.f32.mrf.mxu0  ;;  %v6489_v35 = vadd.f32 %v6488_v2, %v6487_v4 }
 0x1e0   :  { %v3250_v43 = vadd.f32 %v3249_v34, %v3248_v24  ;;  %v3275_v6 = vrot.slane %v3274_v1, 2  ;;  %v6490_v7 = vpop.f32.mrf.mxu1 }
 0x1e1   :  { %v6445_v12 = vpop.f32.mrf.mxu0  ;;  %v4150_v5 = vadd.f32 %v6489_v35, %v6443_v54 }
 0x1e2   :  { %v3251_v60 = vrot.slane %v3250_v43, 1  ;;  %v3276_v40 = vadd.f32 %v3275_v6, %v3274_v1  ;;  %v6491_v13 = vpop.f32.mrf.mxu1 }
 0x1e3   :  { %v6447_v53 = vpop.f32.mrf.mxu0 }
 0x1e4   :  { %v3252_v63 = vadd.f32 %v3251_v60, %v3250_v43  ;;  %v3277_v30 = vrot.slane %v3276_v40, 1  ;;  %v6493_v15 = vpop.f32.mrf.mxu1 }
 0x1e5   :  { %v6448_v39 = vpop.f32.mrf.mxu0 }
 0x1e6   :  { %v8469_v21 = vadd.f32 %v3252_v63, %v8378_v19  ;;  %v3278_v37 = vadd.f32 %v3277_v30, %v3276_v40  ;;  %v6494_v52 = vpop.f32.mrf.mxu1  ;;  %v6449_v50 = vadd.f32 %v6448_v39, %v6447_v53 }
 0x1e7   :  { %v6450_v16 = vpop.f32.mrf.mxu0 }
 0x1e8   :  { %8836 = vst [vmem:[#allocation32_spill] sm:$0xff] %v8469_v21  ;;  %v8472_v56 = vadd.f32 %v3278_v37, %v8380_v28  ;;  %v6496_v24 = vpop.f32.mrf.mxu1  ;;  %v6492_v21 = vadd.f32 %v6491_v13, %v6490_v7 }
 0x1e9   :  { %v6451_v34 = vpop.f32.mrf.mxu0 }
 0x1ea   :  { %8837 = vst [vmem:[#allocation33_spill] sm:$0xff] %v8472_v56  ;;  %v6497_v23 = vpop.f32.mrf.mxu1  ;;  %v6446_v56 = vadd.f32 %v6445_v12, %v6444_v38  ;;  %v6452_v51 = vadd.f32 %v6451_v34, %v6450_v16 }
 0x1eb   :  { %v8474_v47 = vpop.f32.mrf.mxu0  ;;  %v6498_v4 = vadd.f32 %v6497_v23, %v6496_v24 }
 0x1ec   :  { %v8476_v1 = vpop.f32.mrf.mxu1  ;;  %v4153_v62 = vadd.f32 %v6492_v21, %v6446_v56 }
 0x1ed   :  { %v8478_v43 = vpop.f32.mrf.mxu0 }
 0x1ee   :  { %v8480_v6 = vpop.f32.mrf.mxu1 }
 0x1ef   :  { %v8482_v60 = vpop.f32.mrf.mxu0  ;;  %v6501_v54 = vadd.f32 %v8480_v6, %v8476_v1 }
 0x1f0   :  { %v8484_v19 = vpop.f32.mrf.mxu1 }
 0x1f1   :  { %v8486_v40 = vpop.f32.mrf.mxu0 }
 0x1f2   :  { %v8488_v63 = vpop.f32.mrf.mxu1 }
 0x1f3   :  { %v8490_v28 = vpop.f32.mrf.mxu0 }
 0x1f4   :  { %v8492_v30 = vpop.f32.mrf.mxu1 }
 0x1f5   :  { %8838 = vst [vmem:[#allocation34_spill] sm:$0xff] %v8492_v30  ;;  %v8494_v37 = vpop.f32.mrf.mxu0 }
 0x1f6   :  { %v8496_v17 = vpop.f32.mrf.mxu1 }
 0x1f7   :  { %8839 = vst [vmem:[#allocation35_spill] sm:$0xff] %v8496_v17  ;;  %v8498_v49 = vpop.f32.mrf.mxu0 }
 0x1f8   :  { %8840 = vst [vmem:[#allocation36_spill] sm:$0xff] %v8498_v49  ;;  %v8500_v36 = vpop.f32.mrf.mxu1 }
 0x1f9   :  { %8841 = vst [vmem:[#allocation37_spill] sm:$0xff] %v8500_v36  ;;  %v8502_v48 = vpop.f32.mrf.mxu0  ;;  %v4145_v36 = vadd.f32 %v6486_v31, %v6440_v46 }
 0x1fa   :  { %8842 = vst [vmem:[#allocation38_spill] sm:$0xff] %v8502_v48  ;;  %v8504_v45 = vpop.f32.mrf.mxu1  ;;  %v6495_v48 = vadd.f32 %v6494_v52, %v6493_v15 }
 0x1fb   :  { %8843 = vst [vmem:[#allocation39_spill] sm:$0xff] %v8504_v45  ;;  %v6527_v11 = vpop.f32.mrf.mxu0 }
 0x1fc   :  { %v6573_v42 = vpop.f32.mrf.mxu1  ;;  %v4158_v46 = vadd.f32 %v6495_v48, %v6449_v50 }
 0x1fd   :  { %v6528_v27 = vpop.f32.mrf.mxu0 }
 0x1fe   :  { %v6574_v55 = vpop.f32.mrf.mxu1  ;;  %v6529_v58 = vadd.f32 %v6528_v27, %v6527_v11 }
 0x1ff   :  { %v6530_v25 = vpop.f32.mrf.mxu0 }
 0x200   :  { %v6576_v20 = vpop.f32.mrf.mxu1 }
 0x201   :  { %v6531_v3 = vpop.f32.mrf.mxu0 }
 0x202   :  { %v6577_v44 = vpop.f32.mrf.mxu1  ;;  %v6532_v10 = vadd.f32 %v6531_v3, %v6530_v25  ;;  %v4215_v25 = vadd.f32 %v6529_v58, %v4142_v61 }
 0x203   :  { %v6533_v29 = vpop.f32.mrf.mxu0  ;;  %v6578_v0 = vadd.f32 %v6577_v44, %v6576_v20 }
 0x204   :  { %v6579_v18 = vpop.f32.mrf.mxu1  ;;  %v4218_v17 = vadd.f32 %v6532_v10, %v4145_v36  ;;  %v4161_v10 = vadd.f32 %v6498_v4, %v6452_v51 }
 0x205   :  { %v6534_v8 = vpop.f32.mrf.mxu0 }
 0x206   :  { %v6580_v32 = vpop.f32.mrf.mxu1  ;;  %v6535_v41 = vadd.f32 %v6534_v8, %v6533_v29  ;;  %v6575_v29 = vadd.f32 %v6574_v55, %v6573_v42  ;;  %v8513_v27 = vadd.f32 %v6578_v0, %v4218_v17  ;;  %v8848_v0 = vld [vmem:[#allocation37_spill] sm:$0xff] }
 0x207   :  { %v6536_v9 = vpop.f32.mrf.mxu0  ;;  %v6581_v11 = vadd.f32 %v6580_v32, %v6579_v18  ;;  %v6458_v32 = vadd.f32 %v8486_v40, %v8482_v60  ;;  %v6504_v18 = vadd.f32 %v8488_v63, %v8484_v19  ;;  %v6461_v19 = vadd.f32 %v8494_v37, %v8490_v28  ;;  %v8844_v40 = vld [vmem:[#allocation34_spill] sm:$0xff]  ;;  %v8845_v63 = vld [vmem:[#allocation35_spill] sm:$0xff]  ;;  %v8846_v28 = vld [vmem:[#allocation36_spill] sm:$0xff] }
 0x208   :  { %v6582_v33 = vpop.f32.mrf.mxu1  ;;  %v4223_v2 = vadd.f32 %v6535_v41, %v4150_v5  ;;  %v8519_v44 = vadd.f32 %v6575_v29, %v4215_v25  ;;  %v4343_v17 = vmul.f32 %v8513_v27, %v8513_v27  ;;  %v8847_v37 = vld [vmem:[#allocation38_spill] sm:$0xff] }
 0x209   :  { %v6537_v57 = vpop.f32.mrf.mxu0  ;;  %v4169_v16 = vadd.f32 %v6504_v18, %v6458_v32  ;;  %v6464_v25 = vadd.f32 %v8847_v37, %v8846_v28 }
 0x20a   :  { %v6583_v45 = vpop.f32.mrf.mxu1  ;;  %v6538_v30 = vadd.f32 %v6537_v57, %v6536_v9  ;;  %v6455_v57 = vadd.f32 %v8478_v43, %v8474_v47  ;;  %v8521_v20 = vadd.f32 %v6581_v11, %v4223_v2  ;;  %v4326_v56 = vadd.f32 %v8513_v27, %v8519_v44  ;;  %v8849_v2 = vld [vmem:[#allocation39_spill] sm:$0xff] }
 0x20b   :  { %v6539_v26 = vpop.f32.mrf.mxu0  ;;  %v6584_v48 = vadd.f32 %v6583_v45, %v6582_v33  ;;  %v4342_v45 = vmul.f32 %v8519_v44, %v8519_v44 }
 0x20c   :  { %v6585_v49 = vpop.f32.mrf.mxu1  ;;  %v4226_v14 = vadd.f32 %v6538_v30, %v4153_v62  ;;  %v4166_v12 = vadd.f32 %v6501_v54, %v6455_v57  ;;  %v4344_v53 = vmul.f32 %v8521_v20, %v8521_v20  ;;  %v6507_v30 = vadd.f32 %v8845_v63, %v8844_v40 }
 0x20d   :  { %v6540_v22 = vpop.f32.mrf.mxu0  ;;  %v4352_v34 = vadd.f32 %v4343_v17, %v4342_v45  ;;  %v4327_v58 = vadd.f32 %v4326_v56, %v8521_v20 }
 0x20e   :  { %v6586_v3 = vpop.f32.mrf.mxu1  ;;  %v6541_v38 = vadd.f32 %v6540_v22, %v6539_v26  ;;  %v8529_v47 = vadd.f32 %v6584_v48, %v4226_v14  ;;  %v4174_v29 = vadd.f32 %v6507_v30, %v6461_v19 }
 0x20f   :  { %v6542_v31 = vpop.f32.mrf.mxu0  ;;  %v6587_v23 = vadd.f32 %v6586_v3, %v6585_v49  ;;  %v4353_v50 = vadd.f32 %v4352_v34, %v4344_v53 }
 0x210   :  { %v6588_v8 = vpop.f32.mrf.mxu1  ;;  %v4231_v55 = vadd.f32 %v6541_v38, %v4158_v46  ;;  %v4345_v1 = vmul.f32 %v8529_v47, %v8529_v47  ;;  %v4328_v62 = vadd.f32 %v4327_v58, %v8529_v47  ;;  %v6510_v38 = vadd.f32 %v8849_v2, %v8848_v0 }
 0x211   :  { %v6543_v35 = vpop.f32.mrf.mxu0 }
 0x212   :  { %v6544_v59 = vadd.f32 %v6543_v35, %v6542_v31  ;;  %v6589_v9 = vpop.f32.mrf.mxu1  ;;  %v8535_v15 = vadd.f32 %v6587_v23, %v4231_v55  ;;  %v4354_v31 = vadd.f32 %v4353_v50, %v4345_v1  ;;  %v4177_v32 = vadd.f32 %v6510_v38, %v6464_v25 }
 0x213   :  { %v6545_v42 = vpop.f32.mrf.mxu0  ;;  %v6590_v39 = vadd.f32 %v6589_v9, %v6588_v8  ;;  %v4380_v38 = vlaneseq }
 0x214   :  { %v6591_v36 = vpop.f32.mrf.mxu1  ;;  %v4234_v52 = vadd.f32 %v6544_v59, %v4161_v10  ;;  %v4346_v61 = vmul.f32 %v8535_v15, %v8535_v15  ;;  %v4329_v11 = vadd.f32 %v4328_v62, %v8535_v15 }
 0x215   :  { %v6546_v7 = vpop.f32.mrf.mxu0 }
 0x216   :  { %v6547_v13 = vadd.f32 %v6546_v7, %v6545_v42  ;;  %v6592_v33 = vpop.f32.mrf.mxu1  ;;  %v8541_v43 = vadd.f32 %v6590_v39, %v4234_v52  ;;  %v4355_v57 = vadd.f32 %v4354_v31, %v4346_v61  ;;  %v4381_v31 = vshrl.u32 %v4380_v38, 7 }
 0x217   :  { %v6548_v21 = vpop.f32.mrf.mxu0  ;;  %v6593_v6 = vadd.f32 %v6592_v33, %v6591_v36 }
 0x218   :  { %v4239_v49 = vadd.f32 %v6547_v13, %v4166_v12  ;;  %v6594_v24 = vpop.f32.mrf.mxu1  ;;  %v4347_v46 = vmul.f32 %v8541_v43, %v8541_v43  ;;  %v4330_v9 = vadd.f32 %v4329_v11, %v8541_v43 }
 0x219   :  { %v6549_v60 = vpop.f32.mrf.mxu0 }
 0x21a   :  { %v6550_v41 = vadd.f32 %v6549_v60, %v6548_v21  ;;  %v6595_v26 = vpop.f32.mrf.mxu1  ;;  %v8550_v5 = vadd.f32 %v6593_v6, %v4239_v49  ;;  %v4356_v18 = vadd.f32 %v4355_v57, %v4347_v46  ;;  %v4372_v46 = vld [vmem:[%s8773_s2] sm:$0x1] }
 0x21b   :  { %v6551_v22 = vpop.f32.mrf.mxu0  ;;  %v6596_v4 = vadd.f32 %v6595_v26, %v6594_v24 }
 0x21c   :  { %v4242_v51 = vadd.f32 %v6550_v41, %v4169_v16  ;;  %v6597_v3 = vpop.f32.mrf.mxu1  ;;  %v4348_v54 = vmul.f32 %v8550_v5, %v8550_v5  ;;  %v4331_v17 = vadd.f32 %v4330_v9, %v8550_v5 }
 0x21d   :  { %v6552_v8 = vpop.f32.mrf.mxu0 }
 0x21e   :  { %v8560_v14 = vadd.f32 %v6596_v4, %v4242_v51  ;;  %v6553_v35 = vadd.f32 %v6552_v8, %v6551_v22  ;;  %v6598_v10 = vpop.f32.mrf.mxu1  ;;  %v4357_v13 = vadd.f32 %v4356_v18, %v4348_v54  ;;  %v8850_v22 = vld [vmem:[#allocation32_spill] sm:$0xff]  ;;  %v8851_v4 = vld [vmem:[#allocation33_spill] sm:$0xff]  ;;  %v4382_v8 = vsub.s32 0, %v4381_v31 }
 0x21f   :  { %v6554_v59 = vpop.f32.mrf.mxu0  ;;  %v6599_v55 = vadd.f32 %v6598_v10, %v6597_v3  ;;  %v8855_v18 = vld [vmem:[#allocation5_spill] sm:$0xff] }
 0x220   :  { %v4247_v48 = vadd.f32 %v6553_v35, %v4174_v29  ;;  %v6600_v42 = vpop.f32.mrf.mxu1  ;;  %v4349_v23 = vmul.f32 %v8560_v14, %v8560_v14  ;;  %v4332_v33 = vadd.f32 %v4331_v17, %v8560_v14  ;;  %v4376_v35 = vld [vmem:[%s8774_s3] sm:$0x1] }
 0x221   :  { %v6555_v36 = vpop.f32.mrf.mxu0  ;;  %v8856_v17 = vld [vmem:[#allocation6_spill] sm:$0xff] }
 0x222   :  { %v8568_v52 = vadd.f32 %v6599_v55, %v4247_v48  ;;  %v6556_v7 = vadd.f32 %v6555_v36, %v6554_v59  ;;  %v6601_v12 = vpop.f32.mrf.mxu1  ;;  %v4358_v21 = vadd.f32 %v4357_v13, %v4349_v23  ;;  %v8852_v59 = vld [vmem:[#allocation2_spill] sm:$0xff]  ;;  %v8853_v48 = vld [vmem:[#allocation3_spill] sm:$0xff]  ;;  %v8858_v13 = vld [vmem:[#allocation8_spill] sm:$0xff] }
 0x223   :  { %v6602_v39 = vadd.f32 %v6601_v12, %v6600_v42  ;;  %v8854_v42 = vld [vmem:[#allocation4_spill] sm:$0xff] }
 0x224   :  { %v4350_v45 = vmul.f32 %v8568_v52, %v8568_v52  ;;  %v4250_v53 = vadd.f32 %v6556_v7, %v4177_v32  ;;  %v4333_v16 = vadd.f32 %v4332_v33, %v8568_v52  ;;  %v8857_v7 = vld [vmem:[#allocation7_spill] sm:$0xff] }
 0x226   :  { %v8574_v56 = vadd.f32 %v6602_v39, %v4250_v53  ;;  %v4359_v49 = vadd.f32 %v4358_v21, %v4350_v45  ;;  %v8859_v45 = vld [vmem:[#allocation9_spill] sm:$0xff]  ;;  %v8860_v39 = vld [vmem:[#allocation10_spill] sm:$0xff] }
 0x228   :  { %v4334_v24 = vadd.f32 %v4333_v16, %v8574_v56  ;;  %v4351_v34 = vmul.f32 %v8574_v56, %v8574_v56  ;;  %v8861_v16 = vld [vmem:[#allocation11_spill] sm:$0xff] }
 0x22a   :  { %v4335_v1 = vrot.slane %v4334_v24, 4  ;;  %v4360_v6 = vadd.f32 %v4359_v49, %v4351_v34  ;;  %v8862_v34 = vld [vmem:[#allocation12_spill] sm:$0xff] }
 0x22c   :  { %v4336_v60 = vadd.f32 %v4335_v1, %v4334_v24  ;;  %v4361_v19 = vrot.slane %v4360_v6, 4 }
 0x22e   :  { %v4337_v40 = vrot.slane %v4336_v60, 2  ;;  %v4362_v63 = vadd.f32 %v4361_v19, %v4360_v6  ;;  %v8863_v6 = vld [vmem:[#allocation13_spill] sm:$0xff]  ;;  %v8864_v19 = vld [vmem:[#allocation14_spill] sm:$0xff] }
 0x230   :  { %v4338_v30 = vadd.f32 %v4337_v40, %v4336_v60  ;;  %v4363_v58 = vrot.slane %v4362_v63, 2 }
 0x232   :  { %v4339_v41 = vrot.slane %v4338_v30, 1  ;;  %v4364_v26 = vadd.f32 %v4363_v58, %v4362_v63  ;;  %v8865_v63 = vld [vmem:[#allocation15_spill] sm:$0xff] }
 0x234   :  { %v4340_v50 = vadd.f32 %v4339_v41, %v4338_v30  ;;  %v4365_v61 = vrot.slane %v4364_v26, 1 }
 0x236   :  { %v4341_v62 = vadd.f32 %v4340_v50, %v8850_v22  ;;  %v4366_v51 = vadd.f32 %v4365_v61, %v4364_v26 }
 0x238   :  { %v4367_v3 = vadd.f32 %v4366_v51, %v8851_v4  ;;  %v4368_v28 = vmul.f32 0.004132231, %v4341_v62 }
 0x23a   :  { %v4369_v37 = vmul.f32 0.004132231, %v4367_v3  ;;  %v4370_v25 = vmul.f32 %v4368_v28, %v4368_v28 }
 0x23c   :  { %v4371_v0 = vsub.f32 %v4369_v37, %v4370_v25 }
 0x23e   :  { %v4373_v2 = vadd.f32 1e-05, %v4371_v0 }
 0x240   :  { %6859 = vrsqrt.f32 %v4373_v2 }
 0x24d   :  { %v6860_v29 = vpop.eup %6859 }
 0x24e   :  { %v4375_v11 = vmul.f32 %v6860_v29, %v4372_v46 }
 0x250   :  { %v4377_v10 = vmul.f32 %v4375_v11, %v4368_v28  ;;  %v8587_v57 = vrot.slane %v4375_v11, %v4382_v8 }
 0x252   :  { %v4378_v54 = vsub.f32 %v4376_v35, %v4377_v10  ;;  %v4385_v9 = vmul.f32 %v8587_v57, %v8852_v59  ;;  %v4386_v55 = vmul.f32 %v8587_v57, %v8853_v48  ;;  %v4387_v32 = vmul.f32 %v8587_v57, %v8854_v42 }
 0x253   :  { %v4388_v36 = vmul.f32 %v8587_v57, %v8855_v18  ;;  %v4389_v23 = vmul.f32 %v8587_v57, %v8856_v17  ;;  %v4390_v12 = vmul.f32 %v8587_v57, %v8857_v7  ;;  %v4391_v33 = vmul.f32 %v8587_v57, %v8858_v13 }
 0x254   :  { %v4392_v53 = vmul.f32 %v8587_v57, %v8859_v45  ;;  %v4393_v21 = vmul.f32 %v8587_v57, %v8860_v39  ;;  %v4394_v49 = vmul.f32 %v8587_v57, %v8861_v16  ;;  %v8609_v24 = vrot.slane %v4378_v54, %v4382_v8  ;;  %v8866_v54 = vld [vmem:[#allocation16_spill] sm:$0xff] }
 0x255   :  { %v4471_v1 = vmul.f32 %v8587_v57, %v8862_v34  ;;  %v4472_v60 = vmul.f32 %v8587_v57, %v8863_v6  ;;  %v4473_v40 = vmul.f32 %v8587_v57, %v8864_v19  ;;  %v4474_v30 = vmul.f32 %v8587_v57, %v8865_v63 }
 0x256   :  { %v4401_v58 = vadd.f32 %v8609_v24, %v4385_v9  ;;  %v4402_v41 = vadd.f32 %v8609_v24, %v4386_v55  ;;  %v4403_v26 = vadd.f32 %v8609_v24, %v4387_v32  ;;  %v4404_v50 = vadd.f32 %v8609_v24, %v4388_v36  ;;  %v8867_v55 = vld [vmem:[#allocation17_spill] sm:$0xff]  ;;  %v8868_v32 = vld [vmem:[#allocation18_spill] sm:$0xff]  ;;  %v8869_v36 = vld [vmem:[#allocation19_spill] sm:$0xff] }
 0x257   :  { %v4405_v61 = vadd.f32 %v8609_v24, %v4389_v23  ;;  %v4406_v22 = vadd.f32 %v8609_v24, %v4390_v12  ;;  %v4407_v62 = vadd.f32 %v8609_v24, %v4391_v33  ;;  %v4408_v51 = vadd.f32 %v8609_v24, %v4392_v53  ;;  %v8870_v23 = vld [vmem:[#allocation20_spill] sm:$0xff]  ;;  %v8871_v12 = vld [vmem:[#allocation21_spill] sm:$0xff] }
 0x258   :  { %v4409_v4 = vadd.f32 %v8609_v24, %v4393_v21  ;;  %v4410_v3 = vadd.f32 %v8609_v24, %v4394_v49  ;;  %v4411_v28 = vmax.f32 %v4401_v58, 0.0  ;;  %v4412_v37 = vmax.f32 %v4402_v41, 0.0 }
 0x259   :  { %v4413_v25 = vmax.f32 %v4403_v26, 0.0  ;;  %v4414_v0 = vmax.f32 %v4404_v50, 0.0  ;;  %v4415_v2 = vmax.f32 %v4405_v61, 0.0  ;;  %v4416_v38 = vmax.f32 %v4406_v22, 0.0 }
 0x25a   :  { %v4417_v31 = vmax.f32 %v4407_v62, 0.0  ;;  %v4418_v46 = vmax.f32 %v4408_v51, 0.0  ;;  %v4419_v8 = vmax.f32 %v4409_v4, 0.0  ;;  %v4420_v29 = vmax.f32 %v4410_v3, 0.0  ;;  %v8872_v4 = vld [vmem:[#allocation22_spill] sm:$0xff] }
 0x25b   :  { %v5751_v11 = vpack.c.bf16 %v4412_v37, %v4411_v28  ;;  %v5756_v35 = vpack.c.bf16 %v4414_v0, %v4413_v25  ;;  %v5761_v10 = vpack.c.bf16 %v4416_v38, %v4415_v2  ;;  %v4475_v59 = vmul.f32 %v8587_v57, %v8866_v54  ;;  %v8873_v28 = vld [vmem:[#allocation23_spill] sm:$0xff]  ;;  %v8874_v2 = vld [vmem:[#allocation24_spill] sm:$0xff] }
 0x25c   :  { %v5766_v9 = vpack.c.bf16 %v4418_v46, %v4417_v31  ;;  %v5771_v48 = vpack.c.bf16 %v4420_v29, %v4419_v8  ;;  %v4476_v42 = vmul.f32 %v8587_v57, %v8867_v55  ;;  %v4477_v18 = vmul.f32 %v8587_v57, %v8868_v32  ;;  %v8875_v31 = vld [vmem:[#allocation25_spill] sm:$0xff]  ;;  %v8876_v8 = vld [vmem:[#allocation26_spill] sm:$0xff] }
 0x25d   :  { %5752 = vst [vmem:[%s8775_s4] sm:$0xff] %v5751_v11   ;;  %5848 = vst [vmem:[%s8775_s4 + $0x8] sm:$0xff] %v5756_v35   ;;  %v4478_v17 = vmul.f32 %v8587_v57, %v8869_v36  ;;  %v4479_v7 = vmul.f32 %v8587_v57, %v8870_v23  ;;  %v4480_v13 = vmul.f32 %v8587_v57, %v8871_v12  ;;  %v8877_v11 = vld [vmem:[#allocation27_spill] sm:$0xff] }
 0x25e   :  { %5849 = vst [vmem:[%s8775_s4 + $0x10] sm:$0xff] %v5761_v10   ;;  %v4481_v33 = vadd.f32 %v4471_v1, %v8609_v24  ;;  %5850 = vst [vmem:[%s8775_s4 + $0x18] sm:$0xff] %v5766_v9   ;;  %v4482_v45 = vadd.f32 %v4472_v60, %v8609_v24  ;;  %v4483_v53 = vadd.f32 %v4473_v40, %v8609_v24  ;;  %v8878_v10 = vld [vmem:[#allocation28_spill] sm:$0xff] }
 0x25f   :  { %5851 = vst [vmem:[%s8775_s4 + $0x20] sm:$0xff] %v5771_v48   ;;  %v4484_v39 = vadd.f32 %v4474_v30, %v8609_v24  ;;  %v4485_v21 = vadd.f32 %v4475_v59, %v8609_v24  ;;  %v4486_v16 = vadd.f32 %v4476_v42, %v8609_v24  ;;  %v4487_v49 = vadd.f32 %v4477_v18, %v8609_v24  ;;  %v8879_v59 = vld [vmem:[#allocation29_spill] sm:$0xff]  ;;  %v8880_v48 = vld [vmem:[#allocation30_spill] sm:$0xff]  ;;  %v8881_v42 = vld [vmem:[#allocation31_spill] sm:$0xff] }
 0x260   :  { %v4488_v34 = vadd.f32 %v4478_v17, %v8609_v24  ;;  %v4489_v1 = vadd.f32 %v4479_v7, %v8609_v24  ;;  %v4490_v6 = vadd.f32 %v4480_v13, %v8609_v24  ;;  %v4491_v19 = vmax.f32 %v4481_v33, 0.0 }
 0x261   :  { %v4492_v63 = vmax.f32 %v4482_v45, 0.0  ;;  %v4493_v58 = vmax.f32 %v4483_v53, 0.0  ;;  %v4494_v60 = vmax.f32 %v4484_v39, 0.0  ;;  %v4495_v41 = vmax.f32 %v4485_v21, 0.0 }
 0x262   :  { %v4496_v40 = vmax.f32 %v4486_v16, 0.0  ;;  %v4497_v26 = vmax.f32 %v4487_v49, 0.0  ;;  %v4498_v30 = vmax.f32 %v4488_v34, 0.0  ;;  %v4499_v50 = vmax.f32 %v4489_v1, 0.0 }
 0x263   :  { %v4500_v61 = vmax.f32 %v4490_v6, 0.0  ;;  %v5776_v22 = vpack.c.bf16 %v4492_v63, %v4491_v19  ;;  %v5781_v62 = vpack.c.bf16 %v4494_v60, %v4493_v58  ;;  %v4552_v3 = vmul.f32 %v8587_v57, %v8872_v4 }
 0x264   :  { %v5786_v51 = vpack.c.bf16 %v4496_v40, %v4495_v41  ;;  %v4553_v37 = vmul.f32 %v8587_v57, %v8873_v28  ;;  %v5791_v25 = vpack.c.bf16 %v4498_v30, %v4497_v26  ;;  %v4554_v38 = vmul.f32 %v8587_v57, %v8874_v2 }
 0x265   :  { %5852 = vst [vmem:[%s8775_s4 + $0x28] sm:$0xff] %v5776_v22   ;;  %v5796_v0 = vpack.c.bf16 %v4500_v61, %v4499_v50  ;;  %v4555_v46 = vmul.f32 %v8587_v57, %v8875_v31  ;;  %5853 = vst [vmem:[%s8775_s4 + $0x30] sm:$0xff] %v5781_v62   ;;  %v4556_v29 = vmul.f32 %v8587_v57, %v8876_v8 }
 0x266   :  { %5854 = vst [vmem:[%s8775_s4 + $0x38] sm:$0xff] %v5786_v51   ;;  %v4557_v35 = vmul.f32 %v8587_v57, %v8877_v11  ;;  %v4558_v54 = vmul.f32 %v8587_v57, %v8878_v10  ;;  %v4559_v9 = vmul.f32 %v8587_v57, %v8879_v59  ;;  %5855 = vst [vmem:[%s8775_s4 + $0x40] sm:$0xff] %v5791_v25  }
 0x267   :  { %5856 = vst [vmem:[%s8775_s4 + $0x48] sm:$0xff] %v5796_v0   ;;  %v4560_v55 = vmul.f32 %v8587_v57, %v8880_v48  ;;  %v4561_v32 = vmul.f32 %v8587_v57, %v8881_v42  ;;  %v4562_v18 = vadd.f32 %v4552_v3, %v8609_v24  ;;  %v4563_v36 = vadd.f32 %v4553_v37, %v8609_v24 }
 0x268   :  { %v4564_v17 = vadd.f32 %v4554_v38, %v8609_v24  ;;  %v4565_v23 = vadd.f32 %v4555_v46, %v8609_v24  ;;  %v4566_v7 = vadd.f32 %v4556_v29, %v8609_v24  ;;  %v4567_v12 = vadd.f32 %v4557_v35, %v8609_v24 }
 0x269   :  { %v4568_v13 = vadd.f32 %v4558_v54, %v8609_v24  ;;  %v4569_v33 = vadd.f32 %v4559_v9, %v8609_v24  ;;  %v4570_v45 = vadd.f32 %v4560_v55, %v8609_v24  ;;  %v4571_v53 = vadd.f32 %v4561_v32, %v8609_v24 }
 0x26a   :  { %v4572_v39 = vmax.f32 %v4562_v18, 0.0  ;;  %v4573_v21 = vmax.f32 %v4563_v36, 0.0  ;;  %v4574_v16 = vmax.f32 %v4564_v17, 0.0  ;;  %v4575_v49 = vmax.f32 %v4565_v23, 0.0 }
 0x26b   :  { %v4576_v34 = vmax.f32 %v4566_v7, 0.0  ;;  %v4577_v1 = vmax.f32 %v4567_v12, 0.0  ;;  %v4578_v6 = vmax.f32 %v4568_v13, 0.0  ;;  %v4579_v19 = vmax.f32 %v4569_v33, 0.0 }
 0x26c   :  { %v4580_v63 = vmax.f32 %v4570_v45, 0.0  ;;  %v4581_v58 = vmax.f32 %v4571_v53, 0.0  ;;  %v5801_v60 = vpack.c.bf16 %v4573_v21, %v4572_v39  ;;  %v5806_v41 = vpack.c.bf16 %v4575_v49, %v4574_v16 }
 0x26d   :  { %v5811_v40 = vpack.c.bf16 %v4577_v1, %v4576_v34  ;;  %v5816_v26 = vpack.c.bf16 %v4579_v19, %v4578_v6  ;;  %v4633_v30 = vmul.f32 %v8587_v57, %v8519_v44  ;;  %v4634_v50 = vmul.f32 %v8587_v57, %v8513_v27 }
 0x26e   :  { %5857 = vst [vmem:[%s8775_s4 + $0x50] sm:$0xff] %v5801_v60   ;;  %5858 = vst [vmem:[%s8775_s4 + $0x58] sm:$0xff] %v5806_v41   ;;  %v5821_v61 = vpack.c.bf16 %v4581_v58, %v4580_v63  ;;  %v4635_v22 = vmul.f32 %v8587_v57, %v8521_v20  ;;  %v4636_v62 = vmul.f32 %v8587_v57, %v8529_v47 }
 0x26f   :  { %v4637_v44 = vmul.f32 %v8587_v57, %v8535_v15  ;;  %5859 = vst [vmem:[%s8775_s4 + $0x60] sm:$0xff] %v5811_v40   ;;  %5860 = vst [vmem:[%s8775_s4 + $0x68] sm:$0xff] %v5816_v26   ;;  %v4638_v27 = vmul.f32 %v8587_v57, %v8541_v43  ;;  %v4639_v20 = vmul.f32 %v8587_v57, %v8550_v5 }
 0x270   :  { %v4640_v47 = vmul.f32 %v8587_v57, %v8560_v14  ;;  %v4641_v15 = vmul.f32 %v8587_v57, %v8568_v52  ;;  %5861 = vst [vmem:[%s8775_s4 + $0x70] sm:$0xff] %v5821_v61   ;;  %v4642_v51 = vmul.f32 %v8587_v57, %v8574_v56  ;;  %v4643_v4 = vadd.f32 %v4633_v30, %v8609_v24 }
 0x271   :  { %v4644_v43 = vadd.f32 %v4634_v50, %v8609_v24  ;;  %v4645_v3 = vadd.f32 %v4635_v22, %v8609_v24  ;;  %v4646_v5 = vadd.f32 %v4636_v62, %v8609_v24  ;;  %v4647_v14 = vadd.f32 %v4637_v44, %v8609_v24 }
 0x272   :  { %v4648_v28 = vadd.f32 %v4638_v27, %v8609_v24  ;;  %v4649_v52 = vadd.f32 %v4639_v20, %v8609_v24  ;;  %v4650_v37 = vadd.f32 %v4640_v47, %v8609_v24  ;;  %v4651_v25 = vadd.f32 %v4641_v15, %v8609_v24 }
 0x273   :  { %v4652_v56 = vadd.f32 %v4642_v51, %v8609_v24  ;;  %v4653_v57 = vmax.f32 %v4643_v4, 0.0  ;;  %v4654_v0 = vmax.f32 %v4644_v43, 0.0  ;;  %v4655_v2 = vmax.f32 %v4645_v3, 0.0 }
 0x274   :  { %v4656_v38 = vmax.f32 %v4646_v5, 0.0  ;;  %v4657_v31 = vmax.f32 %v4647_v14, 0.0  ;;  %v4658_v46 = vmax.f32 %v4648_v28, 0.0  ;;  %v4659_v8 = vmax.f32 %v4649_v52, 0.0 }
 0x275   :  { %v4660_v29 = vmax.f32 %v4650_v37, 0.0  ;;  %v4661_v11 = vmax.f32 %v4651_v25, 0.0  ;;  %v4662_v35 = vmax.f32 %v4652_v56, 0.0  ;;  %v5826_v10 = vpack.c.bf16 %v4654_v0, %v4653_v57 }
 0x276   :  { %v5831_v54 = vpack.c.bf16 %v4656_v38, %v4655_v2  ;;  %v5836_v59 = vpack.c.bf16 %v4658_v46, %v4657_v31 }
 0x277   :  { %v5841_v9 = vpack.c.bf16 %v4660_v29, %v4659_v8  ;;  %5862 = vst [vmem:[%s8775_s4 + $0x78] sm:$0xff] %v5826_v10   ;;  %v5846_v24 = vpack.c.bf16 %v4662_v35, %v4661_v11 }
 0x278   :  { %5863 = vst [vmem:[%s8775_s4 + $0x80] sm:$0xff] %v5831_v54   ;;  %5864 = vst [vmem:[%s8775_s4 + $0x88] sm:$0xff] %v5836_v59  }
 0x279   :  { %5865 = vst [vmem:[%s8775_s4 + $0x90] sm:$0xff] %v5841_v9   ;;  %5866 = vst [vmem:[%s8775_s4 + $0x98] sm:$0xff] %v5846_v24  }

// kernel: generator_forward.8
= control target key start
LH: loop header
LB: loop body
LE: loop exit
PB: predicated region body
PF: predicated region fallthrough
CT: control target
= control target key end

     0   :  { %s1115_s18 = smov 0   ;;  %s1117_s19 = smov 0   ;;  %s1437_s0 = inlined_call_operand.vmem [shape: bf16[4,288,128], index: 0, kind: input, shape index: {}]   ;;  %s1438_s1 = inlined_call_operand.vmem [shape: f32[4,1,128], index: 1, kind: input, shape index: {}]   ;;  %s1439_s2 = inlined_call_operand.vmem [shape: f32[4,1,128], index: 2, kind: input, shape index: {}]   ;;  %s1440_s3 = inlined_call_operand.vmem [shape: f32[1,128], index: 3, kind: input, shape index: {}]   ;;  %s1441_s4 = inlined_call_operand.vmem [shape: f32[1,128], index: 4, kind: input, shape index: {}]   ;;  %s1442_s5 = inlined_call_operand.vmem [shape: bf16[4,288,128], index: 5, kind: output, shape index: {}]  }
   0x1   :  { %s1119_s20 = smov 0  }
   0x2 LB: > { %s27_s21 = sadd.s32 1, %s1079_s19  ;;  %p761_p0 = scmp.ge.s32.totalorder %s1083_s20, 1  ;;  %s1083_s20 = sphi %s1119_s20, %s15_s20   ;;  %s1079_s19 = sphi %s1117_s19, %s1444_s19   ;;  %s1075_s18 = sphi %s1115_s18, %s1443_s18  }
   0x3   : > { %p29_p1 = scmp.ge.s32.totalorder %s27_s21, 4  ;;  %p208_p2 = scmp.lt.s32.totalorder %s1083_s20, 5 }
   0x5   : > { %s1446_s21 = smov (%p29_p1, %s27_s21), 0  ;;  %p209_p3 = pnand %p761_p0, %p208_p2 }
   0x6   : > { %p245_p4 = scmp.lt.s32.totalorder (!%p209_p3), %s1075_s18, 3 }
   0x7   : > { %212 = sbr.rel (%p209_p3) target bundleno = 83 (0x53), region = 40 }
   0xc   : > { %v264_v0 = vld [vmem:[%s1438_s1] sm:$0x1]  ;;  %v265_v1 = vld [vmem:[%s1438_s1 + $0x1] sm:$0x1]  ;;  %vm268_vm0 = vcmask 1040384   ;;  %s1448_s18 = smov (!%p245_p4, %s1075_s18), 3  ;;  %v371_v27 = vlaneseq }
   0xd   : > { %v266_v2 = vld [vmem:[%s1438_s1 + $0x2] sm:$0x1]  ;;  %v267_v3 = vld [vmem:[%s1438_s1 + $0x3] sm:$0x1]  ;;  %v269_v4 = vsel %vm268_vm0, %v264_v0, 0.0  ;;  %v270_v5 = vsel %vm268_vm0, %v265_v1, 0.0 }
   0xe   : > { %v271_v6 = vadd.f32 %v270_v5, %v269_v4  ;;  %v272_v7 = vsel %vm268_vm0, %v266_v2, 0.0  ;;  %v274_v8 = vsel %vm268_vm0, %v267_v3, 0.0  ;;  %v276_v9 = vld [vmem:[%s1439_s2] sm:$0x1]  ;;  %v277_v10 = vld [vmem:[%s1439_s2 + $0x1] sm:$0x1] }
   0xf   : > { %v278_v11 = vld [vmem:[%s1439_s2 + $0x2] sm:$0x1]  ;;  %v279_v12 = vld [vmem:[%s1439_s2 + $0x3] sm:$0x1]  ;;  %v280_v14 = vsel %vm268_vm0, %v276_v9, 0.0  ;;  %v281_v15 = vsel %vm268_vm0, %v277_v10, 0.0 }
  0x10   : > { %v273_v13 = vadd.f32 %v272_v7, %v271_v6  ;;  %v283_v16 = vsel %vm268_vm0, %v278_v11, 0.0  ;;  %v282_v17 = vadd.f32 %v281_v15, %v280_v14  ;;  %v285_v19 = vsel %vm268_vm0, %v279_v12, 0.0  ;;  %s1034_s13 = smul.u32 144, %s1448_s18  ;;  %v291_v53 = vld [vmem:[%s1440_s3] sm:$0x1] }
  0x11   : > { %v1183_v28 = vshrl.u32 %v371_v27, 7 }
  0x12   : > { %v275_v18 = vadd.f32 %v274_v8, %v273_v13  ;;  %v284_v20 = vadd.f32 %v283_v16, %v282_v17  ;;  %s1181_s16 = scalar_lea.vmem %s1437_s0, %s1034_s13  ;;  %v295_v13 = vld [vmem:[%s1441_s4] sm:$0x1]  ;;  %s1314_s27 = scalar_lea.vmem %s1442_s5, %s1034_s13 }
  0x13   : > { %v1186_v29 = vld [vmem:[%s1181_s16] sm:$0xff]   ;;  %v1189_v30 = vld [vmem:[%s1181_s16 + $0x8] sm:$0xff]   ;;  %v1192_v31 = vld [vmem:[%s1181_s16 + $0x10] sm:$0xff]   ;;  %v373_v37 = vsub.s32 0, %v1183_v28 }
  0x14   : > { %v1168_v21 = vmul.f32 0.0009451796, %v275_v18  ;;  %v286_v22 = vadd.f32 %v285_v19, %v284_v20  ;;  %v1195_v32 = vld [vmem:[%s1181_s16 + $0x18] sm:$0xff]   ;;  %v1198_v33 = vld [vmem:[%s1181_s16 + $0x20] sm:$0xff]   ;;  %v1201_v34 = vld [vmem:[%s1181_s16 + $0x28] sm:$0xff]   ;;  %v840_v35 = vunpack.c.l.bf16 %v1186_v29  ;;  %v841_v36 = vunpack.c.h.bf16 %v1186_v29 }
  0x15   : > { %v844_v38 = vunpack.c.l.bf16 %v1189_v30  ;;  %v1208_v39 = vld [vmem:[%s1181_s16 + $0x30] sm:$0xff]   ;;  %v1211_v40 = vld [vmem:[%s1181_s16 + $0x38] sm:$0xff]   ;;  %v845_v41 = vunpack.c.h.bf16 %v1189_v30  ;;  %v848_v42 = vunpack.c.l.bf16 %v1192_v31  ;;  %v849_v43 = vunpack.c.h.bf16 %v1192_v31  ;;  %v1218_v45 = vld [vmem:[%s1181_s16 + $0x40] sm:$0xff]  }
  0x16   : > { %v289_v23 = vmul.f32 %v1168_v21, %v1168_v21  ;;  %v288_v24 = vmul.f32 0.0009451796, %v286_v22  ;;  %v852_v44 = vunpack.c.l.bf16 %v1195_v32  ;;  %v1221_v46 = vld [vmem:[%s1181_s16 + $0x48] sm:$0xff]   ;;  %v853_v47 = vunpack.c.h.bf16 %v1195_v32  ;;  %v1228_v51 = vld [vmem:[%s1181_s16 + $0x50] sm:$0xff]   ;;  %v1231_v52 = vld [vmem:[%s1181_s16 + $0x58] sm:$0xff]  }
  0x17   : > { %v856_v48 = vunpack.c.l.bf16 %v1198_v33  ;;  %v857_v49 = vunpack.c.h.bf16 %v1198_v33  ;;  %v860_v50 = vunpack.c.l.bf16 %v1201_v34  ;;  %v861_v54 = vunpack.c.h.bf16 %v1201_v34  ;;  %v1241_v58 = vld [vmem:[%s1181_s16 + $0x60] sm:$0xff]   ;;  %v1248_v63 = vld [vmem:[%s1181_s16 + $0x68] sm:$0xff]   ;;  %v1251_v0 = vld [vmem:[%s1181_s16 + $0x70] sm:$0xff]  }
  0x18   : > { %v290_v25 = vsub.f32 %v288_v24, %v289_v23  ;;  %v864_v55 = vunpack.c.l.bf16 %v1208_v39  ;;  %v865_v56 = vunpack.c.h.bf16 %v1208_v39  ;;  %v868_v57 = vunpack.c.l.bf16 %v1211_v40  ;;  %v1258_v6 = vld [vmem:[%s1181_s16 + $0x78] sm:$0xff]   ;;  %v1264_v11 = vld [vmem:[%s1181_s16 + $0x80] sm:$0xff]   ;;  %v1267_v12 = vld [vmem:[%s1181_s16 + $0x88] sm:$0xff]  }
  0x19   : > { %v869_v59 = vunpack.c.h.bf16 %v1211_v40  ;;  %v872_v60 = vunpack.c.l.bf16 %v1218_v45  ;;  %v873_v61 = vunpack.c.h.bf16 %v1218_v45  ;;  %v876_v62 = vunpack.c.l.bf16 %v1221_v46 }
  0x1a   : > { %v292_v26 = vadd.f32 1e-05, %v290_v25  ;;  %v877_v2 = vunpack.c.h.bf16 %v1221_v46  ;;  %v880_v3 = vunpack.c.l.bf16 %v1228_v51  ;;  %v881_v4 = vunpack.c.h.bf16 %v1228_v51 }
  0x1b   : > { %v884_v5 = vunpack.c.l.bf16 %v1231_v52  ;;  %v885_v8 = vunpack.c.h.bf16 %v1231_v52  ;;  %v888_v9 = vunpack.c.l.bf16 %v1241_v58  ;;  %v889_v10 = vunpack.c.h.bf16 %v1241_v58 }
  0x1c   : > { %1059 = vrsqrt.f32 %v292_v26  ;;  %v892_v14 = vunpack.c.l.bf16 %v1248_v63  ;;  %v893_v15 = vunpack.c.h.bf16 %v1248_v63  ;;  %v896_v16 = vunpack.c.l.bf16 %v1251_v0 }
  0x1d   : > { %v897_v17 = vunpack.c.h.bf16 %v1251_v0  ;;  %v900_v20 = vunpack.c.l.bf16 %v1258_v6  ;;  %v901_v22 = vunpack.c.h.bf16 %v1258_v6  ;;  %v904_v23 = vunpack.c.l.bf16 %v1264_v11 }
  0x1e   : > { %v905_v24 = vunpack.c.h.bf16 %v1264_v11  ;;  %v908_v25 = vunpack.c.l.bf16 %v1267_v12  ;;  %v909_v26 = vunpack.c.h.bf16 %v1267_v12 }
  0x29   : > { %v1060_v1 = vpop.eup %1059 }
  0x2a   : > { %v294_v7 = vmul.f32 %v1060_v1, %v291_v53 }
  0x2c   : > { %v296_v18 = vmul.f32 %v294_v7, %v1168_v21  ;;  %v1277_v19 = vrot.slane %v294_v7, %v373_v37 }
  0x2e   : > { %v297_v27 = vsub.f32 %v295_v13, %v296_v18  ;;  %v376_v28 = vmul.f32 %v840_v35, %v1277_v19  ;;  %v377_v29 = vmul.f32 %v841_v36, %v1277_v19  ;;  %v378_v21 = vmul.f32 %v844_v38, %v1277_v19 }
  0x2f   : > { %v379_v30 = vmul.f32 %v845_v41, %v1277_v19  ;;  %v380_v31 = vmul.f32 %v848_v42, %v1277_v19  ;;  %v381_v32 = vmul.f32 %v849_v43, %v1277_v19  ;;  %v382_v33 = vmul.f32 %v852_v44, %v1277_v19 }
  0x30   : > { %v1292_v34 = vrot.slane %v297_v27, %v373_v37  ;;  %v383_v39 = vmul.f32 %v853_v47, %v1277_v19  ;;  %v384_v53 = vmul.f32 %v856_v48, %v1277_v19  ;;  %v385_v35 = vmul.f32 %v857_v49, %v1277_v19 }
  0x31   : > { %v386_v36 = vmul.f32 %v860_v50, %v1277_v19  ;;  %v387_v38 = vmul.f32 %v861_v54, %v1277_v19  ;;  %v388_v41 = vmul.f32 %v864_v55, %v1277_v19  ;;  %v389_v42 = vmul.f32 %v865_v56, %v1277_v19 }
  0x32   : > { %v418_v43 = vadd.f32 %v1292_v34, %v376_v28  ;;  %v419_v37 = vadd.f32 %v1292_v34, %v377_v29  ;;  %v420_v44 = vadd.f32 %v1292_v34, %v378_v21  ;;  %v421_v47 = vadd.f32 %v1292_v34, %v379_v30 }
  0x33   : > { %v422_v48 = vadd.f32 %v1292_v34, %v380_v31  ;;  %v423_v49 = vadd.f32 %v1292_v34, %v381_v32  ;;  %v424_v50 = vadd.f32 %v1292_v34, %v382_v33  ;;  %v425_v54 = vadd.f32 %v1292_v34, %v383_v39 }
  0x34   : > { %v454_v1 = vmax.f32 %v418_v43, 0.0  ;;  %v455_v55 = vmax.f32 %v419_v37, 0.0  ;;  %v456_v7 = vmax.f32 %v420_v44, 0.0  ;;  %v457_v56 = vmax.f32 %v421_v47, 0.0 }
  0x35   : > { %v458_v13 = vmax.f32 %v422_v48, 0.0  ;;  %v459_v18 = vmax.f32 %v423_v49, 0.0  ;;  %v460_v27 = vmax.f32 %v424_v50, 0.0  ;;  %v461_v28 = vmax.f32 %v425_v54, 0.0 }
  0x36   : > { %v913_v29 = vpack.c.bf16 %v455_v55, %v454_v1  ;;  %v918_v21 = vpack.c.bf16 %v457_v56, %v456_v7  ;;  %v426_v30 = vadd.f32 %v1292_v34, %v384_v53  ;;  %v427_v31 = vadd.f32 %v1292_v34, %v385_v35 }
  0x37   : > { %v923_v32 = vpack.c.bf16 %v459_v18, %v458_v13  ;;  %v928_v33 = vpack.c.bf16 %v461_v28, %v460_v27  ;;  %v428_v39 = vadd.f32 %v1292_v34, %v386_v36  ;;  %v429_v43 = vadd.f32 %v1292_v34, %v387_v38 }
  0x38   : > { %914 = vst [vmem:[%s1314_s27] sm:$0xff] %v913_v29   ;;  %1017 = vst [vmem:[%s1314_s27 + $0x8] sm:$0xff] %v918_v21   ;;  %v462_v37 = vmax.f32 %v426_v30, 0.0  ;;  %v463_v44 = vmax.f32 %v427_v31, 0.0  ;;  %v430_v47 = vadd.f32 %v1292_v34, %v388_v41  ;;  %v431_v48 = vadd.f32 %v1292_v34, %v389_v42 }
  0x39   : > { %1018 = vst [vmem:[%s1314_s27 + $0x10] sm:$0xff] %v923_v32   ;;  %1019 = vst [vmem:[%s1314_s27 + $0x18] sm:$0xff] %v928_v33   ;;  %v464_v53 = vmax.f32 %v428_v39, 0.0  ;;  %v465_v49 = vmax.f32 %v429_v43, 0.0  ;;  %v390_v35 = vmul.f32 %v868_v57, %v1277_v19  ;;  %v391_v36 = vmul.f32 %v869_v59, %v1277_v19 }
  0x3a   : > { %v933_v38 = vpack.c.bf16 %v463_v44, %v462_v37  ;;  %v466_v50 = vmax.f32 %v430_v47, 0.0  ;;  %v467_v54 = vmax.f32 %v431_v48, 0.0  ;;  %v392_v41 = vmul.f32 %v872_v60, %v1277_v19 }
  0x3b   : > { %v938_v42 = vpack.c.bf16 %v465_v49, %v464_v53  ;;  %v432_v1 = vadd.f32 %v1292_v34, %v390_v35  ;;  %v433_v55 = vadd.f32 %v1292_v34, %v391_v36  ;;  %v393_v57 = vmul.f32 %v873_v61, %v1277_v19 }
  0x3c   : > { %1020 = vst [vmem:[%s1314_s27 + $0x20] sm:$0xff] %v933_v38   ;;  %v943_v40 = vpack.c.bf16 %v467_v54, %v466_v50  ;;  %v434_v59 = vadd.f32 %v1292_v34, %v392_v41  ;;  %v394_v7 = vmul.f32 %v876_v62, %v1277_v19  ;;  %v395_v60 = vmul.f32 %v877_v2, %v1277_v19 }
  0x3d   : > { %1021 = vst [vmem:[%s1314_s27 + $0x28] sm:$0xff] %v938_v42   ;;  %v468_v56 = vmax.f32 %v432_v1, 0.0  ;;  %v469_v13 = vmax.f32 %v433_v55, 0.0  ;;  %v435_v18 = vadd.f32 %v1292_v34, %v393_v57  ;;  %v396_v45 = vmul.f32 %v880_v3, %v1277_v19 }
  0x3e   : > { %1022 = vst [vmem:[%s1314_s27 + $0x30] sm:$0xff] %v943_v40   ;;  %v470_v61 = vmax.f32 %v434_v59, 0.0  ;;  %v436_v27 = vadd.f32 %v1292_v34, %v394_v7  ;;  %v437_v62 = vadd.f32 %v1292_v34, %v395_v60  ;;  %v397_v46 = vmul.f32 %v881_v4, %v1277_v19 }
  0x3f   : > { %v948_v2 = vpack.c.bf16 %v469_v13, %v468_v56  ;;  %v471_v28 = vmax.f32 %v435_v18, 0.0  ;;  %v438_v29 = vadd.f32 %v1292_v34, %v396_v45  ;;  %v398_v21 = vmul.f32 %v884_v5, %v1277_v19 }
  0x40   : > { %v472_v3 = vmax.f32 %v436_v27, 0.0  ;;  %v473_v30 = vmax.f32 %v437_v62, 0.0  ;;  %v439_v31 = vadd.f32 %v1292_v34, %v397_v46  ;;  %v399_v32 = vmul.f32 %v885_v8, %v1277_v19 }
  0x41   : > { %1023 = vst [vmem:[%s1314_s27 + $0x38] sm:$0xff] %v948_v2   ;;  %v953_v51 = vpack.c.bf16 %v471_v28, %v470_v61  ;;  %v474_v4 = vmax.f32 %v438_v29, 0.0  ;;  %v440_v33 = vadd.f32 %v1292_v34, %v398_v21  ;;  %v400_v39 = vmul.f32 %v888_v9, %v1277_v19 }
  0x42   : > { %v958_v43 = vpack.c.bf16 %v473_v30, %v472_v3  ;;  %v475_v5 = vmax.f32 %v439_v31, 0.0  ;;  %v441_v37 = vadd.f32 %v1292_v34, %v399_v32  ;;  %v401_v52 = vmul.f32 %v889_v10, %v1277_v19 }
  0x43   : > { %1024 = vst [vmem:[%s1314_s27 + $0x40] sm:$0xff] %v953_v51   ;;  %v476_v8 = vmax.f32 %v440_v33, 0.0  ;;  %v442_v44 = vadd.f32 %v1292_v34, %v400_v39  ;;  %v402_v47 = vmul.f32 %v892_v14, %v1277_v19  ;;  %v403_v9 = vmul.f32 %v893_v15, %v1277_v19 }
  0x44   : > { %1025 = vst [vmem:[%s1314_s27 + $0x48] sm:$0xff] %v958_v43   ;;  %v963_v48 = vpack.c.bf16 %v475_v5, %v474_v4  ;;  %v477_v53 = vmax.f32 %v441_v37, 0.0  ;;  %v443_v58 = vadd.f32 %v1292_v34, %v401_v52  ;;  %v404_v10 = vmul.f32 %v896_v16, %v1277_v19 }
  0x45   : > { %v478_v49 = vmax.f32 %v442_v44, 0.0  ;;  %v444_v35 = vadd.f32 %v1292_v34, %v402_v47  ;;  %v445_v36 = vadd.f32 %v1292_v34, %v403_v9  ;;  %v405_v63 = vmul.f32 %v897_v17, %v1277_v19 }
  0x46   : > { %1026 = vst [vmem:[%s1314_s27 + $0x50] sm:$0xff] %v963_v48   ;;  %v968_v14 = vpack.c.bf16 %v477_v53, %v476_v8  ;;  %v479_v15 = vmax.f32 %v443_v58, 0.0  ;;  %v446_v38 = vadd.f32 %v1292_v34, %v404_v10  ;;  %v406_v50 = vmul.f32 %v900_v20, %v1277_v19 }
  0x47   : > { %v480_v16 = vmax.f32 %v444_v35, 0.0  ;;  %v481_v54 = vmax.f32 %v445_v36, 0.0  ;;  %v447_v41 = vadd.f32 %v1292_v34, %v405_v63  ;;  %v407_v0 = vmul.f32 %v901_v22, %v1277_v19 }
  0x48   : > { %1027 = vst [vmem:[%s1314_s27 + $0x58] sm:$0xff] %v968_v14   ;;  %v973_v17 = vpack.c.bf16 %v479_v15, %v478_v49  ;;  %v482_v42 = vmax.f32 %v446_v38, 0.0  ;;  %v448_v1 = vadd.f32 %v1292_v34, %v406_v50  ;;  %v408_v55 = vmul.f32 %v904_v23, %v1277_v19 }
  0x49   : > { %v978_v57 = vpack.c.bf16 %v481_v54, %v480_v16  ;;  %v483_v20 = vmax.f32 %v447_v41, 0.0  ;;  %v449_v40 = vadd.f32 %v1292_v34, %v407_v0  ;;  %v409_v6 = vmul.f32 %v905_v24, %v1277_v19 }
  0x4a   : > { %1028 = vst [vmem:[%s1314_s27 + $0x60] sm:$0xff] %v973_v17   ;;  %v484_v22 = vmax.f32 %v448_v1, 0.0  ;;  %v450_v59 = vadd.f32 %v1292_v34, %v408_v55  ;;  %v410_v7 = vmul.f32 %v908_v25, %v1277_v19  ;;  %v411_v23 = vmul.f32 %v909_v26, %v1277_v19 }
  0x4b   : > { %1029 = vst [vmem:[%s1314_s27 + $0x68] sm:$0xff] %v978_v57   ;;  %v983_v60 = vpack.c.bf16 %v483_v20, %v482_v42  ;;  %v485_v56 = vmax.f32 %v449_v40, 0.0  ;;  %v451_v11 = vadd.f32 %v1292_v34, %v409_v6 }
  0x4c   : > { %v486_v24 = vmax.f32 %v450_v59, 0.0  ;;  %v452_v13 = vadd.f32 %v1292_v34, %v410_v7  ;;  %v453_v18 = vadd.f32 %v1292_v34, %v411_v23 }
  0x4d   : > { %1030 = vst [vmem:[%s1314_s27 + $0x70] sm:$0xff] %v983_v60   ;;  %v988_v45 = vpack.c.bf16 %v485_v56, %v484_v22  ;;  %v487_v61 = vmax.f32 %v451_v11, 0.0 }
  0x4e   : > { %v488_v25 = vmax.f32 %v452_v13, 0.0  ;;  %v489_v27 = vmax.f32 %v453_v18, 0.0 }
  0x4f   : > { %1031 = vst [vmem:[%s1314_s27 + $0x78] sm:$0xff] %v988_v45   ;;  %v993_v12 = vpack.c.bf16 %v487_v61, %v486_v24 }
  0x50   : > { %v998_v19 = vpack.c.bf16 %v489_v27, %v488_v25 }
  0x51   : > { %1032 = vst [vmem:[%s1314_s27 + $0x80] sm:$0xff] %v993_v12  }
  0x52   : > { %1033 = vst [vmem:[%s1314_s27 + $0x88] sm:$0xff] %v998_v19  }
  0x53 PF: > { %s15_s20 = sadd.s32 1, %s1083_s20   ;;  %s1443_s18 = smov %s1079_s19 }
  0x54   : > { %p12_p5 = scmp.ge.s32.totalorder %s15_s20, 6   ;;  %s1444_s19 = smov %s1446_s21 }
  0x56   :  { %14 = sbr.rel (!%p12_p5) target bundleno = 2 (0x2), region = 70 }

// kernel: generator_forward.7
= control target key start
LH: loop header
LB: loop body
LE: loop exit
PB: predicated region body
PF: predicated region fallthrough
CT: control target
= control target key end

     0   :  { %s2300_s15 = smov 0   ;;  %s2302_s16 = smov 0   ;;  %s2641_s0 = inlined_call_operand.vmem [shape: bf16[4,288,512], index: 0, kind: input, shape index: {}]   ;;  %s2642_s1 = inlined_call_operand.vmem [shape: bf16[4,512,128], index: 1, kind: input, shape index: {}]   ;;  %s2643_s2 = inlined_call_operand.vmem [shape: bf16[4,288,128], index: 2, kind: output, shape index: {0}]   ;;  %s2644_s3 = inlined_call_operand.vmem [shape: f32[4,1,128], index: 3, kind: output, shape index: {1}]   ;;  %s2645_s4 = inlined_call_operand.vmem [shape: f32[4,1,128], index: 4, kind: output, shape index: {2}]  }
   0x1   :  { %s2304_s17 = smov 0  }
   0x2 LB: > { %s27_s18 = sadd.s32 1, %s2268_s16  ;;  %p1792_p0 = scmp.ge.s32.totalorder %s2272_s17, 1  ;;  %s2272_s17 = sphi %s2304_s17, %s15_s17   ;;  %s2268_s16 = sphi %s2302_s16, %s2647_s16   ;;  %s2264_s15 = sphi %s2300_s15, %s2646_s15  }
   0x3   : > { %p29_p1 = scmp.ge.s32.totalorder %s27_s18, 4  ;;  %p203_p2 = scmp.lt.s32.totalorder %s2272_s17, 5 }
   0x5   : > { %s2649_s18 = smov (%p29_p1, %s27_s18), 0  ;;  %p204_p3 = pnand %p1792_p0, %p203_p2 }
   0x6   : > { %p252_p4 = scmp.lt.s32.totalorder (!%p204_p3), %s2264_s15, 3 }
   0x7   : > { %207 = sbr.rel (%p204_p3) target bundleno = 432 (0x1b0), region = 28 }
   0xc   : > { %v2274_v0 = vmov 0   ;;  %s2651_s15 = smov (!%p252_p4, %s2264_s15), 3 }
   0xd   : > { %976 = vmatprep.subr.bf16.mxu0 %v2274_v0  ;;  %1153 = vmatprep.subr.bf16.mxu1 %v2274_v0  ;;  %s1939_s19 = sshll.u32 %s2651_s15, 8  ;;  %s2083_s23 = smul.u32 576, %s2651_s15 }
   0xe   : > { %s2326_s22 = scalar_lea.vmem %s2642_s1, %s1939_s19  ;;  %s2084_s27 = smul.u32 144, %s2651_s15 }
   0xf   : > { %v2110_v1 = vld [vmem:[%s2326_s22 + $0x38] sm:$0xff]   ;;  %v2112_v3 = vld [vmem:[%s2326_s22 + $0x30] sm:$0xff]   ;;  %v2114_v5 = vld [vmem:[%s2326_s22 + $0x28] sm:$0xff]   ;;  %s2362_s26 = scalar_lea.vmem %s2641_s0, %s2083_s23  ;;  %s280_s7 = scalar_lea.vmem %s2644_s3, %s2651_s15 }
  0x10   : > { %v2111_v2 = vld [vmem:[%s2326_s22 + $0xb8] sm:$0xff]   ;;  %977 = vmatpush1.bf16.msra.mxu0 %v2110_v1  ;;  %v2113_v4 = vld [vmem:[%s2326_s22 + $0xb0] sm:$0xff]   ;;  %v2115_v6 = vld [vmem:[%s2326_s22 + $0xa8] sm:$0xff]   ;;  %s2472_s30 = scalar_lea.vmem %s2643_s2, %s2084_s27  ;;  %s285_s10 = scalar_lea.vmem %s2645_s4, %s2651_s15 }
  0x11   : > { %1154 = vmatpush1.bf16.msra.mxu1 %v2111_v2  ;;  %978 = vmatprep.subr.bf16.mxu0 %v2274_v0  ;;  %v2116_v7 = vld [vmem:[%s2326_s22 + $0x20] sm:$0xff]   ;;  %v2118_v9 = vld [vmem:[%s2326_s22 + $0x18] sm:$0xff]   ;;  %v2120_v11 = vld [vmem:[%s2326_s22 + $0x10] sm:$0xff]  }
  0x12   : > { %1155 = vmatprep.subr.bf16.mxu1 %v2274_v0  ;;  %v2117_v8 = vld [vmem:[%s2326_s22 + $0xa0] sm:$0xff]   ;;  %v2119_v10 = vld [vmem:[%s2326_s22 + $0x98] sm:$0xff]   ;;  %v2121_v12 = vld [vmem:[%s2326_s22 + $0x90] sm:$0xff]  }
  0x13   : > { %v2122_v13 = vld [vmem:[%s2326_s22 + $0x8] sm:$0xff]   ;;  %v2124_v15 = vld [vmem:[%s2326_s22] sm:$0xff]   ;;  %v2126_v17 = vld [vmem:[%s2326_s22 + $0x78] sm:$0xff]  }
  0x14   : > { %979 = vmatpush1.bf16.msra.mxu0 %v2112_v3  ;;  %v2123_v14 = vld [vmem:[%s2326_s22 + $0x88] sm:$0xff]   ;;  %v2125_v16 = vld [vmem:[%s2326_s22 + $0x80] sm:$0xff]   ;;  %v2127_v18 = vld [vmem:[%s2326_s22 + $0xf8] sm:$0xff]  }
  0x15   : > { %1156 = vmatpush1.bf16.msra.mxu1 %v2113_v4  ;;  %980 = vmatprep.subr.bf16.mxu0 %v2274_v0  ;;  %v2144_v19 = vld [vmem:[%s2362_s26 + $0x4] ss:$16 sps:$4 sm:$0xff]   ;;  %v2147_v21 = vld [vmem:[%s2362_s26 + $0xc] ss:$16 sps:$4 sm:$0xff]   ;;  %v2142_v35 = vld [vmem:[%s2362_s26] ss:$16 sps:$4 sm:$0xff]  }
  0x16   : > { %1157 = vmatprep.subr.bf16.mxu1 %v2274_v0  ;;  %v2128_v20 = vld [vmem:[%s2326_s22 + $0x70] sm:$0xff]   ;;  %1008 = vmatprep.mubr.bf16.mxu0 %v2144_v19  ;;  %v2130_v23 = vld [vmem:[%s2326_s22 + $0x68] sm:$0xff]   ;;  %v2132_v25 = vld [vmem:[%s2326_s22 + $0x60] sm:$0xff]  }
  0x17   : > { %v2129_v22 = vld [vmem:[%s2326_s22 + $0xf0] sm:$0xff]   ;;  %1185 = vmatprep.mubr.bf16.mxu1 %v2147_v21  ;;  %v2131_v24 = vld [vmem:[%s2326_s22 + $0xe8] sm:$0xff]   ;;  %v2133_v26 = vld [vmem:[%s2326_s22 + $0xe0] sm:$0xff]  }
  0x18   : > { %981 = vmatpush1.bf16.msra.mxu0 %v2114_v5  ;;  %v2134_v27 = vld [vmem:[%s2326_s22 + $0x58] sm:$0xff]   ;;  %v2136_v29 = vld [vmem:[%s2326_s22 + $0x50] sm:$0xff]   ;;  %v2138_v31 = vld [vmem:[%s2326_s22 + $0x48] sm:$0xff]  }
  0x19   : > { %1158 = vmatpush1.bf16.msra.mxu1 %v2115_v6  ;;  %982 = vmatprep.subr.bf16.mxu0 %v2274_v0  ;;  %v2135_v28 = vld [vmem:[%s2326_s22 + $0xd8] sm:$0xff]   ;;  %v2137_v30 = vld [vmem:[%s2326_s22 + $0xd0] sm:$0xff]   ;;  %v2139_v32 = vld [vmem:[%s2326_s22 + $0xc8] sm:$0xff]  }
  0x1a   : > { %1159 = vmatprep.subr.bf16.mxu1 %v2274_v0  ;;  %v2140_v33 = vld [vmem:[%s2326_s22 + $0x40] sm:$0xff]   ;;  %v2145_v36 = vld [vmem:[%s2362_s26 + $0x8] ss:$16 sps:$4 sm:$0xff]   ;;  %v2150_v38 = vld [vmem:[%s2362_s26 + $0x2c] ss:$16 sps:$4 sm:$0xff]  }
  0x1b   : > { %v2141_v34 = vld [vmem:[%s2326_s22 + $0xc0] sm:$0xff]   ;;  %v2153_v40 = vld [vmem:[%s2362_s26 + $0x28] ss:$16 sps:$4 sm:$0xff]   ;;  %v2156_v42 = vld [vmem:[%s2362_s26 + $0x4c] ss:$16 sps:$4 sm:$0xff]  }
  0x1c   : > { %983 = vmatpush1.bf16.msra.mxu0 %v2116_v7  ;;  %v2148_v37 = vld [vmem:[%s2362_s26 + $0x24] ss:$16 sps:$4 sm:$0xff]   ;;  %v2152_v39 = vld [vmem:[%s2362_s26 + $0x20] ss:$16 sps:$4 sm:$0xff]   ;;  %v2159_v44 = vld [vmem:[%s2362_s26 + $0x48] ss:$16 sps:$4 sm:$0xff]  }
  0x1d   : > { %1160 = vmatpush1.bf16.msra.mxu1 %v2117_v8  ;;  %984 = vmatprep.subr.bf16.mxu0 %v2274_v0  ;;  %v2154_v41 = vld [vmem:[%s2362_s26 + $0x44] ss:$16 sps:$4 sm:$0xff]   ;;  %v2158_v43 = vld [vmem:[%s2362_s26 + $0x40] ss:$16 sps:$4 sm:$0xff]   ;;  %v2162_v46 = vld [vmem:[%s2362_s26 + $0x6c] ss:$16 sps:$4 sm:$0xff]  }
  0x1e   : > { %1161 = vmatprep.subr.bf16.mxu1 %v2274_v0  ;;  %v2160_v45 = vld [vmem:[%s2362_s26 + $0x64] ss:$16 sps:$4 sm:$0xff]   ;;  %v2164_v47 = vld [vmem:[%s2362_s26 + $0x60] ss:$16 sps:$4 sm:$0xff]   ;;  %v2165_v48 = vld [vmem:[%s2362_s26 + $0x68] ss:$16 sps:$4 sm:$0xff]  }
  0x1f   : > { %v2166_v49 = vld [vmem:[%s2362_s26 + $0x84] ss:$16 sps:$4 sm:$0xff]   ;;  %v2168_v50 = vld [vmem:[%s2362_s26 + $0x8c] ss:$16 sps:$4 sm:$0xff]   ;;  %v2170_v51 = vld [vmem:[%s2362_s26 + $0x80] ss:$16 sps:$4 sm:$0xff]  }
  0x20   : > { %985 = vmatpush1.bf16.msra.mxu0 %v2118_v9  ;;  %v2171_v52 = vld [vmem:[%s2362_s26 + $0x88] ss:$16 sps:$4 sm:$0xff]   ;;  %v2172_v53 = vld [vmem:[%s2362_s26 + $0xa4] ss:$16 sps:$4 sm:$0xff]   ;;  %v2174_v54 = vld [vmem:[%s2362_s26 + $0xac] ss:$16 sps:$4 sm:$0xff]  }
  0x21   : > { %1162 = vmatpush1.bf16.msra.mxu1 %v2119_v10  ;;  %986 = vmatprep.subr.bf16.mxu0 %v2274_v0  ;;  %v2176_v55 = vld [vmem:[%s2362_s26 + $0xa0] ss:$16 sps:$4 sm:$0xff]   ;;  %v2177_v56 = vld [vmem:[%s2362_s26 + $0xa8] ss:$16 sps:$4 sm:$0xff]   ;;  %v2178_v57 = vld [vmem:[%s2362_s26 + $0xc4] ss:$16 sps:$4 sm:$0xff]  }
  0x22   : > { %1163 = vmatprep.subr.bf16.mxu1 %v2274_v0  ;;  %v2180_v58 = vld [vmem:[%s2362_s26 + $0xcc] ss:$16 sps:$4 sm:$0xff]   ;;  %v2182_v59 = vld [vmem:[%s2362_s26 + $0xc0] ss:$16 sps:$4 sm:$0xff]   ;;  %v2183_v60 = vld [vmem:[%s2362_s26 + $0xc8] ss:$16 sps:$4 sm:$0xff]  }
  0x23   : > { %v2184_v61 = vld [vmem:[%s2362_s26 + $0xe4] ss:$16 sps:$4 sm:$0xff]   ;;  %v2186_v62 = vld [vmem:[%s2362_s26 + $0xec] ss:$16 sps:$4 sm:$0xff]   ;;  %v2188_v63 = vld [vmem:[%s2362_s26 + $0xe0] ss:$16 sps:$4 sm:$0xff]  }
  0x24   : > { %987 = vmatpush1.bf16.msra.mxu0 %v2120_v11  ;;  %v2190_v1 = vld [vmem:[%s2362_s26 + $0x104] ss:$16 sps:$4 sm:$0xff]   ;;  %v2192_v2 = vld [vmem:[%s2362_s26 + $0x10c] ss:$16 sps:$4 sm:$0xff]   ;;  %v2194_v3 = vld [vmem:[%s2362_s26 + $0x100] ss:$16 sps:$4 sm:$0xff]  }
  0x25   : > { %1164 = vmatpush1.bf16.msra.mxu1 %v2121_v12  ;;  %988 = vmatprep.subr.bf16.mxu0 %v2274_v0  ;;  %v2195_v4 = vld [vmem:[%s2362_s26 + $0x108] ss:$16 sps:$4 sm:$0xff]   ;;  %v2196_v5 = vld [vmem:[%s2362_s26 + $0x124] ss:$16 sps:$4 sm:$0xff]   ;;  %v2198_v6 = vld [vmem:[%s2362_s26 + $0x12c] ss:$16 sps:$4 sm:$0xff]  }
  0x26   : > { %1165 = vmatprep.subr.bf16.mxu1 %v2274_v0  ;;  %v2200_v7 = vld [vmem:[%s2362_s26 + $0x120] ss:$16 sps:$4 sm:$0xff]   ;;  %v2201_v8 = vld [vmem:[%s2362_s26 + $0x128] ss:$16 sps:$4 sm:$0xff]   ;;  %v2202_v9 = vld [vmem:[%s2362_s26 + $0x144] ss:$16 sps:$4 sm:$0xff]  }
  0x27   : > { %v2204_v10 = vld [vmem:[%s2362_s26 + $0x14c] ss:$16 sps:$4 sm:$0xff]   ;;  %v2206_v11 = vld [vmem:[%s2362_s26 + $0x140] ss:$16 sps:$4 sm:$0xff]   ;;  %v2207_v12 = vld [vmem:[%s2362_s26 + $0x148] ss:$16 sps:$4 sm:$0xff]  }
  0x28   : > { %989 = vmatpush1.bf16.msra.mxu0 %v2122_v13  ;;  %v2208_v13 = vld [vmem:[%s2362_s26 + $0x164] ss:$16 sps:$4 sm:$0xff]   ;;  %v2218_v19 = vld [vmem:[%s2362_s26 + $0x180] ss:$16 sps:$4 sm:$0xff]  }
  0x29   : > { %1166 = vmatpush1.bf16.msra.mxu1 %v2123_v14  ;;  %990 = vmatprep.subr.bf16.mxu0 %v2274_v0  ;;  %v2210_v14 = vld [vmem:[%s2362_s26 + $0x16c] ss:$16 sps:$4 sm:$0xff]   ;;  %v2220_v21 = vld [vmem:[%s2362_s26 + $0x1a4] ss:$16 sps:$4 sm:$0xff]  }
  0x2a   : > { %1167 = vmatprep.subr.bf16.mxu1 %v2274_v0 }
  0x2c   : > { %991 = vmatpush1.bf16.msra.mxu0 %v2124_v15  ;;  %v2212_v15 = vld [vmem:[%s2362_s26 + $0x160] ss:$16 sps:$4 sm:$0xff]  }
  0x2d   : > { %1168 = vmatpush1.bf16.msra.mxu1 %v2125_v16  ;;  %992 = vmatprep.subr.bf16.mxu0 %v2274_v0  ;;  %v2213_v16 = vld [vmem:[%s2362_s26 + $0x168] ss:$16 sps:$4 sm:$0xff]  }
  0x2e   : > { %1169 = vmatprep.subr.bf16.mxu1 %v2274_v0 }
  0x30   : > { %993 = vmatpush2.bf16.msra.mxu0 %v2126_v17  ;;  %v2214_v17 = vld [vmem:[%s2362_s26 + $0x184] ss:$16 sps:$4 sm:$0xff]  }
  0x31   : > { %1170 = vmatpush2.bf16.msra.mxu1 %v2127_v18  ;;  %994 = vmatprep.subr.bf16.mxu0 %v2274_v0  ;;  %v2216_v18 = vld [vmem:[%s2362_s26 + $0x18c] ss:$16 sps:$4 sm:$0xff]  }
  0x32   : > { %1171 = vmatprep.subr.bf16.mxu1 %v2274_v0 }
  0x34   : > { %995 = vmatpush2.bf16.msra.mxu0 %v2128_v20  ;;  %v2219_v20 = vld [vmem:[%s2362_s26 + $0x188] ss:$16 sps:$4 sm:$0xff]  }
  0x35   : > { %1172 = vmatpush2.bf16.msra.mxu1 %v2129_v22  ;;  %996 = vmatprep.subr.bf16.mxu0 %v2274_v0  ;;  %v2222_v22 = vld [vmem:[%s2362_s26 + $0x1ac] ss:$16 sps:$4 sm:$0xff]  }
  0x36   : > { %1173 = vmatprep.subr.bf16.mxu1 %v2274_v0 }
  0x38   : > { %997 = vmatpush2.bf16.msra.mxu0 %v2130_v23  ;;  %v2224_v23 = vld [vmem:[%s2362_s26 + $0x1a0] ss:$16 sps:$4 sm:$0xff]  }
  0x39   : > { %1174 = vmatpush2.bf16.msra.mxu1 %v2131_v24  ;;  %998 = vmatprep.subr.bf16.mxu0 %v2274_v0  ;;  %v2225_v24 = vld [vmem:[%s2362_s26 + $0x1a8] ss:$16 sps:$4 sm:$0xff]  }
  0x3a   : > { %1175 = vmatprep.subr.bf16.mxu1 %v2274_v0 }
  0x3c   : > { %999 = vmatpush2.bf16.msra.mxu0 %v2132_v25  ;;  %v2226_v25 = vld [vmem:[%s2362_s26 + $0x1c4] ss:$16 sps:$4 sm:$0xff]  }
  0x3d   : > { %1176 = vmatpush2.bf16.msra.mxu1 %v2133_v26  ;;  %1000 = vmatprep.subr.bf16.mxu0 %v2274_v0  ;;  %v2228_v26 = vld [vmem:[%s2362_s26 + $0x1cc] ss:$16 sps:$4 sm:$0xff]  }
  0x3e   : > { %1177 = vmatprep.subr.bf16.mxu1 %v2274_v0 }
  0x40   : > { %1001 = vmatpush2.bf16.msra.mxu0 %v2134_v27  ;;  %v2230_v27 = vld [vmem:[%s2362_s26 + $0x1c0] ss:$16 sps:$4 sm:$0xff]  }
  0x41   : > { %1178 = vmatpush2.bf16.msra.mxu1 %v2135_v28  ;;  %1002 = vmatprep.subr.bf16.mxu0 %v2274_v0  ;;  %v2231_v28 = vld [vmem:[%s2362_s26 + $0x1c8] ss:$16 sps:$4 sm:$0xff]  }
  0x42   : > { %1179 = vmatprep.subr.bf16.mxu1 %v2274_v0 }
  0x44   : > { %1003 = vmatpush2.bf16.msra.mxu0 %v2136_v29  ;;  %v2232_v29 = vld [vmem:[%s2362_s26 + $0x1e4] ss:$16 sps:$4 sm:$0xff]  }
  0x45   : > { %1180 = vmatpush2.bf16.msra.mxu1 %v2137_v30  ;;  %1004 = vmatprep.subr.bf16.mxu0 %v2274_v0  ;;  %v2234_v30 = vld [vmem:[%s2362_s26 + $0x1ec] ss:$16 sps:$4 sm:$0xff]  }
  0x46   : > { %1181 = vmatprep.subr.bf16.mxu1 %v2274_v0 }
  0x48   : > { %1005 = vmatpush2.bf16.msra.mxu0 %v2138_v31  ;;  %v2236_v31 = vld [vmem:[%s2362_s26 + $0x1e0] ss:$16 sps:$4 sm:$0xff]  }
  0x49   : > { %1182 = vmatpush2.bf16.msra.mxu1 %v2139_v32  ;;  %1006 = vmatprep.subr.bf16.mxu0 %v2274_v0  ;;  %v2237_v32 = vld [vmem:[%s2362_s26 + $0x1e8] ss:$16 sps:$4 sm:$0xff]  }
  0x4a   : > { %1183 = vmatprep.subr.bf16.mxu1 %v2274_v0  ;;  %v2189_v0 = vld [vmem:[%s2362_s26 + $0xe8] ss:$16 sps:$4 sm:$0xff]  }
  0x4c   : > { %1007 = vmatpush2.bf16.msra.mxu0 %v2140_v33  ;;  %v2238_v33 = vld [vmem:[%s2362_s26 + $0x204] ss:$16 sps:$4 sm:$0xff]  }
  0x4d   : > { %1184 = vmatpush2.bf16.msra.mxu1 %v2141_v34  ;;  %v2240_v34 = vld [vmem:[%s2362_s26 + $0x20c] ss:$16 sps:$4 sm:$0xff]  }
  0x4f   : > { %1009 = vmatmul.mubr.bf16.vlgmr.msra.gmra.mxu0 %v2142_v35  ;;  %v2242_v35 = vld [vmem:[%s2362_s26 + $0x200] ss:$16 sps:$4 sm:$0xff]  }
  0x50   : > { %1186 = vmatmul.mubr.bf16.vlgmr.msra.gmra.mxu1 %v2145_v36  ;;  %1016 = vmatprep.mubr.bf16.mxu0 %v2148_v37  ;;  %v2243_v36 = vld [vmem:[%s2362_s26 + $0x208] ss:$16 sps:$4 sm:$0xff]   ;;  %v2244_v37 = vld [vmem:[%s2362_s26 + $0x224] ss:$16 sps:$4 sm:$0xff]  }
  0x51   : > { %1193 = vmatprep.mubr.bf16.mxu1 %v2150_v38  ;;  %v2246_v38 = vld [vmem:[%s2362_s26 + $0x22c] ss:$16 sps:$4 sm:$0xff]  }
  0x57   : > { %1017 = vmatmul.mubr.bf16.gmra.mxu0 %v2152_v39  ;;  %v2248_v39 = vld [vmem:[%s2362_s26 + $0x220] ss:$16 sps:$4 sm:$0xff]  }
  0x58   : > { %1194 = vmatmul.mubr.bf16.gmra.mxu1 %v2153_v40  ;;  %1024 = vmatprep.mubr.bf16.mxu0 %v2154_v41  ;;  %v2249_v40 = vld [vmem:[%s2362_s26 + $0x228] ss:$16 sps:$4 sm:$0xff]  }
  0x59   : > { %1201 = vmatprep.mubr.bf16.mxu1 %v2156_v42 }
  0x5f   : > { %1025 = vmatmul.mubr.bf16.gmra.mxu0 %v2158_v43 }
  0x60   : > { %1202 = vmatmul.mubr.bf16.gmra.mxu1 %v2159_v44  ;;  %1032 = vmatprep.mubr.bf16.mxu0 %v2160_v45 }
  0x61   : > { %1209 = vmatprep.mubr.bf16.mxu1 %v2162_v46 }
  0x67   : > { %1033 = vmatmul.mubr.bf16.gmra.mxu0 %v2164_v47 }
  0x68   : > { %1210 = vmatmul.mubr.bf16.gmra.mxu1 %v2165_v48  ;;  %1040 = vmatprep.mubr.bf16.mxu0 %v2166_v49 }
  0x69   : > { %1217 = vmatprep.mubr.bf16.mxu1 %v2168_v50 }
  0x6f   : > { %1041 = vmatmul.mubr.bf16.gmra.mxu0 %v2170_v51 }
  0x70   : > { %1218 = vmatmul.mubr.bf16.gmra.mxu1 %v2171_v52  ;;  %1048 = vmatprep.mubr.bf16.mxu0 %v2172_v53 }
  0x71   : > { %1225 = vmatprep.mubr.bf16.mxu1 %v2174_v54 }
  0x77   : > { %1049 = vmatmul.mubr.bf16.gmra.mxu0 %v2176_v55 }
  0x78   : > { %1226 = vmatmul.mubr.bf16.gmra.mxu1 %v2177_v56  ;;  %1056 = vmatprep.mubr.bf16.mxu0 %v2178_v57 }
  0x79   : > { %1233 = vmatprep.mubr.bf16.mxu1 %v2180_v58 }
  0x7f   : > { %1057 = vmatmul.mubr.bf16.gmra.mxu0 %v2182_v59 }
  0x80   : > { %1234 = vmatmul.mubr.bf16.gmra.mxu1 %v2183_v60  ;;  %1064 = vmatprep.mubr.bf16.mxu0 %v2184_v61 }
  0x81   : > { %1241 = vmatprep.mubr.bf16.mxu1 %v2186_v62 }
  0x87   : > { %1065 = vmatmul.mubr.bf16.gmra.mxu0 %v2188_v63 }
  0x88   : > { %1242 = vmatmul.mubr.bf16.gmra.mxu1 %v2189_v0  ;;  %1072 = vmatprep.mubr.bf16.mxu0 %v2190_v1 }
  0x89   : > { %1249 = vmatprep.mubr.bf16.mxu1 %v2192_v2 }
  0x8f   : > { %1073 = vmatmul.mubr.bf16.gmra.mxu0 %v2194_v3 }
  0x90   : > { %1250 = vmatmul.mubr.bf16.gmra.mxu1 %v2195_v4  ;;  %1080 = vmatprep.mubr.bf16.mxu0 %v2196_v5 }
  0x91   : > { %1257 = vmatprep.mubr.bf16.mxu1 %v2198_v6 }
  0x97   : > { %1081 = vmatmul.mubr.bf16.gmra.mxu0 %v2200_v7 }
  0x98   : > { %1258 = vmatmul.mubr.bf16.gmra.mxu1 %v2201_v8  ;;  %1088 = vmatprep.mubr.bf16.mxu0 %v2202_v9 }
  0x99   : > { %1265 = vmatprep.mubr.bf16.mxu1 %v2204_v10 }
  0x9f   : > { %1089 = vmatmul.mubr.bf16.gmra.mxu0 %v2206_v11 }
  0xa0   : > { %1266 = vmatmul.mubr.bf16.gmra.mxu1 %v2207_v12  ;;  %1096 = vmatprep.mubr.bf16.mxu0 %v2208_v13 }
  0xa1   : > { %1273 = vmatprep.mubr.bf16.mxu1 %v2210_v14 }
  0xa7   : > { %1097 = vmatmul.mubr.bf16.gmra.mxu0 %v2212_v15 }
  0xa8   : > { %1274 = vmatmul.mubr.bf16.gmra.mxu1 %v2213_v16  ;;  %1104 = vmatprep.mubr.bf16.mxu0 %v2214_v17 }
  0xa9   : > { %1281 = vmatprep.mubr.bf16.mxu1 %v2216_v18 }
  0xaf   : > { %1105 = vmatmul.mubr.bf16.gmra.mxu0 %v2218_v19 }
  0xb0   : > { %1282 = vmatmul.mubr.bf16.gmra.mxu1 %v2219_v20  ;;  %1112 = vmatprep.mubr.bf16.mxu0 %v2220_v21 }
  0xb1   : > { %1289 = vmatprep.mubr.bf16.mxu1 %v2222_v22 }
  0xb7   : > { %1113 = vmatmul.mubr.bf16.gmra.mxu0 %v2224_v23 }
  0xb8   : > { %1290 = vmatmul.mubr.bf16.gmra.mxu1 %v2225_v24  ;;  %1120 = vmatprep.mubr.bf16.mxu0 %v2226_v25 }
  0xb9   : > { %1297 = vmatprep.mubr.bf16.mxu1 %v2228_v26 }
  0xbf   : > { %1121 = vmatmul.mubr.bf16.gmra.mxu0 %v2230_v27 }
  0xc0   : > { %1298 = vmatmul.mubr.bf16.gmra.mxu1 %v2231_v28  ;;  %1128 = vmatprep.mubr.bf16.mxu0 %v2232_v29 }
  0xc1   : > { %1305 = vmatprep.mubr.bf16.mxu1 %v2234_v30 }
  0xc7   : > { %1129 = vmatmul.mubr.bf16.gmra.mxu0 %v2236_v31 }
  0xc8   : > { %1306 = vmatmul.mubr.bf16.gmra.mxu1 %v2237_v32  ;;  %1136 = vmatprep.mubr.bf16.mxu0 %v2238_v33 }
  0xc9   : > { %1313 = vmatprep.mubr.bf16.mxu1 %v2240_v34 }
  0xcf   : > { %1137 = vmatmul.mubr.bf16.gmra.mxu0 %v2242_v35 }
  0xd0   : > { %1314 = vmatmul.mubr.bf16.gmra.mxu1 %v2243_v36  ;;  %1144 = vmatprep.mubr.bf16.mxu0 %v2244_v37 }
  0xd1   : > { %1321 = vmatprep.mubr.bf16.mxu1 %v2246_v38 }
  0xd7   : > { %1145 = vmatmul.mubr.bf16.gmra.mxu0 %v2248_v39 }
  0xd8   : > { %1322 = vmatmul.mubr.bf16.gmra.mxu1 %v2249_v40 }
 0x10f   : > { %v1010_v41 = vpop.f32.mrf.mxu0 }
 0x110   : > { %v1187_v42 = vpop.f32.mrf.mxu1 }
 0x111   : > { %v1012_v43 = vpop.f32.mrf.mxu0  ;;  %v1188_v45 = vadd.f32 %v1187_v42, %v1010_v41 }
 0x112   : > { %v1189_v44 = vpop.f32.mrf.mxu1 }
 0x113   : > { %v1013_v46 = vpop.f32.mrf.mxu0  ;;  %v1552_v51 = vmul.f32 %v1188_v45, %v1188_v45 }
 0x114   : > { %v1190_v47 = vpop.f32.mrf.mxu1 }
 0x115   : > { %v1191_v48 = vadd.f32 %v1190_v47, %v1013_v46  ;;  %v1015_v49 = vpop.f32.mrf.mxu0 }
 0x116   : > { %v1192_v50 = vpop.f32.mrf.mxu1 }
 0x117   : > { %v1979_v52 = vpack.c.bf16 %v1191_v48, %v1188_v45  ;;  %v1510_v53 = vadd.f32 %v1191_v48, %v1188_v45  ;;  %v1553_v54 = vmul.f32 %v1191_v48, %v1191_v48  ;;  %v1018_v55 = vpop.f32.mrf.mxu0 }
 0x118   : > { %v1195_v56 = vpop.f32.mrf.mxu1 }
 0x119   : > { %1980 = vst [vmem:[%s2472_s30] sm:$0xff] %v1979_v52   ;;  %v1588_v57 = vadd.f32 %v1553_v54, %v1552_v51  ;;  %v1196_v58 = vadd.f32 %v1195_v56, %v1018_v55  ;;  %v1020_v59 = vpop.f32.mrf.mxu0 }
 0x11a   : > { %v1197_v60 = vpop.f32.mrf.mxu1 }
 0x11b   : > { %v1554_v61 = vmul.f32 %v1196_v58, %v1196_v58  ;;  %v1021_v62 = vpop.f32.mrf.mxu0  ;;  %v1511_v0 = vadd.f32 %v1510_v53, %v1196_v58 }
 0x11c   : > { %v1198_v63 = vpop.f32.mrf.mxu1 }
 0x11d   : > { %v1199_v1 = vadd.f32 %v1198_v63, %v1021_v62  ;;  %v1023_v2 = vpop.f32.mrf.mxu0  ;;  %v1589_v4 = vadd.f32 %v1588_v57, %v1554_v61 }
 0x11e   : > { %v1200_v3 = vpop.f32.mrf.mxu1 }
 0x11f   : > { %v1984_v5 = vpack.c.bf16 %v1199_v1, %v1196_v58  ;;  %v2475_v6 = vadd.f32 %v1511_v0, %v1199_v1  ;;  %v1555_v7 = vmul.f32 %v1199_v1, %v1199_v1  ;;  %v1026_v8 = vpop.f32.mrf.mxu0 }
 0x120   : > { %v1203_v9 = vpop.f32.mrf.mxu1 }
 0x121   : > { %2066 = vst [vmem:[%s2472_s30 + $0x8] sm:$0xff] %v1984_v5   ;;  %v2478_v10 = vadd.f32 %v1589_v4, %v1555_v7  ;;  %v1028_v11 = vpop.f32.mrf.mxu0  ;;  %v2480_v15 = vadd.f32 %v1203_v9, %v1026_v8 }
 0x122   : > { %v1205_v12 = vpop.f32.mrf.mxu1 }
 0x123   : > { %v1029_v13 = vpop.f32.mrf.mxu0 }
 0x124   : > { %v1206_v14 = vpop.f32.mrf.mxu1 }
 0x125   : > { %v2482_v16 = vadd.f32 %v1206_v14, %v1029_v13  ;;  %v1031_v17 = vpop.f32.mrf.mxu0 }
 0x126   : > { %v1208_v18 = vpop.f32.mrf.mxu1 }
 0x127   : > { %v1989_v19 = vpack.c.bf16 %v2482_v16, %v2480_v15  ;;  %v1034_v20 = vpop.f32.mrf.mxu0 }
 0x128   : > { %v1211_v21 = vpop.f32.mrf.mxu1 }
 0x129   : > { %2067 = vst [vmem:[%s2472_s30 + $0x10] sm:$0xff] %v1989_v19   ;;  %v1036_v22 = vpop.f32.mrf.mxu0  ;;  %v2487_v26 = vadd.f32 %v1211_v21, %v1034_v20 }
 0x12a   : > { %v1213_v23 = vpop.f32.mrf.mxu1 }
 0x12b   : > { %v1037_v24 = vpop.f32.mrf.mxu0 }
 0x12c   : > { %v1214_v25 = vpop.f32.mrf.mxu1 }
 0x12d   : > { %v2489_v27 = vadd.f32 %v1214_v25, %v1037_v24  ;;  %v1039_v28 = vpop.f32.mrf.mxu0 }
 0x12e   : > { %v1216_v29 = vpop.f32.mrf.mxu1 }
 0x12f   : > { %v1994_v30 = vpack.c.bf16 %v2489_v27, %v2487_v26  ;;  %v1042_v31 = vpop.f32.mrf.mxu0 }
 0x130   : > { %v1219_v32 = vpop.f32.mrf.mxu1 }
 0x131   : > { %2068 = vst [vmem:[%s2472_s30 + $0x18] sm:$0xff] %v1994_v30   ;;  %v1044_v33 = vpop.f32.mrf.mxu0  ;;  %v2494_v37 = vadd.f32 %v1219_v32, %v1042_v31 }
 0x132   : > { %v1221_v34 = vpop.f32.mrf.mxu1 }
 0x133   : > { %v1045_v35 = vpop.f32.mrf.mxu0 }
 0x134   : > { %v1222_v36 = vpop.f32.mrf.mxu1 }
 0x135   : > { %v2496_v38 = vadd.f32 %v1222_v36, %v1045_v35  ;;  %v1047_v39 = vpop.f32.mrf.mxu0 }
 0x136   : > { %v1224_v40 = vpop.f32.mrf.mxu1  ;;  %v1556_v39 = vmul.f32 %v2480_v15, %v2480_v15 }
 0x137   : > { %v1999_v41 = vpack.c.bf16 %v2496_v38, %v2494_v37  ;;  %v1050_v42 = vpop.f32.mrf.mxu0 }
 0x138   : > { %v1227_v43 = vpop.f32.mrf.mxu1 }
 0x139   : > { %2069 = vst [vmem:[%s2472_s30 + $0x20] sm:$0xff] %v1999_v41   ;;  %v1052_v44 = vpop.f32.mrf.mxu0  ;;  %v2501_v48 = vadd.f32 %v1227_v43, %v1050_v42  ;;  %v1557_v43 = vmul.f32 %v2482_v16, %v2482_v16 }
 0x13a   : > { %v1229_v45 = vpop.f32.mrf.mxu1 }
 0x13b   : > { %v1053_v46 = vpop.f32.mrf.mxu0  ;;  %v1513_v45 = vadd.f32 %v2475_v6, %v2480_v15 }
 0x13c   : > { %v1230_v47 = vpop.f32.mrf.mxu1 }
 0x13d   : > { %v2503_v49 = vadd.f32 %v1230_v47, %v1053_v46  ;;  %v1055_v50 = vpop.f32.mrf.mxu0  ;;  %v1591_v47 = vadd.f32 %v2478_v10, %v1556_v39 }
 0x13e   : > { %v1232_v51 = vpop.f32.mrf.mxu1  ;;  %v1558_v50 = vmul.f32 %v2487_v26, %v2487_v26 }
 0x13f   : > { %v2004_v52 = vpack.c.bf16 %v2503_v49, %v2501_v48  ;;  %v1058_v53 = vpop.f32.mrf.mxu0 }
 0x140   : > { %v1235_v54 = vpop.f32.mrf.mxu1 }
 0x141   : > { %2070 = vst [vmem:[%s2472_s30 + $0x28] sm:$0xff] %v2004_v52   ;;  %v1060_v55 = vpop.f32.mrf.mxu0  ;;  %v2508_v59 = vadd.f32 %v1235_v54, %v1058_v53  ;;  %v1514_v52 = vadd.f32 %v1513_v45, %v2482_v16  ;;  %v1592_v54 = vadd.f32 %v1591_v47, %v1557_v43 }
 0x142   : > { %v1237_v56 = vpop.f32.mrf.mxu1  ;;  %v1559_v55 = vmul.f32 %v2489_v27, %v2489_v27 }
 0x143   : > { %v1061_v57 = vpop.f32.mrf.mxu0 }
 0x144   : > { %v1238_v58 = vpop.f32.mrf.mxu1 }
 0x145   : > { %v2510_v60 = vadd.f32 %v1238_v58, %v1061_v57  ;;  %v1063_v61 = vpop.f32.mrf.mxu0  ;;  %v1515_v57 = vadd.f32 %v1514_v52, %v2487_v26  ;;  %v1593_v58 = vadd.f32 %v1592_v54, %v1558_v50  ;;  %v1561_v26 = vmul.f32 %v2496_v38, %v2496_v38 }
 0x146   : > { %v1240_v62 = vpop.f32.mrf.mxu1  ;;  %v1560_v61 = vmul.f32 %v2494_v37, %v2494_v37 }
 0x147   : > { %v2009_v63 = vpack.c.bf16 %v2510_v60, %v2508_v59  ;;  %v1066_v0 = vpop.f32.mrf.mxu0  ;;  %v1516_v16 = vadd.f32 %v1515_v57, %v2489_v27 }
 0x148   : > { %v1243_v1 = vpop.f32.mrf.mxu1 }
 0x149   : > { %2071 = vst [vmem:[%s2472_s30 + $0x30] sm:$0xff] %v2009_v63   ;;  %v1068_v2 = vpop.f32.mrf.mxu0  ;;  %v2515_v7 = vadd.f32 %v1243_v1, %v1066_v0  ;;  %v1594_v1 = vadd.f32 %v1593_v58, %v1559_v55 }
 0x14a   : > { %v1245_v3 = vpop.f32.mrf.mxu1 }
 0x14b   : > { %v1069_v4 = vpop.f32.mrf.mxu0  ;;  %v1517_v3 = vadd.f32 %v1516_v16, %v2494_v37  ;;  %v1566_v39 = vmul.f32 %v2515_v7, %v2515_v7 }
 0x14c   : > { %v1246_v5 = vpop.f32.mrf.mxu1 }
 0x14d   : > { %v2517_v8 = vadd.f32 %v1246_v5, %v1069_v4  ;;  %v1071_v9 = vpop.f32.mrf.mxu0  ;;  %v1595_v5 = vadd.f32 %v1594_v1, %v1560_v61  ;;  %v1518_v27 = vadd.f32 %v1517_v3, %v2496_v38 }
 0x14e   : > { %v1248_v11 = vpop.f32.mrf.mxu1  ;;  %v1562_v9 = vmul.f32 %v2501_v48, %v2501_v48 }
 0x14f   : > { %v2014_v12 = vpack.c.bf16 %v2517_v8, %v2515_v7  ;;  %v1074_v13 = vpop.f32.mrf.mxu0  ;;  %v1567_v43 = vmul.f32 %v2517_v8, %v2517_v8 }
 0x150   : > { %v1251_v14 = vpop.f32.mrf.mxu1 }
 0x151   : > { %2072 = vst [vmem:[%s2472_s30 + $0x38] sm:$0xff] %v2014_v12   ;;  %v1076_v17 = vpop.f32.mrf.mxu0  ;;  %v2522_v21 = vadd.f32 %v1251_v14, %v1074_v13  ;;  %v1596_v13 = vadd.f32 %v1595_v5, %v1561_v26  ;;  %v1563_v14 = vmul.f32 %v2503_v49, %v2503_v49 }
 0x152   : > { %v1253_v18 = vpop.f32.mrf.mxu1 }
 0x153   : > { %v1077_v19 = vpop.f32.mrf.mxu0  ;;  %v1519_v18 = vadd.f32 %v1518_v27, %v2501_v48  ;;  %v1565_v48 = vmul.f32 %v2510_v60, %v2510_v60 }
 0x154   : > { %v1254_v20 = vpop.f32.mrf.mxu1 }
 0x155   : > { %v2524_v22 = vadd.f32 %v1254_v20, %v1077_v19  ;;  %v1079_v23 = vpop.f32.mrf.mxu0  ;;  %v1520_v38 = vadd.f32 %v1519_v18, %v2503_v49 }
 0x156   : > { %v1256_v24 = vpop.f32.mrf.mxu1  ;;  %v1597_v23 = vadd.f32 %v1596_v13, %v1562_v9 }
 0x157   : > { %v2019_v25 = vpack.c.bf16 %v2524_v22, %v2522_v21  ;;  %v1082_v28 = vpop.f32.mrf.mxu0  ;;  %v1564_v24 = vmul.f32 %v2508_v59, %v2508_v59 }
 0x158   : > { %v1259_v29 = vpop.f32.mrf.mxu1 }
 0x159   : > { %2073 = vst [vmem:[%s2472_s30 + $0x40] sm:$0xff] %v2019_v25   ;;  %v1084_v30 = vpop.f32.mrf.mxu0  ;;  %v2529_v34 = vadd.f32 %v1259_v29, %v1082_v28 }
 0x15a   : > { %v1261_v31 = vpop.f32.mrf.mxu1  ;;  %v1598_v30 = vadd.f32 %v1597_v23, %v1563_v14 }
 0x15b   : > { %v1085_v32 = vpop.f32.mrf.mxu0  ;;  %v1570_v61 = vmul.f32 %v2529_v34, %v2529_v34 }
 0x15c   : > { %v1262_v33 = vpop.f32.mrf.mxu1 }
 0x15d   : > { %v2531_v35 = vadd.f32 %v1262_v33, %v1085_v32  ;;  %v1087_v36 = vpop.f32.mrf.mxu0  ;;  %v1521_v32 = vadd.f32 %v1520_v38, %v2508_v59 }
 0x15e   : > { %v1264_v40 = vpop.f32.mrf.mxu1  ;;  %v1599_v36 = vadd.f32 %v1598_v30, %v1564_v24 }
 0x15f   : > { %v2024_v41 = vpack.c.bf16 %v2531_v35, %v2529_v34  ;;  %v1090_v42 = vpop.f32.mrf.mxu0  ;;  %v1522_v49 = vadd.f32 %v1521_v32, %v2510_v60 }
 0x160   : > { %v1267_v44 = vpop.f32.mrf.mxu1 }
 0x161   : > { %2074 = vst [vmem:[%s2472_s30 + $0x48] sm:$0xff] %v2024_v41   ;;  %v1092_v46 = vpop.f32.mrf.mxu0  ;;  %v2549_v6 = vadd.f32 %v1267_v44, %v1090_v42  ;;  %v1600_v42 = vadd.f32 %v1599_v36, %v1565_v48  ;;  %v1523_v45 = vadd.f32 %v1522_v49, %v2515_v7 }
 0x162   : > { %v1269_v51 = vpop.f32.mrf.mxu1 }
 0x163   : > { %v1093_v53 = vpop.f32.mrf.mxu0  ;;  %v1601_v50 = vadd.f32 %v1600_v42, %v1566_v39  ;;  %v1568_v51 = vmul.f32 %v2522_v21, %v2522_v21  ;;  %v1524_v60 = vadd.f32 %v1523_v45, %v2517_v8  ;;  %v1572_v5 = vmul.f32 %v2549_v6, %v2549_v6 }
 0x164   : > { %v1270_v56 = vpop.f32.mrf.mxu1 }
 0x165   : > { %v2551_v15 = vadd.f32 %v1270_v56, %v1093_v53  ;;  %v1095_v10 = vpop.f32.mrf.mxu0  ;;  %v1602_v55 = vadd.f32 %v1601_v50, %v1567_v43  ;;  %v1569_v56 = vmul.f32 %v2524_v22, %v2524_v22  ;;  %v1525_v7 = vadd.f32 %v1524_v60, %v2522_v21 }
 0x166   : > { %v1272_v62 = vpop.f32.mrf.mxu1 }
 0x167   : > { %v2029_v63 = vpack.c.bf16 %v2551_v15, %v2549_v6  ;;  %v1098_v0 = vpop.f32.mrf.mxu0  ;;  %v1603_v58 = vadd.f32 %v1602_v55, %v1568_v51  ;;  %v1526_v16 = vadd.f32 %v1525_v7, %v2524_v22  ;;  %v1573_v13 = vmul.f32 %v2551_v15, %v2551_v15 }
 0x168   : > { %v1275_v2 = vpop.f32.mrf.mxu1 }
 0x169   : > { %2075 = vst [vmem:[%s2472_s30 + $0x50] sm:$0xff] %v2029_v63   ;;  %v1100_v4 = vpop.f32.mrf.mxu0  ;;  %v2568_v19 = vadd.f32 %v1275_v2, %v1098_v0  ;;  %v1604_v63 = vadd.f32 %v1603_v58, %v1569_v56  ;;  %v1571_v0 = vmul.f32 %v2531_v35, %v2531_v35  ;;  %v1527_v26 = vadd.f32 %v1526_v16, %v2529_v34 }
 0x16a   : > { %v1277_v11 = vpop.f32.mrf.mxu1 }
 0x16b   : > { %v1101_v12 = vpop.f32.mrf.mxu0  ;;  %v1605_v4 = vadd.f32 %v1604_v63, %v1570_v61  ;;  %v1528_v11 = vadd.f32 %v1527_v26, %v2531_v35 }
 0x16c   : > { %v1278_v17 = vpop.f32.mrf.mxu1 }
 0x16d   : > { %v2570_v37 = vadd.f32 %v1278_v17, %v1101_v12  ;;  %v1103_v20 = vpop.f32.mrf.mxu0  ;;  %v1606_v12 = vadd.f32 %v1605_v4, %v1571_v0  ;;  %v1529_v17 = vadd.f32 %v1528_v11, %v2549_v6 }
 0x16e   : > { %v1280_v25 = vpop.f32.mrf.mxu1  ;;  %v1574_v20 = vmul.f32 %v2568_v19, %v2568_v19 }
 0x16f   : > { %v2034_v28 = vpack.c.bf16 %v2570_v37, %v2568_v19  ;;  %v1106_v29 = vpop.f32.mrf.mxu0  ;;  %v1607_v18 = vadd.f32 %v1606_v12, %v1572_v5  ;;  %v1530_v24 = vadd.f32 %v1529_v17, %v2551_v15  ;;  %v1575_v38 = vmul.f32 %v2570_v37, %v2570_v37 }
 0x170   : > { %v1283_v31 = vpop.f32.mrf.mxu1 }
 0x171   : > { %2076 = vst [vmem:[%s2472_s30 + $0x58] sm:$0xff] %v2034_v28   ;;  %v1108_v33 = vpop.f32.mrf.mxu0  ;;  %v1284_v46 = vadd.f32 %v1283_v31, %v1106_v29  ;;  %v1608_v35 = vadd.f32 %v1607_v18, %v1573_v13  ;;  %v1531_v29 = vadd.f32 %v1530_v24, %v2568_v19 }
 0x172   : > { %v1285_v40 = vpop.f32.mrf.mxu1 }
 0x173   : > { %v1109_v41 = vpop.f32.mrf.mxu0  ;;  %v1609_v31 = vadd.f32 %v1608_v35, %v1574_v20  ;;  %v1576_v32 = vmul.f32 %v1284_v46, %v1284_v46  ;;  %v1532_v36 = vadd.f32 %v1531_v29, %v2570_v37 }
 0x174   : > { %v1286_v44 = vpop.f32.mrf.mxu1 }
 0x175   : > { %v2587_v59 = vadd.f32 %v1286_v44, %v1109_v41  ;;  %v1111_v47 = vpop.f32.mrf.mxu0  ;;  %v1610_v15 = vadd.f32 %v1609_v31, %v1575_v38  ;;  %v1533_v42 = vadd.f32 %v1532_v36, %v1284_v46 }
 0x176   : > { %v1288_v52 = vpop.f32.mrf.mxu1 }
 0x177   : > { %v2039_v53 = vpack.c.bf16 %v2587_v59, %v1284_v46  ;;  %v1114_v54 = vpop.f32.mrf.mxu0  ;;  %v1577_v49 = vmul.f32 %v2587_v59, %v2587_v59  ;;  %v1611_v44 = vadd.f32 %v1610_v15, %v1576_v32  ;;  %v1534_v45 = vadd.f32 %v1533_v42, %v2587_v59 }
 0x178   : > { %v1291_v57 = vpop.f32.mrf.mxu1 }
 0x179   : > { %2077 = vst [vmem:[%s2472_s30 + $0x60] sm:$0xff] %v2039_v53   ;;  %v1116_v10 = vpop.f32.mrf.mxu0  ;;  %v1292_v2 = vadd.f32 %v1291_v57, %v1114_v54  ;;  %v1612_v51 = vadd.f32 %v1611_v44, %v1577_v49 }
 0x17a   : > { %v1293_v62 = vpop.f32.mrf.mxu1 }
 0x17b   : > { %v1117_v8 = vpop.f32.mrf.mxu0  ;;  %v1578_v47 = vmul.f32 %v1292_v2, %v1292_v2  ;;  %v1535_v37 = vadd.f32 %v1534_v45, %v1292_v2 }
 0x17c   : > { %v1294_v1 = vpop.f32.mrf.mxu1 }
 0x17d   : > { %v1295_v21 = vadd.f32 %v1294_v1, %v1117_v8  ;;  %v1119_v3 = vpop.f32.mrf.mxu0  ;;  %v1613_v57 = vadd.f32 %v1612_v51, %v1578_v47 }
 0x17e   : > { %v1296_v9 = vpop.f32.mrf.mxu1 }
 0x17f   : > { %v2044_v22 = vpack.c.bf16 %v1295_v21, %v1292_v2  ;;  %v1122_v27 = vpop.f32.mrf.mxu0  ;;  %v1579_v60 = vmul.f32 %v1295_v21, %v1295_v21  ;;  %v1536_v7 = vadd.f32 %v1535_v37, %v1295_v21 }
 0x180   : > { %v1299_v14 = vpop.f32.mrf.mxu1 }
 0x181   : > { %2078 = vst [vmem:[%s2472_s30 + $0x68] sm:$0xff] %v2044_v22   ;;  %v1124_v34 = vpop.f32.mrf.mxu0  ;;  %v1300_v30 = vadd.f32 %v1299_v14, %v1122_v27  ;;  %v1614_v62 = vadd.f32 %v1613_v57, %v1579_v60 }
 0x182   : > { %v1301_v23 = vpop.f32.mrf.mxu1 }
 0x183   : > { %v1125_v25 = vpop.f32.mrf.mxu0  ;;  %v1580_v46 = vmul.f32 %v1300_v30, %v1300_v30  ;;  %v1537_v16 = vadd.f32 %v1536_v7, %v1300_v30 }
 0x184   : > { %v1302_v28 = vpop.f32.mrf.mxu1 }
 0x185   : > { %v1303_v6 = vadd.f32 %v1302_v28, %v1125_v25  ;;  %v1127_v48 = vpop.f32.mrf.mxu0  ;;  %v1615_v0 = vadd.f32 %v1614_v62, %v1580_v46 }
 0x186   : > { %v1304_v33 = vpop.f32.mrf.mxu1 }
 0x187   : > { %v2049_v39 = vpack.c.bf16 %v1303_v6, %v1300_v30  ;;  %v1130_v40 = vpop.f32.mrf.mxu0  ;;  %v1581_v59 = vmul.f32 %v1303_v6, %v1303_v6  ;;  %v1538_v1 = vadd.f32 %v1537_v16, %v1303_v6 }
 0x188   : > { %v1307_v41 = vpop.f32.mrf.mxu1 }
 0x189   : > { %2079 = vst [vmem:[%s2472_s30 + $0x70] sm:$0xff] %v2049_v39   ;;  %v1132_v43 = vpop.f32.mrf.mxu0  ;;  %v1308_v53 = vadd.f32 %v1307_v41, %v1130_v40  ;;  %v1616_v5 = vadd.f32 %v1615_v0, %v1581_v59 }
 0x18a   : > { %v1309_v19 = vpop.f32.mrf.mxu1 }
 0x18b   : > { %v1133_v50 = vpop.f32.mrf.mxu0  ;;  %v1582_v26 = vmul.f32 %v1308_v53, %v1308_v53  ;;  %v1539_v9 = vadd.f32 %v1538_v1, %v1308_v53 }
 0x18c   : > { %v1310_v52 = vpop.f32.mrf.mxu1 }
 0x18d   : > { %v1311_v54 = vadd.f32 %v1310_v52, %v1133_v50  ;;  %v1135_v55 = vpop.f32.mrf.mxu0  ;;  %v1617_v12 = vadd.f32 %v1616_v5, %v1582_v26 }
 0x18e   : > { %v1312_v56 = vpop.f32.mrf.mxu1 }
 0x18f   : > { %v2054_v10 = vpack.c.bf16 %v1311_v54, %v1308_v53  ;;  %v1138_v58 = vpop.f32.mrf.mxu0  ;;  %v1583_v21 = vmul.f32 %v1311_v54, %v1311_v54  ;;  %v1540_v13 = vadd.f32 %v1539_v9, %v1311_v54 }
 0x190   : > { %v1315_v61 = vpop.f32.mrf.mxu1 }
 0x191   : > { %2080 = vst [vmem:[%s2472_s30 + $0x78] sm:$0xff] %v2054_v10   ;;  %v1140_v8 = vpop.f32.mrf.mxu0  ;;  %v1316_v2 = vadd.f32 %v1315_v61, %v1138_v58  ;;  %v1618_v20 = vadd.f32 %v1617_v12, %v1583_v21 }
 0x192   : > { %v1317_v63 = vpop.f32.mrf.mxu1 }
 0x193   : > { %v1141_v3 = vpop.f32.mrf.mxu0  ;;  %v1584_v14 = vmul.f32 %v1316_v2, %v1316_v2  ;;  %v1541_v23 = vadd.f32 %v1540_v13, %v1316_v2 }
 0x194   : > { %v1318_v4 = vpop.f32.mrf.mxu1 }
 0x195   : > { %v1319_v11 = vadd.f32 %v1318_v4, %v1141_v3  ;;  %v1143_v22 = vpop.f32.mrf.mxu0  ;;  %v1619_v28 = vadd.f32 %v1618_v20, %v1584_v14 }
 0x196   : > { %v1320_v27 = vpop.f32.mrf.mxu1 }
 0x197   : > { %v2059_v17 = vpack.c.bf16 %v1319_v11, %v1316_v2  ;;  %v1146_v34 = vpop.f32.mrf.mxu0  ;;  %v1585_v24 = vmul.f32 %v1319_v11, %v1319_v11  ;;  %v1542_v29 = vadd.f32 %v1541_v23, %v1319_v11 }
 0x198   : > { %v1323_v18 = vpop.f32.mrf.mxu1 }
 0x199   : > { %2081 = vst [vmem:[%s2472_s30 + $0x80] sm:$0xff] %v2059_v17   ;;  %v1324_v25 = vadd.f32 %v1323_v18, %v1146_v34  ;;  %v1148_v35 = vpop.f32.mrf.mxu0  ;;  %v1620_v31 = vadd.f32 %v1619_v28, %v1585_v24 }
 0x19a   : > { %v1325_v38 = vpop.f32.mrf.mxu1 }
 0x19b   : > { %v1586_v30 = vmul.f32 %v1324_v25, %v1324_v25  ;;  %v1149_v6 = vpop.f32.mrf.mxu0  ;;  %v1543_v32 = vadd.f32 %v1542_v29, %v1324_v25 }
 0x19c   : > { %v1326_v48 = vpop.f32.mrf.mxu1 }
 0x19d   : > { %v1327_v33 = vadd.f32 %v1326_v48, %v1149_v6  ;;  %v1151_v36 = vpop.f32.mrf.mxu0  ;;  %v1621_v40 = vadd.f32 %v1620_v31, %v1586_v30 }
 0x19e   : > { %v1328_v39 = vpop.f32.mrf.mxu1 }
 0x19f   : > { %v2064_v15 = vpack.c.bf16 %v1327_v33, %v1324_v25  ;;  %v1544_v49 = vadd.f32 %v1543_v32, %v1327_v33  ;;  %v1587_v41 = vmul.f32 %v1327_v33, %v1327_v33 }
 0x1a1   : > { %2082 = vst [vmem:[%s2472_s30 + $0x88] sm:$0xff] %v2064_v15   ;;  %v1545_v42 = vrot.slane %v1544_v49, 4  ;;  %v1622_v43 = vadd.f32 %v1621_v40, %v1587_v41 }
 0x1a3   : > { %v1546_v44 = vadd.f32 %v1545_v42, %v1544_v49  ;;  %v1623_v19 = vrot.slane %v1622_v43, 4 }
 0x1a5   : > { %v1547_v45 = vrot.slane %v1546_v44, 2  ;;  %v1624_v47 = vadd.f32 %v1623_v19, %v1622_v43 }
 0x1a7   : > { %v1548_v50 = vadd.f32 %v1547_v45, %v1546_v44  ;;  %v1625_v51 = vrot.slane %v1624_v47, 2 }
 0x1a9   : > { %v1549_v52 = vrot.slane %v1548_v50, 1  ;;  %v1626_v37 = vadd.f32 %v1625_v51, %v1624_v47 }
 0x1ab   : > { %v1550_v60 = vadd.f32 %v1549_v52, %v1548_v50  ;;  %v1627_v53 = vrot.slane %v1626_v37, 1 }
 0x1ad   : > { %1551 = vst [vmem:[%s280_s7] sm:$0x1] %v1550_v60  ;;  %v1628_v54 = vadd.f32 %v1627_v53, %v1626_v37 }
 0x1af   : > { %1629 = vst [vmem:[%s285_s10] sm:$0x1] %v1628_v54 }
 0x1b0 PF: > { %s15_s17 = sadd.s32 1, %s2272_s17   ;;  %s2646_s15 = smov %s2268_s16 }
 0x1b1   : > { %p12_p5 = scmp.ge.s32.totalorder %s15_s17, 6   ;;  %s2647_s16 = smov %s2649_s18 }
 0x1b3   :  { %14 = sbr.rel (!%p12_p5) target bundleno = 2 (0x2), region = 85 }

// kernel: generator_forward.9
= control target key start
LH: loop header
LB: loop body
LE: loop exit
PB: predicated region body
PF: predicated region fallthrough
CT: control target
= control target key end

     0   :  { %s1837_s9 = smov 0   ;;  %s1839_s10 = smov 0   ;;  %s2098_s0 = inlined_call_operand.vmem [shape: bf16[4,1152,256], index: 0, kind: input, shape index: {}]   ;;  %s2099_s1 = inlined_call_operand.vmem [shape: bf16[4,256,128], index: 1, kind: input, shape index: {}]   ;;  %s2100_s2 = inlined_call_operand.vmem [shape: f32[4,1152,128], index: 2, kind: output, shape index: {}]  }
   0x1   :  { %s1841_s11 = smov 0   ;;  %s1843_s12 = smov 0  }
   0x2   :  { %s1845_s13 = smov 0  }
   0x3 LB: > { %s21_s14 = sadd.s32 1, %s1811_s11  ;;  %s24_s15 = sadd.s32 1, %s1815_s12  ;;  %s1819_s13 = sphi %s1845_s13, %s12_s13   ;;  %s1815_s12 = sphi %s1843_s12, %s2104_s12   ;;  %s1811_s11 = sphi %s1841_s11, %s2103_s11   ;;  %s1807_s10 = sphi %s1839_s10, %s2102_s10   ;;  %s1803_s9 = sphi %s1837_s9, %s2101_s9  }
   0x4   : > { %p22_p0 = scmp.ge.s32.totalorder %s21_s14, 2  ;;  %p1341_p1 = scmp.ge.s32.totalorder %s1819_s13, 1 }
   0x5   : > { %p144_p2 = scmp.lt.s32.totalorder %s1819_s13, 9 }
   0x6   : > { %s2106_s14 = smov (%p22_p0, %s21_s14), 0  ;;  %s2108_s15 = smov (!%p22_p0, %s24_s15), %s1815_s12 }
   0x7   : > { %p145_p3 = pnand %p1341_p1, %p144_p2  ;;  %p26_p4 = scmp.ge.s32.totalorder %s2108_s15, 4 }
   0x8   : > { %p181_p5 = scmp.lt.s32.totalorder (!%p145_p3), %s1807_s10, 3  ;;  %s180_s16 = smul.u32 (!%p145_p3), 72, %s1803_s9 }
   0x9   : > { %s2110_s15 = smov (%p26_p4, %s2108_s15), 0  ;;  %148 = sbr.rel (%p145_p3) target bundleno = 430 (0x1ae), region = 28 }
   0xa   : > { %p183_p6 = scmp.lt.s32.totalorder (!%p145_p3), %s180_s16, 143 }
   0xe   : > { %v1821_v0 = vmov 0   ;;  %s2112_s10 = smov (!%p181_p5, %s1807_s10), 3  ;;  %s2114_s16 = smov (!%p183_p6, %s180_s16), 143 }
   0xf   : > { %767 = vmatprep.subr.bf16.mxu0 %v1821_v0  ;;  %1438 = vmatprep.subr.bf16.mxu1 %v1821_v0  ;;  %s1437_s17 = sshll.u32 %s2112_s10, 7  ;;  %s1470_s21 = smul.u32 288, %s2112_s10 }
  0x10   : > { %s1875_s20 = scalar_lea.vmem %s2099_s1, %s1437_s17  ;;  %s1342_s22 = sshll.u32 %s2114_s16, 1 }
  0x11   : > { %v1513_v1 = vld [vmem:[%s1875_s20 + $0x38] sm:$0xff]   ;;  %v1514_v2 = vld [vmem:[%s1875_s20 + $0x30] sm:$0xff]   ;;  %v1515_v3 = vld [vmem:[%s1875_s20 + $0x28] sm:$0xff]   ;;  %s187_s23 = sadd.s32 %s1470_s21, %s1342_s22  ;;  %s1471_s28 = smul.u32 144, %s2112_s10 }
  0x12   : > { %768 = vmatpush1.bf16.msra.mxu0 %v1513_v1  ;;  %1454 = vmatpush1.bf16.msra.mxu1 %v1513_v1  ;;  %v1516_v4 = vld [vmem:[%s1875_s20 + $0x20] sm:$0xff]   ;;  %s1343_s24 = sshll.u32 %s187_s23, 2  ;;  %v1517_v5 = vld [vmem:[%s1875_s20 + $0x18] sm:$0xff]   ;;  %v1518_v7 = vld [vmem:[%s1875_s20 + $0x10] sm:$0xff]  }
  0x13   : > { %769 = vmatprep.subr.bf16.mxu0 %v1821_v0  ;;  %1439 = vmatprep.subr.bf16.mxu1 %v1821_v0  ;;  %s1895_s27 = scalar_lea.vmem %s2098_s0, %s1343_s24  ;;  %v1519_v9 = vld [vmem:[%s1875_s20 + $0x8] sm:$0xff]   ;;  %v1520_v10 = vld [vmem:[%s1875_s20] sm:$0xff]   ;;  %v1521_v11 = vld [vmem:[%s1875_s20 + $0x78] sm:$0xff]   ;;  %s202_s29 = sadd.s32 %s1471_s28, %s2114_s16 }
  0x14   : > { %v1531_v6 = vld [vmem:[%s1895_s27 + $0x4] ss:$8 sps:$4 sm:$0xff]   ;;  %v1522_v12 = vld [vmem:[%s1875_s20 + $0x70] sm:$0xff]   ;;  %v1525_v15 = vld [vmem:[%s1875_s20 + $0x58] sm:$0xff]   ;;  %s1346_s30 = sshll.u32 %s202_s29, 3 }
  0x15   : > { %v1534_v8 = vld [vmem:[%s1895_s27 + $0x124] ss:$8 sps:$4 sm:$0xff]   ;;  %799 = vmatprep.mubr.bf16.mxu0 %v1531_v6  ;;  %v1526_v16 = vld [vmem:[%s1875_s20 + $0x50] sm:$0xff]   ;;  %v1529_v19 = vld [vmem:[%s1895_s27] ss:$8 sps:$4 sm:$0xff]   ;;  %s2009_s5 = scalar_lea.vmem %s2100_s2, %s1346_s30 }
  0x16   : > { %770 = vmatpush1.bf16.msra.mxu0 %v1514_v2  ;;  %1455 = vmatpush1.bf16.msra.mxu1 %v1514_v2  ;;  %v1523_v13 = vld [vmem:[%s1875_s20 + $0x68] sm:$0xff]   ;;  %v1524_v14 = vld [vmem:[%s1875_s20 + $0x60] sm:$0xff]   ;;  %v1535_v21 = vld [vmem:[%s1895_s27 + $0x14] ss:$8 sps:$4 sm:$0xff]  }
  0x17   : > { %771 = vmatprep.subr.bf16.mxu0 %v1821_v0  ;;  %1440 = vmatprep.subr.bf16.mxu1 %v1821_v0  ;;  %v1527_v17 = vld [vmem:[%s1875_s20 + $0x48] sm:$0xff]   ;;  %v1528_v18 = vld [vmem:[%s1875_s20 + $0x40] sm:$0xff]   ;;  %v1537_v22 = vld [vmem:[%s1895_s27 + $0x134] ss:$8 sps:$4 sm:$0xff]  }
  0x18   : > { %943 = vmatprep.mubr.bf16.mxu1 %v1534_v8  ;;  %v1532_v20 = vld [vmem:[%s1895_s27 + $0x120] ss:$8 sps:$4 sm:$0xff]   ;;  %v1539_v23 = vld [vmem:[%s1895_s27 + $0x10] ss:$8 sps:$4 sm:$0xff]   ;;  %v1541_v25 = vld [vmem:[%s1895_s27 + $0x24] ss:$8 sps:$4 sm:$0xff]  }
  0x19   : > { %v1540_v24 = vld [vmem:[%s1895_s27 + $0x130] ss:$8 sps:$4 sm:$0xff]   ;;  %v1543_v26 = vld [vmem:[%s1895_s27 + $0x144] ss:$8 sps:$4 sm:$0xff]   ;;  %v1545_v27 = vld [vmem:[%s1895_s27 + $0x20] ss:$8 sps:$4 sm:$0xff]  }
  0x1a   : > { %772 = vmatpush1.bf16.msra.mxu0 %v1515_v3  ;;  %1456 = vmatpush1.bf16.msra.mxu1 %v1515_v3  ;;  %v1546_v28 = vld [vmem:[%s1895_s27 + $0x140] ss:$8 sps:$4 sm:$0xff]   ;;  %v1547_v29 = vld [vmem:[%s1895_s27 + $0x34] ss:$8 sps:$4 sm:$0xff]   ;;  %v1551_v31 = vld [vmem:[%s1895_s27 + $0x30] ss:$8 sps:$4 sm:$0xff]  }
  0x1b   : > { %773 = vmatprep.subr.bf16.mxu0 %v1821_v0  ;;  %1441 = vmatprep.subr.bf16.mxu1 %v1821_v0  ;;  %v1549_v30 = vld [vmem:[%s1895_s27 + $0x154] ss:$8 sps:$4 sm:$0xff]   ;;  %v1552_v32 = vld [vmem:[%s1895_s27 + $0x150] ss:$8 sps:$4 sm:$0xff]   ;;  %v1553_v33 = vld [vmem:[%s1895_s27 + $0x44] ss:$8 sps:$4 sm:$0xff]  }
  0x1c   : > { %v1555_v34 = vld [vmem:[%s1895_s27 + $0x164] ss:$8 sps:$4 sm:$0xff]   ;;  %v1557_v35 = vld [vmem:[%s1895_s27 + $0x40] ss:$8 sps:$4 sm:$0xff]   ;;  %v1559_v37 = vld [vmem:[%s1895_s27 + $0x54] ss:$8 sps:$4 sm:$0xff]  }
  0x1d   : > { %v1558_v36 = vld [vmem:[%s1895_s27 + $0x160] ss:$8 sps:$4 sm:$0xff]   ;;  %v1561_v38 = vld [vmem:[%s1895_s27 + $0x174] ss:$8 sps:$4 sm:$0xff]   ;;  %v1563_v39 = vld [vmem:[%s1895_s27 + $0x50] ss:$8 sps:$4 sm:$0xff]  }
  0x1e   : > { %774 = vmatpush1.bf16.msra.mxu0 %v1516_v4  ;;  %1457 = vmatpush1.bf16.msra.mxu1 %v1516_v4  ;;  %v1564_v40 = vld [vmem:[%s1895_s27 + $0x170] ss:$8 sps:$4 sm:$0xff]   ;;  %v1565_v41 = vld [vmem:[%s1895_s27 + $0x64] ss:$8 sps:$4 sm:$0xff]   ;;  %v1569_v43 = vld [vmem:[%s1895_s27 + $0x60] ss:$8 sps:$4 sm:$0xff]  }
  0x1f   : > { %775 = vmatprep.subr.bf16.mxu0 %v1821_v0  ;;  %1442 = vmatprep.subr.bf16.mxu1 %v1821_v0  ;;  %v1567_v42 = vld [vmem:[%s1895_s27 + $0x184] ss:$8 sps:$4 sm:$0xff]   ;;  %v1570_v44 = vld [vmem:[%s1895_s27 + $0x180] ss:$8 sps:$4 sm:$0xff]   ;;  %v1571_v45 = vld [vmem:[%s1895_s27 + $0x74] ss:$8 sps:$4 sm:$0xff]  }
  0x20   : > { %v1573_v46 = vld [vmem:[%s1895_s27 + $0x194] ss:$8 sps:$4 sm:$0xff]   ;;  %v1575_v47 = vld [vmem:[%s1895_s27 + $0x70] ss:$8 sps:$4 sm:$0xff]   ;;  %v1577_v49 = vld [vmem:[%s1895_s27 + $0x84] ss:$8 sps:$4 sm:$0xff]  }
  0x21   : > { %v1576_v48 = vld [vmem:[%s1895_s27 + $0x190] ss:$8 sps:$4 sm:$0xff]   ;;  %v1579_v50 = vld [vmem:[%s1895_s27 + $0x1a4] ss:$8 sps:$4 sm:$0xff]   ;;  %v1581_v51 = vld [vmem:[%s1895_s27 + $0x80] ss:$8 sps:$4 sm:$0xff]  }
  0x22   : > { %776 = vmatpush1.bf16.msra.mxu0 %v1517_v5  ;;  %1458 = vmatpush1.bf16.msra.mxu1 %v1517_v5  ;;  %v1582_v52 = vld [vmem:[%s1895_s27 + $0x1a0] ss:$8 sps:$4 sm:$0xff]   ;;  %v1583_v53 = vld [vmem:[%s1895_s27 + $0x94] ss:$8 sps:$4 sm:$0xff]   ;;  %v1587_v55 = vld [vmem:[%s1895_s27 + $0x90] ss:$8 sps:$4 sm:$0xff]  }
  0x23   : > { %777 = vmatprep.subr.bf16.mxu0 %v1821_v0  ;;  %1443 = vmatprep.subr.bf16.mxu1 %v1821_v0  ;;  %v1585_v54 = vld [vmem:[%s1895_s27 + $0x1b4] ss:$8 sps:$4 sm:$0xff]   ;;  %v1588_v56 = vld [vmem:[%s1895_s27 + $0x1b0] ss:$8 sps:$4 sm:$0xff]   ;;  %v1589_v57 = vld [vmem:[%s1895_s27 + $0xa4] ss:$8 sps:$4 sm:$0xff]  }
  0x24   : > { %v1591_v58 = vld [vmem:[%s1895_s27 + $0x1c4] ss:$8 sps:$4 sm:$0xff]   ;;  %v1593_v59 = vld [vmem:[%s1895_s27 + $0xa0] ss:$8 sps:$4 sm:$0xff]   ;;  %v1595_v61 = vld [vmem:[%s1895_s27 + $0xb4] ss:$8 sps:$4 sm:$0xff]  }
  0x25   : > { %v1594_v60 = vld [vmem:[%s1895_s27 + $0x1c0] ss:$8 sps:$4 sm:$0xff]   ;;  %v1597_v62 = vld [vmem:[%s1895_s27 + $0x1d4] ss:$8 sps:$4 sm:$0xff]   ;;  %v1599_v63 = vld [vmem:[%s1895_s27 + $0xb0] ss:$8 sps:$4 sm:$0xff]  }
  0x26   : > { %778 = vmatpush1.bf16.msra.mxu0 %v1518_v7  ;;  %1459 = vmatpush1.bf16.msra.mxu1 %v1518_v7  ;;  %v1601_v1 = vld [vmem:[%s1895_s27 + $0xc4] ss:$8 sps:$4 sm:$0xff]   ;;  %v1605_v3 = vld [vmem:[%s1895_s27 + $0xc0] ss:$8 sps:$4 sm:$0xff]   ;;  %v1607_v5 = vld [vmem:[%s1895_s27 + $0xd4] ss:$8 sps:$4 sm:$0xff]  }
  0x27   : > { %779 = vmatprep.subr.bf16.mxu0 %v1821_v0  ;;  %1444 = vmatprep.subr.bf16.mxu1 %v1821_v0  ;;  %v1603_v2 = vld [vmem:[%s1895_s27 + $0x1e4] ss:$8 sps:$4 sm:$0xff]   ;;  %v1606_v4 = vld [vmem:[%s1895_s27 + $0x1e0] ss:$8 sps:$4 sm:$0xff]   ;;  %v1609_v6 = vld [vmem:[%s1895_s27 + $0x1f4] ss:$8 sps:$4 sm:$0xff]  }
  0x28   : > { %v1611_v7 = vld [vmem:[%s1895_s27 + $0xd0] ss:$8 sps:$4 sm:$0xff]  }
  0x29   : > { %v1612_v8 = vld [vmem:[%s1895_s27 + $0x1f0] ss:$8 sps:$4 sm:$0xff]  }
  0x2a   : > { %780 = vmatpush1.bf16.msra.mxu0 %v1519_v9  ;;  %1460 = vmatpush1.bf16.msra.mxu1 %v1519_v9  ;;  %v1613_v9 = vld [vmem:[%s1895_s27 + $0xe4] ss:$8 sps:$4 sm:$0xff]  }
  0x2b   : > { %781 = vmatprep.subr.bf16.mxu0 %v1821_v0  ;;  %1445 = vmatprep.subr.bf16.mxu1 %v1821_v0 }
  0x2e   : > { %782 = vmatpush1.bf16.msra.mxu0 %v1520_v10  ;;  %1461 = vmatpush1.bf16.msra.mxu1 %v1520_v10  ;;  %v1615_v10 = vld [vmem:[%s1895_s27 + $0x204] ss:$8 sps:$4 sm:$0xff]  }
  0x2f   : > { %783 = vmatprep.subr.bf16.mxu0 %v1821_v0  ;;  %1446 = vmatprep.subr.bf16.mxu1 %v1821_v0 }
  0x32   : > { %784 = vmatpush2.bf16.msra.mxu0 %v1521_v11  ;;  %1462 = vmatpush2.bf16.msra.mxu1 %v1521_v11  ;;  %v1617_v11 = vld [vmem:[%s1895_s27 + $0xe0] ss:$8 sps:$4 sm:$0xff]  }
  0x33   : > { %785 = vmatprep.subr.bf16.mxu0 %v1821_v0  ;;  %1447 = vmatprep.subr.bf16.mxu1 %v1821_v0 }
  0x36   : > { %786 = vmatpush2.bf16.msra.mxu0 %v1522_v12  ;;  %1463 = vmatpush2.bf16.msra.mxu1 %v1522_v12  ;;  %v1618_v12 = vld [vmem:[%s1895_s27 + $0x200] ss:$8 sps:$4 sm:$0xff]  }
  0x37   : > { %787 = vmatprep.subr.bf16.mxu0 %v1821_v0  ;;  %1448 = vmatprep.subr.bf16.mxu1 %v1821_v0 }
  0x3a   : > { %788 = vmatpush2.bf16.msra.mxu0 %v1523_v13  ;;  %1464 = vmatpush2.bf16.msra.mxu1 %v1523_v13  ;;  %v1619_v13 = vld [vmem:[%s1895_s27 + $0xf4] ss:$8 sps:$4 sm:$0xff]  }
  0x3b   : > { %789 = vmatprep.subr.bf16.mxu0 %v1821_v0  ;;  %1449 = vmatprep.subr.bf16.mxu1 %v1821_v0 }
  0x3e   : > { %790 = vmatpush2.bf16.msra.mxu0 %v1524_v14  ;;  %1465 = vmatpush2.bf16.msra.mxu1 %v1524_v14  ;;  %v1621_v14 = vld [vmem:[%s1895_s27 + $0x214] ss:$8 sps:$4 sm:$0xff]  }
  0x3f   : > { %791 = vmatprep.subr.bf16.mxu0 %v1821_v0  ;;  %1450 = vmatprep.subr.bf16.mxu1 %v1821_v0 }
  0x42   : > { %792 = vmatpush2.bf16.msra.mxu0 %v1525_v15  ;;  %1466 = vmatpush2.bf16.msra.mxu1 %v1525_v15  ;;  %v1623_v15 = vld [vmem:[%s1895_s27 + $0xf0] ss:$8 sps:$4 sm:$0xff]  }
  0x43   : > { %793 = vmatprep.subr.bf16.mxu0 %v1821_v0  ;;  %1451 = vmatprep.subr.bf16.mxu1 %v1821_v0 }
  0x46   : > { %794 = vmatpush2.bf16.msra.mxu0 %v1526_v16  ;;  %1467 = vmatpush2.bf16.msra.mxu1 %v1526_v16  ;;  %v1624_v16 = vld [vmem:[%s1895_s27 + $0x210] ss:$8 sps:$4 sm:$0xff]  }
  0x47   : > { %795 = vmatprep.subr.bf16.mxu0 %v1821_v0  ;;  %1452 = vmatprep.subr.bf16.mxu1 %v1821_v0 }
  0x4a   : > { %796 = vmatpush2.bf16.msra.mxu0 %v1527_v17  ;;  %1468 = vmatpush2.bf16.msra.mxu1 %v1527_v17  ;;  %v1625_v17 = vld [vmem:[%s1895_s27 + $0x104] ss:$8 sps:$4 sm:$0xff]  }
  0x4b   : > { %797 = vmatprep.subr.bf16.mxu0 %v1821_v0  ;;  %1453 = vmatprep.subr.bf16.mxu1 %v1821_v0  ;;  %v1600_v0 = vld [vmem:[%s1895_s27 + $0x1d0] ss:$8 sps:$4 sm:$0xff]  }
  0x4e   : > { %798 = vmatpush2.bf16.msra.mxu0 %v1528_v18  ;;  %1469 = vmatpush2.bf16.msra.mxu1 %v1528_v18  ;;  %v1627_v18 = vld [vmem:[%s1895_s27 + $0x224] ss:$8 sps:$4 sm:$0xff]  }
  0x51   : > { %800 = vmatmul.mubr.bf16.vlgmr.msra.gmra.mxu0 %v1529_v19  ;;  %944 = vmatmul.mubr.bf16.vlgmr.msra.gmra.mxu1 %v1532_v20  ;;  %v1629_v19 = vld [vmem:[%s1895_s27 + $0x100] ss:$8 sps:$4 sm:$0xff]  }
  0x52   : > { %807 = vmatprep.mubr.bf16.mxu0 %v1535_v21  ;;  %951 = vmatprep.mubr.bf16.mxu1 %v1537_v22  ;;  %v1630_v20 = vld [vmem:[%s1895_s27 + $0x220] ss:$8 sps:$4 sm:$0xff]   ;;  %v1631_v21 = vld [vmem:[%s1895_s27 + $0x114] ss:$8 sps:$4 sm:$0xff]  }
  0x53   : > { %v1633_v22 = vld [vmem:[%s1895_s27 + $0x234] ss:$8 sps:$4 sm:$0xff]  }
  0x59   : > { %808 = vmatmul.mubr.bf16.gmra.mxu0 %v1539_v23  ;;  %952 = vmatmul.mubr.bf16.gmra.mxu1 %v1540_v24  ;;  %v1635_v23 = vld [vmem:[%s1895_s27 + $0x110] ss:$8 sps:$4 sm:$0xff]  }
  0x5a   : > { %815 = vmatprep.mubr.bf16.mxu0 %v1541_v25  ;;  %959 = vmatprep.mubr.bf16.mxu1 %v1543_v26  ;;  %v1636_v24 = vld [vmem:[%s1895_s27 + $0x230] ss:$8 sps:$4 sm:$0xff]  }
  0x61   : > { %816 = vmatmul.mubr.bf16.gmra.mxu0 %v1545_v27  ;;  %960 = vmatmul.mubr.bf16.gmra.mxu1 %v1546_v28 }
  0x62   : > { %823 = vmatprep.mubr.bf16.mxu0 %v1547_v29  ;;  %967 = vmatprep.mubr.bf16.mxu1 %v1549_v30 }
  0x69   : > { %824 = vmatmul.mubr.bf16.gmra.mxu0 %v1551_v31  ;;  %968 = vmatmul.mubr.bf16.gmra.mxu1 %v1552_v32 }
  0x6a   : > { %831 = vmatprep.mubr.bf16.mxu0 %v1553_v33  ;;  %975 = vmatprep.mubr.bf16.mxu1 %v1555_v34 }
  0x71   : > { %832 = vmatmul.mubr.bf16.gmra.mxu0 %v1557_v35  ;;  %976 = vmatmul.mubr.bf16.gmra.mxu1 %v1558_v36 }
  0x72   : > { %839 = vmatprep.mubr.bf16.mxu0 %v1559_v37  ;;  %983 = vmatprep.mubr.bf16.mxu1 %v1561_v38 }
  0x79   : > { %840 = vmatmul.mubr.bf16.gmra.mxu0 %v1563_v39  ;;  %984 = vmatmul.mubr.bf16.gmra.mxu1 %v1564_v40 }
  0x7a   : > { %847 = vmatprep.mubr.bf16.mxu0 %v1565_v41  ;;  %991 = vmatprep.mubr.bf16.mxu1 %v1567_v42 }
  0x81   : > { %848 = vmatmul.mubr.bf16.gmra.mxu0 %v1569_v43  ;;  %992 = vmatmul.mubr.bf16.gmra.mxu1 %v1570_v44 }
  0x82   : > { %855 = vmatprep.mubr.bf16.mxu0 %v1571_v45  ;;  %999 = vmatprep.mubr.bf16.mxu1 %v1573_v46 }
  0x89   : > { %856 = vmatmul.mubr.bf16.gmra.mxu0 %v1575_v47  ;;  %1000 = vmatmul.mubr.bf16.gmra.mxu1 %v1576_v48 }
  0x8a   : > { %863 = vmatprep.mubr.bf16.mxu0 %v1577_v49  ;;  %1007 = vmatprep.mubr.bf16.mxu1 %v1579_v50 }
  0x91   : > { %864 = vmatmul.mubr.bf16.gmra.mxu0 %v1581_v51  ;;  %1008 = vmatmul.mubr.bf16.gmra.mxu1 %v1582_v52 }
  0x92   : > { %871 = vmatprep.mubr.bf16.mxu0 %v1583_v53  ;;  %1015 = vmatprep.mubr.bf16.mxu1 %v1585_v54 }
  0x99   : > { %872 = vmatmul.mubr.bf16.gmra.mxu0 %v1587_v55  ;;  %1016 = vmatmul.mubr.bf16.gmra.mxu1 %v1588_v56 }
  0x9a   : > { %879 = vmatprep.mubr.bf16.mxu0 %v1589_v57  ;;  %1023 = vmatprep.mubr.bf16.mxu1 %v1591_v58 }
  0xa1   : > { %880 = vmatmul.mubr.bf16.gmra.mxu0 %v1593_v59  ;;  %1024 = vmatmul.mubr.bf16.gmra.mxu1 %v1594_v60 }
  0xa2   : > { %887 = vmatprep.mubr.bf16.mxu0 %v1595_v61  ;;  %1031 = vmatprep.mubr.bf16.mxu1 %v1597_v62 }
  0xa9   : > { %888 = vmatmul.mubr.bf16.gmra.mxu0 %v1599_v63  ;;  %1032 = vmatmul.mubr.bf16.gmra.mxu1 %v1600_v0 }
  0xaa   : > { %895 = vmatprep.mubr.bf16.mxu0 %v1601_v1  ;;  %1039 = vmatprep.mubr.bf16.mxu1 %v1603_v2 }
  0xb1   : > { %896 = vmatmul.mubr.bf16.gmra.mxu0 %v1605_v3  ;;  %1040 = vmatmul.mubr.bf16.gmra.mxu1 %v1606_v4 }
  0xb2   : > { %903 = vmatprep.mubr.bf16.mxu0 %v1607_v5  ;;  %1047 = vmatprep.mubr.bf16.mxu1 %v1609_v6 }
  0xb9   : > { %904 = vmatmul.mubr.bf16.gmra.mxu0 %v1611_v7  ;;  %1048 = vmatmul.mubr.bf16.gmra.mxu1 %v1612_v8 }
  0xba   : > { %911 = vmatprep.mubr.bf16.mxu0 %v1613_v9  ;;  %1055 = vmatprep.mubr.bf16.mxu1 %v1615_v10 }
  0xc1   : > { %912 = vmatmul.mubr.bf16.gmra.mxu0 %v1617_v11  ;;  %1056 = vmatmul.mubr.bf16.gmra.mxu1 %v1618_v12 }
  0xc2   : > { %919 = vmatprep.mubr.bf16.mxu0 %v1619_v13  ;;  %1063 = vmatprep.mubr.bf16.mxu1 %v1621_v14 }
  0xc9   : > { %920 = vmatmul.mubr.bf16.gmra.mxu0 %v1623_v15  ;;  %1064 = vmatmul.mubr.bf16.gmra.mxu1 %v1624_v16 }
  0xca   : > { %927 = vmatprep.mubr.bf16.mxu0 %v1625_v17  ;;  %1071 = vmatprep.mubr.bf16.mxu1 %v1627_v18 }
  0xd1   : > { %928 = vmatmul.mubr.bf16.gmra.mxu0 %v1629_v19  ;;  %1072 = vmatmul.mubr.bf16.gmra.mxu1 %v1630_v20 }
  0xd2   : > { %935 = vmatprep.mubr.bf16.mxu0 %v1631_v21  ;;  %1079 = vmatprep.mubr.bf16.mxu1 %v1633_v22 }
  0xd9   : > { %936 = vmatmul.mubr.bf16.gmra.mxu0 %v1635_v23  ;;  %1080 = vmatmul.mubr.bf16.gmra.mxu1 %v1636_v24 }
 0x111   : > { %v801_v25 = vpop.f32.mrf.mxu0  ;;  %v945_v26 = vpop.f32.mrf.mxu1 }
 0x112   : > { %1637 = vtanh.f32 %v801_v25 }
 0x113   : > { %1639 = vtanh.f32 %v945_v26  ;;  %v803_v27 = vpop.f32.mrf.mxu0  ;;  %v947_v28 = vpop.f32.mrf.mxu1 }
 0x115   : > { %v804_v29 = vpop.f32.mrf.mxu0  ;;  %v948_v30 = vpop.f32.mrf.mxu1 }
 0x116   : > { %1641 = vtanh.f32 %v804_v29 }
 0x117   : > { %1643 = vtanh.f32 %v948_v30  ;;  %v806_v31 = vpop.f32.mrf.mxu0  ;;  %v950_v32 = vpop.f32.mrf.mxu1 }
 0x119   : > { %v809_v33 = vpop.f32.mrf.mxu0  ;;  %v953_v34 = vpop.f32.mrf.mxu1 }
 0x11a   : > { %1645 = vtanh.f32 %v809_v33 }
 0x11b   : > { %1647 = vtanh.f32 %v953_v34  ;;  %v811_v35 = vpop.f32.mrf.mxu0  ;;  %v955_v36 = vpop.f32.mrf.mxu1 }
 0x11d   : > { %v812_v37 = vpop.f32.mrf.mxu0  ;;  %v956_v38 = vpop.f32.mrf.mxu1 }
 0x11e   : > { %1649 = vtanh.f32 %v812_v37 }
 0x11f   : > { %v1638_v39 = vpop.eup %1637  ;;  %1651 = vtanh.f32 %v956_v38  ;;  %v814_v40 = vpop.f32.mrf.mxu0 }
 0x120   : > { %v958_v41 = vpop.f32.mrf.mxu1  ;;  %v1640_v42 = vpop.eup %1639  ;;  %1160 = vst [vmem:[%s2009_s5] sm:$0xff] %v1638_v39 }
 0x121   : > { %1196 = vst [vmem:[%s2009_s5 + $0x120] sm:$0xff] %v1640_v42  ;;  %v817_v43 = vpop.f32.mrf.mxu0 }
 0x122   : > { %v961_v44 = vpop.f32.mrf.mxu1  ;;  %1653 = vtanh.f32 %v817_v43 }
 0x123   : > { %v1642_v45 = vpop.eup %1641  ;;  %1655 = vtanh.f32 %v961_v44  ;;  %v819_v46 = vpop.f32.mrf.mxu0 }
 0x124   : > { %v963_v47 = vpop.f32.mrf.mxu1  ;;  %v1644_v48 = vpop.eup %1643  ;;  %1161 = vst [vmem:[%s2009_s5 + $0x8] sm:$0xff] %v1642_v45 }
 0x125   : > { %1197 = vst [vmem:[%s2009_s5 + $0x128] sm:$0xff] %v1644_v48  ;;  %v820_v49 = vpop.f32.mrf.mxu0 }
 0x126   : > { %v964_v50 = vpop.f32.mrf.mxu1  ;;  %1657 = vtanh.f32 %v820_v49 }
 0x127   : > { %v1646_v51 = vpop.eup %1645  ;;  %1659 = vtanh.f32 %v964_v50  ;;  %v822_v52 = vpop.f32.mrf.mxu0 }
 0x128   : > { %v966_v53 = vpop.f32.mrf.mxu1  ;;  %v1648_v54 = vpop.eup %1647  ;;  %1162 = vst [vmem:[%s2009_s5 + $0x10] sm:$0xff] %v1646_v51 }
 0x129   : > { %1198 = vst [vmem:[%s2009_s5 + $0x130] sm:$0xff] %v1648_v54  ;;  %v825_v55 = vpop.f32.mrf.mxu0 }
 0x12a   : > { %v969_v56 = vpop.f32.mrf.mxu1  ;;  %1661 = vtanh.f32 %v825_v55 }
 0x12b   : > { %v1650_v57 = vpop.eup %1649  ;;  %1663 = vtanh.f32 %v969_v56  ;;  %v827_v58 = vpop.f32.mrf.mxu0 }
 0x12c   : > { %v971_v59 = vpop.f32.mrf.mxu1  ;;  %v1652_v60 = vpop.eup %1651  ;;  %1163 = vst [vmem:[%s2009_s5 + $0x18] sm:$0xff] %v1650_v57 }
 0x12d   : > { %1199 = vst [vmem:[%s2009_s5 + $0x138] sm:$0xff] %v1652_v60  ;;  %v828_v61 = vpop.f32.mrf.mxu0 }
 0x12e   : > { %v972_v62 = vpop.f32.mrf.mxu1  ;;  %1665 = vtanh.f32 %v828_v61 }
 0x12f   : > { %v1654_v63 = vpop.eup %1653  ;;  %1667 = vtanh.f32 %v972_v62  ;;  %v830_v0 = vpop.f32.mrf.mxu0 }
 0x130   : > { %v974_v1 = vpop.f32.mrf.mxu1  ;;  %v1656_v2 = vpop.eup %1655  ;;  %1164 = vst [vmem:[%s2009_s5 + $0x20] sm:$0xff] %v1654_v63 }
 0x131   : > { %1200 = vst [vmem:[%s2009_s5 + $0x140] sm:$0xff] %v1656_v2  ;;  %v833_v3 = vpop.f32.mrf.mxu0 }
 0x132   : > { %v977_v4 = vpop.f32.mrf.mxu1  ;;  %1669 = vtanh.f32 %v833_v3 }
 0x133   : > { %v1658_v5 = vpop.eup %1657  ;;  %1671 = vtanh.f32 %v977_v4  ;;  %v835_v6 = vpop.f32.mrf.mxu0 }
 0x134   : > { %v979_v7 = vpop.f32.mrf.mxu1  ;;  %v1660_v8 = vpop.eup %1659  ;;  %1165 = vst [vmem:[%s2009_s5 + $0x28] sm:$0xff] %v1658_v5 }
 0x135   : > { %1201 = vst [vmem:[%s2009_s5 + $0x148] sm:$0xff] %v1660_v8  ;;  %v836_v9 = vpop.f32.mrf.mxu0 }
 0x136   : > { %v980_v10 = vpop.f32.mrf.mxu1  ;;  %1673 = vtanh.f32 %v836_v9 }
 0x137   : > { %v1662_v11 = vpop.eup %1661  ;;  %1675 = vtanh.f32 %v980_v10  ;;  %v838_v12 = vpop.f32.mrf.mxu0 }
 0x138   : > { %v982_v13 = vpop.f32.mrf.mxu1  ;;  %v1664_v14 = vpop.eup %1663  ;;  %1166 = vst [vmem:[%s2009_s5 + $0x30] sm:$0xff] %v1662_v11 }
 0x139   : > { %1202 = vst [vmem:[%s2009_s5 + $0x150] sm:$0xff] %v1664_v14  ;;  %v841_v15 = vpop.f32.mrf.mxu0 }
 0x13a   : > { %v985_v16 = vpop.f32.mrf.mxu1  ;;  %1677 = vtanh.f32 %v841_v15 }
 0x13b   : > { %v1666_v17 = vpop.eup %1665  ;;  %1679 = vtanh.f32 %v985_v16  ;;  %v843_v18 = vpop.f32.mrf.mxu0 }
 0x13c   : > { %v987_v19 = vpop.f32.mrf.mxu1  ;;  %v1668_v20 = vpop.eup %1667  ;;  %1167 = vst [vmem:[%s2009_s5 + $0x38] sm:$0xff] %v1666_v17 }
 0x13d   : > { %1203 = vst [vmem:[%s2009_s5 + $0x158] sm:$0xff] %v1668_v20  ;;  %v844_v21 = vpop.f32.mrf.mxu0 }
 0x13e   : > { %v988_v22 = vpop.f32.mrf.mxu1  ;;  %1681 = vtanh.f32 %v844_v21 }
 0x13f   : > { %v1670_v23 = vpop.eup %1669  ;;  %1683 = vtanh.f32 %v988_v22  ;;  %v846_v24 = vpop.f32.mrf.mxu0 }
 0x140   : > { %v990_v25 = vpop.f32.mrf.mxu1  ;;  %v1672_v26 = vpop.eup %1671  ;;  %1168 = vst [vmem:[%s2009_s5 + $0x40] sm:$0xff] %v1670_v23 }
 0x141   : > { %1204 = vst [vmem:[%s2009_s5 + $0x160] sm:$0xff] %v1672_v26  ;;  %v849_v27 = vpop.f32.mrf.mxu0 }
 0x142   : > { %v993_v28 = vpop.f32.mrf.mxu1  ;;  %1685 = vtanh.f32 %v849_v27 }
 0x143   : > { %v1674_v29 = vpop.eup %1673  ;;  %1687 = vtanh.f32 %v993_v28  ;;  %v851_v30 = vpop.f32.mrf.mxu0 }
 0x144   : > { %v995_v31 = vpop.f32.mrf.mxu1  ;;  %v1676_v32 = vpop.eup %1675  ;;  %1169 = vst [vmem:[%s2009_s5 + $0x48] sm:$0xff] %v1674_v29 }
 0x145   : > { %1205 = vst [vmem:[%s2009_s5 + $0x168] sm:$0xff] %v1676_v32  ;;  %v852_v33 = vpop.f32.mrf.mxu0 }
 0x146   : > { %v996_v34 = vpop.f32.mrf.mxu1  ;;  %1689 = vtanh.f32 %v852_v33 }
 0x147   : > { %v1678_v35 = vpop.eup %1677  ;;  %1691 = vtanh.f32 %v996_v34  ;;  %v854_v36 = vpop.f32.mrf.mxu0 }
 0x148   : > { %v998_v37 = vpop.f32.mrf.mxu1  ;;  %v1680_v38 = vpop.eup %1679  ;;  %1170 = vst [vmem:[%s2009_s5 + $0x50] sm:$0xff] %v1678_v35 }
 0x149   : > { %1206 = vst [vmem:[%s2009_s5 + $0x170] sm:$0xff] %v1680_v38  ;;  %v857_v39 = vpop.f32.mrf.mxu0 }
 0x14a   : > { %v1001_v40 = vpop.f32.mrf.mxu1  ;;  %1693 = vtanh.f32 %v857_v39 }
 0x14b   : > { %v1682_v41 = vpop.eup %1681  ;;  %1695 = vtanh.f32 %v1001_v40  ;;  %v859_v42 = vpop.f32.mrf.mxu0 }
 0x14c   : > { %v1003_v43 = vpop.f32.mrf.mxu1  ;;  %v1684_v44 = vpop.eup %1683  ;;  %1171 = vst [vmem:[%s2009_s5 + $0x58] sm:$0xff] %v1682_v41 }
 0x14d   : > { %1207 = vst [vmem:[%s2009_s5 + $0x178] sm:$0xff] %v1684_v44  ;;  %v860_v45 = vpop.f32.mrf.mxu0 }
 0x14e   : > { %v1004_v46 = vpop.f32.mrf.mxu1  ;;  %1697 = vtanh.f32 %v860_v45 }
 0x14f   : > { %v1686_v47 = vpop.eup %1685  ;;  %1699 = vtanh.f32 %v1004_v46  ;;  %v862_v48 = vpop.f32.mrf.mxu0 }
 0x150   : > { %v1006_v49 = vpop.f32.mrf.mxu1  ;;  %v1688_v50 = vpop.eup %1687  ;;  %1172 = vst [vmem:[%s2009_s5 + $0x60] sm:$0xff] %v1686_v47 }
 0x151   : > { %1208 = vst [vmem:[%s2009_s5 + $0x180] sm:$0xff] %v1688_v50  ;;  %v865_v51 = vpop.f32.mrf.mxu0 }
 0x152   : > { %v1009_v52 = vpop.f32.mrf.mxu1  ;;  %1701 = vtanh.f32 %v865_v51 }
 0x153   : > { %v1690_v53 = vpop.eup %1689  ;;  %1703 = vtanh.f32 %v1009_v52  ;;  %v867_v54 = vpop.f32.mrf.mxu0 }
 0x154   : > { %v1011_v55 = vpop.f32.mrf.mxu1  ;;  %v1692_v56 = vpop.eup %1691  ;;  %1173 = vst [vmem:[%s2009_s5 + $0x68] sm:$0xff] %v1690_v53 }
 0x155   : > { %1209 = vst [vmem:[%s2009_s5 + $0x188] sm:$0xff] %v1692_v56  ;;  %v868_v57 = vpop.f32.mrf.mxu0 }
 0x156   : > { %v1012_v58 = vpop.f32.mrf.mxu1  ;;  %1705 = vtanh.f32 %v868_v57 }
 0x157   : > { %v1694_v59 = vpop.eup %1693  ;;  %1707 = vtanh.f32 %v1012_v58  ;;  %v870_v60 = vpop.f32.mrf.mxu0 }
 0x158   : > { %v1014_v61 = vpop.f32.mrf.mxu1  ;;  %v1696_v62 = vpop.eup %1695  ;;  %1174 = vst [vmem:[%s2009_s5 + $0x70] sm:$0xff] %v1694_v59 }
 0x159   : > { %1210 = vst [vmem:[%s2009_s5 + $0x190] sm:$0xff] %v1696_v62  ;;  %v873_v63 = vpop.f32.mrf.mxu0 }
 0x15a   : > { %v1017_v0 = vpop.f32.mrf.mxu1  ;;  %1709 = vtanh.f32 %v873_v63 }
 0x15b   : > { %v1698_v1 = vpop.eup %1697  ;;  %1711 = vtanh.f32 %v1017_v0  ;;  %v875_v2 = vpop.f32.mrf.mxu0 }
 0x15c   : > { %v1019_v3 = vpop.f32.mrf.mxu1  ;;  %v1700_v4 = vpop.eup %1699  ;;  %1175 = vst [vmem:[%s2009_s5 + $0x78] sm:$0xff] %v1698_v1 }
 0x15d   : > { %1211 = vst [vmem:[%s2009_s5 + $0x198] sm:$0xff] %v1700_v4  ;;  %v876_v5 = vpop.f32.mrf.mxu0 }
 0x15e   : > { %v1020_v6 = vpop.f32.mrf.mxu1  ;;  %1713 = vtanh.f32 %v876_v5 }
 0x15f   : > { %v1702_v7 = vpop.eup %1701  ;;  %1715 = vtanh.f32 %v1020_v6  ;;  %v878_v8 = vpop.f32.mrf.mxu0 }
 0x160   : > { %v1022_v9 = vpop.f32.mrf.mxu1  ;;  %v1704_v10 = vpop.eup %1703  ;;  %1176 = vst [vmem:[%s2009_s5 + $0x80] sm:$0xff] %v1702_v7 }
 0x161   : > { %1212 = vst [vmem:[%s2009_s5 + $0x1a0] sm:$0xff] %v1704_v10  ;;  %v881_v11 = vpop.f32.mrf.mxu0 }
 0x162   : > { %v1025_v12 = vpop.f32.mrf.mxu1  ;;  %1717 = vtanh.f32 %v881_v11 }
 0x163   : > { %v1706_v13 = vpop.eup %1705  ;;  %1719 = vtanh.f32 %v1025_v12  ;;  %v883_v14 = vpop.f32.mrf.mxu0 }
 0x164   : > { %v1027_v15 = vpop.f32.mrf.mxu1  ;;  %v1708_v16 = vpop.eup %1707  ;;  %1177 = vst [vmem:[%s2009_s5 + $0x88] sm:$0xff] %v1706_v13 }
 0x165   : > { %1213 = vst [vmem:[%s2009_s5 + $0x1a8] sm:$0xff] %v1708_v16  ;;  %v884_v17 = vpop.f32.mrf.mxu0 }
 0x166   : > { %v1028_v18 = vpop.f32.mrf.mxu1  ;;  %1721 = vtanh.f32 %v884_v17 }
 0x167   : > { %v1710_v19 = vpop.eup %1709  ;;  %1723 = vtanh.f32 %v1028_v18  ;;  %v886_v20 = vpop.f32.mrf.mxu0 }
 0x168   : > { %v1030_v21 = vpop.f32.mrf.mxu1  ;;  %v1712_v22 = vpop.eup %1711  ;;  %1178 = vst [vmem:[%s2009_s5 + $0x90] sm:$0xff] %v1710_v19 }
 0x169   : > { %1214 = vst [vmem:[%s2009_s5 + $0x1b0] sm:$0xff] %v1712_v22  ;;  %v889_v23 = vpop.f32.mrf.mxu0 }
 0x16a   : > { %v1033_v24 = vpop.f32.mrf.mxu1  ;;  %1725 = vtanh.f32 %v889_v23 }
 0x16b   : > { %v1714_v25 = vpop.eup %1713  ;;  %1727 = vtanh.f32 %v1033_v24  ;;  %v891_v26 = vpop.f32.mrf.mxu0 }
 0x16c   : > { %v1035_v27 = vpop.f32.mrf.mxu1  ;;  %v1716_v28 = vpop.eup %1715  ;;  %1179 = vst [vmem:[%s2009_s5 + $0x98] sm:$0xff] %v1714_v25 }
 0x16d   : > { %1215 = vst [vmem:[%s2009_s5 + $0x1b8] sm:$0xff] %v1716_v28  ;;  %v892_v29 = vpop.f32.mrf.mxu0 }
 0x16e   : > { %v1036_v30 = vpop.f32.mrf.mxu1  ;;  %1729 = vtanh.f32 %v892_v29 }
 0x16f   : > { %v1718_v31 = vpop.eup %1717  ;;  %1731 = vtanh.f32 %v1036_v30  ;;  %v894_v32 = vpop.f32.mrf.mxu0 }
 0x170   : > { %v1038_v33 = vpop.f32.mrf.mxu1  ;;  %v1720_v34 = vpop.eup %1719  ;;  %1180 = vst [vmem:[%s2009_s5 + $0xa0] sm:$0xff] %v1718_v31 }
 0x171   : > { %1216 = vst [vmem:[%s2009_s5 + $0x1c0] sm:$0xff] %v1720_v34  ;;  %v897_v35 = vpop.f32.mrf.mxu0 }
 0x172   : > { %v1041_v36 = vpop.f32.mrf.mxu1  ;;  %1733 = vtanh.f32 %v897_v35 }
 0x173   : > { %v1722_v37 = vpop.eup %1721  ;;  %1735 = vtanh.f32 %v1041_v36  ;;  %v899_v38 = vpop.f32.mrf.mxu0 }
 0x174   : > { %v1043_v39 = vpop.f32.mrf.mxu1  ;;  %v1724_v40 = vpop.eup %1723  ;;  %1181 = vst [vmem:[%s2009_s5 + $0xa8] sm:$0xff] %v1722_v37 }
 0x175   : > { %1217 = vst [vmem:[%s2009_s5 + $0x1c8] sm:$0xff] %v1724_v40  ;;  %v900_v41 = vpop.f32.mrf.mxu0 }
 0x176   : > { %v1044_v42 = vpop.f32.mrf.mxu1  ;;  %1737 = vtanh.f32 %v900_v41 }
 0x177   : > { %v1726_v43 = vpop.eup %1725  ;;  %1739 = vtanh.f32 %v1044_v42  ;;  %v902_v44 = vpop.f32.mrf.mxu0 }
 0x178   : > { %v1046_v45 = vpop.f32.mrf.mxu1  ;;  %v1728_v46 = vpop.eup %1727  ;;  %1182 = vst [vmem:[%s2009_s5 + $0xb0] sm:$0xff] %v1726_v43 }
 0x179   : > { %1218 = vst [vmem:[%s2009_s5 + $0x1d0] sm:$0xff] %v1728_v46  ;;  %v905_v47 = vpop.f32.mrf.mxu0 }
 0x17a   : > { %v1049_v48 = vpop.f32.mrf.mxu1  ;;  %1741 = vtanh.f32 %v905_v47 }
 0x17b   : > { %v1730_v49 = vpop.eup %1729  ;;  %1743 = vtanh.f32 %v1049_v48  ;;  %v907_v50 = vpop.f32.mrf.mxu0 }
 0x17c   : > { %v1051_v51 = vpop.f32.mrf.mxu1  ;;  %v1732_v52 = vpop.eup %1731  ;;  %1183 = vst [vmem:[%s2009_s5 + $0xb8] sm:$0xff] %v1730_v49 }
 0x17d   : > { %1219 = vst [vmem:[%s2009_s5 + $0x1d8] sm:$0xff] %v1732_v52  ;;  %v908_v53 = vpop.f32.mrf.mxu0 }
 0x17e   : > { %v1052_v54 = vpop.f32.mrf.mxu1  ;;  %1745 = vtanh.f32 %v908_v53 }
 0x17f   : > { %v1734_v55 = vpop.eup %1733  ;;  %1747 = vtanh.f32 %v1052_v54  ;;  %v910_v56 = vpop.f32.mrf.mxu0 }
 0x180   : > { %v1054_v57 = vpop.f32.mrf.mxu1  ;;  %v1736_v58 = vpop.eup %1735  ;;  %1184 = vst [vmem:[%s2009_s5 + $0xc0] sm:$0xff] %v1734_v55 }
 0x181   : > { %1220 = vst [vmem:[%s2009_s5 + $0x1e0] sm:$0xff] %v1736_v58  ;;  %v913_v59 = vpop.f32.mrf.mxu0 }
 0x182   : > { %v1057_v60 = vpop.f32.mrf.mxu1  ;;  %1749 = vtanh.f32 %v913_v59 }
 0x183   : > { %v1738_v61 = vpop.eup %1737  ;;  %1751 = vtanh.f32 %v1057_v60  ;;  %v915_v62 = vpop.f32.mrf.mxu0 }
 0x184   : > { %v1059_v63 = vpop.f32.mrf.mxu1  ;;  %v1740_v0 = vpop.eup %1739  ;;  %1185 = vst [vmem:[%s2009_s5 + $0xc8] sm:$0xff] %v1738_v61 }
 0x185   : > { %1221 = vst [vmem:[%s2009_s5 + $0x1e8] sm:$0xff] %v1740_v0  ;;  %v916_v1 = vpop.f32.mrf.mxu0 }
 0x186   : > { %v1060_v2 = vpop.f32.mrf.mxu1  ;;  %1753 = vtanh.f32 %v916_v1 }
 0x187   : > { %v1742_v3 = vpop.eup %1741  ;;  %1755 = vtanh.f32 %v1060_v2  ;;  %v918_v4 = vpop.f32.mrf.mxu0 }
 0x188   : > { %v1062_v5 = vpop.f32.mrf.mxu1  ;;  %v1744_v6 = vpop.eup %1743  ;;  %1186 = vst [vmem:[%s2009_s5 + $0xd0] sm:$0xff] %v1742_v3 }
 0x189   : > { %1222 = vst [vmem:[%s2009_s5 + $0x1f0] sm:$0xff] %v1744_v6  ;;  %v921_v7 = vpop.f32.mrf.mxu0 }
 0x18a   : > { %v1065_v8 = vpop.f32.mrf.mxu1  ;;  %1757 = vtanh.f32 %v921_v7 }
 0x18b   : > { %v1746_v9 = vpop.eup %1745  ;;  %1759 = vtanh.f32 %v1065_v8  ;;  %v923_v10 = vpop.f32.mrf.mxu0 }
 0x18c   : > { %v1067_v11 = vpop.f32.mrf.mxu1  ;;  %v1748_v12 = vpop.eup %1747  ;;  %1187 = vst [vmem:[%s2009_s5 + $0xd8] sm:$0xff] %v1746_v9 }
 0x18d   : > { %1223 = vst [vmem:[%s2009_s5 + $0x1f8] sm:$0xff] %v1748_v12  ;;  %v924_v13 = vpop.f32.mrf.mxu0 }
 0x18e   : > { %v1068_v14 = vpop.f32.mrf.mxu1  ;;  %1761 = vtanh.f32 %v924_v13 }
 0x18f   : > { %v1750_v15 = vpop.eup %1749  ;;  %1763 = vtanh.f32 %v1068_v14  ;;  %v926_v16 = vpop.f32.mrf.mxu0 }
 0x190   : > { %v1070_v17 = vpop.f32.mrf.mxu1  ;;  %v1752_v18 = vpop.eup %1751  ;;  %1188 = vst [vmem:[%s2009_s5 + $0xe0] sm:$0xff] %v1750_v15 }
 0x191   : > { %1224 = vst [vmem:[%s2009_s5 + $0x200] sm:$0xff] %v1752_v18  ;;  %v929_v19 = vpop.f32.mrf.mxu0 }
 0x192   : > { %v1073_v20 = vpop.f32.mrf.mxu1  ;;  %1765 = vtanh.f32 %v929_v19 }
 0x193   : > { %v1754_v21 = vpop.eup %1753  ;;  %1767 = vtanh.f32 %v1073_v20  ;;  %v931_v22 = vpop.f32.mrf.mxu0 }
 0x194   : > { %v1075_v23 = vpop.f32.mrf.mxu1  ;;  %v1756_v24 = vpop.eup %1755  ;;  %1189 = vst [vmem:[%s2009_s5 + $0xe8] sm:$0xff] %v1754_v21 }
 0x195   : > { %1225 = vst [vmem:[%s2009_s5 + $0x208] sm:$0xff] %v1756_v24  ;;  %v932_v25 = vpop.f32.mrf.mxu0 }
 0x196   : > { %v1076_v26 = vpop.f32.mrf.mxu1  ;;  %1769 = vtanh.f32 %v932_v25 }
 0x197   : > { %v1758_v27 = vpop.eup %1757  ;;  %1771 = vtanh.f32 %v1076_v26  ;;  %v934_v28 = vpop.f32.mrf.mxu0 }
 0x198   : > { %v1078_v29 = vpop.f32.mrf.mxu1  ;;  %v1760_v30 = vpop.eup %1759  ;;  %1190 = vst [vmem:[%s2009_s5 + $0xf0] sm:$0xff] %v1758_v27 }
 0x199   : > { %1226 = vst [vmem:[%s2009_s5 + $0x210] sm:$0xff] %v1760_v30  ;;  %v937_v31 = vpop.f32.mrf.mxu0 }
 0x19a   : > { %v1081_v32 = vpop.f32.mrf.mxu1  ;;  %1773 = vtanh.f32 %v937_v31 }
 0x19b   : > { %v1762_v33 = vpop.eup %1761  ;;  %1775 = vtanh.f32 %v1081_v32  ;;  %v939_v34 = vpop.f32.mrf.mxu0 }
 0x19c   : > { %v1083_v35 = vpop.f32.mrf.mxu1  ;;  %v1764_v36 = vpop.eup %1763  ;;  %1191 = vst [vmem:[%s2009_s5 + $0xf8] sm:$0xff] %v1762_v33 }
 0x19d   : > { %1227 = vst [vmem:[%s2009_s5 + $0x218] sm:$0xff] %v1764_v36  ;;  %v940_v37 = vpop.f32.mrf.mxu0 }
 0x19e   : > { %v1084_v38 = vpop.f32.mrf.mxu1  ;;  %1777 = vtanh.f32 %v940_v37 }
 0x19f   : > { %v1766_v39 = vpop.eup %1765  ;;  %1779 = vtanh.f32 %v1084_v38  ;;  %v942_v40 = vpop.f32.mrf.mxu0 }
 0x1a0   : > { %v1086_v41 = vpop.f32.mrf.mxu1  ;;  %v1768_v42 = vpop.eup %1767  ;;  %1192 = vst [vmem:[%s2009_s5 + $0x100] sm:$0xff] %v1766_v39 }
 0x1a1   : > { %1228 = vst [vmem:[%s2009_s5 + $0x220] sm:$0xff] %v1768_v42 }
 0x1a3   : > { %v1770_v43 = vpop.eup %1769 }
 0x1a4   : > { %v1772_v44 = vpop.eup %1771  ;;  %1193 = vst [vmem:[%s2009_s5 + $0x108] sm:$0xff] %v1770_v43 }
 0x1a5   : > { %1229 = vst [vmem:[%s2009_s5 + $0x228] sm:$0xff] %v1772_v44 }
 0x1a7   : > { %v1774_v45 = vpop.eup %1773 }
 0x1a8   : > { %v1776_v46 = vpop.eup %1775  ;;  %1194 = vst [vmem:[%s2009_s5 + $0x110] sm:$0xff] %v1774_v45 }
 0x1a9   : > { %1230 = vst [vmem:[%s2009_s5 + $0x230] sm:$0xff] %v1776_v46 }
 0x1ab   : > { %v1778_v47 = vpop.eup %1777 }
 0x1ac   : > { %v1780_v48 = vpop.eup %1779  ;;  %1195 = vst [vmem:[%s2009_s5 + $0x118] sm:$0xff] %v1778_v47 }
 0x1ad   : > { %1231 = vst [vmem:[%s2009_s5 + $0x238] sm:$0xff] %v1780_v48 }
 0x1ae PF: > { %s12_s13 = sadd.s32 1, %s1819_s13   ;;  %s2101_s9 = smov %s1811_s11 }
 0x1af   : > { %p9_p7 = scmp.ge.s32.totalorder %s12_s13, 10   ;;  %s2102_s10 = smov %s1815_s12 }
 0x1b0   : > { %s2103_s11 = smov %s2106_s14  ;;  %s2104_s12 = smov %s2110_s15 }
 0x1b1   :  { %11 = sbr.rel (!%p9_p7) target bundleno = 3 (0x3), region = 61 }

</bundles_post_ra>
